<compile_context>
chip_gen: v6e
topology: v6e:2x2x1
jax: 0.10.0
libtpu: 0.0.40
codegen_flags: <defaults>
</compile_context>

<pallas_src>
import numpy as np
import jax
import jax.numpy as jnp
from jax.experimental import pallas as pl
from jax.experimental.pallas import tpu as pltpu

_POOL_SIZES = (2, 4, 8)
_HIGHEST = jax.lax.Precision.HIGHEST


# ----------------------- static 1-D resampling matrices ----------------------

def _pool_mat(n_in, s):
    """(n_in, n_in//s): columns average length-s groups (AvgPool, stride s)."""
    n_out = n_in // s
    m = np.zeros((n_in, n_out), np.float32)
    for j in range(n_out):
        m[j * s:(j + 1) * s, j] = 1.0 / s
    return m


def _lin_mat(n_in, n_out):
    """(n_in, n_out): 1-D linear-interp weights, PyTorch align_corners=True."""
    m = np.zeros((n_in, n_out), np.float32)
    if n_out == 1:
        m[0, 0] = 1.0
        return m
    if n_in == 1:
        m[0, :] = 1.0
        return m
    scale = (n_in - 1) / (n_out - 1)
    for j in range(n_out):
        src = j * scale
        f = min(int(np.floor(src)), n_in - 2)
        t = src - f
        m[f, j] += 1.0 - t
        m[f + 1, j] += t
    return m


def _band_masks(seg, valid):
    """(3, seg, seg): masks[kw][wi, wo] = 1 iff wi == wo + (kw-1), wi, wo < valid.

    Encodes the W-direction taps of a 3x3 conv (zero padding) *within* a
    channel segment, so the block-diagonal structure of the packed matrices
    guarantees no cross-channel / cross-sample lane leakage."""
    m = np.zeros((3, seg, seg), np.float32)
    for kw in range(3):
        off = kw - 1
        for wo in range(valid):
            wi = wo + off
            if 0 <= wi < valid:
                m[kw, wi, wo] = 1.0
    return m


# ------------------------------ matrix tables --------------------------------
# Packed layout: P[h, (n*C + c)*w_seg + w].  Left (H-direction) matrices are
# embedded in (H, H); right (lane-direction) matrices are block-diagonal over
# the N*C planes with naturally compacted lane counts per pyramid level.

def _build_tables(params, N, C, H, W):
    NC = N * C
    sizes = _POOL_SIZES

    # H-direction (left) matrices, all embedded in (H, H).
    # Slots: 0..2 avg-pool(2,4,8); 3..5 bilinear-up to H; 6..7 bilinear x0.5
    hm = np.zeros((8, H, H), np.float32)
    for i, s in enumerate(sizes):
        hm[i, :H // s, :] = _pool_mat(H, s).T
        hm[3 + i, :, :H // s] = _lin_mat(H // s, H).T
    for i, s in enumerate(sizes[:-1]):
        hm[6 + i, :H // (2 * s), :H // s] = _lin_mat(H // s, H // (2 * s)).T
    hm = jnp.asarray(hm)

    # Lane-direction (right) matrices for the static resamples.
    eye_nc = np.eye(NC, dtype=np.float32)
    pw = [jnp.asarray(np.kron(eye_nc, _pool_mat(W, s))) for s in sizes]
    uw = [jnp.asarray(np.kron(eye_nc, _lin_mat(W // s, W))) for s in sizes]
    dn = [jnp.asarray(np.kron(eye_nc, _lin_mat(W // s, W // (2 * s))))
          for s in sizes[:-1]]

    # Weight-dependent band matrices (depthwise per level, dense conv_sum).
    # Built with broadcast-multiply + sum only (no dot) so the table values
    # are exact f32 regardless of the default matmul precision.
    eyeN = np.eye(N, dtype=np.float32)
    eyeC = np.eye(C, dtype=np.float32)

    dmats = []
    for i, s in enumerate(sizes):
        w_s = W // s
        masks = jnp.asarray(_band_masks(w_s, w_s))                # (3, ws, ws)
        wk = params["dw"][i].reshape(C, 3, 3).astype(jnp.float32)
        per_kh = []
        for kh in range(3):
            # blk[c, wi, wo] = sum_kw wk[c, kh, kw] * masks[kw, wi, wo]
            blk = (wk[:, kh, :, None, None] * masks[None]).sum(axis=1)
            m = (eyeN[:, None, None, :, None, None]
                 * eyeC[None, :, None, None, :, None]
                 * blk[None, :, :, None, None, :])                # (N,C,ws,N,C,ws)
            per_kh.append(m.reshape(NC * w_s, NC * w_s))
        dmats.append(jnp.stack(per_kh))                           # (3, NCws, NCws)

    masks_f = jnp.asarray(_band_masks(W, W))                      # (3, W, W)
    wsum = params["conv_sum"].astype(jnp.float32)                 # (Co, Ci, 3, 3)
    per_kh = []
    for kh in range(3):
        # blk[co, ci, wi, wo] = sum_kw wsum[co, ci, kh, kw] * masks[kw, wi, wo]
        blk = (wsum[:, :, kh, :, None, None] * masks_f[None, None]).sum(axis=2)
        blk = jnp.transpose(blk, (1, 2, 0, 3))                    # (ci, wi, co, wo)
        m = (eyeN[:, None, None, :, None, None]
             * blk[None, :, :, None, :, :])                       # (N,C,W,N,C,W)
        per_kh.append(m.reshape(NC * W, NC * W))
    smat = jnp.stack(per_kh)                                      # (3, NCW, NCW)

    return [hm, pw[0], pw[1], pw[2], uw[0], uw[1], uw[2],
            dn[0], dn[1], dmats[0], dmats[1], dmats[2], smat]


# --------------------------------- kernel ------------------------------------

def _kernel(x_ref, hm_ref,
            pw0_ref, pw1_ref, pw2_ref,
            uw0_ref, uw1_ref, uw2_ref,
            dn0_ref, dn1_ref,
            d0_ref, d1_ref, d2_ref,
            s_ref, o_ref):
    f32 = jnp.float32

    def dot(a, b):
        # HIGHEST keeps the f32 MXU path (needed for the 1e-4 tolerance).
        return jnp.dot(a, b, precision=_HIGHEST, preferred_element_type=f32)

    def rowshift(a, dh):
        """tap[r] = a[r + dh] with zeros shifted in at the array boundary."""
        if dh == 0:
            return a
        rows = a.shape[0]
        rolled = pltpu.roll(a, (-dh) % rows, 0)                  # XLU sublane rotate
        r = jax.lax.broadcasted_iota(jnp.int32, a.shape, 0)
        ok = (r + dh >= 0) & (r + dh < rows)
        return jnp.where(ok, rolled, 0.0)

    def conv3x3(a, band_ref):
        """3x3 conv, zero pad: sum_kh rowshift(a, kh-1) @ band_ref[kh]."""
        acc = dot(a, band_ref[1])
        acc = acc + dot(rowshift(a, -1), band_ref[0])
        acc = acc + dot(rowshift(a, 1), band_ref[2])
        return acc

    def resample(a, h_slot, w_ref):
        """Separable resample: Hmat @ a @ Wmat (pool / bilinear up / down)."""
        return dot(dot(hm_ref[h_slot], a), w_ref[...])

    x = x_ref[...].astype(f32)                                   # (H, N*C*W)
    pw = (pw0_ref, pw1_ref, pw2_ref)
    uw = (uw0_ref, uw1_ref, uw2_ref)
    dn = (dn0_ref, dn1_ref)
    dmat = (d0_ref, d1_ref, d2_ref)

    resl = x
    y_down = None
    for i in range(3):                                           # pyramid levels
        pooled = resample(x, i, pw[i])
        inp = pooled if i == 0 else pooled + y_down
        y = conv3x3(inp, dmat[i])                                # depthwise 3x3
        resl = resl + resample(y, 3 + i, uw[i])                  # bilinear up
        if i != 2:
            y_down = resample(y, 6 + i, dn[i])                   # bilinear x0.5

    # Exact (erf) GELU; erf via A&S 7.1.26 (|err| < 1.5e-7).  The divide runs
    # on the EUP (approx reciprocal) + one Newton step to restore accuracy.
    z = resl * 0.7071067811865476
    az = jnp.abs(z)
    den = 1.0 + 0.3275911 * az
    t = pl.reciprocal(den, approx=True)
    t = t * (2.0 - den * t)
    poly = ((((1.061405429 * t - 1.453152027) * t
              + 1.421413741) * t - 0.284496736) * t + 0.254829592) * t
    erf_abs = 1.0 - poly * jnp.exp(-az * az)
    erf_z = jnp.where(z < 0, -erf_abs, erf_abs)
    g = 0.5 * resl * (1.0 + erf_z)

    # conv_sum: dense 3x3, C -> C (channel mixing folded into the band mats).
    o_ref[...] = conv3x3(g, s_ref).astype(o_ref.dtype)           # 128-lane store


# -------------------------------- wrapper -------------------------------------

@jax.jit
def fine2coarse_forward(x, params):
    """Fine2Coarse.forward(x) — x is NCHW like PyTorch."""
    N, C, H, W = x.shape
    assert H % _POOL_SIZES[-1] == 0 and W % _POOL_SIZES[-1] == 0
    L = N * C * W

    tables = _build_tables(params, N, C, H, W)

    # Lane-dense packing: (N, C, H, W) -> (H, N*C*W); 8 KiB, one transpose.
    xp = jnp.transpose(x.astype(jnp.float32), (2, 0, 1, 3)).reshape(H, L)

    vmem = pltpu.MemorySpace.VMEM
    out_p = pl.pallas_call(
        _kernel,
        out_shape=jax.ShapeDtypeStruct((H, L), x.dtype),
        in_specs=[pl.BlockSpec(memory_space=vmem)] * (1 + len(tables)),
        out_specs=pl.BlockSpec(memory_space=vmem),
    )(xp, *tables)
    # TODO(synk): on v7x one could shard the batch over the 2 TensorCores with
    # grid=(N,) + dimension_semantics=("parallel",); at 4 KiB/sample the fixed
    # per-core cost likely dominates, so the single packed step is the default.

    return out_p.reshape(H, N, C, W).transpose(1, 2, 0, 3).astype(x.dtype)


# ----------------- deterministic parameter init (PyTorch shapes) --------------

def init_fine2coarse_params(key, k):
    keys = jax.random.split(key, 4)

    def unif(kk, shape, fan_in):
        bound = 1.0 / np.sqrt(fan_in)
        return jax.random.uniform(kk, shape, jnp.float32, -bound, bound)

    dw = [unif(keys[i], (k, 1, 3, 3), 9) for i in range(3)]   # depthwise, groups=k
    conv_sum = unif(keys[3], (k, k, 3, 3), k * 9)             # dense 3x3, bias=False
    return {"dw": dw, "conv_sum": conv_sum}


# ---------------- pure-JAX reference (for correctness check) ------------------

def _avg_pool(x, s):
    n, c, h, w = x.shape
    return x.reshape(n, c, h // s, s, w // s, s).mean(axis=(3, 5))


def _conv(x, w, groups=1):
    dn = jax.lax.conv_dimension_numbers(x.shape, w.shape, ("NCHW", "OIHW", "NCHW"))
    return jax.lax.conv_general_dilated(
        x, w, (1, 1), "SAME", dimension_numbers=dn,
        feature_group_count=groups, precision=_HIGHEST)


def _resize_bilinear_ac(x, out_h, out_w):
    """F.interpolate(..., mode='bilinear', align_corners=True), NCHW."""
    n, c, h, w = x.shape

    def coords(n_in, n_out):
        if n_out == 1 or n_in == 1:
            z = np.zeros(n_out, np.int64)
            return z, z, np.zeros(n_out, np.float32)
        src = np.arange(n_out) * (n_in - 1) / (n_out - 1)
        lo = np.minimum(np.floor(src).astype(np.int64), n_in - 2)
        t = (src - lo).astype(np.float32)
        return lo, lo + 1, t

    lh, hh, th = coords(h, out_h)
    lw, hw, tw = coords(w, out_w)
    xv = (x[:, :, lh, :] * (1.0 - th)[None, None, :, None]
          + x[:, :, hh, :] * th[None, None, :, None])
    return (xv[:, :, :, lw] * (1.0 - tw)[None, None, None, :]
            + xv[:, :, :, hw] * tw[None, None, None, :])


def _ref_forward(x, params):
    n, c, H, W = x.shape
    resl = x
    y_down = None
    for i, s in enumerate(_POOL_SIZES):
        pooled = _avg_pool(x, s)
        inp = pooled if i == 0 else pooled + y_down
        y = _conv(inp, params["dw"][i], groups=c)
        resl = resl + _resize_bilinear_ac(y, H, W)
        if i != len(_POOL_SIZES) - 1:
            y_down = _resize_bilinear_ac(y, y.shape[2] // 2, y.shape[3] // 2)
    resl = jax.nn.gelu(resl, approximate=False)
    return _conv(resl, params["conv_sum"])


if __name__ == "__main__":
    N, C, H, W = 2, 4, 16, 16

    key = jax.random.PRNGKey(0)
    kx, kp = jax.random.split(key)
    x = jax.random.normal(kx, (N, C, H, W), jnp.float32)
    params = init_fine2coarse_params(kp, C)

    out = jax.block_until_ready(fine2coarse_forward(x, params))
    ref = jax.block_until_ready(_ref_forward(x, params))

    np.testing.assert_allclose(np.asarray(out), np.asarray(ref),
                               rtol=1e-4, atol=1e-4)
    print("KERNEL_OK")
</pallas_src>

<mosaic_0001>
module attributes {stable_mosaic.version = 11 : i64} {
  func.func @_kernel(%arg0: memref<16x128xf32, #tpu.memory_space<vmem>>, %arg1: memref<8x16x16xf32, #tpu.memory_space<vmem>>, %arg2: memref<128x64xf32, #tpu.memory_space<vmem>>, %arg3: memref<128x32xf32, #tpu.memory_space<vmem>>, %arg4: memref<128x16xf32, #tpu.memory_space<vmem>>, %arg5: memref<64x128xf32, #tpu.memory_space<vmem>>, %arg6: memref<32x128xf32, #tpu.memory_space<vmem>>, %arg7: memref<16x128xf32, #tpu.memory_space<vmem>>, %arg8: memref<64x32xf32, #tpu.memory_space<vmem>>, %arg9: memref<32x16xf32, #tpu.memory_space<vmem>>, %arg10: memref<3x64x64xf32, #tpu.memory_space<vmem>>, %arg11: memref<3x32x32xf32, #tpu.memory_space<vmem>>, %arg12: memref<3x16x16xf32, #tpu.memory_space<vmem>>, %arg13: memref<3x128x128xf32, #tpu.memory_space<vmem>>, %arg14: memref<16x128xf32, #tpu.memory_space<vmem>>) attributes {dimension_semantics = [], scalar_prefetch = 0 : i64, scratch_operands = 0 : i64, tpu.core_type = #tpu.core_type<tc>} {
    %c0 = arith.constant 0 : index
    %c0_0 = arith.constant 0 : index
    %0 = vector.load %arg0[%c0, %c0_0] : memref<16x128xf32, #tpu.memory_space<vmem>>, vector<16x128xf32>
    %c0_1 = arith.constant 0 : index
    %c0_2 = arith.constant 0 : index
    %c0_3 = arith.constant 0 : index
    %1 = vector.load %arg1[%c0_1, %c0_2, %c0_3] : memref<8x16x16xf32, #tpu.memory_space<vmem>>, vector<1x16x16xf32>
    %2 = vector.shape_cast %1 : vector<1x16x16xf32> to vector<16x16xf32>
    %cst = arith.constant dense<0.000000e+00> : vector<16x128xf32>
    %3 = tpu.matmul %2, %0, %cst {dimension_numbers = #tpu.dot_dimension_numbers<[1], [0], [0], [1], [0, 0, 1, 1], [], []>, precision = #tpu.contract_precision<fp32>} : vector<16x16xf32>, vector<16x128xf32>, vector<16x128xf32> -> vector<16x128xf32>
    %c0_4 = arith.constant 0 : index
    %c0_5 = arith.constant 0 : index
    %4 = vector.load %arg2[%c0_4, %c0_5] : memref<128x64xf32, #tpu.memory_space<vmem>>, vector<128x64xf32>
    %cst_6 = arith.constant dense<0.000000e+00> : vector<16x64xf32>
    %5 = tpu.matmul %3, %4, %cst_6 {dimension_numbers = #tpu.dot_dimension_numbers<[1], [0], [0], [1], [0, 0, 1, 1], [], []>, precision = #tpu.contract_precision<fp32>} : vector<16x128xf32>, vector<128x64xf32>, vector<16x64xf32> -> vector<16x64xf32>
    %c1 = arith.constant 1 : index
    %c0_7 = arith.constant 0 : index
    %c0_8 = arith.constant 0 : index
    %6 = vector.load %arg10[%c1, %c0_7, %c0_8] : memref<3x64x64xf32, #tpu.memory_space<vmem>>, vector<1x64x64xf32>
    %7 = vector.shape_cast %6 : vector<1x64x64xf32> to vector<64x64xf32>
    %cst_9 = arith.constant dense<0.000000e+00> : vector<16x64xf32>
    %8 = tpu.matmul %5, %7, %cst_9 {dimension_numbers = #tpu.dot_dimension_numbers<[1], [0], [0], [1], [0, 0, 1, 1], [], []>, precision = #tpu.contract_precision<fp32>} : vector<16x64xf32>, vector<64x64xf32>, vector<16x64xf32> -> vector<16x64xf32>
    %c1_i32 = arith.constant 1 : i32
    %9 = tpu.dynamic_rotate %5 by %c1_i32 dim 0 : vector<16x64xf32>, i32 -> vector<16x64xf32>
    %10 = tpu.iota {dimensions = array<i32: 0>} : vector<16x64xi32>
    %c-1_i32 = arith.constant -1 : i32
    %11 = vector.broadcast %c-1_i32 : i32 to vector<16x64xi32>
    %12 = arith.addi %10, %11 : vector<16x64xi32>
    %c0_i32 = arith.constant 0 : i32
    %13 = vector.broadcast %c0_i32 : i32 to vector<16x64xi32>
    %14 = arith.cmpi sge, %12, %13 : vector<16x64xi32>
    %c-1_i32_10 = arith.constant -1 : i32
    %15 = vector.broadcast %c-1_i32_10 : i32 to vector<16x64xi32>
    %16 = arith.addi %10, %15 : vector<16x64xi32>
    %c16_i32 = arith.constant 16 : i32
    %17 = vector.broadcast %c16_i32 : i32 to vector<16x64xi32>
    %18 = arith.cmpi slt, %16, %17 : vector<16x64xi32>
    %19 = arith.andi %14, %18 : vector<16x64xi1>
    %cst_11 = arith.constant 0.000000e+00 : f32
    %20 = vector.broadcast %cst_11 : f32 to vector<16x64xf32>
    %21 = arith.select %19, %9, %20 : vector<16x64xi1>, vector<16x64xf32>
    %c0_12 = arith.constant 0 : index
    %c0_13 = arith.constant 0 : index
    %c0_14 = arith.constant 0 : index
    %22 = vector.load %arg10[%c0_12, %c0_13, %c0_14] : memref<3x64x64xf32, #tpu.memory_space<vmem>>, vector<1x64x64xf32>
    %23 = vector.shape_cast %22 : vector<1x64x64xf32> to vector<64x64xf32>
    %cst_15 = arith.constant dense<0.000000e+00> : vector<16x64xf32>
    %24 = tpu.matmul %21, %23, %cst_15 {dimension_numbers = #tpu.dot_dimension_numbers<[1], [0], [0], [1], [0, 0, 1, 1], [], []>, precision = #tpu.contract_precision<fp32>} : vector<16x64xf32>, vector<64x64xf32>, vector<16x64xf32> -> vector<16x64xf32>
    %25 = arith.addf %8, %24 : vector<16x64xf32>
    %c15_i32 = arith.constant 15 : i32
    %26 = tpu.dynamic_rotate %5 by %c15_i32 dim 0 : vector<16x64xf32>, i32 -> vector<16x64xf32>
    %27 = tpu.iota {dimensions = array<i32: 0>} : vector<16x64xi32>
    %c1_i32_16 = arith.constant 1 : i32
    %28 = vector.broadcast %c1_i32_16 : i32 to vector<16x64xi32>
    %29 = arith.addi %27, %28 : vector<16x64xi32>
    %c0_i32_17 = arith.constant 0 : i32
    %30 = vector.broadcast %c0_i32_17 : i32 to vector<16x64xi32>
    %31 = arith.cmpi sge, %29, %30 : vector<16x64xi32>
    %c1_i32_18 = arith.constant 1 : i32
    %32 = vector.broadcast %c1_i32_18 : i32 to vector<16x64xi32>
    %33 = arith.addi %27, %32 : vector<16x64xi32>
    %c16_i32_19 = arith.constant 16 : i32
    %34 = vector.broadcast %c16_i32_19 : i32 to vector<16x64xi32>
    %35 = arith.cmpi slt, %33, %34 : vector<16x64xi32>
    %36 = arith.andi %31, %35 : vector<16x64xi1>
    %cst_20 = arith.constant 0.000000e+00 : f32
    %37 = vector.broadcast %cst_20 : f32 to vector<16x64xf32>
    %38 = arith.select %36, %26, %37 : vector<16x64xi1>, vector<16x64xf32>
    %c2 = arith.constant 2 : index
    %c0_21 = arith.constant 0 : index
    %c0_22 = arith.constant 0 : index
    %39 = vector.load %arg10[%c2, %c0_21, %c0_22] : memref<3x64x64xf32, #tpu.memory_space<vmem>>, vector<1x64x64xf32>
    %40 = vector.shape_cast %39 : vector<1x64x64xf32> to vector<64x64xf32>
    %cst_23 = arith.constant dense<0.000000e+00> : vector<16x64xf32>
    %41 = tpu.matmul %38, %40, %cst_23 {dimension_numbers = #tpu.dot_dimension_numbers<[1], [0], [0], [1], [0, 0, 1, 1], [], []>, precision = #tpu.contract_precision<fp32>} : vector<16x64xf32>, vector<64x64xf32>, vector<16x64xf32> -> vector<16x64xf32>
    %42 = arith.addf %25, %41 : vector<16x64xf32>
    %c3 = arith.constant 3 : index
    %c0_24 = arith.constant 0 : index
    %c0_25 = arith.constant 0 : index
    %43 = vector.load %arg1[%c3, %c0_24, %c0_25] : memref<8x16x16xf32, #tpu.memory_space<vmem>>, vector<1x16x16xf32>
    %44 = vector.shape_cast %43 : vector<1x16x16xf32> to vector<16x16xf32>
    %cst_26 = arith.constant dense<0.000000e+00> : vector<16x64xf32>
    %45 = tpu.matmul %44, %42, %cst_26 {dimension_numbers = #tpu.dot_dimension_numbers<[1], [0], [0], [1], [0, 0, 1, 1], [], []>, precision = #tpu.contract_precision<fp32>} : vector<16x16xf32>, vector<16x64xf32>, vector<16x64xf32> -> vector<16x64xf32>
    %c0_27 = arith.constant 0 : index
    %c0_28 = arith.constant 0 : index
    %46 = vector.load %arg5[%c0_27, %c0_28] : memref<64x128xf32, #tpu.memory_space<vmem>>, vector<64x128xf32>
    %cst_29 = arith.constant dense<0.000000e+00> : vector<16x128xf32>
    %47 = tpu.matmul %45, %46, %cst_29 {dimension_numbers = #tpu.dot_dimension_numbers<[1], [0], [0], [1], [0, 0, 1, 1], [], []>, precision = #tpu.contract_precision<fp32>} : vector<16x64xf32>, vector<64x128xf32>, vector<16x128xf32> -> vector<16x128xf32>
    %48 = arith.addf %0, %47 : vector<16x128xf32>
    %c6 = arith.constant 6 : index
    %c0_30 = arith.constant 0 : index
    %c0_31 = arith.constant 0 : index
    %49 = vector.load %arg1[%c6, %c0_30, %c0_31] : memref<8x16x16xf32, #tpu.memory_space<vmem>>, vector<1x16x16xf32>
    %50 = vector.shape_cast %49 : vector<1x16x16xf32> to vector<16x16xf32>
    %cst_32 = arith.constant dense<0.000000e+00> : vector<16x64xf32>
    %51 = tpu.matmul %50, %42, %cst_32 {dimension_numbers = #tpu.dot_dimension_numbers<[1], [0], [0], [1], [0, 0, 1, 1], [], []>, precision = #tpu.contract_precision<fp32>} : vector<16x16xf32>, vector<16x64xf32>, vector<16x64xf32> -> vector<16x64xf32>
    %c0_33 = arith.constant 0 : index
    %c0_34 = arith.constant 0 : index
    %52 = vector.load %arg8[%c0_33, %c0_34] : memref<64x32xf32, #tpu.memory_space<vmem>>, vector<64x32xf32>
    %cst_35 = arith.constant dense<0.000000e+00> : vector<16x32xf32>
    %53 = tpu.matmul %51, %52, %cst_35 {dimension_numbers = #tpu.dot_dimension_numbers<[1], [0], [0], [1], [0, 0, 1, 1], [], []>, precision = #tpu.contract_precision<fp32>} : vector<16x64xf32>, vector<64x32xf32>, vector<16x32xf32> -> vector<16x32xf32>
    %c1_36 = arith.constant 1 : index
    %c0_37 = arith.constant 0 : index
    %c0_38 = arith.constant 0 : index
    %54 = vector.load %arg1[%c1_36, %c0_37, %c0_38] : memref<8x16x16xf32, #tpu.memory_space<vmem>>, vector<1x16x16xf32>
    %55 = vector.shape_cast %54 : vector<1x16x16xf32> to vector<16x16xf32>
    %cst_39 = arith.constant dense<0.000000e+00> : vector<16x128xf32>
    %56 = tpu.matmul %55, %0, %cst_39 {dimension_numbers = #tpu.dot_dimension_numbers<[1], [0], [0], [1], [0, 0, 1, 1], [], []>, precision = #tpu.contract_precision<fp32>} : vector<16x16xf32>, vector<16x128xf32>, vector<16x128xf32> -> vector<16x128xf32>
    %c0_40 = arith.constant 0 : index
    %c0_41 = arith.constant 0 : index
    %57 = vector.load %arg3[%c0_40, %c0_41] : memref<128x32xf32, #tpu.memory_space<vmem>>, vector<128x32xf32>
    %cst_42 = arith.constant dense<0.000000e+00> : vector<16x32xf32>
    %58 = tpu.matmul %56, %57, %cst_42 {dimension_numbers = #tpu.dot_dimension_numbers<[1], [0], [0], [1], [0, 0, 1, 1], [], []>, precision = #tpu.contract_precision<fp32>} : vector<16x128xf32>, vector<128x32xf32>, vector<16x32xf32> -> vector<16x32xf32>
    %59 = arith.addf %58, %53 : vector<16x32xf32>
    %c1_43 = arith.constant 1 : index
    %c0_44 = arith.constant 0 : index
    %c0_45 = arith.constant 0 : index
    %60 = vector.load %arg11[%c1_43, %c0_44, %c0_45] : memref<3x32x32xf32, #tpu.memory_space<vmem>>, vector<1x32x32xf32>
    %61 = vector.shape_cast %60 : vector<1x32x32xf32> to vector<32x32xf32>
    %cst_46 = arith.constant dense<0.000000e+00> : vector<16x32xf32>
    %62 = tpu.matmul %59, %61, %cst_46 {dimension_numbers = #tpu.dot_dimension_numbers<[1], [0], [0], [1], [0, 0, 1, 1], [], []>, precision = #tpu.contract_precision<fp32>} : vector<16x32xf32>, vector<32x32xf32>, vector<16x32xf32> -> vector<16x32xf32>
    %c1_i32_47 = arith.constant 1 : i32
    %63 = tpu.dynamic_rotate %59 by %c1_i32_47 dim 0 : vector<16x32xf32>, i32 -> vector<16x32xf32>
    %64 = tpu.iota {dimensions = array<i32: 0>} : vector<16x32xi32>
    %c-1_i32_48 = arith.constant -1 : i32
    %65 = vector.broadcast %c-1_i32_48 : i32 to vector<16x32xi32>
    %66 = arith.addi %64, %65 : vector<16x32xi32>
    %c0_i32_49 = arith.constant 0 : i32
    %67 = vector.broadcast %c0_i32_49 : i32 to vector<16x32xi32>
    %68 = arith.cmpi sge, %66, %67 : vector<16x32xi32>
    %c-1_i32_50 = arith.constant -1 : i32
    %69 = vector.broadcast %c-1_i32_50 : i32 to vector<16x32xi32>
    %70 = arith.addi %64, %69 : vector<16x32xi32>
    %c16_i32_51 = arith.constant 16 : i32
    %71 = vector.broadcast %c16_i32_51 : i32 to vector<16x32xi32>
    %72 = arith.cmpi slt, %70, %71 : vector<16x32xi32>
    %73 = arith.andi %68, %72 : vector<16x32xi1>
    %cst_52 = arith.constant 0.000000e+00 : f32
    %74 = vector.broadcast %cst_52 : f32 to vector<16x32xf32>
    %75 = arith.select %73, %63, %74 : vector<16x32xi1>, vector<16x32xf32>
    %c0_53 = arith.constant 0 : index
    %c0_54 = arith.constant 0 : index
    %c0_55 = arith.constant 0 : index
    %76 = vector.load %arg11[%c0_53, %c0_54, %c0_55] : memref<3x32x32xf32, #tpu.memory_space<vmem>>, vector<1x32x32xf32>
    %77 = vector.shape_cast %76 : vector<1x32x32xf32> to vector<32x32xf32>
    %cst_56 = arith.constant dense<0.000000e+00> : vector<16x32xf32>
    %78 = tpu.matmul %75, %77, %cst_56 {dimension_numbers = #tpu.dot_dimension_numbers<[1], [0], [0], [1], [0, 0, 1, 1], [], []>, precision = #tpu.contract_precision<fp32>} : vector<16x32xf32>, vector<32x32xf32>, vector<16x32xf32> -> vector<16x32xf32>
    %79 = arith.addf %62, %78 : vector<16x32xf32>
    %c15_i32_57 = arith.constant 15 : i32
    %80 = tpu.dynamic_rotate %59 by %c15_i32_57 dim 0 : vector<16x32xf32>, i32 -> vector<16x32xf32>
    %81 = tpu.iota {dimensions = array<i32: 0>} : vector<16x32xi32>
    %c1_i32_58 = arith.constant 1 : i32
    %82 = vector.broadcast %c1_i32_58 : i32 to vector<16x32xi32>
    %83 = arith.addi %81, %82 : vector<16x32xi32>
    %c0_i32_59 = arith.constant 0 : i32
    %84 = vector.broadcast %c0_i32_59 : i32 to vector<16x32xi32>
    %85 = arith.cmpi sge, %83, %84 : vector<16x32xi32>
    %c1_i32_60 = arith.constant 1 : i32
    %86 = vector.broadcast %c1_i32_60 : i32 to vector<16x32xi32>
    %87 = arith.addi %81, %86 : vector<16x32xi32>
    %c16_i32_61 = arith.constant 16 : i32
    %88 = vector.broadcast %c16_i32_61 : i32 to vector<16x32xi32>
    %89 = arith.cmpi slt, %87, %88 : vector<16x32xi32>
    %90 = arith.andi %85, %89 : vector<16x32xi1>
    %cst_62 = arith.constant 0.000000e+00 : f32
    %91 = vector.broadcast %cst_62 : f32 to vector<16x32xf32>
    %92 = arith.select %90, %80, %91 : vector<16x32xi1>, vector<16x32xf32>
    %c2_63 = arith.constant 2 : index
    %c0_64 = arith.constant 0 : index
    %c0_65 = arith.constant 0 : index
    %93 = vector.load %arg11[%c2_63, %c0_64, %c0_65] : memref<3x32x32xf32, #tpu.memory_space<vmem>>, vector<1x32x32xf32>
    %94 = vector.shape_cast %93 : vector<1x32x32xf32> to vector<32x32xf32>
    %cst_66 = arith.constant dense<0.000000e+00> : vector<16x32xf32>
    %95 = tpu.matmul %92, %94, %cst_66 {dimension_numbers = #tpu.dot_dimension_numbers<[1], [0], [0], [1], [0, 0, 1, 1], [], []>, precision = #tpu.contract_precision<fp32>} : vector<16x32xf32>, vector<32x32xf32>, vector<16x32xf32> -> vector<16x32xf32>
    %96 = arith.addf %79, %95 : vector<16x32xf32>
    %c4 = arith.constant 4 : index
    %c0_67 = arith.constant 0 : index
    %c0_68 = arith.constant 0 : index
    %97 = vector.load %arg1[%c4, %c0_67, %c0_68] : memref<8x16x16xf32, #tpu.memory_space<vmem>>, vector<1x16x16xf32>
    %98 = vector.shape_cast %97 : vector<1x16x16xf32> to vector<16x16xf32>
    %cst_69 = arith.constant dense<0.000000e+00> : vector<16x32xf32>
    %99 = tpu.matmul %98, %96, %cst_69 {dimension_numbers = #tpu.dot_dimension_numbers<[1], [0], [0], [1], [0, 0, 1, 1], [], []>, precision = #tpu.contract_precision<fp32>} : vector<16x16xf32>, vector<16x32xf32>, vector<16x32xf32> -> vector<16x32xf32>
    %c0_70 = arith.constant 0 : index
    %c0_71 = arith.constant 0 : index
    %100 = vector.load %arg6[%c0_70, %c0_71] : memref<32x128xf32, #tpu.memory_space<vmem>>, vector<32x128xf32>
    %cst_72 = arith.constant dense<0.000000e+00> : vector<16x128xf32>
    %101 = tpu.matmul %99, %100, %cst_72 {dimension_numbers = #tpu.dot_dimension_numbers<[1], [0], [0], [1], [0, 0, 1, 1], [], []>, precision = #tpu.contract_precision<fp32>} : vector<16x32xf32>, vector<32x128xf32>, vector<16x128xf32> -> vector<16x128xf32>
    %102 = arith.addf %48, %101 : vector<16x128xf32>
    %c7 = arith.constant 7 : index
    %c0_73 = arith.constant 0 : index
    %c0_74 = arith.constant 0 : index
    %103 = vector.load %arg1[%c7, %c0_73, %c0_74] : memref<8x16x16xf32, #tpu.memory_space<vmem>>, vector<1x16x16xf32>
    %104 = vector.shape_cast %103 : vector<1x16x16xf32> to vector<16x16xf32>
    %cst_75 = arith.constant dense<0.000000e+00> : vector<16x32xf32>
    %105 = tpu.matmul %104, %96, %cst_75 {dimension_numbers = #tpu.dot_dimension_numbers<[1], [0], [0], [1], [0, 0, 1, 1], [], []>, precision = #tpu.contract_precision<fp32>} : vector<16x16xf32>, vector<16x32xf32>, vector<16x32xf32> -> vector<16x32xf32>
    %c0_76 = arith.constant 0 : index
    %c0_77 = arith.constant 0 : index
    %106 = vector.load %arg9[%c0_76, %c0_77] : memref<32x16xf32, #tpu.memory_space<vmem>>, vector<32x16xf32>
    %cst_78 = arith.constant dense<0.000000e+00> : vector<16x16xf32>
    %107 = tpu.matmul %105, %106, %cst_78 {dimension_numbers = #tpu.dot_dimension_numbers<[1], [0], [0], [1], [0, 0, 1, 1], [], []>, precision = #tpu.contract_precision<fp32>} : vector<16x32xf32>, vector<32x16xf32>, vector<16x16xf32> -> vector<16x16xf32>
    %c2_79 = arith.constant 2 : index
    %c0_80 = arith.constant 0 : index
    %c0_81 = arith.constant 0 : index
    %108 = vector.load %arg1[%c2_79, %c0_80, %c0_81] : memref<8x16x16xf32, #tpu.memory_space<vmem>>, vector<1x16x16xf32>
    %109 = vector.shape_cast %108 : vector<1x16x16xf32> to vector<16x16xf32>
    %cst_82 = arith.constant dense<0.000000e+00> : vector<16x128xf32>
    %110 = tpu.matmul %109, %0, %cst_82 {dimension_numbers = #tpu.dot_dimension_numbers<[1], [0], [0], [1], [0, 0, 1, 1], [], []>, precision = #tpu.contract_precision<fp32>} : vector<16x16xf32>, vector<16x128xf32>, vector<16x128xf32> -> vector<16x128xf32>
    %c0_83 = arith.constant 0 : index
    %c0_84 = arith.constant 0 : index
    %111 = vector.load %arg4[%c0_83, %c0_84] : memref<128x16xf32, #tpu.memory_space<vmem>>, vector<128x16xf32>
    %cst_85 = arith.constant dense<0.000000e+00> : vector<16x16xf32>
    %112 = tpu.matmul %110, %111, %cst_85 {dimension_numbers = #tpu.dot_dimension_numbers<[1], [0], [0], [1], [0, 0, 1, 1], [], []>, precision = #tpu.contract_precision<fp32>} : vector<16x128xf32>, vector<128x16xf32>, vector<16x16xf32> -> vector<16x16xf32>
    %113 = arith.addf %112, %107 : vector<16x16xf32>
    %c1_86 = arith.constant 1 : index
    %c0_87 = arith.constant 0 : index
    %c0_88 = arith.constant 0 : index
    %114 = vector.load %arg12[%c1_86, %c0_87, %c0_88] : memref<3x16x16xf32, #tpu.memory_space<vmem>>, vector<1x16x16xf32>
    %115 = vector.shape_cast %114 : vector<1x16x16xf32> to vector<16x16xf32>
    %cst_89 = arith.constant dense<0.000000e+00> : vector<16x16xf32>
    %116 = tpu.matmul %113, %115, %cst_89 {dimension_numbers = #tpu.dot_dimension_numbers<[1], [0], [0], [1], [0, 0, 1, 1], [], []>, precision = #tpu.contract_precision<fp32>} : vector<16x16xf32>, vector<16x16xf32>, vector<16x16xf32> -> vector<16x16xf32>
    %c1_i32_90 = arith.constant 1 : i32
    %117 = tpu.dynamic_rotate %113 by %c1_i32_90 dim 0 : vector<16x16xf32>, i32 -> vector<16x16xf32>
    %118 = tpu.iota {dimensions = array<i32: 0>} : vector<16x16xi32>
    %c-1_i32_91 = arith.constant -1 : i32
    %119 = vector.broadcast %c-1_i32_91 : i32 to vector<16x16xi32>
    %120 = arith.addi %118, %119 : vector<16x16xi32>
    %c0_i32_92 = arith.constant 0 : i32
    %121 = vector.broadcast %c0_i32_92 : i32 to vector<16x16xi32>
    %122 = arith.cmpi sge, %120, %121 : vector<16x16xi32>
    %c-1_i32_93 = arith.constant -1 : i32
    %123 = vector.broadcast %c-1_i32_93 : i32 to vector<16x16xi32>
    %124 = arith.addi %118, %123 : vector<16x16xi32>
    %c16_i32_94 = arith.constant 16 : i32
    %125 = vector.broadcast %c16_i32_94 : i32 to vector<16x16xi32>
    %126 = arith.cmpi slt, %124, %125 : vector<16x16xi32>
    %127 = arith.andi %122, %126 : vector<16x16xi1>
    %cst_95 = arith.constant 0.000000e+00 : f32
    %128 = vector.broadcast %cst_95 : f32 to vector<16x16xf32>
    %129 = arith.select %127, %117, %128 : vector<16x16xi1>, vector<16x16xf32>
    %c0_96 = arith.constant 0 : index
    %c0_97 = arith.constant 0 : index
    %c0_98 = arith.constant 0 : index
    %130 = vector.load %arg12[%c0_96, %c0_97, %c0_98] : memref<3x16x16xf32, #tpu.memory_space<vmem>>, vector<1x16x16xf32>
    %131 = vector.shape_cast %130 : vector<1x16x16xf32> to vector<16x16xf32>
    %cst_99 = arith.constant dense<0.000000e+00> : vector<16x16xf32>
    %132 = tpu.matmul %129, %131, %cst_99 {dimension_numbers = #tpu.dot_dimension_numbers<[1], [0], [0], [1], [0, 0, 1, 1], [], []>, precision = #tpu.contract_precision<fp32>} : vector<16x16xf32>, vector<16x16xf32>, vector<16x16xf32> -> vector<16x16xf32>
    %133 = arith.addf %116, %132 : vector<16x16xf32>
    %c15_i32_100 = arith.constant 15 : i32
    %134 = tpu.dynamic_rotate %113 by %c15_i32_100 dim 0 : vector<16x16xf32>, i32 -> vector<16x16xf32>
    %135 = tpu.iota {dimensions = array<i32: 0>} : vector<16x16xi32>
    %c1_i32_101 = arith.constant 1 : i32
    %136 = vector.broadcast %c1_i32_101 : i32 to vector<16x16xi32>
    %137 = arith.addi %135, %136 : vector<16x16xi32>
    %c0_i32_102 = arith.constant 0 : i32
    %138 = vector.broadcast %c0_i32_102 : i32 to vector<16x16xi32>
    %139 = arith.cmpi sge, %137, %138 : vector<16x16xi32>
    %c1_i32_103 = arith.constant 1 : i32
    %140 = vector.broadcast %c1_i32_103 : i32 to vector<16x16xi32>
    %141 = arith.addi %135, %140 : vector<16x16xi32>
    %c16_i32_104 = arith.constant 16 : i32
    %142 = vector.broadcast %c16_i32_104 : i32 to vector<16x16xi32>
    %143 = arith.cmpi slt, %141, %142 : vector<16x16xi32>
    %144 = arith.andi %139, %143 : vector<16x16xi1>
    %cst_105 = arith.constant 0.000000e+00 : f32
    %145 = vector.broadcast %cst_105 : f32 to vector<16x16xf32>
    %146 = arith.select %144, %134, %145 : vector<16x16xi1>, vector<16x16xf32>
    %c2_106 = arith.constant 2 : index
    %c0_107 = arith.constant 0 : index
    %c0_108 = arith.constant 0 : index
    %147 = vector.load %arg12[%c2_106, %c0_107, %c0_108] : memref<3x16x16xf32, #tpu.memory_space<vmem>>, vector<1x16x16xf32>
    %148 = vector.shape_cast %147 : vector<1x16x16xf32> to vector<16x16xf32>
    %cst_109 = arith.constant dense<0.000000e+00> : vector<16x16xf32>
    %149 = tpu.matmul %146, %148, %cst_109 {dimension_numbers = #tpu.dot_dimension_numbers<[1], [0], [0], [1], [0, 0, 1, 1], [], []>, precision = #tpu.contract_precision<fp32>} : vector<16x16xf32>, vector<16x16xf32>, vector<16x16xf32> -> vector<16x16xf32>
    %150 = arith.addf %133, %149 : vector<16x16xf32>
    %c5 = arith.constant 5 : index
    %c0_110 = arith.constant 0 : index
    %c0_111 = arith.constant 0 : index
    %151 = vector.load %arg1[%c5, %c0_110, %c0_111] : memref<8x16x16xf32, #tpu.memory_space<vmem>>, vector<1x16x16xf32>
    %152 = vector.shape_cast %151 : vector<1x16x16xf32> to vector<16x16xf32>
    %cst_112 = arith.constant dense<0.000000e+00> : vector<16x16xf32>
    %153 = tpu.matmul %152, %150, %cst_112 {dimension_numbers = #tpu.dot_dimension_numbers<[1], [0], [0], [1], [0, 0, 1, 1], [], []>, precision = #tpu.contract_precision<fp32>} : vector<16x16xf32>, vector<16x16xf32>, vector<16x16xf32> -> vector<16x16xf32>
    %c0_113 = arith.constant 0 : index
    %c0_114 = arith.constant 0 : index
    %154 = vector.load %arg7[%c0_113, %c0_114] : memref<16x128xf32, #tpu.memory_space<vmem>>, vector<16x128xf32>
    %cst_115 = arith.constant dense<0.000000e+00> : vector<16x128xf32>
    %155 = tpu.matmul %153, %154, %cst_115 {dimension_numbers = #tpu.dot_dimension_numbers<[1], [0], [0], [1], [0, 0, 1, 1], [], []>, precision = #tpu.contract_precision<fp32>} : vector<16x16xf32>, vector<16x128xf32>, vector<16x128xf32> -> vector<16x128xf32>
    %156 = arith.addf %102, %155 : vector<16x128xf32>
    %cst_116 = arith.constant 0.707106769 : f32
    %157 = vector.broadcast %cst_116 : f32 to vector<16x128xf32>
    %158 = arith.mulf %156, %157 : vector<16x128xf32>
    %159 = math.absf %158 : vector<16x128xf32>
    %cst_117 = arith.constant 0.327591091 : f32
    %160 = vector.broadcast %cst_117 : f32 to vector<16x128xf32>
    %161 = arith.mulf %160, %159 : vector<16x128xf32>
    %cst_118 = arith.constant 1.000000e+00 : f32
    %162 = vector.broadcast %cst_118 : f32 to vector<16x128xf32>
    %163 = arith.addf %162, %161 : vector<16x128xf32>
    %164 = tpu.reciprocal %163 {approx = true} : vector<16x128xf32> -> vector<16x128xf32>
    %165 = arith.mulf %163, %164 : vector<16x128xf32>
    %cst_119 = arith.constant 2.000000e+00 : f32
    %166 = vector.broadcast %cst_119 : f32 to vector<16x128xf32>
    %167 = arith.subf %166, %165 : vector<16x128xf32>
    %168 = arith.mulf %164, %167 : vector<16x128xf32>
    %cst_120 = arith.constant 1.06140542 : f32
    %169 = vector.broadcast %cst_120 : f32 to vector<16x128xf32>
    %170 = arith.mulf %169, %168 : vector<16x128xf32>
    %cst_121 = arith.constant 1.45315206 : f32
    %171 = vector.broadcast %cst_121 : f32 to vector<16x128xf32>
    %172 = arith.subf %170, %171 : vector<16x128xf32>
    %173 = arith.mulf %172, %168 : vector<16x128xf32>
    %cst_122 = arith.constant 1.42141378 : f32
    %174 = vector.broadcast %cst_122 : f32 to vector<16x128xf32>
    %175 = arith.addf %173, %174 : vector<16x128xf32>
    %176 = arith.mulf %175, %168 : vector<16x128xf32>
    %cst_123 = arith.constant 0.284496725 : f32
    %177 = vector.broadcast %cst_123 : f32 to vector<16x128xf32>
    %178 = arith.subf %176, %177 : vector<16x128xf32>
    %179 = arith.mulf %178, %168 : vector<16x128xf32>
    %cst_124 = arith.constant 0.254829586 : f32
    %180 = vector.broadcast %cst_124 : f32 to vector<16x128xf32>
    %181 = arith.addf %179, %180 : vector<16x128xf32>
    %182 = arith.mulf %181, %168 : vector<16x128xf32>
    %cst_125 = arith.constant 0.000000e+00 : f32
    %183 = vector.broadcast %cst_125 : f32 to vector<16x128xf32>
    %184 = arith.subf %183, %159 : vector<16x128xf32>
    %185 = arith.mulf %184, %159 : vector<16x128xf32>
    %186 = math.exp %185 : vector<16x128xf32>
    %187 = arith.mulf %182, %186 : vector<16x128xf32>
    %cst_126 = arith.constant 1.000000e+00 : f32
    %188 = vector.broadcast %cst_126 : f32 to vector<16x128xf32>
    %189 = arith.subf %188, %187 : vector<16x128xf32>
    %cst_127 = arith.constant 0.000000e+00 : f32
    %190 = vector.broadcast %cst_127 : f32 to vector<16x128xf32>
    %191 = arith.cmpf olt, %158, %190 : vector<16x128xf32>
    %cst_128 = arith.constant 0.000000e+00 : f32
    %192 = vector.broadcast %cst_128 : f32 to vector<16x128xf32>
    %193 = arith.subf %192, %189 : vector<16x128xf32>
    %194 = arith.select %191, %193, %189 : vector<16x128xi1>, vector<16x128xf32>
    %cst_129 = arith.constant 5.000000e-01 : f32
    %195 = vector.broadcast %cst_129 : f32 to vector<16x128xf32>
    %196 = arith.mulf %195, %156 : vector<16x128xf32>
    %cst_130 = arith.constant 1.000000e+00 : f32
    %197 = vector.broadcast %cst_130 : f32 to vector<16x128xf32>
    %198 = arith.addf %197, %194 : vector<16x128xf32>
    %199 = arith.mulf %196, %198 : vector<16x128xf32>
    %c1_131 = arith.constant 1 : index
    %c0_132 = arith.constant 0 : index
    %c0_133 = arith.constant 0 : index
    %200 = vector.load %arg13[%c1_131, %c0_132, %c0_133] : memref<3x128x128xf32, #tpu.memory_space<vmem>>, vector<1x128x128xf32>
    %201 = vector.shape_cast %200 : vector<1x128x128xf32> to vector<128x128xf32>
    %cst_134 = arith.constant dense<0.000000e+00> : vector<16x128xf32>
    %202 = tpu.matmul %199, %201, %cst_134 {dimension_numbers = #tpu.dot_dimension_numbers<[1], [0], [0], [1], [0, 0, 1, 1], [], []>, precision = #tpu.contract_precision<fp32>} : vector<16x128xf32>, vector<128x128xf32>, vector<16x128xf32> -> vector<16x128xf32>
    %c1_i32_135 = arith.constant 1 : i32
    %203 = tpu.dynamic_rotate %199 by %c1_i32_135 dim 0 : vector<16x128xf32>, i32 -> vector<16x128xf32>
    %204 = tpu.iota {dimensions = array<i32: 0>} : vector<16x128xi32>
    %c-1_i32_136 = arith.constant -1 : i32
    %205 = vector.broadcast %c-1_i32_136 : i32 to vector<16x128xi32>
    %206 = arith.addi %204, %205 : vector<16x128xi32>
    %c0_i32_137 = arith.constant 0 : i32
    %207 = vector.broadcast %c0_i32_137 : i32 to vector<16x128xi32>
    %208 = arith.cmpi sge, %206, %207 : vector<16x128xi32>
    %c-1_i32_138 = arith.constant -1 : i32
    %209 = vector.broadcast %c-1_i32_138 : i32 to vector<16x128xi32>
    %210 = arith.addi %204, %209 : vector<16x128xi32>
    %c16_i32_139 = arith.constant 16 : i32
    %211 = vector.broadcast %c16_i32_139 : i32 to vector<16x128xi32>
    %212 = arith.cmpi slt, %210, %211 : vector<16x128xi32>
    %213 = arith.andi %208, %212 : vector<16x128xi1>
    %cst_140 = arith.constant 0.000000e+00 : f32
    %214 = vector.broadcast %cst_140 : f32 to vector<16x128xf32>
    %215 = arith.select %213, %203, %214 : vector<16x128xi1>, vector<16x128xf32>
    %c0_141 = arith.constant 0 : index
    %c0_142 = arith.constant 0 : index
    %c0_143 = arith.constant 0 : index
    %216 = vector.load %arg13[%c0_141, %c0_142, %c0_143] : memref<3x128x128xf32, #tpu.memory_space<vmem>>, vector<1x128x128xf32>
    %217 = vector.shape_cast %216 : vector<1x128x128xf32> to vector<128x128xf32>
    %cst_144 = arith.constant dense<0.000000e+00> : vector<16x128xf32>
    %218 = tpu.matmul %215, %217, %cst_144 {dimension_numbers = #tpu.dot_dimension_numbers<[1], [0], [0], [1], [0, 0, 1, 1], [], []>, precision = #tpu.contract_precision<fp32>} : vector<16x128xf32>, vector<128x128xf32>, vector<16x128xf32> -> vector<16x128xf32>
    %219 = arith.addf %202, %218 : vector<16x128xf32>
    %c15_i32_145 = arith.constant 15 : i32
    %220 = tpu.dynamic_rotate %199 by %c15_i32_145 dim 0 : vector<16x128xf32>, i32 -> vector<16x128xf32>
    %221 = tpu.iota {dimensions = array<i32: 0>} : vector<16x128xi32>
    %c1_i32_146 = arith.constant 1 : i32
    %222 = vector.broadcast %c1_i32_146 : i32 to vector<16x128xi32>
    %223 = arith.addi %221, %222 : vector<16x128xi32>
    %c0_i32_147 = arith.constant 0 : i32
    %224 = vector.broadcast %c0_i32_147 : i32 to vector<16x128xi32>
    %225 = arith.cmpi sge, %223, %224 : vector<16x128xi32>
    %c1_i32_148 = arith.constant 1 : i32
    %226 = vector.broadcast %c1_i32_148 : i32 to vector<16x128xi32>
    %227 = arith.addi %221, %226 : vector<16x128xi32>
    %c16_i32_149 = arith.constant 16 : i32
    %228 = vector.broadcast %c16_i32_149 : i32 to vector<16x128xi32>
    %229 = arith.cmpi slt, %227, %228 : vector<16x128xi32>
    %230 = arith.andi %225, %229 : vector<16x128xi1>
    %cst_150 = arith.constant 0.000000e+00 : f32
    %231 = vector.broadcast %cst_150 : f32 to vector<16x128xf32>
    %232 = arith.select %230, %220, %231 : vector<16x128xi1>, vector<16x128xf32>
    %c2_151 = arith.constant 2 : index
    %c0_152 = arith.constant 0 : index
    %c0_153 = arith.constant 0 : index
    %233 = vector.load %arg13[%c2_151, %c0_152, %c0_153] : memref<3x128x128xf32, #tpu.memory_space<vmem>>, vector<1x128x128xf32>
    %234 = vector.shape_cast %233 : vector<1x128x128xf32> to vector<128x128xf32>
    %cst_154 = arith.constant dense<0.000000e+00> : vector<16x128xf32>
    %235 = tpu.matmul %232, %234, %cst_154 {dimension_numbers = #tpu.dot_dimension_numbers<[1], [0], [0], [1], [0, 0, 1, 1], [], []>, precision = #tpu.contract_precision<fp32>} : vector<16x128xf32>, vector<128x128xf32>, vector<16x128xf32> -> vector<16x128xf32>
    %236 = arith.addf %219, %235 : vector<16x128xf32>
    %c0_155 = arith.constant 0 : index
    %c0_156 = arith.constant 0 : index
    %237 = vector.load %arg14[%c0_155, %c0_156] : memref<16x128xf32, #tpu.memory_space<vmem>>, vector<16x128xf32>
    tpu.vector_store %arg14[%c0_155, %c0_156], %236 {strides = array<i32>} : memref<16x128xf32, #tpu.memory_space<vmem>>, vector<16x128xf32>,
    return
  }
}

</mosaic_0001>

<bundles_post_ra>
// kernel: fine2coarse_forward.1
= control target key start
LH: loop header
LB: loop body
LE: loop exit
PB: predicated region body
PF: predicated region fallthrough
CT: control target
= control target key end

     0   :  { %vm51_vm0 = vcmask 130048   ;;  %vm1295_vm4 = vcmask 523264   ;;  %vm6518_vm6 = vcmask 261120   ;;  %s25124_s0 = inlined_call_operand.vmem [shape: f32[16,128], index: 0, kind: input, shape index: {}]   ;;  %s25125_s1 = inlined_call_operand.vmem [shape: f32[8,16,16], index: 1, kind: input, shape index: {}]   ;;  %s25126_s2 = inlined_call_operand.vmem [shape: f32[128,64], index: 2, kind: input, shape index: {}]   ;;  %s25127_s10 = inlined_call_operand.vmem [shape: f32[3,64,64], index: 10, kind: input, shape index: {}]   ;;  %s25128_s5 = inlined_call_operand.vmem [shape: f32[64,128], index: 5, kind: input, shape index: {}]   ;;  %s25129_s8 = inlined_call_operand.vmem [shape: f32[64,32], index: 8, kind: input, shape index: {}]   ;;  %s25130_s3 = inlined_call_operand.vmem [shape: f32[128,32], index: 3, kind: input, shape index: {}]   ;;  %s25131_s11 = inlined_call_operand.vmem [shape: f32[3,32,32], index: 11, kind: input, shape index: {}]   ;;  %s25132_s6 = inlined_call_operand.vmem [shape: f32[32,128], index: 6, kind: input, shape index: {}]   ;;  %s25133_s9 = inlined_call_operand.vmem [shape: f32[32,16], index: 9, kind: input, shape index: {}]   ;;  %s25134_s4 = inlined_call_operand.vmem [shape: f32[128,16], index: 4, kind: input, shape index: {}]   ;;  %s25135_s12 = inlined_call_operand.vmem [shape: f32[3,16,16], index: 12, kind: input, shape index: {}]   ;;  %s25136_s7 = inlined_call_operand.vmem [shape: f32[16,128], index: 7, kind: input, shape index: {}]   ;;  %s25137_s13 = inlined_call_operand.vmem [shape: f32[3,128,128], index: 13, kind: input, shape index: {}]   ;;  %s25138_s14 = inlined_call_operand.vmem [shape: f32[16,128], index: 14, kind: output, shape index: {}]  }
   0x1   :  { %v48_v0 = vld [vmem:[%s25124_s0 + $0x8] sm:$0xff]  ;;  %v47_v1 = vld [vmem:[%s25124_s0] sm:$0xff]  ;;  %v575_v12 = vld [vmem:[%s25126_s2 + $0x78] sm:$0xff] }
   0x2   :  { %v49_v2 = vld [vmem:[%s25125_s1] sm:$0xff]  ;;  %v20446_v3 = vand.u32 4294901760, %v48_v0  ;;  %v20448_v4 = vand.u32 4294901760, %v47_v1  ;;  %v50_v6 = vld [vmem:[%s25125_s1 + $0x8] sm:$0xff]  ;;  %v574_v17 = vld [vmem:[%s25126_s2 + $0x70] sm:$0xff]  ;;  %v20484_v19 = vand.u32 4294901760, %v575_v12 }
   0x3   :  { %v53_v5 = vsel %vm51_vm0, %v49_v2, 0  ;;  %v56_v8 = vsel %vm51_vm0, %v50_v6, 0  ;;  %v573_v23 = vld [vmem:[%s25126_s2 + $0x68] sm:$0xff]  ;;  %v20494_v25 = vand.u32 4294901760, %v574_v17  ;;  %v572_v29 = vld [vmem:[%s25126_s2 + $0x60] sm:$0xff]  ;;  %v571_v34 = vld [vmem:[%s25126_s2 + $0x58] sm:$0xff] }
   0x4   :  { %25244 = vst [vmem:[#allocation2_spill] sm:$0xff] %v20446_v3  ;;  %25245 = vst [vmem:[#allocation3_spill] sm:$0xff] %v20448_v4  ;;  %v20454_v7 = vand.u32 4294901760, %v53_v5  ;;  %17688 = vmatprep.subr.mxu0 %v20446_v3  ;;  %v20459_v9 = vsub.f32 %v48_v0, %v20446_v3  ;;  %v20461_v10 = vand.u32 4294901760, %v56_v8  ;;  %v20464_v11 = vsub.f32 %v47_v1, %v20448_v4  ;;  %v570_v37 = vld [vmem:[%s25126_s2 + $0x50] sm:$0xff]  ;;  %v569_v41 = vld [vmem:[%s25126_s2 + $0x48] sm:$0xff] }
   0x5   :  { %17689 = vmatpush3.msra.mxu0 %v20446_v3  ;;  %v20504_v31 = vsub.f32 %v575_v12, %v20484_v19  ;;  %v20506_v32 = vand.u32 4294901760, %v573_v23  ;;  %v20514_v35 = vsub.f32 %v574_v17, %v20494_v25  ;;  %v20516_v36 = vand.u32 4294901760, %v572_v29  ;;  %v568_v45 = vld [vmem:[%s25126_s2 + $0x40] sm:$0xff] }
   0x6   :  { %25246 = vst [vmem:[#allocation4_spill] sm:$0xff] %v20459_v9  ;;  %25247 = vst [vmem:[#allocation5_spill] sm:$0xff] %v20464_v11  ;;  %v126_v13 = vsub.f32 %v53_v5, %v20454_v7  ;;  %17699 = vmatprep.mubr.f32.mxu1 %v20454_v7  ;;  %17690 = vmatprep.subr.mxu0 %v20448_v4  ;;  %v20474_v14 = vand.u32 4294901760, %v20459_v9  ;;  %v136_v15 = vsub.f32 %v56_v8, %v20461_v10 }
   0x7   :  { %v20478_v16 = vand.u32 4294901760, %v20464_v11  ;;  %17691 = vmatpush3.msra.mxu0 %v20448_v4  ;;  %v20525_v38 = vand.u32 4294901760, %v20504_v31  ;;  %v20528_v39 = vsub.f32 %v573_v23, %v20506_v32  ;;  %v20530_v40 = vand.u32 4294901760, %v571_v34 }
   0x8   :  { %25248 = vst [vmem:[#allocation6_spill] sm:$0xff] %v20474_v14  ;;  %v127_v18 = vand.u32 4294901760, %v126_v13  ;;  %v177_v20 = vsub.f32 %v20459_v9, %v20474_v14  ;;  %v137_v21 = vand.u32 4294901760, %v136_v15  ;;  %17702 = vmatprep.subr.mxu0 %v20459_v9  ;;  %v20540_v42 = vand.u32 4294901760, %v20514_v35 }
   0x9   :  { %25249 = vst [vmem:[#allocation7_spill] sm:$0xff] %v20478_v16  ;;  %v184_v22 = vsub.f32 %v20464_v11, %v20478_v16  ;;  %v20543_v43 = vsub.f32 %v572_v29, %v20516_v36  ;;  %v20545_v44 = vand.u32 4294901760, %v570_v37  ;;  %v681_v46 = vsub.f32 %v20504_v31, %v20525_v38  ;;  %v564_v29 = vld [vmem:[%s25126_s2 + $0x20] sm:$0xff] }
   0xa   :  { %v128_v24 = vsub.f32 %v126_v13, %v127_v18  ;;  %v20496_v26 = vand.u32 4294901760, %v177_v20  ;;  %v138_v27 = vsub.f32 %v136_v15, %v137_v21  ;;  %v20555_v47 = vand.u32 4294901760, %v20528_v39 }
   0xb   :  { %v20498_v28 = vand.u32 4294901760, %v184_v22  ;;  %v20558_v48 = vsub.f32 %v571_v34, %v20530_v40  ;;  %v20560_v49 = vand.u32 4294901760, %v569_v41  ;;  %v688_v50 = vsub.f32 %v20514_v35, %v20540_v42  ;;  %v565_v22 = vld [vmem:[%s25126_s2 + $0x28] sm:$0xff] }
   0xc   :  { %25250 = vst [vmem:[#allocation8_spill] sm:$0xff] %v20496_v26  ;;  %v129_v30 = vand.u32 4294901760, %v128_v24  ;;  %17695 = vmatprep.subr.mxu1 %v20496_v26  ;;  %v139_v33 = vand.u32 4294901760, %v138_v27  ;;  %v20568_v51 = vand.u32 4294901760, %v20543_v43  ;;  %v20571_v52 = vsub.f32 %v570_v37, %v20545_v44 }
   0xd   :  { %25251 = vst [vmem:[#allocation9_spill] sm:$0xff] %v20498_v28  ;;  %17696 = vmatpush3.msra.mxu1 %v20496_v26  ;;  %v20573_v53 = vand.u32 4294901760, %v568_v45  ;;  %v682_v54 = vand.u32 4294901760, %v681_v46  ;;  %v695_v55 = vsub.f32 %v20528_v39, %v20555_v47  ;;  %v20581_v56 = vand.u32 4294901760, %v20558_v48 }
   0xe   :  { %17692 = vmatprep.mubr.f32.mxu0 %v129_v30  ;;  %17697 = vmatprep.subr.mxu1 %v20498_v28  ;;  %v20584_v57 = vsub.f32 %v569_v41, %v20560_v49  ;;  %v689_v58 = vand.u32 4294901760, %v688_v50  ;;  %v702_v59 = vsub.f32 %v20543_v43, %v20568_v51  ;;  %v20593_v60 = vand.u32 4294901760, %v20571_v52  ;;  %v563_v41 = vld [vmem:[%s25126_s2 + $0x18] sm:$0xff] }
   0xf   :  { %17693 = vmatmul.mubr.f32.vlgmr.msra.gmra.mxu0 %v139_v33  ;;  %17698 = vmatpush3.msra.mxu1 %v20498_v28  ;;  %v20596_v61 = vsub.f32 %v568_v45, %v20573_v53  ;;  %v696_v62 = vand.u32 4294901760, %v695_v55  ;;  %v709_v63 = vsub.f32 %v20558_v48, %v20581_v56  ;;  %v20655_v27 = vand.u32 4294901760, %v565_v22 }
  0x10   :  { %17703 = vmatpush3.msra.mxu0 %v20459_v9  ;;  %17700 = vmatmul.mubr.f32.vlgmr.msra.gmra.mxu1 %v20461_v10  ;;  %v20604_v0 = vand.u32 4294901760, %v20584_v57  ;;  %v703_v1 = vand.u32 4294901760, %v702_v59  ;;  %v716_v2 = vsub.f32 %v20571_v52, %v20593_v60  ;;  %v20670_v37 = vand.u32 4294901760, %v564_v29 }
  0x11   :  { %17704 = vmatprep.subr.mxu0 %v20464_v11  ;;  %17709 = vmatprep.subr.mxu1 %v20446_v3  ;;  %v20611_v5 = vand.u32 4294901760, %v20596_v61  ;;  %v710_v6 = vand.u32 4294901760, %v709_v63  ;;  %v20668_v34 = vsub.f32 %v565_v22, %v20655_v27  ;;  %v20686_v55 = vand.u32 4294901760, %v563_v41 }
  0x12   :  { %17705 = vmatpush3.msra.mxu0 %v20464_v11  ;;  %17706 = vmatprep.mubr.f32.mxu0 %v126_v13  ;;  %v717_v8 = vand.u32 4294901760, %v716_v2 }
  0x13   :  { %17710 = vmatpush3.msra.mxu1 %v20446_v3  ;;  %17707 = vmatmul.mubr.f32.vlgmr.msra.gmra.mxu0 %v136_v15  ;;  %v567_v15 = vld [vmem:[%s25126_s2 + $0x38] sm:$0xff]  ;;  %v20680_v50 = vand.u32 4294901760, %v20668_v34  ;;  %v20700_v2 = vsub.f32 %v563_v41, %v20686_v55 }
  0x14   :  { %17711 = vmatprep.subr.mxu1 %v20448_v4  ;;  %17716 = vmatprep.subr.mxu0 %v20474_v14  ;;  %v20634_v17 = vand.u32 4294901760, %v567_v15 }
  0x15   :  { %17712 = vmatpush3.msra.mxu1 %v20448_v4  ;;  %17713 = vmatprep.mubr.f32.mxu1 %v127_v18  ;;  %v566_v18 = vld [vmem:[%s25126_s2 + $0x30] sm:$0xff]  ;;  %25252 = vst [vmem:[#allocation10_spill] sm:$0xff] %v20680_v50 }
  0x16   :  { %17717 = vmatpush3.msra.mxu0 %v20474_v14  ;;  %17714 = vmatmul.mubr.f32.vlgmr.msra.gmra.mxu1 %v137_v21  ;;  %v20640_v20 = vsub.f32 %v567_v15, %v20634_v17  ;;  %v20642_v21 = vand.u32 4294901760, %v566_v18  ;;  %v560_v15 = vld [vmem:[%s25126_s2] sm:$0xff] }
  0x17   :  { %17718 = vmatprep.subr.mxu0 %v20478_v16  ;;  %17723 = vmatprep.subr.mxu1 %v20446_v3 }
  0x18   :  { %17719 = vmatpush3.msra.mxu0 %v20478_v16  ;;  %17720 = vmatprep.mubr.f32.mxu0 %v20454_v7  ;;  %v20650_v23 = vand.u32 4294901760, %v20640_v20  ;;  %v20653_v24 = vsub.f32 %v566_v18, %v20642_v21 }
  0x19   :  { %17724 = vmatpush3.msra.mxu1 %v20446_v3  ;;  %17721 = vmatmul.mubr.f32.vlgmr.msra.gmra.mxu0 %v20461_v10 }
  0x1a   :  { %17725 = vmatprep.subr.mxu1 %v20448_v4  ;;  %17727 = vmatprep.mubr.f32.mxu1 %v20454_v7  ;;  %v723_v7 = vsub.f32 %v20584_v57, %v20604_v0  ;;  %v737_v30 = vsub.f32 %v20640_v20, %v20650_v23  ;;  %v20665_v33 = vand.u32 4294901760, %v20653_v24 }
  0x1b   :  { %17726 = vmatpush3.msra.mxu1 %v20448_v4  ;;  %17730 = vmatprep.subr.mxu0 %v20484_v19 }
  0x1c   :  { %17728 = vmatmul.mubr.f32.vlgmr.msra.gmra.mxu1 %v20461_v10  ;;  %17765 = vmatprep.subr.mxu1 %v682_v54  ;;  %v730_v10 = vsub.f32 %v20596_v61, %v20611_v5  ;;  %v724_v12 = vand.u32 4294901760, %v723_v7  ;;  %v738_v45 = vand.u32 4294901760, %v737_v30  ;;  %v744_v46 = vsub.f32 %v20653_v24, %v20665_v33 }
  0x1d   :  { %17766 = vmatpush3.msra.mxu1 %v682_v54  ;;  %17731 = vmatpush3.msra.mxu0 %v20484_v19  ;;  %v20683_v54 = vsub.f32 %v564_v29, %v20670_v37  ;;  %v20727_v30 = vand.u32 4294901760, %v560_v15 }
  0x1e   :  { %17767 = vmatprep.subr.mxu1 %v689_v58  ;;  %17732 = vmatprep.subr.mxu0 %v20494_v25  ;;  %v731_v13 = vand.u32 4294901760, %v730_v10  ;;  %v745_v59 = vand.u32 4294901760, %v744_v46 }
  0x1f   :  { %17768 = vmatpush3.msra.mxu1 %v689_v58  ;;  %17733 = vmatpush3.msra.mxu0 %v20494_v25  ;;  %v562_v58 = vld [vmem:[%s25126_s2 + $0x10] sm:$0xff]  ;;  %v20695_v63 = vand.u32 4294901760, %v20683_v54 }
  0x20   :  { %17769 = vmatprep.subr.mxu1 %v696_v62  ;;  %17734 = vmatprep.subr.mxu0 %v20506_v32 }
  0x21   :  { %17770 = vmatpush3.msra.mxu1 %v696_v62  ;;  %17735 = vmatpush3.msra.mxu0 %v20506_v32  ;;  %v751_v62 = vsub.f32 %v20668_v34, %v20680_v50  ;;  %25253 = vst [vmem:[#allocation11_spill] sm:$0xff] %v20695_v63 }
  0x22   :  { %17771 = vmatprep.subr.mxu1 %v703_v1  ;;  %17736 = vmatprep.subr.mxu0 %v20516_v36 }
  0x23   :  { %17772 = vmatpush3.msra.mxu1 %v703_v1  ;;  %17737 = vmatpush3.msra.mxu0 %v20516_v36  ;;  %v20697_v1 = vand.u32 4294901760, %v562_v58  ;;  %v752_v7 = vand.u32 4294901760, %v751_v62 }
  0x24   :  { %17773 = vmatprep.subr.mxu1 %v710_v6  ;;  %17738 = vmatprep.subr.mxu0 %v20530_v40 }
  0x25   :  { %17774 = vmatpush3.msra.mxu1 %v710_v6  ;;  %17739 = vmatpush3.msra.mxu0 %v20530_v40  ;;  %v561_v6 = vld [vmem:[%s25126_s2 + $0x8] sm:$0xff]  ;;  %v20709_v10 = vsub.f32 %v562_v58, %v20697_v1  ;;  %v20739_v58 = vsub.f32 %v560_v15, %v20727_v30 }
  0x26   :  { %17775 = vmatprep.subr.mxu1 %v717_v8  ;;  %17740 = vmatprep.subr.mxu0 %v20545_v44 }
  0x27   :  { %17776 = vmatpush3.msra.mxu1 %v717_v8  ;;  %17741 = vmatpush3.msra.mxu0 %v20545_v44  ;;  %v758_v8 = vsub.f32 %v20683_v54, %v20695_v63  ;;  %v20722_v22 = vand.u32 4294901760, %v20709_v10 }
  0x28   :  { %17777 = vmatprep.subr.mxu1 %v724_v12  ;;  %17742 = vmatprep.subr.mxu0 %v20560_v49 }
  0x29   :  { %17778 = vmatpush3.msra.mxu1 %v724_v12  ;;  %17743 = vmatpush3.msra.mxu0 %v20560_v49  ;;  %v20711_v12 = vand.u32 4294901760, %v561_v6  ;;  %v759_v18 = vand.u32 4294901760, %v758_v8  ;;  %25255 = vst [vmem:[#allocation13_spill] sm:$0xff] %v20722_v22 }
  0x2a   :  { %17779 = vmatprep.subr.mxu1 %v731_v13  ;;  %17744 = vmatprep.subr.mxu0 %v20573_v53 }
  0x2b   :  { %17780 = vmatpush3.msra.mxu1 %v731_v13  ;;  %17745 = vmatpush3.msra.mxu0 %v20573_v53  ;;  %v20715_v13 = vand.u32 4294901760, %v20700_v2  ;;  %v20725_v29 = vsub.f32 %v561_v6, %v20711_v12 }
  0x2c   :  { %17746 = vmatprep.subr.mxu0 %v20634_v17  ;;  %17781 = vmatprep.subr.mxu1 %v738_v45 }
  0x2d   :  { %17747 = vmatpush3.msra.mxu0 %v20634_v17  ;;  %17782 = vmatpush3.msra.mxu1 %v738_v45  ;;  %25254 = vst [vmem:[#allocation12_spill] sm:$0xff] %v20715_v13  ;;  %v765_v41 = vsub.f32 %v20700_v2, %v20715_v13  ;;  %v772_v45 = vsub.f32 %v20709_v10, %v20722_v22  ;;  %v20736_v46 = vand.u32 4294901760, %v20725_v29 }
  0x2e   :  { %17748 = vmatprep.subr.mxu0 %v20642_v21  ;;  %17783 = vmatprep.subr.mxu1 %v745_v59 }
  0x2f   :  { %17749 = vmatpush3.msra.mxu0 %v20642_v21  ;;  %17784 = vmatpush3.msra.mxu1 %v745_v59  ;;  %25256 = vst [vmem:[#allocation14_spill] sm:$0xff] %v20736_v46  ;;  %v766_v59 = vand.u32 4294901760, %v765_v41  ;;  %v773_v62 = vand.u32 4294901760, %v772_v45  ;;  %v779_v6 = vsub.f32 %v20725_v29, %v20736_v46 }
  0x30   :  { %17750 = vmatprep.subr.mxu0 %v20655_v27  ;;  %17785 = vmatprep.subr.mxu1 %v752_v7 }
  0x31   :  { %17751 = vmatpush3.msra.mxu0 %v20655_v27  ;;  %17786 = vmatpush3.msra.mxu1 %v752_v7  ;;  %v20746_v7 = vand.u32 4294901760, %v20739_v58  ;;  %v780_v8 = vand.u32 4294901760, %v779_v6 }
  0x32   :  { %17752 = vmatprep.subr.mxu0 %v20670_v37  ;;  %17787 = vmatprep.subr.mxu1 %v759_v18 }
  0x33   :  { %17753 = vmatpush3.msra.mxu0 %v20670_v37  ;;  %17788 = vmatpush3.msra.mxu1 %v759_v18  ;;  %25257 = vst [vmem:[#allocation15_spill] sm:$0xff] %v20746_v7  ;;  %v786_v15 = vsub.f32 %v20739_v58, %v20746_v7 }
  0x34   :  { %17754 = vmatprep.subr.mxu0 %v20686_v55  ;;  %17789 = vmatprep.subr.mxu1 %v766_v59 }
  0x35   :  { %17755 = vmatpush3.msra.mxu0 %v20686_v55  ;;  %17790 = vmatpush3.msra.mxu1 %v766_v59  ;;  %v787_v18 = vand.u32 4294901760, %v786_v15 }
  0x36   :  { %17756 = vmatprep.subr.mxu0 %v20697_v1  ;;  %17791 = vmatprep.subr.mxu1 %v773_v62 }
  0x37   :  { %17757 = vmatpush3.msra.mxu0 %v20697_v1  ;;  %17792 = vmatpush3.msra.mxu1 %v773_v62 }
  0x38   :  { %17758 = vmatprep.subr.mxu0 %v20711_v12  ;;  %17793 = vmatprep.subr.mxu1 %v780_v8 }
  0x39   :  { %17759 = vmatpush3.msra.mxu0 %v20711_v12  ;;  %17794 = vmatpush3.msra.mxu1 %v780_v8 }
  0x3a   :  { %17760 = vmatprep.subr.mxu0 %v20727_v30  ;;  %17795 = vmatprep.subr.mxu1 %v787_v18 }
  0x3b   :  { %17761 = vmatpush3.msra.mxu0 %v20727_v30  ;;  %17796 = vmatpush3.msra.mxu1 %v787_v18 }
  0x3c   :  { %17800 = vmatprep.subr.mxu0 %v20504_v31  ;;  %17835 = vmatprep.subr.mxu1 %v20484_v19 }
  0xcf   :  { %v17694_v41 = vpop.f32.mrf.mxu0 }
  0xd0   :  { %v17701_v16 = vpop.f32.mrf.mxu1 }
  0xd1   :  { %v131_v45 = vpop.f32.mrf.mxu0  ;;  %v229_v14 = vadd.f32 %v17701_v16, %v17694_v41 }
  0xd2   :  { %v222_v11 = vpop.f32.mrf.mxu1 }
  0xd3   :  { %v223_v9 = vadd.f32 %v222_v11, %v131_v45  ;;  %v17708_v59 = vpop.f32.mrf.mxu0 }
  0xd4   :  { %v312_v6 = vadd.f32 %v17708_v59, %v229_v14 }
  0xd5   :  { %v304_v4 = vpop.f32.mrf.mxu0 }
  0xd6   :  { %v305_v3 = vadd.f32 %v304_v4, %v223_v9  ;;  %v17715_v28 = vpop.f32.mrf.mxu1 }
  0xd7   :  { %v395_v26 = vadd.f32 %v17715_v28, %v312_v6 }
  0xd8   :  { %v386_v62 = vpop.f32.mrf.mxu1 }
  0xd9   :  { %v387_v15 = vadd.f32 %v386_v62, %v305_v3  ;;  %v17722_v7 = vpop.f32.mrf.mxu0 }
  0xda   :  { %v478_v8 = vadd.f32 %v17722_v7, %v395_v26 }
  0xdb   :  { %v471_v46 = vpop.f32.mrf.mxu0 }
  0xdc   :  { %v17729_v18 = vpop.f32.mrf.mxu1  ;;  %v472_v22 = vadd.f32 %v471_v46, %v387_v15 }
  0xdd   :  { %v557_v13 = vadd.f32 %v17729_v18, %v478_v8 }
  0xde   :  { %v550_v63 = vpop.f32.mrf.mxu1 }
  0xdf   :  { %v20753_v50 = vand.u32 4294901760, %v557_v13  ;;  %v551_v16 = vadd.f32 %v550_v63, %v472_v22 }
  0xe1   :  { %v20756_v11 = vsub.f32 %v557_v13, %v20753_v50  ;;  %v20758_v14 = vand.u32 4294901760, %v551_v16 }
  0xe3   :  { %v669_v4 = vand.u32 4294901760, %v20756_v11  ;;  %v658_v9 = vsub.f32 %v551_v16, %v20758_v14  ;;  %17797 = vmatprep.mubr.f32.mxu1 %v20758_v14 }
  0xe4   :  { %17798 = vmatmul.mubr.f32.vlgmr.msra.gmra.mxu1 %v20753_v50 }
  0xe5   :  { %17836 = vmatpush3.msra.mxu1 %v20484_v19  ;;  %v659_v3 = vand.u32 4294901760, %v658_v9  ;;  %v670_v26 = vsub.f32 %v20756_v11, %v669_v4 }
  0xe6   :  { %17837 = vmatprep.subr.mxu1 %v20494_v25 }
  0xe7   :  { %17838 = vmatpush3.msra.mxu1 %v20494_v25  ;;  %17867 = vmatprep.mubr.f32.mxu1 %v659_v3  ;;  %v660_v28 = vsub.f32 %v658_v9, %v659_v3  ;;  %v671_v13 = vand.u32 4294901760, %v670_v26 }
  0xe8   :  { %17839 = vmatprep.subr.mxu1 %v20506_v32 }
  0xe9   :  { %17840 = vmatpush3.msra.mxu1 %v20506_v32  ;;  %v661_v63 = vand.u32 4294901760, %v660_v28 }
  0xea   :  { %17841 = vmatprep.subr.mxu1 %v20516_v36 }
  0xeb   :  { %17842 = vmatpush3.msra.mxu1 %v20516_v36  ;;  %17762 = vmatprep.mubr.f32.mxu0 %v661_v63 }
  0xec   :  { %17843 = vmatprep.subr.mxu1 %v20530_v40  ;;  %17763 = vmatmul.mubr.f32.vlgmr.msra.gmra.mxu0 %v671_v13 }
  0xed   :  { %17801 = vmatpush3.msra.mxu0 %v20504_v31  ;;  %17844 = vmatpush3.msra.mxu1 %v20530_v40  ;;  %v25260_v31 = vld [vmem:[#allocation12_spill] sm:$0xff] }
  0xee   :  { %17802 = vmatprep.subr.mxu0 %v20514_v35  ;;  %17832 = vmatprep.mubr.f32.mxu0 %v658_v9 }
  0xef   :  { %17845 = vmatprep.subr.mxu1 %v20545_v44  ;;  %17803 = vmatpush3.msra.mxu0 %v20514_v35  ;;  %v25262_v35 = vld [vmem:[#allocation14_spill] sm:$0xff] }
  0xf0   :  { %17846 = vmatpush3.msra.mxu1 %v20545_v44  ;;  %17804 = vmatprep.subr.mxu0 %v20528_v39 }
  0xf1   :  { %17847 = vmatprep.subr.mxu1 %v20560_v49  ;;  %17805 = vmatpush3.msra.mxu0 %v20528_v39 }
  0xf2   :  { %17848 = vmatpush3.msra.mxu1 %v20560_v49  ;;  %17806 = vmatprep.subr.mxu0 %v20543_v43 }
  0xf3   :  { %17849 = vmatprep.subr.mxu1 %v20573_v53  ;;  %17807 = vmatpush3.msra.mxu0 %v20543_v43 }
  0xf4   :  { %17850 = vmatpush3.msra.mxu1 %v20573_v53  ;;  %17808 = vmatprep.subr.mxu0 %v20558_v48 }
  0xf5   :  { %17851 = vmatprep.subr.mxu1 %v20634_v17  ;;  %17809 = vmatpush3.msra.mxu0 %v20558_v48 }
  0xf6   :  { %17852 = vmatpush3.msra.mxu1 %v20634_v17  ;;  %17810 = vmatprep.subr.mxu0 %v20571_v52 }
  0xf7   :  { %17853 = vmatprep.subr.mxu1 %v20642_v21  ;;  %17811 = vmatpush3.msra.mxu0 %v20571_v52 }
  0xf8   :  { %17854 = vmatpush3.msra.mxu1 %v20642_v21  ;;  %17812 = vmatprep.subr.mxu0 %v20584_v57 }
  0xf9   :  { %17855 = vmatprep.subr.mxu1 %v20655_v27  ;;  %17813 = vmatpush3.msra.mxu0 %v20584_v57 }
  0xfa   :  { %17856 = vmatpush3.msra.mxu1 %v20655_v27  ;;  %17814 = vmatprep.subr.mxu0 %v20596_v61 }
  0xfb   :  { %17857 = vmatprep.subr.mxu1 %v20670_v37  ;;  %17815 = vmatpush3.msra.mxu0 %v20596_v61 }
  0xfc   :  { %17858 = vmatpush3.msra.mxu1 %v20670_v37  ;;  %17816 = vmatprep.subr.mxu0 %v20640_v20 }
  0xfd   :  { %17859 = vmatprep.subr.mxu1 %v20686_v55  ;;  %17817 = vmatpush3.msra.mxu0 %v20640_v20 }
  0xfe   :  { %17860 = vmatpush3.msra.mxu1 %v20686_v55  ;;  %17818 = vmatprep.subr.mxu0 %v20653_v24 }
  0xff   :  { %17861 = vmatprep.subr.mxu1 %v20697_v1  ;;  %17819 = vmatpush3.msra.mxu0 %v20653_v24 }
 0x100   :  { %17862 = vmatpush3.msra.mxu1 %v20697_v1  ;;  %17820 = vmatprep.subr.mxu0 %v20668_v34 }
 0x101   :  { %17863 = vmatprep.subr.mxu1 %v20711_v12  ;;  %17821 = vmatpush3.msra.mxu0 %v20668_v34 }
 0x102   :  { %17864 = vmatpush3.msra.mxu1 %v20711_v12  ;;  %17822 = vmatprep.subr.mxu0 %v20683_v54 }
 0x103   :  { %17865 = vmatprep.subr.mxu1 %v20727_v30  ;;  %17823 = vmatpush3.msra.mxu0 %v20683_v54 }
 0x104   :  { %17866 = vmatpush3.msra.mxu1 %v20727_v30  ;;  %17824 = vmatprep.subr.mxu0 %v20700_v2 }
 0x105   :  { %17868 = vmatmul.mubr.f32.vlgmr.msra.gmra.mxu1 %v669_v4  ;;  %17905 = vmatprep.subr.mxu1 %v20484_v19 }
 0x106   :  { %17825 = vmatpush3.msra.mxu0 %v20700_v2  ;;  %17906 = vmatpush3.msra.mxu1 %v20484_v19  ;;  %v25258_v19 = vld [vmem:[#allocation10_spill] sm:$0xff] }
 0x107   :  { %17937 = vmatprep.mubr.f32.mxu1 %v20758_v14  ;;  %17826 = vmatprep.subr.mxu0 %v20709_v10 }
 0x108   :  { %17907 = vmatprep.subr.mxu1 %v20494_v25  ;;  %17827 = vmatpush3.msra.mxu0 %v20709_v10  ;;  %v1287_v10 = vld [vmem:[%s25127_s10] sm:$0xff] }
 0x109   :  { %17908 = vmatpush3.msra.mxu1 %v20494_v25  ;;  %17828 = vmatprep.subr.mxu0 %v20725_v29  ;;  %v25259_v25 = vld [vmem:[#allocation11_spill] sm:$0xff] }
 0x10a   :  { %17909 = vmatprep.subr.mxu1 %v20506_v32  ;;  %17829 = vmatpush3.msra.mxu0 %v20725_v29 }
 0x10b   :  { %17910 = vmatpush3.msra.mxu1 %v20506_v32  ;;  %17830 = vmatprep.subr.mxu0 %v20739_v58  ;;  %v25261_v32 = vld [vmem:[#allocation13_spill] sm:$0xff] }
 0x10c   :  { %17911 = vmatprep.subr.mxu1 %v20516_v36  ;;  %17831 = vmatpush3.msra.mxu0 %v20739_v58 }
 0x10d   :  { %17912 = vmatpush3.msra.mxu1 %v20516_v36  ;;  %17833 = vmatmul.mubr.f32.vlgmr.msra.gmra.mxu0 %v20756_v11  ;;  %v25263_v36 = vld [vmem:[#allocation15_spill] sm:$0xff] }
 0x10e   :  { %17870 = vmatprep.subr.mxu0 %v20525_v38  ;;  %17913 = vmatprep.subr.mxu1 %v20530_v40 }
 0x10f   :  { %17871 = vmatpush3.msra.mxu0 %v20525_v38  ;;  %17902 = vmatprep.mubr.f32.mxu0 %v20758_v14  ;;  %v1294_v38 = vld [vmem:[%s25127_s10 + $0x38] sm:$0xff] }
 0x110   :  { %17914 = vmatpush3.msra.mxu1 %v20530_v40  ;;  %17872 = vmatprep.subr.mxu0 %v20540_v42  ;;  %v20903_v39 = vand.u32 4294901760, %v1294_v38  ;;  %v1293_v40 = vld [vmem:[%s25127_s10 + $0x30] sm:$0xff] }
 0x111   :  { %17915 = vmatprep.subr.mxu1 %v20545_v44  ;;  %17873 = vmatpush3.msra.mxu0 %v20540_v42  ;;  %v20911_v43 = vand.u32 4294901760, %v1293_v40 }
 0x112   :  { %17916 = vmatpush3.msra.mxu1 %v20545_v44  ;;  %17874 = vmatprep.subr.mxu0 %v20555_v47  ;;  %v20909_v42 = vsub.f32 %v1294_v38, %v20903_v39  ;;  %v1292_v44 = vld [vmem:[%s25127_s10 + $0x28] sm:$0xff] }
 0x113   :  { %17917 = vmatprep.subr.mxu1 %v20560_v49  ;;  %17875 = vmatpush3.msra.mxu0 %v20555_v47  ;;  %v20922_v48 = vsub.f32 %v1293_v40, %v20911_v43 }
 0x114   :  { %17918 = vmatpush3.msra.mxu1 %v20560_v49  ;;  %17876 = vmatprep.subr.mxu0 %v20568_v51  ;;  %v20919_v47 = vand.u32 4294901760, %v20909_v42  ;;  %v20924_v49 = vand.u32 4294901760, %v1292_v44 }
 0x115   :  { %17919 = vmatprep.subr.mxu1 %v20573_v53  ;;  %17877 = vmatpush3.msra.mxu0 %v20568_v51  ;;  %v1291_v51 = vld [vmem:[%s25127_s10 + $0x20] sm:$0xff] }
 0x116   :  { %17920 = vmatpush3.msra.mxu1 %v20573_v53  ;;  %17878 = vmatprep.subr.mxu0 %v20581_v56  ;;  %v1415_v52 = vsub.f32 %v20909_v42, %v20919_v47  ;;  %v20934_v53 = vand.u32 4294901760, %v20922_v48  ;;  %v20939_v57 = vand.u32 4294901760, %v1291_v51 }
 0x117   :  { %17921 = vmatprep.subr.mxu1 %v20634_v17  ;;  %17879 = vmatpush3.msra.mxu0 %v20581_v56  ;;  %v20937_v56 = vsub.f32 %v1292_v44, %v20924_v49 }
 0x118   :  { %17922 = vmatpush3.msra.mxu1 %v20634_v17  ;;  %17880 = vmatprep.subr.mxu0 %v20593_v60  ;;  %v1416_v61 = vand.u32 4294901760, %v1415_v52  ;;  %v20952_v17 = vsub.f32 %v1291_v51, %v20939_v57 }
 0x119   :  { %17923 = vmatprep.subr.mxu1 %v20642_v21  ;;  %17881 = vmatpush3.msra.mxu0 %v20593_v60  ;;  %v1290_v60 = vld [vmem:[%s25127_s10 + $0x18] sm:$0xff] }
 0x11a   :  { %17924 = vmatpush3.msra.mxu1 %v20642_v21  ;;  %17882 = vmatprep.subr.mxu0 %v20604_v0  ;;  %v20955_v20 = vand.u32 4294901760, %v1290_v60  ;;  %v1289_v21 = vld [vmem:[%s25127_s10 + $0x10] sm:$0xff] }
 0x11b   :  { %17925 = vmatprep.subr.mxu1 %v20655_v27  ;;  %17883 = vmatpush3.msra.mxu0 %v20604_v0  ;;  %v1422_v0 = vsub.f32 %v20922_v48, %v20934_v53 }
 0x11c   :  { %17926 = vmatpush3.msra.mxu1 %v20655_v27  ;;  %17884 = vmatprep.subr.mxu0 %v20611_v5  ;;  %v20964_v27 = vand.u32 4294901760, %v20952_v17  ;;  %v20969_v34 = vsub.f32 %v1290_v60, %v20955_v20 }
 0x11d   :  { %17927 = vmatprep.subr.mxu1 %v20670_v37  ;;  %17885 = vmatpush3.msra.mxu0 %v20611_v5  ;;  %v20949_v5 = vand.u32 4294901760, %v20937_v56 }
 0x11e   :  { %17928 = vmatpush3.msra.mxu1 %v20670_v37  ;;  %17886 = vmatprep.subr.mxu0 %v20650_v23  ;;  %v1288_v37 = vld [vmem:[%s25127_s10 + $0x8] sm:$0xff]  ;;  %v1436_v54 = vsub.f32 %v20952_v17, %v20964_v27  ;;  %v20984_v2 = vand.u32 4294901760, %v20969_v34 }
 0x11f   :  { %17929 = vmatprep.subr.mxu1 %v20686_v55  ;;  %17887 = vmatpush3.msra.mxu0 %v20650_v23  ;;  %v1423_v23 = vand.u32 4294901760, %v1422_v0  ;;  %v1429_v24 = vsub.f32 %v20937_v56, %v20949_v5 }
 0x120   :  { %17930 = vmatpush3.msra.mxu1 %v20686_v55  ;;  %17888 = vmatprep.subr.mxu0 %v20665_v33  ;;  %v1443_v46 = vsub.f32 %v20969_v34, %v20984_v2 }
 0x121   :  { %17931 = vmatprep.subr.mxu1 %v20697_v1  ;;  %17889 = vmatpush3.msra.mxu0 %v20665_v33  ;;  %v20966_v33 = vand.u32 4294901760, %v1289_v21 }
 0x122   :  { %17932 = vmatpush3.msra.mxu1 %v20697_v1  ;;  %17890 = vmatprep.subr.mxu0 %v25258_v19  ;;  %v20980_v1 = vand.u32 4294901760, %v1288_v37  ;;  %v1444_v45 = vand.u32 4294901760, %v1443_v46 }
 0x123   :  { %17933 = vmatprep.subr.mxu1 %v20711_v12  ;;  %17891 = vmatpush3.msra.mxu0 %v25258_v19  ;;  %v20978_v55 = vsub.f32 %v1289_v21, %v20966_v33  ;;  %v1271_v19 = vlaneseq }
 0x124   :  { %17934 = vmatpush3.msra.mxu1 %v20711_v12  ;;  %17892 = vmatprep.subr.mxu0 %v25259_v25  ;;  %v1437_v12 = vand.u32 4294901760, %v1436_v54  ;;  %v20994_v29 = vsub.f32 %v1288_v37, %v20980_v1 }
 0x125   :  { %17935 = vmatprep.subr.mxu1 %v20727_v30  ;;  %17893 = vmatpush3.msra.mxu0 %v25259_v25  ;;  %v20991_v22 = vand.u32 4294901760, %v20978_v55  ;;  %v21022_v38 = vshrl.u32 %v1271_v19, 7 }
 0x126   :  { %17936 = vmatpush3.msra.mxu1 %v20727_v30  ;;  %17894 = vmatprep.subr.mxu0 %v25260_v31  ;;  %v20996_v30 = vand.u32 4294901760, %v1287_v10  ;;  %v21005_v7 = vand.u32 4294901760, %v20994_v29 }
 0x127   :  { %17938 = vmatmul.mubr.f32.vlgmr.msra.gmra.mxu1 %v20753_v50  ;;  %17895 = vmatpush3.msra.mxu0 %v25260_v31  ;;  %v1450_v58 = vsub.f32 %v20978_v55, %v20991_v22  ;;  %25264 = vst [vmem:[#allocation10_spill] sm:$0xff] %v21022_v38  ;;  %v21025_v52 = vadd.s32 4294967295, %v21022_v38  ;;  %vm1273_vm1 = vcmp.lt.s32.totalorder %v21022_v38, 1  ;;  %vm2470_vm3 = vcmp.lt.s32.totalorder %v21022_v38, 7 }
 0x128   :  { %17896 = vmatprep.subr.mxu0 %v25261_v32  ;;  %17959 = vmatprep.subr.mxu1 %v1416_v61  ;;  %v21008_v41 = vsub.f32 %v1287_v10, %v20996_v30  ;;  %v1457_v6 = vsub.f32 %v20994_v29, %v21005_v7 }
 0x129   :  { %17897 = vmatpush3.msra.mxu0 %v25261_v32  ;;  %17960 = vmatpush3.msra.mxu1 %v1416_v61  ;;  %v1451_v59 = vand.u32 4294901760, %v1450_v58  ;;  %25265 = vst [vmem:[#allocation11_spill] sm:$0xff] %v21025_v52  ;;  %vm1279_vm2 = vcmp.ge.s32.totalorder %v21025_v52, 0 }
 0x12a   :  { %17898 = vmatprep.subr.mxu0 %v25262_v35  ;;  %17961 = vmatprep.subr.mxu1 %v1423_v23  ;;  %v21015_v62 = vand.u32 4294901760, %v21008_v41  ;;  %v1458_v15 = vand.u32 4294901760, %v1457_v6 }
 0x12b   :  { %17899 = vmatpush3.msra.mxu0 %v25262_v35  ;;  %17962 = vmatpush3.msra.mxu1 %v1423_v23 }
 0x12c   :  { %17900 = vmatprep.subr.mxu0 %v25263_v36  ;;  %v1464_v8 = vsub.f32 %v21008_v41, %v21015_v62 }
 0x12d   :  { %17901 = vmatpush3.msra.mxu0 %v25263_v36 }
 0x12e   :  { %17903 = vmatmul.mubr.f32.vlgmr.msra.gmra.mxu0 %v20753_v50  ;;  %17940 = vmatprep.subr.mxu0 %v20903_v39  ;;  %v1430_v50 = vand.u32 4294901760, %v1429_v24  ;;  %v1465_v18 = vand.u32 4294901760, %v1464_v8 }
 0x12f   :  { %17941 = vmatpush3.msra.mxu0 %v20903_v39 }
 0x130   :  { %17942 = vmatprep.subr.mxu0 %v20911_v43  ;;  %17963 = vmatprep.subr.mxu1 %v1430_v50 }
 0x131   :  { %17943 = vmatpush3.msra.mxu0 %v20911_v43  ;;  %17964 = vmatpush3.msra.mxu1 %v1430_v50 }
 0x132   :  { %17944 = vmatprep.subr.mxu0 %v20924_v49  ;;  %17965 = vmatprep.subr.mxu1 %v1437_v12 }
 0x133   :  { %17945 = vmatpush3.msra.mxu0 %v20924_v49  ;;  %17966 = vmatpush3.msra.mxu1 %v1437_v12 }
 0x134   :  { %17946 = vmatprep.subr.mxu0 %v20939_v57  ;;  %17967 = vmatprep.subr.mxu1 %v1444_v45 }
 0x135   :  { %17947 = vmatpush3.msra.mxu0 %v20939_v57  ;;  %17968 = vmatpush3.msra.mxu1 %v1444_v45 }
 0x136   :  { %17948 = vmatprep.subr.mxu0 %v20955_v20  ;;  %17969 = vmatprep.subr.mxu1 %v1451_v59 }
 0x137   :  { %17949 = vmatpush3.msra.mxu0 %v20955_v20  ;;  %17970 = vmatpush3.msra.mxu1 %v1451_v59 }
 0x138   :  { %17950 = vmatprep.subr.mxu0 %v20966_v33  ;;  %17971 = vmatprep.subr.mxu1 %v1458_v15 }
 0x139   :  { %17951 = vmatpush3.msra.mxu0 %v20966_v33  ;;  %17972 = vmatpush3.msra.mxu1 %v1458_v15 }
 0x13a   :  { %17952 = vmatprep.subr.mxu0 %v20980_v1  ;;  %17973 = vmatprep.subr.mxu1 %v1465_v18 }
 0x13b   :  { %17953 = vmatpush3.msra.mxu0 %v20980_v1  ;;  %17974 = vmatpush3.msra.mxu1 %v1465_v18 }
 0x13c   :  { %17954 = vmatprep.subr.mxu0 %v20996_v30  ;;  %17997 = vmatprep.subr.mxu1 %v20903_v39 }
 0x13d   :  { %17955 = vmatpush3.msra.mxu0 %v20996_v30 }
 0x13e   :  { %17978 = vmatprep.subr.mxu0 %v20909_v42 }
 0x1a4   :  { %v17799_v11 = vpop.f32.mrf.mxu1 }
 0x1a6   :  { %v824_v9 = vpop.f32.mrf.mxu1 }
 0x1ac   :  { %v17764_v16 = vpop.f32.mrf.mxu0 }
 0x1ad   :  { %v831_v3 = vadd.f32 %v17799_v11, %v17764_v16 }
 0x1ae   :  { %v663_v14 = vpop.f32.mrf.mxu0 }
 0x1af   :  { %v825_v63 = vadd.f32 %v824_v9, %v663_v14 }
 0x1c5   :  { %v17869_v26 = vpop.f32.mrf.mxu1 }
 0x1c7   :  { %v1030_v31 = vpop.f32.mrf.mxu1 }
 0x1cd   :  { %v17834_v4 = vpop.f32.mrf.mxu0 }
 0x1ce   :  { %v942_v13 = vadd.f32 %v17834_v4, %v831_v3 }
 0x1cf   :  { %v934_v28 = vpop.f32.mrf.mxu0 }
 0x1d0   :  { %v935_v25 = vadd.f32 %v934_v28, %v825_v63  ;;  %v1039_v32 = vadd.f32 %v17869_v26, %v942_v13  ;;  %v16201_v26 = vld [vmem:[%s25127_s10 + $0x78] sm:$0xff]  ;;  %v16198_v63 = vld [vmem:[%s25127_s10 + $0x60] sm:$0xff] }
 0x1d1   :  { %v21127_v19 = vand.u32 4294901760, %v16198_v63 }
 0x1d2   :  { %v1031_v44 = vadd.f32 %v1030_v31, %v935_v25 }
 0x1e7   :  { %v17939_v35 = vpop.f32.mrf.mxu1 }
 0x1e9   :  { %v1250_v0 = vpop.f32.mrf.mxu1 }
 0x1ee   :  { %v17904_v36 = vpop.f32.mrf.mxu0 }
 0x1ef   :  { %v1164_v40 = vadd.f32 %v17904_v36, %v1039_v32  ;;  %v16195_v32 = vld [vmem:[%s25127_s10 + $0x48] sm:$0xff] }
 0x1f0   :  { %v1157_v51 = vpop.f32.mrf.mxu0 }
 0x1f1   :  { %v21027_v60 = vadd.f32 %v17939_v35, %v1164_v40  ;;  %v1158_v61 = vadd.f32 %v1157_v51, %v1031_v44  ;;  %v21180_v51 = vand.u32 4294901760, %v16195_v32 }
 0x1f3   :  { %v21029_v21 = vadd.f32 %v1250_v0, %v1158_v61  ;;  %v1270_v23 = vrot.slane %v21027_v60, 7  ;;  %v2469_v24 = vrot.slane %v21027_v60, 1 }
 0x1f5   :  { %v1269_v37 = vrot.slane %v21029_v21, 7  ;;  %v2468_v50 = vrot.slane %v21029_v21, 1 }
 0x1f7   :  { %v1275_v54 = vsel %vm1273_vm1, %v1270_v23, %v1269_v37  ;;  %v1274_v10 = vsel %vm1273_vm1, %v1269_v37, %v1270_v23  ;;  %v21044_v12 = vsel %vm2470_vm3, %v2468_v50, %v2469_v24  ;;  %v21048_v46 = vsel %vm2470_vm3, %v2469_v24, %v2468_v50 }
 0x1f8   :  { %v1285_v58 = vsel %vm1279_vm2, %v1275_v54, 0.0  ;;  %v1300_v45 = vsel %vm1295_vm4, %v1274_v10, 0 }
 0x1f9   :  { %v1297_v59 = vsel %vm1295_vm4, %v1285_v58, 0  ;;  %v21054_v6 = vand.u32 4294901760, %v1300_v45 }
 0x1fa   :  { %v21056_v15 = vand.u32 4294901760, %v1297_v59 }
 0x1fb   :  { %v21059_v8 = vsub.f32 %v1300_v45, %v21054_v6 }
 0x1fc   :  { %17975 = vmatprep.mubr.f32.mxu1 %v21056_v15  ;;  %v1376_v18 = vsub.f32 %v1297_v59, %v21056_v15 }
 0x1fd   :  { %17976 = vmatmul.mubr.f32.vlgmr.msra.gmra.mxu1 %v21054_v6  ;;  %v1387_v16 = vand.u32 4294901760, %v21059_v8 }
 0x1fe   :  { %17998 = vmatpush3.msra.mxu1 %v20903_v39  ;;  %v1377_v11 = vand.u32 4294901760, %v1376_v18 }
 0x1ff   :  { %17999 = vmatprep.subr.mxu1 %v20911_v43  ;;  %v1388_v14 = vsub.f32 %v21059_v8, %v1387_v16 }
 0x200   :  { %18000 = vmatpush3.msra.mxu1 %v20911_v43  ;;  %18013 = vmatprep.mubr.f32.mxu1 %v1377_v11  ;;  %v1378_v4 = vsub.f32 %v1376_v18, %v1377_v11 }
 0x201   :  { %18001 = vmatprep.subr.mxu1 %v20924_v49  ;;  %v1389_v3 = vand.u32 4294901760, %v1388_v14 }
 0x202   :  { %18002 = vmatpush3.msra.mxu1 %v20924_v49  ;;  %v1379_v9 = vand.u32 4294901760, %v1378_v4 }
 0x203   :  { %18003 = vmatprep.subr.mxu1 %v20939_v57 }
 0x204   :  { %18004 = vmatpush3.msra.mxu1 %v20939_v57  ;;  %17956 = vmatprep.mubr.f32.mxu0 %v1379_v9 }
 0x205   :  { %18005 = vmatprep.subr.mxu1 %v20955_v20  ;;  %17957 = vmatmul.mubr.f32.vlgmr.msra.gmra.mxu0 %v1389_v3 }
 0x206   :  { %17979 = vmatpush3.msra.mxu0 %v20909_v42  ;;  %18006 = vmatpush3.msra.mxu1 %v20955_v20  ;;  %v21090_v42 = vand.u32 4294901760, %v16201_v26 }
 0x207   :  { %17980 = vmatprep.subr.mxu0 %v20922_v48  ;;  %17994 = vmatprep.mubr.f32.mxu0 %v1376_v18 }
 0x208   :  { %18007 = vmatprep.subr.mxu1 %v20966_v33  ;;  %17981 = vmatpush3.msra.mxu0 %v20922_v48  ;;  %v16200_v48 = vld [vmem:[%s25127_s10 + $0x70] sm:$0xff]  ;;  %v21108_v28 = vsub.f32 %v16201_v26, %v21090_v42  ;;  %v16209_v26 = vld [vmem:[%s25127_s10 + $0xb8] sm:$0xff] }
 0x209   :  { %18008 = vmatpush3.msra.mxu1 %v20966_v33  ;;  %17982 = vmatprep.subr.mxu0 %v20937_v56 }
 0x20a   :  { %18009 = vmatprep.subr.mxu1 %v20980_v1  ;;  %17983 = vmatpush3.msra.mxu0 %v20937_v56  ;;  %v16199_v56 = vld [vmem:[%s25127_s10 + $0x68] sm:$0xff] }
 0x20b   :  { %18010 = vmatpush3.msra.mxu1 %v20980_v1  ;;  %17984 = vmatprep.subr.mxu0 %v20952_v17 }
 0x20c   :  { %18011 = vmatprep.subr.mxu1 %v20996_v30  ;;  %17985 = vmatpush3.msra.mxu0 %v20952_v17  ;;  %v21103_v17 = vand.u32 4294901760, %v16200_v48 }
 0x20d   :  { %18012 = vmatpush3.msra.mxu1 %v20996_v30  ;;  %17986 = vmatprep.subr.mxu0 %v20969_v34 }
 0x20e   :  { %18014 = vmatmul.mubr.f32.vlgmr.msra.gmra.mxu1 %v1387_v16  ;;  %18035 = vmatprep.subr.mxu1 %v20903_v39  ;;  %v21125_v13 = vsub.f32 %v16200_v48, %v21103_v17  ;;  %v21300_v48 = vand.u32 4294901760, %v16209_v26 }
 0x20f   :  { %17987 = vmatpush3.msra.mxu0 %v20969_v34  ;;  %18036 = vmatpush3.msra.mxu1 %v20903_v39  ;;  %v21115_v34 = vand.u32 4294901760, %v16199_v56  ;;  %v16197_v39 = vld [vmem:[%s25127_s10 + $0x58] sm:$0xff] }
 0x210   :  { %18051 = vmatprep.mubr.f32.mxu1 %v21056_v15  ;;  %17988 = vmatprep.subr.mxu0 %v20978_v55  ;;  %v21141_v25 = vand.u32 4294901760, %v16197_v39  ;;  %v21151_v31 = vand.u32 4294901760, %v21125_v13 }
 0x211   :  { %18037 = vmatprep.subr.mxu1 %v20911_v43  ;;  %17989 = vmatpush3.msra.mxu0 %v20978_v55  ;;  %v1883_v55 = vsel %vm1295_vm4, %v21029_v21, 0 }
 0x212   :  { %18038 = vmatpush3.msra.mxu1 %v20911_v43  ;;  %17990 = vmatprep.subr.mxu0 %v20994_v29  ;;  %v21132_v43 = vand.u32 4294901760, %v21108_v28  ;;  %v21163_v35 = vand.u32 4294901760, %v1883_v55  ;;  %v21173_v44 = vsub.f32 %v16197_v39, %v21141_v25  ;;  %v21318_v39 = vsub.f32 %v16209_v26, %v21300_v48 }
 0x213   :  { %18039 = vmatprep.subr.mxu1 %v20924_v49  ;;  %17991 = vmatpush3.msra.mxu0 %v20994_v29  ;;  %v21139_v29 = vsub.f32 %v16199_v56, %v21115_v34  ;;  %v16208_v56 = vld [vmem:[%s25127_s10 + $0xb0] sm:$0xff] }
 0x214   :  { %18040 = vmatpush3.msra.mxu1 %v20924_v49  ;;  %17992 = vmatprep.subr.mxu0 %v21008_v41  ;;  %v16196_v49 = vld [vmem:[%s25127_s10 + $0x50] sm:$0xff]  ;;  %v21192_v21 = vsub.f32 %v1883_v55, %v21163_v35  ;;  %v21204_v24 = vand.u32 4294901760, %v21173_v44 }
 0x215   :  { %18041 = vmatprep.subr.mxu1 %v20939_v57  ;;  %17993 = vmatpush3.msra.mxu0 %v21008_v41  ;;  %v21154_v41 = vsub.f32 %v16198_v63, %v21127_v19  ;;  %v21165_v36 = vand.u32 4294901760, %v16196_v49  ;;  %v21170_v40 = vand.u32 4294901760, %v21139_v29  ;;  %v21313_v63 = vand.u32 4294901760, %v16208_v56 }
 0x216   :  { %18042 = vmatpush3.msra.mxu1 %v20939_v57  ;;  %17995 = vmatmul.mubr.f32.vlgmr.msra.gmra.mxu0 %v21059_v8  ;;  %v2001_v57 = vsub.f32 %v21108_v28, %v21132_v43  ;;  %v1963_v50 = vand.u32 4294901760, %v21192_v21  ;;  %v2029_v10 = vsub.f32 %v21173_v44, %v21204_v24  ;;  %v1886_v8 = vsel %vm1295_vm4, %v21027_v60, 0 }
 0x217   :  { %18016 = vmatprep.subr.mxu0 %v20919_v47  ;;  %18043 = vmatprep.subr.mxu1 %v20955_v20  ;;  %v21187_v61 = vand.u32 4294901760, %v21154_v41  ;;  %v2015_v23 = vsub.f32 %v21139_v29, %v21170_v40  ;;  %v21249_v14 = vand.u32 4294901760, %v1886_v8 }
 0x218   :  { %18017 = vmatpush3.msra.mxu0 %v20919_v47  ;;  %18032 = vmatprep.mubr.f32.mxu0 %v21056_v15  ;;  %v16194_v47 = vld [vmem:[%s25127_s10 + $0x40] sm:$0xff]  ;;  %v2002_v0 = vand.u32 4294901760, %v2001_v57  ;;  %v2030_v18 = vand.u32 4294901760, %v2029_v10 }
 0x219   :  { %18044 = vmatpush3.msra.mxu1 %v20955_v20  ;;  %18018 = vmatprep.subr.mxu0 %v20934_v53  ;;  %v2008_v20 = vsub.f32 %v21125_v13, %v21151_v31  ;;  %v2022_v37 = vsub.f32 %v21154_v41, %v21187_v61 }
 0x21a   :  { %18045 = vmatprep.subr.mxu1 %v20966_v33  ;;  %18019 = vmatpush3.msra.mxu0 %v20934_v53  ;;  %v21195_v53 = vsub.f32 %v16196_v49, %v21165_v36 }
 0x21b   :  { %18046 = vmatpush3.msra.mxu1 %v20966_v33  ;;  %18020 = vmatprep.subr.mxu0 %v20949_v5  ;;  %v21197_v33 = vand.u32 4294901760, %v16194_v47  ;;  %v2023_v45 = vand.u32 4294901760, %v2022_v37 }
 0x21c   :  { %18047 = vmatprep.subr.mxu1 %v20980_v1  ;;  %18021 = vmatpush3.msra.mxu0 %v20949_v5  ;;  %v21209_v5 = vsub.f32 %v16195_v32, %v21180_v51  ;;  %v21218_v54 = vand.u32 4294901760, %v21195_v53 }
 0x21d   :  { %18048 = vmatpush3.msra.mxu1 %v20980_v1  ;;  %18022 = vmatprep.subr.mxu0 %v20964_v27  ;;  %v2009_v1 = vand.u32 4294901760, %v2008_v20  ;;  %v1276_v20 = vadd.s32 8, %v21022_v38 }
 0x21e   :  { %18049 = vmatprep.subr.mxu1 %v20996_v30  ;;  %18023 = vmatpush3.msra.mxu0 %v20964_v27  ;;  %v21221_v27 = vsub.f32 %v16194_v47, %v21197_v33  ;;  %v21229_v58 = vand.u32 4294901760, %v21209_v5  ;;  %v2036_v59 = vsub.f32 %v21195_v53, %v21218_v54  ;;  %v16203_v47 = vld [vmem:[%s25127_s10 + $0x88] sm:$0xff] }
 0x21f   :  { %18050 = vmatpush3.msra.mxu1 %v20996_v30  ;;  %18024 = vmatprep.subr.mxu0 %v20984_v2  ;;  %v2016_v30 = vand.u32 4294901760, %v2015_v23 }
 0x220   :  { %18052 = vmatmul.mubr.f32.vlgmr.msra.gmra.mxu1 %v21054_v6  ;;  %18073 = vmatprep.subr.mxu1 %v2002_v0  ;;  %v21237_v15 = vand.u32 4294901760, %v21221_v27  ;;  %v2037_v11 = vand.u32 4294901760, %v2036_v59 }
 0x221   :  { %18025 = vmatpush3.msra.mxu0 %v20984_v2  ;;  %18074 = vmatpush3.msra.mxu1 %v2002_v0  ;;  %v1964_v2 = vsub.f32 %v21192_v21, %v1963_v50 }
 0x222   :  { %18089 = vmatprep.mubr.f32.mxu1 %v21163_v35  ;;  %18026 = vmatprep.subr.mxu0 %v20991_v22  ;;  %v2050_v60 = vsub.f32 %v21221_v27, %v21237_v15 }
 0x223   :  { %18075 = vmatprep.subr.mxu1 %v2009_v1  ;;  %18027 = vmatpush3.msra.mxu0 %v20991_v22  ;;  %v2043_v22 = vsub.f32 %v21209_v5, %v21229_v58  ;;  %v1965_v16 = vand.u32 4294901760, %v1964_v2 }
 0x224   :  { %18076 = vmatpush3.msra.mxu1 %v2009_v1  ;;  %18028 = vmatprep.subr.mxu0 %v21005_v7  ;;  %v21400_v1 = vadd.s32 1, %v1276_v20 }
 0x225   :  { %18077 = vmatprep.subr.mxu1 %v2016_v30  ;;  %18029 = vmatpush3.msra.mxu0 %v21005_v7  ;;  %v2044_v7 = vand.u32 4294901760, %v2043_v22 }
 0x226   :  { %18078 = vmatpush3.msra.mxu1 %v2016_v30  ;;  %18030 = vmatprep.subr.mxu0 %v21015_v62  ;;  %25266 = vst [vmem:[#allocation12_spill] sm:$0xff] %v21400_v1  ;;  %vm2478_vm5 = vcmp.lt.s32.totalorder %v21400_v1, 16 }
 0x227   :  { %18079 = vmatprep.subr.mxu1 %v2023_v45  ;;  %18031 = vmatpush3.msra.mxu0 %v21015_v62  ;;  %v2051_v62 = vand.u32 4294901760, %v2050_v60 }
 0x228   :  { %18080 = vmatpush3.msra.mxu1 %v2023_v45  ;;  %18033 = vmatmul.mubr.f32.vlgmr.msra.gmra.mxu0 %v21054_v6  ;;  %v21256_v6 = vsub.f32 %v1886_v8, %v21249_v14 }
 0x229   :  { %18054 = vmatprep.subr.mxu0 %v21090_v42  ;;  %18081 = vmatprep.subr.mxu1 %v2030_v18 }
 0x22a   :  { %18055 = vmatpush3.msra.mxu0 %v21090_v42  ;;  %18070 = vmatprep.mubr.f32.mxu0 %v1965_v16  ;;  %v1973_v4 = vand.u32 4294901760, %v21256_v6 }
 0x22b   :  { %18082 = vmatpush3.msra.mxu1 %v2030_v18  ;;  %18056 = vmatprep.subr.mxu0 %v21103_v17  ;;  %v2482_v18 = vsel %vm2478_vm5, %v21048_v46, 0.0 }
 0x22c   :  { %18083 = vmatprep.subr.mxu1 %v2037_v11  ;;  %18057 = vmatpush3.msra.mxu0 %v21103_v17  ;;  %v1974_v9 = vsub.f32 %v21256_v6, %v1973_v4  ;;  %v2496_v46 = vsel %vm1295_vm4, %v2482_v18, 0  ;;  %v16211_v18 = vld [vmem:[%s25125_s1 + $0x38] sm:$0xff] }
 0x22d   :  { %18084 = vmatpush3.msra.mxu1 %v2037_v11  ;;  %18058 = vmatprep.subr.mxu0 %v21115_v34 }
 0x22e   :  { %18085 = vmatprep.subr.mxu1 %v2044_v7  ;;  %18059 = vmatpush3.msra.mxu0 %v21115_v34  ;;  %v1975_v3 = vand.u32 4294901760, %v1974_v9 }
 0x22f   :  { %18086 = vmatpush3.msra.mxu1 %v2044_v7  ;;  %18060 = vmatprep.subr.mxu0 %v21127_v19 }
 0x230   :  { %18087 = vmatprep.subr.mxu1 %v2051_v62  ;;  %18061 = vmatpush3.msra.mxu0 %v21127_v19 }
 0x231   :  { %18088 = vmatpush3.msra.mxu1 %v2051_v62  ;;  %18062 = vmatprep.subr.mxu0 %v21141_v25 }
 0x232   :  { %18090 = vmatmul.mubr.f32.vlgmr.msra.gmra.mxu1 %v21249_v14  ;;  %18111 = vmatprep.subr.mxu1 %v21090_v42 }
 0x233   :  { %18063 = vmatpush3.msra.mxu0 %v21141_v25  ;;  %18112 = vmatpush3.msra.mxu1 %v21090_v42 }
 0x234   :  { %18127 = vmatprep.mubr.f32.mxu1 %v1963_v50  ;;  %18064 = vmatprep.subr.mxu0 %v21165_v36 }
 0x235   :  { %18113 = vmatprep.subr.mxu1 %v21103_v17  ;;  %18065 = vmatpush3.msra.mxu0 %v21165_v36 }
 0x236   :  { %18114 = vmatpush3.msra.mxu1 %v21103_v17  ;;  %18066 = vmatprep.subr.mxu0 %v21180_v51 }
 0x237   :  { %18115 = vmatprep.subr.mxu1 %v21115_v34  ;;  %18067 = vmatpush3.msra.mxu0 %v21180_v51 }
 0x238   :  { %18116 = vmatpush3.msra.mxu1 %v21115_v34  ;;  %18068 = vmatprep.subr.mxu0 %v21197_v33 }
 0x239   :  { %18117 = vmatprep.subr.mxu1 %v21127_v19  ;;  %18069 = vmatpush3.msra.mxu0 %v21197_v33 }
 0x23a   :  { %18118 = vmatpush3.msra.mxu1 %v21127_v19  ;;  %18071 = vmatmul.mubr.f32.vlgmr.msra.gmra.mxu0 %v1975_v3 }
 0x23b   :  { %18092 = vmatprep.subr.mxu0 %v21108_v28  ;;  %18119 = vmatprep.subr.mxu1 %v21141_v25 }
 0x23c   :  { %18093 = vmatpush3.msra.mxu0 %v21108_v28  ;;  %18108 = vmatprep.mubr.f32.mxu0 %v21192_v21  ;;  %v16207_v28 = vld [vmem:[%s25127_s10 + $0xa8] sm:$0xff] }
 0x23d   :  { %18120 = vmatpush3.msra.mxu1 %v21141_v25  ;;  %18094 = vmatprep.subr.mxu0 %v21125_v13  ;;  %v21325_v55 = vand.u32 4294901760, %v16207_v28 }
 0x23e   :  { %18121 = vmatprep.subr.mxu1 %v21165_v36  ;;  %18095 = vmatpush3.msra.mxu0 %v21125_v13  ;;  %v16206_v13 = vld [vmem:[%s25127_s10 + $0xa0] sm:$0xff] }
 0x23f   :  { %18122 = vmatpush3.msra.mxu1 %v21165_v36  ;;  %18096 = vmatprep.subr.mxu0 %v21139_v29  ;;  %v21337_v49 = vand.u32 4294901760, %v16206_v13  ;;  %v21349_v32 = vsub.f32 %v16207_v28, %v21325_v55 }
 0x240   :  { %18123 = vmatprep.subr.mxu1 %v21180_v51  ;;  %18097 = vmatpush3.msra.mxu0 %v21139_v29  ;;  %v21335_v29 = vsub.f32 %v16208_v56, %v21313_v63 }
 0x241   :  { %18124 = vmatpush3.msra.mxu1 %v21180_v51  ;;  %18098 = vmatprep.subr.mxu0 %v21154_v41 }
 0x242   :  { %18125 = vmatprep.subr.mxu1 %v21197_v33  ;;  %18099 = vmatpush3.msra.mxu0 %v21154_v41  ;;  %v2493_v41 = vsel %vm1295_vm4, %v21044_v12, 0  ;;  %v21364_v12 = vsub.f32 %v16206_v13, %v21337_v49 }
 0x243   :  { %18126 = vmatpush3.msra.mxu1 %v21197_v33  ;;  %18100 = vmatprep.subr.mxu0 %v21173_v44  ;;  %v21374_v0 = vand.u32 4294901760, %v2493_v41 }
 0x244   :  { %18128 = vmatmul.mubr.f32.vlgmr.msra.gmra.mxu1 %v1973_v4  ;;  %18149 = vmatprep.subr.mxu1 %v21090_v42 }
 0x245   :  { %18101 = vmatpush3.msra.mxu0 %v21173_v44  ;;  %18150 = vmatpush3.msra.mxu1 %v21090_v42  ;;  %v16205_v42 = vld [vmem:[%s25127_s10 + $0x98] sm:$0xff]  ;;  %v21361_v44 = vand.u32 4294901760, %v21335_v29 }
 0x246   :  { %18165 = vmatprep.mubr.f32.mxu1 %v21163_v35  ;;  %18102 = vmatprep.subr.mxu0 %v21195_v53  ;;  %v21351_v57 = vand.u32 4294901760, %v16205_v42 }
 0x247   :  { %18151 = vmatprep.subr.mxu1 %v21103_v17  ;;  %18103 = vmatpush3.msra.mxu0 %v21195_v53  ;;  %v21381_v53 = vand.u32 4294901760, %v21349_v32 }
 0x248   :  { %18152 = vmatpush3.msra.mxu1 %v21103_v17  ;;  %18104 = vmatprep.subr.mxu0 %v21209_v5  ;;  %v21342_v17 = vand.u32 4294901760, %v21318_v39  ;;  %v21384_v23 = vsub.f32 %v16205_v42, %v21351_v57 }
 0x249   :  { %18153 = vmatprep.subr.mxu1 %v21115_v34  ;;  %18105 = vmatpush3.msra.mxu0 %v21209_v5  ;;  %v21398_v5 = vand.u32 4294901760, %v21364_v12 }
 0x24a   :  { %18154 = vmatpush3.msra.mxu1 %v21115_v34  ;;  %18106 = vmatprep.subr.mxu0 %v21221_v27  ;;  %v16204_v34 = vld [vmem:[%s25127_s10 + $0x90] sm:$0xff]  ;;  %v21417_v30 = vand.u32 4294901760, %v21384_v23 }
 0x24b   :  { %18155 = vmatprep.subr.mxu1 %v21127_v19  ;;  %18107 = vmatpush3.msra.mxu0 %v21221_v27  ;;  %v21376_v21 = vand.u32 4294901760, %v16204_v34  ;;  %v2625_v27 = vsub.f32 %v21349_v32, %v21381_v53  ;;  %v2632_v10 = vsub.f32 %v21364_v12, %v21398_v5 }
 0x24c   :  { %18156 = vmatpush3.msra.mxu1 %v21127_v19  ;;  %18109 = vmatmul.mubr.f32.vlgmr.msra.gmra.mxu0 %v21256_v6  ;;  %v2611_v19 = vsub.f32 %v21318_v39, %v21342_v17  ;;  %v2639_v59 = vsub.f32 %v21384_v23, %v21417_v30  ;;  %v21465_v6 = vand.u32 4294901760, %v2496_v46 }
 0x24d   :  { %18130 = vmatprep.subr.mxu0 %v21132_v43  ;;  %18157 = vmatprep.subr.mxu1 %v21141_v25 }
 0x24e   :  { %18131 = vmatpush3.msra.mxu0 %v21132_v43  ;;  %18146 = vmatprep.mubr.f32.mxu0 %v21163_v35  ;;  %v16202_v43 = vld [vmem:[%s25127_s10 + $0x80] sm:$0xff]  ;;  %v21391_v35 = vand.u32 4294901760, %v16203_v47  ;;  %v2612_v37 = vand.u32 4294901760, %v2611_v19  ;;  %v2640_v60 = vand.u32 4294901760, %v2639_v59 }
 0x24f   :  { %18158 = vmatpush3.msra.mxu1 %v21141_v25  ;;  %18132 = vmatprep.subr.mxu0 %v21151_v31  ;;  %v2618_v25 = vsub.f32 %v21335_v29, %v21361_v44  ;;  %v21410_v50 = vand.u32 4294901760, %v16202_v43 }
 0x250   :  { %18159 = vmatprep.subr.mxu1 %v21165_v36  ;;  %18133 = vmatpush3.msra.mxu0 %v21151_v31  ;;  %v21405_v31 = vsub.f32 %v2493_v41, %v21374_v0 }
 0x251   :  { %18160 = vmatpush3.msra.mxu1 %v21165_v36  ;;  %18134 = vmatprep.subr.mxu0 %v21170_v40  ;;  %v21408_v36 = vsub.f32 %v16204_v34, %v21376_v21  ;;  %v21435_v2 = vsub.f32 %v16202_v43, %v21410_v50 }
 0x252   :  { %18161 = vmatprep.subr.mxu1 %v21180_v51  ;;  %18135 = vmatpush3.msra.mxu0 %v21170_v40  ;;  %v21422_v40 = vsub.f32 %v16203_v47, %v21391_v35  ;;  %v2573_v45 = vand.u32 4294901760, %v21405_v31 }
 0x253   :  { %18162 = vmatpush3.msra.mxu1 %v21180_v51  ;;  %18136 = vmatprep.subr.mxu0 %v21187_v61  ;;  %v2619_v51 = vand.u32 4294901760, %v2618_v25  ;;  %v21454_v11 = vand.u32 4294901760, %v21435_v2 }
 0x254   :  { %18163 = vmatprep.subr.mxu1 %v21197_v33  ;;  %18137 = vmatpush3.msra.mxu0 %v21187_v61  ;;  %v21432_v61 = vand.u32 4294901760, %v21408_v36  ;;  %v21443_v8 = vand.u32 4294901760, %v21422_v40  ;;  %v2574_v22 = vsub.f32 %v21405_v31, %v2573_v45 }
 0x255   :  { %18164 = vmatpush3.msra.mxu1 %v21197_v33  ;;  %18138 = vmatprep.subr.mxu0 %v21204_v24  ;;  %v2626_v33 = vand.u32 4294901760, %v2625_v27 }
 0x256   :  { %18166 = vmatmul.mubr.f32.vlgmr.msra.gmra.mxu1 %v21249_v14  ;;  %18187 = vmatprep.subr.mxu1 %v2612_v37  ;;  %v2646_v16 = vsub.f32 %v21408_v36, %v21432_v61  ;;  %v2575_v7 = vand.u32 4294901760, %v2574_v22 }
 0x257   :  { %18139 = vmatpush3.msra.mxu0 %v21204_v24  ;;  %18188 = vmatpush3.msra.mxu1 %v2612_v37  ;;  %v2633_v24 = vand.u32 4294901760, %v2632_v10 }
 0x258   :  { %18203 = vmatprep.mubr.f32.mxu1 %v21374_v0  ;;  %18140 = vmatprep.subr.mxu0 %v21218_v54  ;;  %v2647_v62 = vand.u32 4294901760, %v2646_v16 }
 0x259   :  { %18189 = vmatprep.subr.mxu1 %v2619_v51  ;;  %18141 = vmatpush3.msra.mxu0 %v21218_v54  ;;  %v2653_v54 = vsub.f32 %v21422_v40, %v21443_v8 }
 0x25a   :  { %18190 = vmatpush3.msra.mxu1 %v2619_v51  ;;  %18142 = vmatprep.subr.mxu0 %v21229_v58 }
 0x25b   :  { %18191 = vmatprep.subr.mxu1 %v2626_v33  ;;  %18143 = vmatpush3.msra.mxu0 %v21229_v58  ;;  %v2660_v58 = vsub.f32 %v21435_v2, %v21454_v11  ;;  %v2654_v4 = vand.u32 4294901760, %v2653_v54 }
 0x25c   :  { %18192 = vmatpush3.msra.mxu1 %v2626_v33  ;;  %18144 = vmatprep.subr.mxu0 %v21237_v15 }
 0x25d   :  { %18193 = vmatprep.subr.mxu1 %v2633_v24  ;;  %18145 = vmatpush3.msra.mxu0 %v21237_v15  ;;  %v2661_v15 = vand.u32 4294901760, %v2660_v58 }
 0x25e   :  { %18194 = vmatpush3.msra.mxu1 %v2633_v24  ;;  %18147 = vmatmul.mubr.f32.vlgmr.msra.gmra.mxu0 %v21249_v14  ;;  %v21472_v14 = vsub.f32 %v2496_v46, %v21465_v6 }
 0x25f   :  { %18168 = vmatprep.subr.mxu0 %v21300_v48  ;;  %18195 = vmatprep.subr.mxu1 %v2640_v60 }
 0x260   :  { %18169 = vmatpush3.msra.mxu0 %v21300_v48  ;;  %18184 = vmatprep.mubr.f32.mxu0 %v2575_v7  ;;  %v2583_v9 = vand.u32 4294901760, %v21472_v14 }
 0x261   :  { %18196 = vmatpush3.msra.mxu1 %v2640_v60  ;;  %18170 = vmatprep.subr.mxu0 %v21313_v63  ;;  %v3087_v60 = vsel %vm51_vm0, %v16211_v18, 0 }
 0x262   :  { %18197 = vmatprep.subr.mxu1 %v2647_v62  ;;  %18171 = vmatpush3.msra.mxu0 %v21313_v63  ;;  %v2584_v3 = vsub.f32 %v21472_v14, %v2583_v9 }
 0x263   :  { %18198 = vmatpush3.msra.mxu1 %v2647_v62  ;;  %18172 = vmatprep.subr.mxu0 %v21325_v55 }
 0x264   :  { %18199 = vmatprep.subr.mxu1 %v2654_v4  ;;  %18173 = vmatpush3.msra.mxu0 %v21325_v55  ;;  %v2585_v26 = vand.u32 4294901760, %v2584_v3 }
 0x265   :  { %18200 = vmatpush3.msra.mxu1 %v2654_v4  ;;  %18174 = vmatprep.subr.mxu0 %v21337_v49 }
 0x266   :  { %18201 = vmatprep.subr.mxu1 %v2661_v15  ;;  %18175 = vmatpush3.msra.mxu0 %v21337_v49 }
 0x267   :  { %18202 = vmatpush3.msra.mxu1 %v2661_v15  ;;  %18176 = vmatprep.subr.mxu0 %v21351_v57 }
 0x268   :  { %18204 = vmatmul.mubr.f32.vlgmr.msra.gmra.mxu1 %v21465_v6  ;;  %18225 = vmatprep.subr.mxu1 %v21300_v48 }
 0x269   :  { %18177 = vmatpush3.msra.mxu0 %v21351_v57  ;;  %18226 = vmatpush3.msra.mxu1 %v21300_v48 }
 0x26a   :  { %18241 = vmatprep.mubr.f32.mxu1 %v2573_v45  ;;  %18178 = vmatprep.subr.mxu0 %v21376_v21 }
 0x26b   :  { %18227 = vmatprep.subr.mxu1 %v21313_v63  ;;  %18179 = vmatpush3.msra.mxu0 %v21376_v21 }
 0x26c   :  { %18228 = vmatpush3.msra.mxu1 %v21313_v63  ;;  %18180 = vmatprep.subr.mxu0 %v21391_v35 }
 0x26d   :  { %18229 = vmatprep.subr.mxu1 %v21325_v55  ;;  %18181 = vmatpush3.msra.mxu0 %v21391_v35 }
 0x26e   :  { %18230 = vmatpush3.msra.mxu1 %v21325_v55  ;;  %18182 = vmatprep.subr.mxu0 %v21410_v50 }
 0x26f   :  { %18231 = vmatprep.subr.mxu1 %v21337_v49  ;;  %18183 = vmatpush3.msra.mxu0 %v21410_v50 }
 0x270   :  { %18232 = vmatpush3.msra.mxu1 %v21337_v49  ;;  %18185 = vmatmul.mubr.f32.vlgmr.msra.gmra.mxu0 %v2585_v26 }
 0x271   :  { %18206 = vmatprep.subr.mxu0 %v21318_v39  ;;  %18233 = vmatprep.subr.mxu1 %v21351_v57 }
 0x272   :  { %18207 = vmatpush3.msra.mxu0 %v21318_v39  ;;  %18222 = vmatprep.mubr.f32.mxu0 %v21405_v31 }
 0x273   :  { %18234 = vmatpush3.msra.mxu1 %v21351_v57  ;;  %18208 = vmatprep.subr.mxu0 %v21335_v29 }
 0x274   :  { %18235 = vmatprep.subr.mxu1 %v21376_v21  ;;  %18209 = vmatpush3.msra.mxu0 %v21335_v29 }
 0x275   :  { %18236 = vmatpush3.msra.mxu1 %v21376_v21  ;;  %18210 = vmatprep.subr.mxu0 %v21349_v32 }
 0x276   :  { %18237 = vmatprep.subr.mxu1 %v21391_v35  ;;  %18211 = vmatpush3.msra.mxu0 %v21349_v32 }
 0x277   :  { %18238 = vmatpush3.msra.mxu1 %v21391_v35  ;;  %18212 = vmatprep.subr.mxu0 %v21364_v12 }
 0x278   :  { %18239 = vmatprep.subr.mxu1 %v21410_v50  ;;  %18213 = vmatpush3.msra.mxu0 %v21364_v12 }
 0x279   :  { %18240 = vmatpush3.msra.mxu1 %v21410_v50  ;;  %18214 = vmatprep.subr.mxu0 %v21384_v23 }
 0x27a   :  { %18242 = vmatmul.mubr.f32.vlgmr.msra.gmra.mxu1 %v2583_v9  ;;  %18263 = vmatprep.subr.mxu1 %v21300_v48 }
 0x27b   :  { %18215 = vmatpush3.msra.mxu0 %v21384_v23  ;;  %18264 = vmatpush3.msra.mxu1 %v21300_v48  ;;  %v16210_v48 = vld [vmem:[%s25125_s1 + $0x30] sm:$0xff] }
 0x27c   :  { %18279 = vmatprep.mubr.f32.mxu1 %v21374_v0  ;;  %18216 = vmatprep.subr.mxu0 %v21408_v36  ;;  %v3084_v56 = vsel %vm51_vm0, %v16210_v48, 0 }
 0x27d   :  { %18265 = vmatprep.subr.mxu1 %v21313_v63  ;;  %18217 = vmatpush3.msra.mxu0 %v21408_v36  ;;  %v21563_v28 = vand.u32 4294901760, %v3084_v56 }
 0x27e   :  { %18266 = vmatpush3.msra.mxu1 %v21313_v63  ;;  %18218 = vmatprep.subr.mxu0 %v21422_v40 }
 0x27f   :  { %18267 = vmatprep.subr.mxu1 %v21325_v55  ;;  %18219 = vmatpush3.msra.mxu0 %v21422_v40  ;;  %v21566_v63 = vsub.f32 %v3084_v56, %v21563_v28 }
 0x280   :  { %18268 = vmatpush3.msra.mxu1 %v21325_v55  ;;  %18220 = vmatprep.subr.mxu0 %v21435_v2 }
 0x281   :  { %18269 = vmatprep.subr.mxu1 %v21337_v49  ;;  %18221 = vmatpush3.msra.mxu0 %v21435_v2  ;;  %v3158_v39 = vand.u32 4294901760, %v21566_v63 }
 0x282   :  { %18270 = vmatpush3.msra.mxu1 %v21337_v49  ;;  %18223 = vmatmul.mubr.f32.vlgmr.msra.gmra.mxu0 %v21472_v14 }
 0x283   :  { %18244 = vmatprep.subr.mxu0 %v21342_v17  ;;  %18271 = vmatprep.subr.mxu1 %v21351_v57  ;;  %v3159_v13 = vsub.f32 %v21566_v63, %v3158_v39 }
 0x284   :  { %18245 = vmatpush3.msra.mxu0 %v21342_v17  ;;  %18260 = vmatprep.mubr.f32.mxu0 %v21374_v0 }
 0x285   :  { %18272 = vmatpush3.msra.mxu1 %v21351_v57  ;;  %18246 = vmatprep.subr.mxu0 %v21361_v44  ;;  %v3160_v55 = vand.u32 4294901760, %v3159_v13 }
 0x286   :  { %18273 = vmatprep.subr.mxu1 %v21376_v21  ;;  %18247 = vmatpush3.msra.mxu0 %v21361_v44 }
 0x287   :  { %18274 = vmatpush3.msra.mxu1 %v21376_v21  ;;  %18248 = vmatprep.subr.mxu0 %v21381_v53 }
 0x288   :  { %18275 = vmatprep.subr.mxu1 %v21391_v35  ;;  %18249 = vmatpush3.msra.mxu0 %v21381_v53 }
 0x289   :  { %18276 = vmatpush3.msra.mxu1 %v21391_v35  ;;  %18250 = vmatprep.subr.mxu0 %v21398_v5 }
 0x28a   :  { %18277 = vmatprep.subr.mxu1 %v21410_v50  ;;  %18251 = vmatpush3.msra.mxu0 %v21398_v5 }
 0x28b   :  { %18278 = vmatpush3.msra.mxu1 %v21410_v50  ;;  %18252 = vmatprep.subr.mxu0 %v21417_v30 }
 0x28c   :  { %18280 = vmatmul.mubr.f32.vlgmr.msra.gmra.mxu1 %v21465_v6  ;;  %18253 = vmatpush3.msra.mxu0 %v21417_v30 }
 0x28d   :  { %18254 = vmatprep.subr.mxu0 %v21432_v61  ;;  %18293 = vmatprep.mubr.f32.mxu1 %v21563_v28 }
 0x28e   :  { %18255 = vmatpush3.msra.mxu0 %v21432_v61 }
 0x28f   :  { %18256 = vmatprep.subr.mxu0 %v21443_v8 }
 0x290   :  { %18257 = vmatpush3.msra.mxu0 %v21443_v8 }
 0x291   :  { %18258 = vmatprep.subr.mxu0 %v21454_v11 }
 0x292   :  { %18259 = vmatpush3.msra.mxu0 %v21454_v11 }
 0x293   :  { %18261 = vmatmul.mubr.f32.vlgmr.msra.gmra.mxu0 %v21465_v6  ;;  %v21577_v6 = vand.u32 4294901760, %v3087_v60 }
 0x294   :  { %18286 = vmatprep.mubr.f32.mxu0 %v3160_v55 }
 0x295   :  { %v3167_v56 = vsub.f32 %v3087_v60, %v21577_v6 }
 0x2bd   :  { %v17977_v29 = vpop.f32.mrf.mxu1 }
 0x2bf   :  { %v1502_v41 = vpop.f32.mrf.mxu1 }
 0x2c5   :  { %v17958_v42 = vpop.f32.mrf.mxu0 }
 0x2c6   :  { %v1509_v23 = vadd.f32 %v17977_v29, %v17958_v42 }
 0x2c7   :  { %v1381_v49 = vpop.f32.mrf.mxu0 }
 0x2c8   :  { %v1503_v35 = vadd.f32 %v1502_v41, %v1381_v49 }
 0x2ce   :  { %v18015_v32 = vpop.f32.mrf.mxu1 }
 0x2d0   :  { %v1684_v44 = vpop.f32.mrf.mxu1 }
 0x2d6   :  { %v17996_v17 = vpop.f32.mrf.mxu0 }
 0x2d7   :  { %v1604_v25 = vadd.f32 %v17996_v17, %v1509_v23 }
 0x2d8   :  { %v1596_v57 = vpop.f32.mrf.mxu0 }
 0x2d9   :  { %v1597_v31 = vadd.f32 %v1596_v57, %v1503_v35  ;;  %v1693_v50 = vadd.f32 %v18015_v32, %v1604_v25 }
 0x2db   :  { %v1685_v40 = vadd.f32 %v1684_v44, %v1597_v31 }
 0x2e0   :  { %v18053_v12 = vpop.f32.mrf.mxu1 }
 0x2e2   :  { %v1872_v19 = vpop.f32.mrf.mxu1 }
 0x2e8   :  { %v18034_v34 = vpop.f32.mrf.mxu0 }
 0x2e9   :  { %v1794_v30 = vadd.f32 %v18034_v34, %v1693_v50  ;;  %v3168_v34 = vand.u32 4294901760, %v3167_v56 }
 0x2ea   :  { %v1787_v47 = vpop.f32.mrf.mxu0 }
 0x2eb   :  { %v1788_v45 = vadd.f32 %v1787_v47, %v1685_v40  ;;  %v1879_v2 = vadd.f32 %v18053_v12, %v1794_v30  ;;  %v3169_v23 = vsub.f32 %v3167_v56, %v3168_v34 }
 0x2ed   :  { %v1873_v8 = vadd.f32 %v1872_v19, %v1788_v45 }
 0x2f2   :  { %v18091_v0 = vpop.f32.mrf.mxu1 }
 0x2f4   :  { %v2088_v43 = vpop.f32.mrf.mxu1 }
 0x2fa   :  { %v18072_v20 = vpop.f32.mrf.mxu0 }
 0x2fb   :  { %v1978_v59 = vadd.f32 %v18072_v20, %v1879_v2 }
 0x2fc   :  { %v1967_v21 = vpop.f32.mrf.mxu0 }
 0x2fd   :  { %v1968_v16 = vadd.f32 %v1967_v21, %v1873_v8  ;;  %v2095_v46 = vadd.f32 %v18091_v0, %v1978_v59  ;;  %v3595_v8 = vld [vmem:[%s25128_s5 + $0x20] sm:$0xff] }
 0x2ff   :  { %v2089_v62 = vadd.f32 %v2088_v43, %v1968_v16  ;;  %v21675_v16 = vand.u32 4294901760, %v3595_v8 }
 0x304   :  { %v18129_v5 = vpop.f32.mrf.mxu1 }
 0x306   :  { %v2270_v27 = vpop.f32.mrf.mxu1 }
 0x30c   :  { %v18110_v53 = vpop.f32.mrf.mxu0 }
 0x30d   :  { %v2190_v7 = vadd.f32 %v18110_v53, %v2095_v46 }
 0x30e   :  { %v2182_v37 = vpop.f32.mrf.mxu0 }
 0x30f   :  { %v2183_v14 = vadd.f32 %v2182_v37, %v2089_v62  ;;  %v2279_v26 = vadd.f32 %v18129_v5, %v2190_v7  ;;  %v3170_v37 = vand.u32 4294901760, %v3169_v23  ;;  %v21688_v7 = vsub.f32 %v3595_v8, %v21675_v16 }
 0x311   :  { %v2271_v42 = vadd.f32 %v2270_v27, %v2183_v14 }
 0x316   :  { %v18167_v51 = vpop.f32.mrf.mxu1 }
 0x318   :  { %v2458_v33 = vpop.f32.mrf.mxu1 }
 0x31e   :  { %v18148_v36 = vpop.f32.mrf.mxu0 }
 0x31f   :  { %v2380_v55 = vadd.f32 %v18148_v36, %v2279_v26 }
 0x320   :  { %v2373_v10 = vpop.f32.mrf.mxu0 }
 0x321   :  { %v2374_v41 = vadd.f32 %v2373_v10, %v2271_v42  ;;  %v2465_v12 = vadd.f32 %v18167_v51, %v2380_v55  ;;  %v3597_v10 = vld [vmem:[%s25128_s5 + $0x30] sm:$0xff]  ;;  %v3591_v42 = vld [vmem:[%s25128_s5] sm:$0xff] }
 0x323   :  { %v2459_v0 = vadd.f32 %v2458_v33, %v2374_v41  ;;  %v21732_v41 = vand.u32 4294901760, %v3591_v42 }
 0x328   :  { %v18205_v24 = vpop.f32.mrf.mxu1 }
 0x32a   :  { %v2698_v54 = vpop.f32.mrf.mxu1 }
 0x330   :  { %v18186_v61 = vpop.f32.mrf.mxu0 }
 0x331   :  { %v2705_v58 = vadd.f32 %v18205_v24, %v18186_v61  ;;  %v3596_v61 = vld [vmem:[%s25128_s5 + $0x28] sm:$0xff] }
 0x332   :  { %v2577_v22 = vpop.f32.mrf.mxu0  ;;  %v21660_v59 = vand.u32 4294901760, %v3596_v61 }
 0x333   :  { %v2699_v9 = vadd.f32 %v2698_v54, %v2577_v22 }
 0x334   :  { %v21673_v22 = vsub.f32 %v3596_v61, %v21660_v59 }
 0x336   :  { %v21685_v54 = vand.u32 4294901760, %v21673_v22 }
 0x33a   :  { %v18243_v4 = vpop.f32.mrf.mxu1 }
 0x33c   :  { %v2880_v13 = vpop.f32.mrf.mxu1 }
 0x342   :  { %v18224_v11 = vpop.f32.mrf.mxu0 }
 0x343   :  { %v2800_v3 = vadd.f32 %v18224_v11, %v2705_v58  ;;  %v3594_v11 = vld [vmem:[%s25128_s5 + $0x18] sm:$0xff]  ;;  %v3593_v58 = vld [vmem:[%s25128_s5 + $0x10] sm:$0xff] }
 0x344   :  { %v2792_v15 = vpop.f32.mrf.mxu0  ;;  %v21691_v62 = vand.u32 4294901760, %v3594_v11  ;;  %v21702_v14 = vand.u32 4294901760, %v3593_v58 }
 0x345   :  { %v2793_v48 = vadd.f32 %v2792_v15, %v2699_v9  ;;  %v2889_v29 = vadd.f32 %v18243_v4, %v2800_v3  ;;  %v3732_v4 = vsub.f32 %v21673_v22, %v21685_v54  ;;  %v21700_v15 = vand.u32 4294901760, %v21688_v7  ;;  %v3592_v3 = vld [vmem:[%s25128_s5 + $0x8] sm:$0xff] }
 0x346   :  { %v21705_v9 = vsub.f32 %v3594_v11, %v21691_v62 }
 0x347   :  { %v2881_v57 = vadd.f32 %v2880_v13, %v2793_v48  ;;  %v3733_v26 = vand.u32 4294901760, %v3732_v4  ;;  %v3739_v48 = vsub.f32 %v21688_v7, %v21700_v15  ;;  %v21716_v13 = vand.u32 4294901760, %v3592_v3 }
 0x348   :  { %v21720_v55 = vand.u32 4294901760, %v21705_v9 }
 0x34c   :  { %v18281_v49 = vpop.f32.mrf.mxu1 }
 0x34e   :  { %v3068_v19 = vpop.f32.mrf.mxu1 }
 0x353   :  { %v18262_v17 = vpop.f32.mrf.mxu0 }
 0x354   :  { %v2990_v32 = vadd.f32 %v18262_v17, %v2889_v29  ;;  %v3740_v29 = vand.u32 4294901760, %v3739_v48  ;;  %v21730_v17 = vsub.f32 %v3592_v3, %v21716_v13 }
 0x355   :  { %v2983_v44 = vpop.f32.mrf.mxu0 }
 0x356   :  { %v3075_v47 = vadd.f32 %v18281_v49, %v2990_v32  ;;  %v2984_v20 = vadd.f32 %v2983_v44, %v2881_v57  ;;  %v3746_v32 = vsub.f32 %v21705_v9, %v21720_v55  ;;  %v21744_v44 = vsub.f32 %v3591_v42, %v21732_v41 }
 0x358   :  { %v3079_v21 = vadd.f32 %v3075_v47, %v2465_v12  ;;  %v3069_v53 = vadd.f32 %v3068_v19, %v2984_v20  ;;  %v3747_v12 = vand.u32 4294901760, %v3746_v32  ;;  %v21751_v19 = vand.u32 4294901760, %v21744_v44 }
 0x35a   :  { %v21580_v43 = vand.u32 4294901760, %v3079_v21  ;;  %v3078_v35 = vadd.f32 %v3069_v53, %v2459_v0 }
 0x35c   :  { %v21583_v25 = vsub.f32 %v3079_v21, %v21580_v43  ;;  %v21585_v5 = vand.u32 4294901760, %v3078_v35  ;;  %18282 = vmatprep.subr.mxu0 %v21580_v43  ;;  %v3767_v21 = vsub.f32 %v21744_v44, %v21751_v19 }
 0x35d   :  { %18283 = vmatpush3.msra.mxu0 %v21580_v43 }
 0x35e   :  { %v21590_v31 = vsub.f32 %v3078_v35, %v21585_v5  ;;  %18284 = vmatprep.subr.mxu0 %v21585_v5  ;;  %v21594_v36 = vand.u32 4294901760, %v21583_v25  ;;  %v3768_v53 = vand.u32 4294901760, %v3767_v21 }
 0x35f   :  { %18285 = vmatpush3.msra.mxu0 %v21585_v5 }
 0x360   :  { %18296 = vmatprep.subr.mxu0 %v21583_v25  ;;  %18287 = vmatmul.mubr.f32.vlgmr.msra.gmra.mxu0 %v3170_v37  ;;  %v3208_v50 = vsub.f32 %v21583_v25, %v21594_v36  ;;  %v21601_v27 = vand.u32 4294901760, %v21590_v31 }
 0x361   :  { %18297 = vmatpush3.msra.mxu0 %v21583_v25  ;;  %18300 = vmatprep.mubr.f32.mxu0 %v21566_v63  ;;  %v3598_v63 = vld [vmem:[%s25128_s5 + $0x38] sm:$0xff] }
 0x362   :  { %18298 = vmatprep.subr.mxu0 %v21590_v31  ;;  %v21606_v30 = vand.u32 4294901760, %v3208_v50  ;;  %v3215_v40 = vsub.f32 %v21590_v31, %v21601_v27 }
 0x363   :  { %18299 = vmatpush3.msra.mxu0 %v21590_v31 }
 0x364   :  { %18289 = vmatprep.subr.mxu1 %v21606_v30  ;;  %18310 = vmatprep.subr.mxu0 %v21594_v36  ;;  %v21613_v51 = vand.u32 4294901760, %v3215_v40 }
 0x365   :  { %18290 = vmatpush3.msra.mxu1 %v21606_v30  ;;  %18301 = vmatmul.mubr.f32.vlgmr.msra.gmra.mxu0 %v3167_v56  ;;  %v21714_v56 = vsub.f32 %v3593_v58, %v21702_v14 }
 0x366   :  { %18311 = vmatpush3.msra.mxu0 %v21594_v36  ;;  %18291 = vmatprep.subr.mxu1 %v21613_v51 }
 0x367   :  { %18312 = vmatprep.subr.mxu0 %v21601_v27  ;;  %18292 = vmatpush3.msra.mxu1 %v21613_v51  ;;  %v21727_v49 = vand.u32 4294901760, %v21714_v56 }
 0x368   :  { %18313 = vmatpush3.msra.mxu0 %v21601_v27  ;;  %18294 = vmatmul.mubr.f32.vlgmr.msra.gmra.mxu1 %v21577_v6 }
 0x369   :  { %18303 = vmatprep.subr.mxu1 %v21580_v43  ;;  %18307 = vmatprep.mubr.f32.mxu1 %v3158_v39  ;;  %v21639_v39 = vand.u32 4294901760, %v3598_v63  ;;  %v3753_v57 = vsub.f32 %v21714_v56, %v21727_v49 }
 0x36a   :  { %18304 = vmatpush3.msra.mxu1 %v21580_v43  ;;  %18314 = vmatprep.mubr.f32.mxu0 %v21563_v28 }
 0x36b   :  { %18305 = vmatprep.subr.mxu1 %v21585_v5  ;;  %18315 = vmatmul.mubr.f32.vlgmr.msra.gmra.mxu0 %v21577_v6  ;;  %v21645_v45 = vsub.f32 %v3598_v63, %v21639_v39  ;;  %v3754_v47 = vand.u32 4294901760, %v3753_v57 }
 0x36c   :  { %18306 = vmatpush3.msra.mxu1 %v21585_v5  ;;  %18324 = vmatprep.subr.mxu0 %v21639_v39 }
 0x36d   :  { %18308 = vmatmul.mubr.f32.vlgmr.msra.gmra.mxu1 %v3168_v34  ;;  %18317 = vmatprep.subr.mxu1 %v21580_v43  ;;  %v21655_v2 = vand.u32 4294901760, %v21645_v45  ;;  %v21741_v34 = vand.u32 4294901760, %v21730_v17 }
 0x36e   :  { %18318 = vmatpush3.msra.mxu1 %v21580_v43  ;;  %18321 = vmatprep.mubr.f32.mxu1 %v21563_v28  ;;  %v21647_v28 = vand.u32 4294901760, %v3597_v10 }
 0x36f   :  { %18319 = vmatprep.subr.mxu1 %v21585_v5  ;;  %18325 = vmatpush3.msra.mxu0 %v21639_v39  ;;  %v3718_v18 = vsub.f32 %v21645_v45, %v21655_v2  ;;  %v3760_v20 = vsub.f32 %v21730_v17, %v21741_v34 }
 0x370   :  { %18320 = vmatpush3.msra.mxu1 %v21585_v5  ;;  %v21658_v33 = vsub.f32 %v3597_v10, %v21647_v28  ;;  %18326 = vmatprep.subr.mxu0 %v21647_v28 }
 0x371   :  { %18322 = vmatmul.mubr.f32.vlgmr.msra.gmra.mxu1 %v21577_v6  ;;  %18327 = vmatpush3.msra.mxu0 %v21647_v28  ;;  %v3719_v60 = vand.u32 4294901760, %v3718_v18  ;;  %v3761_v0 = vand.u32 4294901760, %v3760_v20 }
 0x372   :  { %v21670_v24 = vand.u32 4294901760, %v21658_v33  ;;  %18328 = vmatprep.subr.mxu0 %v21660_v59 }
 0x373   :  { %18329 = vmatpush3.msra.mxu0 %v21660_v59  ;;  %18343 = vmatprep.subr.mxu1 %v3719_v60 }
 0x374   :  { %v3725_v46 = vsub.f32 %v21658_v33, %v21670_v24  ;;  %18330 = vmatprep.subr.mxu0 %v21675_v16  ;;  %18344 = vmatpush3.msra.mxu1 %v3719_v60 }
 0x375   :  { %18331 = vmatpush3.msra.mxu0 %v21675_v16 }
 0x376   :  { %v3726_v6 = vand.u32 4294901760, %v3725_v46  ;;  %18332 = vmatprep.subr.mxu0 %v21691_v62 }
 0x377   :  { %18333 = vmatpush3.msra.mxu0 %v21691_v62 }
 0x378   :  { %18345 = vmatprep.subr.mxu1 %v3726_v6  ;;  %18334 = vmatprep.subr.mxu0 %v21702_v14 }
 0x379   :  { %18346 = vmatpush3.msra.mxu1 %v3726_v6  ;;  %18335 = vmatpush3.msra.mxu0 %v21702_v14 }
 0x37a   :  { %18347 = vmatprep.subr.mxu1 %v3733_v26  ;;  %18336 = vmatprep.subr.mxu0 %v21716_v13 }
 0x37b   :  { %18348 = vmatpush3.msra.mxu1 %v3733_v26  ;;  %18337 = vmatpush3.msra.mxu0 %v21716_v13 }
 0x37c   :  { %18349 = vmatprep.subr.mxu1 %v3740_v29  ;;  %18338 = vmatprep.subr.mxu0 %v21732_v41 }
 0x37d   :  { %18350 = vmatpush3.msra.mxu1 %v3740_v29  ;;  %18339 = vmatpush3.msra.mxu0 %v21732_v41 }
 0x37e   :  { %18351 = vmatprep.subr.mxu1 %v3747_v12  ;;  %18362 = vmatprep.subr.mxu0 %v21645_v45 }
 0x37f   :  { %18352 = vmatpush3.msra.mxu1 %v3747_v12 }
 0x380   :  { %18353 = vmatprep.subr.mxu1 %v3754_v47 }
 0x381   :  { %18354 = vmatpush3.msra.mxu1 %v3754_v47 }
 0x382   :  { %18355 = vmatprep.subr.mxu1 %v3761_v0 }
 0x383   :  { %18356 = vmatpush3.msra.mxu1 %v3761_v0 }
 0x384   :  { %18357 = vmatprep.subr.mxu1 %v3768_v53 }
 0x385   :  { %18358 = vmatpush3.msra.mxu1 %v3768_v53 }
 0x386   :  { %18381 = vmatprep.subr.mxu1 %v21639_v39 }
 0x420   :  { %v18288_v23 = vpop.f32.mrf.mxu0 }
 0x422   :  { %v3162_v35 = vpop.f32.mrf.mxu0 }
 0x425   :  { %v18302_v37 = vpop.f32.mrf.mxu0 }
 0x427   :  { %v3335_v63 = vpop.f32.mrf.mxu0 }
 0x428   :  { %v18295_v50 = vpop.f32.mrf.mxu1 }
 0x429   :  { %v3260_v40 = vadd.f32 %v18295_v50, %v18288_v23 }
 0x42a   :  { %v3253_v10 = vpop.f32.mrf.mxu1 }
 0x42b   :  { %v3343_v61 = vadd.f32 %v18302_v37, %v3260_v40  ;;  %v3254_v8 = vadd.f32 %v3253_v10, %v3162_v35  ;;  %v18316_v60 = vpop.f32.mrf.mxu0 }
 0x42d   :  { %v3336_v18 = vadd.f32 %v3335_v63, %v3254_v8  ;;  %v18309_v11 = vpop.f32.mrf.mxu1  ;;  %v3502_v3 = vpop.f32.mrf.mxu0 }
 0x42e   :  { %v3426_v46 = vadd.f32 %v18309_v11, %v3343_v61  ;;  %v4700_v61 = vld [vmem:[%s25129_s8 + $0x10] sm:$0xff] }
 0x42f   :  { %v3417_v58 = vpop.f32.mrf.mxu1 }
 0x430   :  { %v3509_v6 = vadd.f32 %v18316_v60, %v3426_v46  ;;  %v3418_v4 = vadd.f32 %v3417_v58, %v3336_v18  ;;  %v21926_v60 = vand.u32 4294901760, %v4700_v61  ;;  %v4699_v58 = vld [vmem:[%s25129_s8 + $0x8] sm:$0xff] }
 0x431   :  { %v18323_v26 = vpop.f32.mrf.mxu1 }
 0x432   :  { %v3503_v48 = vadd.f32 %v3502_v3, %v3418_v4  ;;  %v3588_v42 = vadd.f32 %v18323_v26, %v3509_v6  ;;  %v21938_v3 = vsub.f32 %v4700_v61, %v21926_v60  ;;  %v21940_v26 = vand.u32 4294901760, %v4699_v58 }
 0x433   :  { %v3581_v29 = vpop.f32.mrf.mxu1 }
 0x434   :  { %v3603_v32 = vsel %vm1295_vm4, %v3588_v42, 0  ;;  %v3582_v57 = vadd.f32 %v3581_v29, %v3503_v48  ;;  %v4698_v42 = vld [vmem:[%s25129_s8] sm:$0xff] }
 0x435   :  { %v21759_v12 = vand.u32 4294901760, %v3603_v32 }
 0x436   :  { %v3600_v47 = vsel %vm1295_vm4, %v3582_v57, 0  ;;  %v21954_v57 = vsub.f32 %v4699_v58, %v21940_v26 }
 0x437   :  { %v3689_v20 = vsub.f32 %v3603_v32, %v21759_v12  ;;  %v3678_v0 = vand.u32 4294901760, %v3600_v47  ;;  %v21951_v32 = vand.u32 4294901760, %v21938_v3 }
 0x439   :  { %v3690_v21 = vand.u32 4294901760, %v3689_v20  ;;  %v3679_v53 = vsub.f32 %v3600_v47, %v3678_v0  ;;  %18359 = vmatprep.mubr.f32.mxu1 %v3678_v0 }
 0x43a   :  { %18360 = vmatmul.mubr.f32.vlgmr.msra.gmra.mxu1 %v21759_v12 }
 0x43b   :  { %18382 = vmatpush3.msra.mxu1 %v21639_v39  ;;  %v3680_v23 = vand.u32 4294901760, %v3679_v53  ;;  %v3691_v35 = vsub.f32 %v3689_v20, %v3690_v21 }
 0x43c   :  { %18383 = vmatprep.subr.mxu1 %v21647_v28 }
 0x43d   :  { %18384 = vmatpush3.msra.mxu1 %v21647_v28  ;;  %18397 = vmatprep.mubr.f32.mxu1 %v3680_v23  ;;  %v3681_v37 = vsub.f32 %v3679_v53, %v3680_v23  ;;  %v3692_v40 = vand.u32 4294901760, %v3691_v35 }
 0x43e   :  { %18385 = vmatprep.subr.mxu1 %v21660_v59 }
 0x43f   :  { %18386 = vmatpush3.msra.mxu1 %v21660_v59  ;;  %v3682_v50 = vand.u32 4294901760, %v3681_v37 }
 0x440   :  { %18387 = vmatprep.subr.mxu1 %v21675_v16 }
 0x441   :  { %18388 = vmatpush3.msra.mxu1 %v21675_v16  ;;  %18340 = vmatprep.mubr.f32.mxu0 %v3682_v50 }
 0x442   :  { %18389 = vmatprep.subr.mxu1 %v21691_v62  ;;  %18341 = vmatmul.mubr.f32.vlgmr.msra.gmra.mxu0 %v3692_v40 }
 0x443   :  { %18363 = vmatpush3.msra.mxu0 %v21645_v45  ;;  %18390 = vmatpush3.msra.mxu1 %v21691_v62  ;;  %v16213_v45 = vld [vmem:[%s25125_s1 + $0x68] sm:$0xff] }
 0x444   :  { %18364 = vmatprep.subr.mxu0 %v21658_v33  ;;  %18378 = vmatprep.mubr.f32.mxu0 %v3679_v53 }
 0x445   :  { %18391 = vmatprep.subr.mxu1 %v21702_v14  ;;  %18365 = vmatpush3.msra.mxu0 %v21658_v33  ;;  %v4194_v33 = vsel %vm51_vm0, %v16213_v45, 0 }
 0x446   :  { %18392 = vmatpush3.msra.mxu1 %v21702_v14  ;;  %18366 = vmatprep.subr.mxu0 %v21673_v22 }
 0x447   :  { %18393 = vmatprep.subr.mxu1 %v21716_v13  ;;  %18367 = vmatpush3.msra.mxu0 %v21673_v22  ;;  %v4273_v22 = vand.u32 4294901760, %v4194_v33 }
 0x448   :  { %18394 = vmatpush3.msra.mxu1 %v21716_v13  ;;  %18368 = vmatprep.subr.mxu0 %v21688_v7 }
 0x449   :  { %18395 = vmatprep.subr.mxu1 %v21732_v41  ;;  %18369 = vmatpush3.msra.mxu0 %v21688_v7 }
 0x44a   :  { %18396 = vmatpush3.msra.mxu1 %v21732_v41  ;;  %18370 = vmatprep.subr.mxu0 %v21705_v9 }
 0x44b   :  { %18398 = vmatmul.mubr.f32.vlgmr.msra.gmra.mxu1 %v3690_v21  ;;  %18419 = vmatprep.subr.mxu1 %v21639_v39 }
 0x44c   :  { %18371 = vmatpush3.msra.mxu0 %v21705_v9  ;;  %18420 = vmatpush3.msra.mxu1 %v21639_v39  ;;  %v16212_v39 = vld [vmem:[%s25125_s1 + $0x60] sm:$0xff] }
 0x44d   :  { %18435 = vmatprep.mubr.f32.mxu1 %v3678_v0  ;;  %18372 = vmatprep.subr.mxu0 %v21714_v56 }
 0x44e   :  { %18421 = vmatprep.subr.mxu1 %v21647_v28  ;;  %18373 = vmatpush3.msra.mxu0 %v21714_v56  ;;  %v4702_v56 = vld [vmem:[%s25129_s8 + $0x20] sm:$0xff] }
 0x44f   :  { %18422 = vmatpush3.msra.mxu1 %v21647_v28  ;;  %18374 = vmatprep.subr.mxu0 %v21730_v17  ;;  %v4191_v28 = vsel %vm51_vm0, %v16212_v39, 0 }
 0x450   :  { %18423 = vmatprep.subr.mxu1 %v21660_v59  ;;  %18375 = vmatpush3.msra.mxu0 %v21730_v17  ;;  %v21899_v17 = vand.u32 4294901760, %v4702_v56 }
 0x451   :  { %18424 = vmatpush3.msra.mxu1 %v21660_v59  ;;  %18376 = vmatprep.subr.mxu0 %v21744_v44  ;;  %v4263_v59 = vand.u32 4294901760, %v4191_v28 }
 0x452   :  { %18425 = vmatprep.subr.mxu1 %v21675_v16  ;;  %18377 = vmatpush3.msra.mxu0 %v21744_v44  ;;  %v21912_v63 = vsub.f32 %v4702_v56, %v21899_v17 }
 0x453   :  { %18426 = vmatpush3.msra.mxu1 %v21675_v16  ;;  %18379 = vmatmul.mubr.f32.vlgmr.msra.gmra.mxu0 %v3689_v20  ;;  %v4860_v20 = vsub.f32 %v21938_v3, %v21951_v32 }
 0x454   :  { %18400 = vmatprep.subr.mxu0 %v21655_v2  ;;  %18427 = vmatprep.subr.mxu1 %v21691_v62  ;;  %v21924_v11 = vand.u32 4294901760, %v21912_v63 }
 0x455   :  { %18401 = vmatpush3.msra.mxu0 %v21655_v2  ;;  %18416 = vmatprep.mubr.f32.mxu0 %v3678_v0  ;;  %v4264_v2 = vsub.f32 %v4191_v28, %v4263_v59  ;;  %v21965_v0 = vand.u32 4294901760, %v21954_v57  ;;  %v4861_v23 = vand.u32 4294901760, %v4860_v20 }
 0x456   :  { %18428 = vmatpush3.msra.mxu1 %v21691_v62  ;;  %18402 = vmatprep.subr.mxu0 %v21670_v24  ;;  %v4846_v4 = vsub.f32 %v21912_v63, %v21924_v11 }
 0x457   :  { %18429 = vmatprep.subr.mxu1 %v21702_v14  ;;  %18403 = vmatpush3.msra.mxu0 %v21670_v24  ;;  %v4274_v24 = vsub.f32 %v4194_v33, %v4273_v22  ;;  %v4265_v16 = vand.u32 4294901760, %v4264_v2  ;;  %v4867_v35 = vsub.f32 %v21954_v57, %v21965_v0 }
 0x458   :  { %18430 = vmatpush3.msra.mxu1 %v21702_v14  ;;  %18404 = vmatprep.subr.mxu0 %v21685_v54  ;;  %v4847_v29 = vand.u32 4294901760, %v4846_v4 }
 0x459   :  { %18431 = vmatprep.subr.mxu1 %v21716_v13  ;;  %18405 = vmatpush3.msra.mxu0 %v21685_v54  ;;  %v4275_v54 = vand.u32 4294901760, %v4274_v24  ;;  %v4868_v50 = vand.u32 4294901760, %v4867_v35 }
 0x45a   :  { %18432 = vmatpush3.msra.mxu1 %v21716_v13  ;;  %18406 = vmatprep.subr.mxu0 %v21700_v15 }
 0x45b   :  { %18433 = vmatprep.subr.mxu1 %v21732_v41  ;;  %18407 = vmatpush3.msra.mxu0 %v21700_v15  ;;  %v4276_v7 = vsub.f32 %v4274_v24, %v4275_v54 }
 0x45c   :  { %18434 = vmatpush3.msra.mxu1 %v21732_v41  ;;  %18408 = vmatprep.subr.mxu0 %v21720_v55  ;;  %v4701_v41 = vld [vmem:[%s25129_s8 + $0x18] sm:$0xff] }
 0x45d   :  { %18436 = vmatmul.mubr.f32.vlgmr.msra.gmra.mxu1 %v21759_v12  ;;  %18445 = vmatprep.subr.mxu1 %v21606_v30  ;;  %v4277_v62 = vand.u32 4294901760, %v4276_v7  ;;  %v21915_v10 = vand.u32 4294901760, %v4701_v41 }
 0x45e   :  { %18409 = vmatpush3.msra.mxu0 %v21720_v55  ;;  %18446 = vmatpush3.msra.mxu1 %v21606_v30  ;;  %v4266_v30 = vsub.f32 %v4264_v2, %v4265_v16 }
 0x45f   :  { %18410 = vmatprep.subr.mxu0 %v21727_v49  ;;  %18447 = vmatprep.subr.mxu1 %v21613_v51  ;;  %v21929_v46 = vsub.f32 %v4701_v41, %v21915_v10 }
 0x460   :  { %18411 = vmatpush3.msra.mxu0 %v21727_v49  ;;  %18448 = vmatpush3.msra.mxu1 %v21613_v51  ;;  %v4267_v51 = vand.u32 4294901760, %v4266_v30 }
 0x461   :  { %18412 = vmatprep.subr.mxu0 %v21741_v34  ;;  %18449 = vmatprep.mubr.f32.mxu1 %v4263_v59  ;;  %v21944_v48 = vand.u32 4294901760, %v21929_v46 }
 0x462   :  { %18459 = vmatprep.subr.mxu1 %v21580_v43  ;;  %18413 = vmatpush3.msra.mxu0 %v21741_v34 }
 0x463   :  { %18450 = vmatmul.mubr.f32.vlgmr.msra.gmra.mxu1 %v4273_v22  ;;  %18414 = vmatprep.subr.mxu0 %v21751_v19  ;;  %v4853_v47 = vsub.f32 %v21929_v46, %v21944_v48 }
 0x464   :  { %18460 = vmatpush3.msra.mxu1 %v21580_v43  ;;  %18415 = vmatpush3.msra.mxu0 %v21751_v19 }
 0x465   :  { %18461 = vmatprep.subr.mxu1 %v21585_v5  ;;  %18417 = vmatmul.mubr.f32.vlgmr.msra.gmra.mxu0 %v21759_v12  ;;  %v21956_v12 = vand.u32 4294901760, %v4698_v42  ;;  %v4854_v53 = vand.u32 4294901760, %v4853_v47 }
 0x466   :  { %18462 = vmatpush3.msra.mxu1 %v21585_v5  ;;  %18438 = vmatprep.subr.mxu0 %v21580_v43 }
 0x467   :  { %18463 = vmatprep.mubr.f32.mxu1 %v4265_v16  ;;  %18473 = vmatprep.subr.mxu1 %v21580_v43  ;;  %v21968_v21 = vsub.f32 %v4698_v42, %v21956_v12 }
 0x468   :  { %18439 = vmatpush3.msra.mxu0 %v21580_v43  ;;  %18464 = vmatmul.mubr.f32.vlgmr.msra.gmra.mxu1 %v4275_v54 }
 0x469   :  { %18474 = vmatpush3.msra.mxu1 %v21580_v43  ;;  %18440 = vmatprep.subr.mxu0 %v21585_v5  ;;  %v4705_v43 = vld [vmem:[%s25129_s8 + $0x38] sm:$0xff]  ;;  %v21975_v37 = vand.u32 4294901760, %v21968_v21 }
 0x46a   :  { %18475 = vmatprep.subr.mxu1 %v21585_v5  ;;  %18441 = vmatpush3.msra.mxu0 %v21585_v5 }
 0x46b   :  { %18442 = vmatprep.mubr.f32.mxu0 %v4267_v51  ;;  %18476 = vmatpush3.msra.mxu1 %v21585_v5  ;;  %v4704_v5 = vld [vmem:[%s25129_s8 + $0x30] sm:$0xff]  ;;  %v4874_v40 = vsub.f32 %v21968_v21, %v21975_v37 }
 0x46c   :  { %18443 = vmatmul.mubr.f32.vlgmr.msra.gmra.mxu0 %v4277_v62  ;;  %18452 = vmatprep.subr.mxu0 %v21583_v25 }
 0x46d   :  { %18453 = vmatpush3.msra.mxu0 %v21583_v25  ;;  %18456 = vmatprep.mubr.f32.mxu0 %v4264_v2  ;;  %v21863_v25 = vand.u32 4294901760, %v4705_v43  ;;  %v4875_v39 = vand.u32 4294901760, %v4874_v40 }
 0x46e   :  { %18454 = vmatprep.subr.mxu0 %v21590_v31  ;;  %18477 = vmatprep.mubr.f32.mxu1 %v4263_v59 }
 0x46f   :  { %18455 = vmatpush3.msra.mxu0 %v21590_v31  ;;  %18478 = vmatmul.mubr.f32.vlgmr.msra.gmra.mxu1 %v4273_v22  ;;  %v21869_v31 = vsub.f32 %v4705_v43, %v21863_v25 }
 0x470   :  { %18457 = vmatmul.mubr.f32.vlgmr.msra.gmra.mxu0 %v4274_v24  ;;  %18466 = vmatprep.subr.mxu0 %v21594_v36 }
 0x471   :  { %18467 = vmatpush3.msra.mxu0 %v21594_v36  ;;  %18470 = vmatprep.mubr.f32.mxu0 %v4263_v59  ;;  %v21871_v36 = vand.u32 4294901760, %v4704_v5  ;;  %v21879_v15 = vand.u32 4294901760, %v21869_v31 }
 0x472   :  { %18468 = vmatprep.subr.mxu0 %v21601_v27 }
 0x473   :  { %18469 = vmatpush3.msra.mxu0 %v21601_v27  ;;  %v4703_v27 = vld [vmem:[%s25129_s8 + $0x28] sm:$0xff]  ;;  %v21882_v14 = vsub.f32 %v4704_v5, %v21871_v36  ;;  %v4825_v13 = vsub.f32 %v21869_v31, %v21879_v15 }
 0x474   :  { %18471 = vmatmul.mubr.f32.vlgmr.msra.gmra.mxu0 %v4273_v22  ;;  %18480 = vmatprep.subr.mxu0 %v21863_v25  ;;  %v21884_v9 = vand.u32 4294901760, %v4703_v27 }
 0x475   :  { %18481 = vmatpush3.msra.mxu0 %v21863_v25  ;;  %v21894_v55 = vand.u32 4294901760, %v21882_v14  ;;  %v4826_v34 = vand.u32 4294901760, %v4825_v13 }
 0x476   :  { %18482 = vmatprep.subr.mxu0 %v21871_v36  ;;  %v21897_v49 = vsub.f32 %v4703_v27, %v21884_v9 }
 0x477   :  { %18483 = vmatpush3.msra.mxu0 %v21871_v36  ;;  %v4832_v44 = vsub.f32 %v21882_v14, %v21894_v55  ;;  %18499 = vmatprep.subr.mxu1 %v4826_v34 }
 0x478   :  { %18484 = vmatprep.subr.mxu0 %v21884_v9  ;;  %v21909_v19 = vand.u32 4294901760, %v21897_v49  ;;  %18500 = vmatpush3.msra.mxu1 %v4826_v34 }
 0x479   :  { %18485 = vmatpush3.msra.mxu0 %v21884_v9  ;;  %v4833_v8 = vand.u32 4294901760, %v4832_v44 }
 0x47a   :  { %18486 = vmatprep.subr.mxu0 %v21899_v17  ;;  %v4839_v18 = vsub.f32 %v21897_v49, %v21909_v19 }
 0x47b   :  { %18487 = vmatpush3.msra.mxu0 %v21899_v17  ;;  %18501 = vmatprep.subr.mxu1 %v4833_v8 }
 0x47c   :  { %18488 = vmatprep.subr.mxu0 %v21915_v10  ;;  %v4840_v6 = vand.u32 4294901760, %v4839_v18  ;;  %18502 = vmatpush3.msra.mxu1 %v4833_v8 }
 0x47d   :  { %18489 = vmatpush3.msra.mxu0 %v21915_v10 }
 0x47e   :  { %18490 = vmatprep.subr.mxu0 %v21926_v60  ;;  %18503 = vmatprep.subr.mxu1 %v4840_v6 }
 0x47f   :  { %18491 = vmatpush3.msra.mxu0 %v21926_v60  ;;  %18504 = vmatpush3.msra.mxu1 %v4840_v6 }
 0x480   :  { %18492 = vmatprep.subr.mxu0 %v21940_v26  ;;  %18505 = vmatprep.subr.mxu1 %v4847_v29 }
 0x481   :  { %18493 = vmatpush3.msra.mxu0 %v21940_v26  ;;  %18506 = vmatpush3.msra.mxu1 %v4847_v29 }
 0x482   :  { %18494 = vmatprep.subr.mxu0 %v21956_v12  ;;  %18507 = vmatprep.subr.mxu1 %v4854_v53 }
 0x483   :  { %18495 = vmatpush3.msra.mxu0 %v21956_v12  ;;  %18508 = vmatpush3.msra.mxu1 %v4854_v53 }
 0x484   :  { %18518 = vmatprep.subr.mxu0 %v21869_v31  ;;  %18509 = vmatprep.subr.mxu1 %v4861_v23 }
 0x485   :  { %18510 = vmatpush3.msra.mxu1 %v4861_v23 }
 0x486   :  { %18511 = vmatprep.subr.mxu1 %v4868_v50 }
 0x487   :  { %18512 = vmatpush3.msra.mxu1 %v4868_v50 }
 0x488   :  { %18513 = vmatprep.subr.mxu1 %v4875_v39 }
 0x489   :  { %18514 = vmatpush3.msra.mxu1 %v4875_v39 }
 0x48a   :  { %18537 = vmatprep.subr.mxu1 %v21863_v25 }
 0x4fa   :  { %v18361_v45 = vpop.f32.mrf.mxu1 }
 0x4fc   :  { %v21984_v22 = vpop.f32.mrf.mxu1 }
 0x4fd   :  { %25268 = vst [vmem:[#allocation14_spill] sm:$0xff] %v21984_v22 }
 0x502   :  { %v18342_v28 = vpop.f32.mrf.mxu0 }
 0x503   :  { %v3812_v33 = vadd.f32 %v18361_v45, %v18342_v28 }
 0x504   :  { %v21982_v59 = vpop.f32.mrf.mxu0 }
 0x505   :  { %25267 = vst [vmem:[#allocation13_spill] sm:$0xff] %v21982_v59 }
 0x50b   :  { %v18399_v16 = vpop.f32.mrf.mxu1 }
 0x50d   :  { %v21986_v30 = vpop.f32.mrf.mxu1 }
 0x50e   :  { %25269 = vst [vmem:[#allocation15_spill] sm:$0xff] %v21986_v30 }
 0x513   :  { %v18380_v2 = vpop.f32.mrf.mxu0 }
 0x514   :  { %v3907_v24 = vadd.f32 %v18380_v2, %v3812_v33 }
 0x515   :  { %v21990_v62 = vpop.f32.mrf.mxu0 }
 0x516   :  { %v3996_v54 = vadd.f32 %v18399_v16, %v3907_v24  ;;  %25271 = vst [vmem:[#allocation17_spill] sm:$0xff] %v21990_v62  ;;  %v5803_v62 = vld [vmem:[%s25130_s3] sm:$0xff] }
 0x51d   :  { %v18437_v7 = vpop.f32.mrf.mxu1 }
 0x51f   :  { %v21988_v51 = vpop.f32.mrf.mxu1 }
 0x520   :  { %25270 = vst [vmem:[#allocation16_spill] sm:$0xff] %v21988_v51  ;;  %v5804_v51 = vld [vmem:[%s25130_s3 + $0x8] sm:$0xff] }
 0x523   :  { %v18451_v43 = vpop.f32.mrf.mxu1 }
 0x525   :  { %v18418_v5 = vpop.f32.mrf.mxu0  ;;  %v4360_v41 = vpop.f32.mrf.mxu1 }
 0x526   :  { %v4097_v27 = vadd.f32 %v18418_v5, %v3996_v54 }
 0x527   :  { %v21994_v13 = vpop.f32.mrf.mxu0 }
 0x528   :  { %v21992_v56 = vadd.f32 %v18437_v7, %v4097_v27  ;;  %25273 = vst [vmem:[#allocation19_spill] sm:$0xff] %v21994_v13  ;;  %v18465_v44 = vpop.f32.mrf.mxu1 }
 0x52a   :  { %25272 = vst [vmem:[#allocation18_spill] sm:$0xff] %v21992_v56  ;;  %v4524_v58 = vpop.f32.mrf.mxu1 }
 0x52c   :  { %v18444_v34 = vpop.f32.mrf.mxu0 }
 0x52d   :  { %v4367_v8 = vadd.f32 %v18451_v43, %v18444_v34 }
 0x52e   :  { %v4269_v61 = vpop.f32.mrf.mxu0 }
 0x52f   :  { %v4361_v6 = vadd.f32 %v4360_v41, %v4269_v61  ;;  %v18479_v53 = vpop.f32.mrf.mxu1  ;;  %v5817_v61 = vld [vmem:[%s25130_s3 + $0x70] sm:$0xff] }
 0x530   :  { %v18458_v18 = vpop.f32.mrf.mxu0 }
 0x531   :  { %v4450_v4 = vadd.f32 %v18458_v18, %v4367_v8  ;;  %v4688_v45 = vpop.f32.mrf.mxu1  ;;  %v22127_v18 = vand.u32 4294901760, %v5817_v61 }
 0x532   :  { %v4442_v42 = vpop.f32.mrf.mxu0 }
 0x533   :  { %v4533_v29 = vadd.f32 %v18465_v44, %v4450_v4  ;;  %v4443_v47 = vadd.f32 %v4442_v42, %v4361_v6  ;;  %v22138_v4 = vsub.f32 %v5817_v61, %v22127_v18 }
 0x534   :  { %v18472_v20 = vpop.f32.mrf.mxu0 }
 0x535   :  { %v4525_v23 = vadd.f32 %v4524_v58, %v4443_v47  ;;  %v4616_v35 = vadd.f32 %v18472_v20, %v4533_v29  ;;  %v5816_v58 = vld [vmem:[%s25130_s3 + $0x68] sm:$0xff]  ;;  %v5815_v29 = vld [vmem:[%s25130_s3 + $0x60] sm:$0xff]  ;;  %v22150_v20 = vand.u32 4294901760, %v22138_v4 }
 0x536   :  { %v4609_v50 = vpop.f32.mrf.mxu0  ;;  %v22140_v42 = vand.u32 4294901760, %v5816_v58 }
 0x537   :  { %v4695_v40 = vadd.f32 %v18479_v53, %v4616_v35  ;;  %v4610_v39 = vadd.f32 %v4609_v50, %v4525_v23  ;;  %v22155_v23 = vand.u32 4294901760, %v5815_v29  ;;  %v5814_v35 = vld [vmem:[%s25130_s3 + $0x58] sm:$0xff] }
 0x538   :  { %v22153_v53 = vsub.f32 %v5816_v58, %v22140_v42 }
 0x539   :  { %v4710_v28 = vsel %vm1295_vm4, %v4695_v40, 0  ;;  %v4689_v33 = vadd.f32 %v4688_v45, %v4610_v39  ;;  %v5931_v40 = vsub.f32 %v22138_v4, %v22150_v20  ;;  %v22168_v45 = vsub.f32 %v5815_v29, %v22155_v23 }
 0x53a   :  { %v21997_v2 = vand.u32 4294901760, %v4710_v28  ;;  %v22165_v39 = vand.u32 4294901760, %v22153_v53 }
 0x53b   :  { %v4707_v24 = vsel %vm1295_vm4, %v4689_v33, 0  ;;  %v5813_v33 = vld [vmem:[%s25130_s3 + $0x50] sm:$0xff] }
 0x53c   :  { %v4796_v16 = vsub.f32 %v4710_v28, %v21997_v2  ;;  %v22001_v54 = vand.u32 4294901760, %v4707_v24  ;;  %v22171_v28 = vand.u32 4294901760, %v5814_v35 }
 0x53e   :  { %v4797_v7 = vand.u32 4294901760, %v4796_v16  ;;  %v4786_v43 = vsub.f32 %v4707_v24, %v22001_v54  ;;  %18515 = vmatprep.mubr.f32.mxu1 %v22001_v54  ;;  %v5938_v24 = vsub.f32 %v22153_v53, %v22165_v39 }
 0x53f   :  { %18516 = vmatmul.mubr.f32.vlgmr.msra.gmra.mxu1 %v21997_v2 }
 0x540   :  { %18538 = vmatpush3.msra.mxu1 %v21863_v25  ;;  %v4787_v5 = vand.u32 4294901760, %v4786_v43  ;;  %v4798_v27 = vsub.f32 %v4796_v16, %v4797_v7 }
 0x541   :  { %18539 = vmatprep.subr.mxu1 %v21871_v36 }
 0x542   :  { %18540 = vmatpush3.msra.mxu1 %v21871_v36  ;;  %18553 = vmatprep.mubr.f32.mxu1 %v4787_v5  ;;  %v4788_v41 = vsub.f32 %v4786_v43, %v4787_v5  ;;  %v4799_v44 = vand.u32 4294901760, %v4798_v27  ;;  %v5939_v5 = vand.u32 4294901760, %v5938_v24  ;;  %v5807_v24 = vld [vmem:[%s25130_s3 + $0x20] sm:$0xff] }
 0x543   :  { %18541 = vmatprep.subr.mxu1 %v21884_v9 }
 0x544   :  { %18542 = vmatpush3.msra.mxu1 %v21884_v9  ;;  %v4789_v34 = vand.u32 4294901760, %v4788_v41 }
 0x545   :  { %18543 = vmatprep.subr.mxu1 %v21899_v17 }
 0x546   :  { %18544 = vmatpush3.msra.mxu1 %v21899_v17  ;;  %18496 = vmatprep.mubr.f32.mxu0 %v4789_v34 }
 0x547   :  { %18545 = vmatprep.subr.mxu1 %v21915_v10  ;;  %18497 = vmatmul.mubr.f32.vlgmr.msra.gmra.mxu0 %v4799_v44 }
 0x548   :  { %18519 = vmatpush3.msra.mxu0 %v21869_v31  ;;  %18546 = vmatpush3.msra.mxu1 %v21915_v10  ;;  %v16214_v31 = vld [vmem:[%s25125_s1 + $0x10] sm:$0xff] }
 0x549   :  { %18520 = vmatprep.subr.mxu0 %v21882_v14  ;;  %18534 = vmatprep.mubr.f32.mxu0 %v4786_v43  ;;  %v5812_v43 = vld [vmem:[%s25130_s3 + $0x48] sm:$0xff] }
 0x54a   :  { %18547 = vmatprep.subr.mxu1 %v21926_v60  ;;  %18521 = vmatpush3.msra.mxu0 %v21882_v14  ;;  %v5296_v14 = vsel %vm51_vm0, %v16214_v31, 0  ;;  %v22196_v34 = vand.u32 4294901760, %v5812_v43  ;;  %v5811_v31 = vld [vmem:[%s25130_s3 + $0x40] sm:$0xff] }
 0x54b   :  { %18548 = vmatpush3.msra.mxu1 %v21926_v60  ;;  %18522 = vmatprep.subr.mxu0 %v21897_v49 }
 0x54c   :  { %18549 = vmatprep.subr.mxu1 %v21940_v26  ;;  %18523 = vmatpush3.msra.mxu0 %v21897_v49  ;;  %v16215_v49 = vld [vmem:[%s25125_s1 + $0x18] sm:$0xff] }
 0x54d   :  { %18550 = vmatpush3.msra.mxu1 %v21940_v26  ;;  %18524 = vmatprep.subr.mxu0 %v21912_v63 }
 0x54e   :  { %18551 = vmatprep.subr.mxu1 %v21956_v12  ;;  %18525 = vmatpush3.msra.mxu0 %v21912_v63  ;;  %v5299_v63 = vsel %vm51_vm0, %v16215_v49, 0 }
 0x54f   :  { %18552 = vmatpush3.msra.mxu1 %v21956_v12  ;;  %18526 = vmatprep.subr.mxu0 %v21929_v46 }
 0x550   :  { %18554 = vmatmul.mubr.f32.vlgmr.msra.gmra.mxu1 %v4797_v7  ;;  %18575 = vmatprep.subr.mxu1 %v21863_v25  ;;  %v22185_v7 = vsub.f32 %v5814_v35, %v22171_v28 }
 0x551   :  { %18527 = vmatpush3.msra.mxu0 %v21929_v46  ;;  %18576 = vmatpush3.msra.mxu1 %v21863_v25  ;;  %v22049_v25 = vand.u32 4294901760, %v5296_v14 }
 0x552   :  { %18591 = vmatprep.mubr.f32.mxu1 %v22001_v54  ;;  %18528 = vmatprep.subr.mxu0 %v21938_v3  ;;  %v22200_v44 = vand.u32 4294901760, %v22185_v7 }
 0x553   :  { %18577 = vmatprep.subr.mxu1 %v21871_v36  ;;  %18529 = vmatpush3.msra.mxu0 %v21938_v3  ;;  %v25276_v3 = vld [vmem:[#allocation2_spill] sm:$0xff] }
 0x554   :  { %18578 = vmatpush3.msra.mxu1 %v21871_v36  ;;  %18530 = vmatprep.subr.mxu0 %v21954_v57  ;;  %v22057_v36 = vand.u32 4294901760, %v5299_v63 }
 0x555   :  { %18579 = vmatprep.subr.mxu1 %v21884_v9  ;;  %18531 = vmatpush3.msra.mxu0 %v21954_v57  ;;  %v25279_v57 = vld [vmem:[#allocation5_spill] sm:$0xff] }
 0x556   :  { %18580 = vmatpush3.msra.mxu1 %v21884_v9  ;;  %18532 = vmatprep.subr.mxu0 %v21968_v21  ;;  %v5369_v9 = vsub.f32 %v5296_v14, %v22049_v25 }
 0x557   :  { %18581 = vmatprep.subr.mxu1 %v21899_v17  ;;  %18533 = vmatpush3.msra.mxu0 %v21968_v21  ;;  %v5818_v21 = vld [vmem:[%s25130_s3 + $0x78] sm:$0xff] }
 0x558   :  { %18582 = vmatpush3.msra.mxu1 %v21899_v17  ;;  %18535 = vmatmul.mubr.f32.vlgmr.msra.gmra.mxu0 %v4796_v16  ;;  %v5379_v17 = vsub.f32 %v5299_v63, %v22057_v36  ;;  %v22180_v16 = vand.u32 4294901760, %v22168_v45  ;;  %v22212_v63 = vand.u32 4294901760, %v5811_v31 }
 0x559   :  { %18556 = vmatprep.subr.mxu0 %v21879_v15  ;;  %18583 = vmatprep.subr.mxu1 %v21915_v10 }
 0x55a   :  { %18557 = vmatpush3.msra.mxu0 %v21879_v15  ;;  %18572 = vmatprep.mubr.f32.mxu0 %v22001_v54  ;;  %v5370_v15 = vand.u32 4294901760, %v5369_v9  ;;  %v22182_v54 = vand.u32 4294901760, %v5813_v33  ;;  %v5945_v27 = vsub.f32 %v22168_v45, %v22180_v16 }
 0x55b   :  { %18584 = vmatpush3.msra.mxu1 %v21915_v10  ;;  %18558 = vmatprep.subr.mxu0 %v21894_v55 }
 0x55c   :  { %18585 = vmatprep.subr.mxu1 %v21926_v60  ;;  %18559 = vmatpush3.msra.mxu0 %v21894_v55  ;;  %v5380_v55 = vand.u32 4294901760, %v5379_v17  ;;  %v5371_v10 = vsub.f32 %v5369_v9, %v5370_v15  ;;  %v22194_v41 = vsub.f32 %v5813_v33, %v22182_v54  ;;  %v5946_v14 = vand.u32 4294901760, %v5945_v27 }
 0x55d   :  { %18586 = vmatpush3.msra.mxu1 %v21926_v60  ;;  %18560 = vmatprep.subr.mxu0 %v21909_v19 }
 0x55e   :  { %18587 = vmatprep.subr.mxu1 %v21940_v26  ;;  %18561 = vmatpush3.msra.mxu0 %v21909_v19  ;;  %v25274_v19 = vld [vmem:[#allocation8_spill] sm:$0xff]  ;;  %v5381_v60 = vsub.f32 %v5379_v17, %v5380_v55  ;;  %v5372_v46 = vand.u32 4294901760, %v5371_v10  ;;  %v22207_v49 = vand.u32 4294901760, %v22194_v41 }
 0x55f   :  { %18588 = vmatpush3.msra.mxu1 %v21940_v26  ;;  %18562 = vmatprep.subr.mxu0 %v21924_v11 }
 0x560   :  { %18589 = vmatprep.subr.mxu1 %v21956_v12  ;;  %18563 = vmatpush3.msra.mxu0 %v21924_v11  ;;  %v25275_v11 = vld [vmem:[#allocation9_spill] sm:$0xff]  ;;  %v5382_v26 = vand.u32 4294901760, %v5381_v60 }
 0x561   :  { %18590 = vmatpush3.msra.mxu1 %v21956_v12  ;;  %18564 = vmatprep.subr.mxu0 %v21944_v48  ;;  %v25280_v12 = vld [vmem:[#allocation6_spill] sm:$0xff] }
 0x562   :  { %18592 = vmatmul.mubr.f32.vlgmr.msra.gmra.mxu1 %v21997_v2  ;;  %18565 = vmatpush3.msra.mxu0 %v21944_v48  ;;  %v25277_v48 = vld [vmem:[#allocation3_spill] sm:$0xff] }
 0x563   :  { %18566 = vmatprep.subr.mxu0 %v21951_v32  ;;  %18601 = vmatprep.subr.mxu1 %v25274_v19 }
 0x564   :  { %18567 = vmatpush3.msra.mxu0 %v21951_v32  ;;  %18602 = vmatpush3.msra.mxu1 %v25274_v19  ;;  %v25278_v32 = vld [vmem:[#allocation4_spill] sm:$0xff] }
 0x565   :  { %18568 = vmatprep.subr.mxu0 %v21965_v0  ;;  %18603 = vmatprep.subr.mxu1 %v25275_v11 }
 0x566   :  { %18569 = vmatpush3.msra.mxu0 %v21965_v0  ;;  %18604 = vmatpush3.msra.mxu1 %v25275_v11  ;;  %v25281_v0 = vld [vmem:[#allocation7_spill] sm:$0xff] }
 0x567   :  { %18570 = vmatprep.subr.mxu0 %v21975_v37  ;;  %18605 = vmatprep.mubr.f32.mxu1 %v22049_v25 }
 0x568   :  { %18571 = vmatpush3.msra.mxu0 %v21975_v37  ;;  %18606 = vmatmul.mubr.f32.vlgmr.msra.gmra.mxu1 %v22057_v36  ;;  %v22119_v37 = vand.u32 4294901760, %v5818_v21 }
 0x569   :  { %18573 = vmatmul.mubr.f32.vlgmr.msra.gmra.mxu0 %v21997_v2  ;;  %18594 = vmatprep.subr.mxu0 %v25276_v3  ;;  %v5932_v2 = vand.u32 4294901760, %v5931_v40 }
 0x56a   :  { %18595 = vmatpush3.msra.mxu0 %v25276_v3  ;;  %18598 = vmatprep.mubr.f32.mxu0 %v5372_v46  ;;  %v22125_v8 = vsub.f32 %v5818_v21, %v22119_v37  ;;  %v5809_v46 = vld [vmem:[%s25130_s3 + $0x30] sm:$0xff] }
 0x56b   :  { %18596 = vmatprep.subr.mxu0 %v25277_v48  ;;  %18615 = vmatprep.subr.mxu1 %v25276_v3  ;;  %v22245_v29 = vand.u32 4294901760, %v5809_v46 }
 0x56c   :  { %18597 = vmatpush3.msra.mxu0 %v25277_v48  ;;  %18616 = vmatpush3.msra.mxu1 %v25276_v3  ;;  %v22135_v6 = vand.u32 4294901760, %v22125_v8 }
 0x56d   :  { %18599 = vmatmul.mubr.f32.vlgmr.msra.gmra.mxu0 %v5382_v26  ;;  %18608 = vmatprep.subr.mxu0 %v25278_v32 }
 0x56e   :  { %18609 = vmatpush3.msra.mxu0 %v25278_v32  ;;  %18617 = vmatprep.subr.mxu1 %v25277_v48  ;;  %v5924_v47 = vsub.f32 %v22125_v8, %v22135_v6 }
 0x56f   :  { %18610 = vmatprep.subr.mxu0 %v25279_v57  ;;  %18612 = vmatprep.mubr.f32.mxu0 %v5369_v9  ;;  %v5810_v9 = vld [vmem:[%s25130_s3 + $0x38] sm:$0xff] }
 0x570   :  { %18611 = vmatpush3.msra.mxu0 %v25279_v57  ;;  %18618 = vmatpush3.msra.mxu1 %v25277_v48  ;;  %v5925_v50 = vand.u32 4294901760, %v5924_v47  ;;  %v22229_v10 = vand.u32 4294901760, %v5810_v9  ;;  %v5808_v47 = vld [vmem:[%s25130_s3 + $0x28] sm:$0xff] }
 0x571   :  { %18619 = vmatprep.mubr.f32.mxu1 %v5370_v15  ;;  %18613 = vmatmul.mubr.f32.vlgmr.msra.gmra.mxu0 %v5379_v17  ;;  %v5959_v17 = vsub.f32 %v22194_v41, %v22207_v49  ;;  %v22256_v33 = vand.u32 4294901760, %v5808_v47 }
 0x572   :  { %18620 = vmatmul.mubr.f32.vlgmr.msra.gmra.mxu1 %v5380_v55  ;;  %18622 = vmatprep.subr.mxu0 %v25280_v12  ;;  %v22227_v55 = vsub.f32 %v5811_v31, %v22212_v63  ;;  %v22242_v58 = vsub.f32 %v5810_v9, %v22229_v10  ;;  %v22271_v31 = vand.u32 4294901760, %v5807_v24 }
 0x573   :  { %18629 = vmatprep.subr.mxu1 %v25276_v3  ;;  %18623 = vmatpush3.msra.mxu0 %v25280_v12  ;;  %v5960_v26 = vand.u32 4294901760, %v5959_v17  ;;  %v22269_v27 = vsub.f32 %v5808_v47, %v22256_v33 }
 0x574   :  { %18630 = vmatpush3.msra.mxu1 %v25276_v3  ;;  %18624 = vmatprep.subr.mxu0 %v25281_v0  ;;  %v22239_v61 = vand.u32 4294901760, %v22227_v55  ;;  %v22254_v40 = vand.u32 4294901760, %v22242_v58 }
 0x575   :  { %18631 = vmatprep.subr.mxu1 %v25277_v48  ;;  %18625 = vmatpush3.msra.mxu0 %v25281_v0  ;;  %v22282_v17 = vand.u32 4294901760, %v22269_v27 }
 0x576   :  { %18626 = vmatprep.mubr.f32.mxu0 %v22049_v25  ;;  %18632 = vmatpush3.msra.mxu1 %v25277_v48 }
 0x577   :  { %18633 = vmatprep.mubr.f32.mxu1 %v22049_v25  ;;  %18627 = vmatmul.mubr.f32.vlgmr.msra.gmra.mxu0 %v22057_v36  ;;  %v22210_v25 = vsub.f32 %v5812_v43, %v22196_v34  ;;  %25283 = vst [vmem:[#allocation21_spill] sm:$0xff] %v22282_v17  ;;  %v5994_v47 = vsub.f32 %v22269_v27, %v22282_v17 }
 0x578   :  { %18634 = vmatmul.mubr.f32.vlgmr.msra.gmra.mxu1 %v22057_v36  ;;  %18636 = vmatprep.subr.mxu0 %v22119_v37  ;;  %v5952_v36 = vsub.f32 %v22185_v7, %v22200_v44 }
 0x579   :  { %18637 = vmatpush3.msra.mxu0 %v22119_v37  ;;  %18671 = vmatprep.subr.mxu1 %v5925_v50  ;;  %v22224_v15 = vand.u32 4294901760, %v22210_v25 }
 0x57a   :  { %18638 = vmatprep.subr.mxu0 %v22127_v18  ;;  %18672 = vmatpush3.msra.mxu1 %v5925_v50  ;;  %v5953_v60 = vand.u32 4294901760, %v5952_v36  ;;  %v5973_v50 = vsub.f32 %v22227_v55, %v22239_v61  ;;  %v5806_v36 = vld [vmem:[%s25130_s3 + $0x18] sm:$0xff] }
 0x57b   :  { %18639 = vmatpush3.msra.mxu0 %v22127_v18  ;;  %18673 = vmatprep.subr.mxu1 %v5932_v2  ;;  %v5966_v21 = vsub.f32 %v22210_v25, %v22224_v15 }
 0x57c   :  { %18640 = vmatprep.subr.mxu0 %v22140_v42  ;;  %18674 = vmatpush3.msra.mxu1 %v5932_v2  ;;  %v22260_v2 = vsub.f32 %v5809_v46, %v22245_v29  ;;  %v5974_v43 = vand.u32 4294901760, %v5973_v50  ;;  %v22287_v46 = vand.u32 4294901760, %v5806_v36 }
 0x57d   :  { %18641 = vmatpush3.msra.mxu0 %v22140_v42  ;;  %18675 = vmatprep.subr.mxu1 %v5939_v5  ;;  %v5967_v35 = vand.u32 4294901760, %v5966_v21  ;;  %v5805_v21 = vld [vmem:[%s25130_s3 + $0x10] sm:$0xff] }
 0x57e   :  { %18642 = vmatprep.subr.mxu0 %v22155_v23  ;;  %18676 = vmatpush3.msra.mxu1 %v5939_v5  ;;  %v5980_v5 = vsub.f32 %v22242_v58, %v22254_v40  ;;  %v22302_v50 = vsub.f32 %v5806_v36, %v22287_v46 }
 0x57f   :  { %18643 = vmatpush3.msra.mxu0 %v22155_v23  ;;  %18677 = vmatprep.subr.mxu1 %v5946_v14 }
 0x580   :  { %18644 = vmatprep.subr.mxu0 %v22171_v28  ;;  %18678 = vmatpush3.msra.mxu1 %v5946_v14  ;;  %v22275_v14 = vand.u32 4294901760, %v22260_v2  ;;  %v5981_v9 = vand.u32 4294901760, %v5980_v5  ;;  %v22314_v36 = vand.u32 4294901760, %v22302_v50 }
 0x581   :  { %18645 = vmatpush3.msra.mxu0 %v22171_v28  ;;  %18679 = vmatprep.subr.mxu1 %v5953_v60 }
 0x582   :  { %18646 = vmatprep.subr.mxu0 %v22182_v54  ;;  %18680 = vmatpush3.msra.mxu1 %v5953_v60  ;;  %25282 = vst [vmem:[#allocation20_spill] sm:$0xff] %v22275_v14  ;;  %v22285_v60 = vsub.f32 %v5807_v24, %v22271_v31  ;;  %v22304_v24 = vand.u32 4294901760, %v5805_v21  ;;  %25285 = vst [vmem:[#allocation23_spill] sm:$0xff] %v22314_v36 }
 0x583   :  { %18647 = vmatpush3.msra.mxu0 %v22182_v54  ;;  %18681 = vmatprep.subr.mxu1 %v5960_v26 }
 0x584   :  { %18648 = vmatprep.subr.mxu0 %v22196_v34  ;;  %18682 = vmatpush3.msra.mxu1 %v5960_v26  ;;  %v5987_v26 = vsub.f32 %v22260_v2, %v22275_v14  ;;  %v22317_v30 = vsub.f32 %v5805_v21, %v22304_v24  ;;  %v22331_v21 = vand.u32 4294901760, %v5803_v62 }
 0x585   :  { %18649 = vmatpush3.msra.mxu0 %v22196_v34  ;;  %18683 = vmatprep.subr.mxu1 %v5967_v35 }
 0x586   :  { %18650 = vmatprep.subr.mxu0 %v22212_v63  ;;  %18684 = vmatpush3.msra.mxu1 %v5967_v35  ;;  %v22299_v35 = vand.u32 4294901760, %v22285_v60  ;;  %v5988_v5 = vand.u32 4294901760, %v5987_v26  ;;  %v22320_v26 = vand.u32 4294901760, %v5804_v51  ;;  %v22329_v22 = vand.u32 4294901760, %v22317_v30 }
 0x587   :  { %18651 = vmatpush3.msra.mxu0 %v22212_v63  ;;  %18685 = vmatprep.subr.mxu1 %v5974_v43 }
 0x588   :  { %18652 = vmatprep.subr.mxu0 %v22229_v10  ;;  %18686 = vmatpush3.msra.mxu1 %v5974_v43  ;;  %25284 = vst [vmem:[#allocation22_spill] sm:$0xff] %v22299_v35  ;;  %v5995_v43 = vand.u32 4294901760, %v5994_v47  ;;  %v6001_v13 = vsub.f32 %v22285_v60, %v22299_v35  ;;  %v6008_v47 = vsub.f32 %v22302_v50, %v22314_v36  ;;  %25286 = vst [vmem:[#allocation24_spill] sm:$0xff] %v22329_v22 }
 0x589   :  { %18653 = vmatpush3.msra.mxu0 %v22229_v10  ;;  %18687 = vmatprep.subr.mxu1 %v5981_v9  ;;  %v22335_v59 = vsub.f32 %v5804_v51, %v22320_v26 }
 0x58a   :  { %18654 = vmatprep.subr.mxu0 %v22245_v29  ;;  %18688 = vmatpush3.msra.mxu1 %v5981_v9  ;;  %v6002_v9 = vand.u32 4294901760, %v6001_v13  ;;  %v6009_v0 = vand.u32 4294901760, %v6008_v47  ;;  %v6015_v13 = vsub.f32 %v22317_v30, %v22329_v22 }
 0x58b   :  { %18655 = vmatpush3.msra.mxu0 %v22245_v29  ;;  %18689 = vmatprep.subr.mxu1 %v5988_v5  ;;  %v22345_v12 = vand.u32 4294901760, %v22335_v59 }
 0x58c   :  { %18656 = vmatprep.subr.mxu0 %v22256_v33  ;;  %18690 = vmatpush3.msra.mxu1 %v5988_v5  ;;  %v22341_v5 = vsub.f32 %v5803_v62, %v22331_v21  ;;  %v6016_v51 = vand.u32 4294901760, %v6015_v13 }
 0x58d   :  { %18657 = vmatpush3.msra.mxu0 %v22256_v33  ;;  %18691 = vmatprep.subr.mxu1 %v5995_v43  ;;  %25287 = vst [vmem:[#allocation25_spill] sm:$0xff] %v22345_v12  ;;  %v6022_v62 = vsub.f32 %v22335_v59, %v22345_v12 }
 0x58e   :  { %18658 = vmatprep.subr.mxu0 %v22271_v31  ;;  %18692 = vmatpush3.msra.mxu1 %v5995_v43  ;;  %v22349_v57 = vand.u32 4294901760, %v22341_v5 }
 0x58f   :  { %18659 = vmatpush3.msra.mxu0 %v22271_v31  ;;  %18693 = vmatprep.subr.mxu1 %v6002_v9  ;;  %v6023_v47 = vand.u32 4294901760, %v6022_v62 }
 0x590   :  { %18660 = vmatprep.subr.mxu0 %v22287_v46  ;;  %18694 = vmatpush3.msra.mxu1 %v6002_v9  ;;  %25288 = vst [vmem:[#allocation26_spill] sm:$0xff] %v22349_v57  ;;  %v6029_v43 = vsub.f32 %v22341_v5, %v22349_v57 }
 0x591   :  { %18661 = vmatpush3.msra.mxu0 %v22287_v46  ;;  %18695 = vmatprep.subr.mxu1 %v6009_v0 }
 0x592   :  { %18662 = vmatprep.subr.mxu0 %v22304_v24  ;;  %18696 = vmatpush3.msra.mxu1 %v6009_v0  ;;  %v6030_v9 = vand.u32 4294901760, %v6029_v43 }
 0x593   :  { %18663 = vmatpush3.msra.mxu0 %v22304_v24  ;;  %18697 = vmatprep.subr.mxu1 %v6016_v51 }
 0x594   :  { %18664 = vmatprep.subr.mxu0 %v22320_v26  ;;  %18698 = vmatpush3.msra.mxu1 %v6016_v51 }
 0x595   :  { %18665 = vmatpush3.msra.mxu0 %v22320_v26  ;;  %18699 = vmatprep.subr.mxu1 %v6023_v47 }
 0x596   :  { %18666 = vmatprep.subr.mxu0 %v22331_v21  ;;  %18700 = vmatpush3.msra.mxu1 %v6023_v47 }
 0x597   :  { %18667 = vmatpush3.msra.mxu0 %v22331_v21  ;;  %18701 = vmatprep.subr.mxu1 %v6030_v9 }
 0x598   :  { %18706 = vmatprep.subr.mxu0 %v22125_v8  ;;  %18702 = vmatpush3.msra.mxu1 %v6030_v9 }
 0x599   :  { %18741 = vmatprep.subr.mxu1 %v22119_v37 }
 0x5ff   :  { %v18517_v13 = vpop.f32.mrf.mxu1 }
 0x601   :  { %v22360_v11 = vpop.f32.mrf.mxu1 }
 0x602   :  { %25290 = vst [vmem:[#allocation28_spill] sm:$0xff] %v22360_v11 }
 0x607   :  { %v18498_v32 = vpop.f32.mrf.mxu0 }
 0x608   :  { %v4919_v48 = vadd.f32 %v18517_v13, %v18498_v32 }
 0x609   :  { %v22358_v3 = vpop.f32.mrf.mxu0 }
 0x60a   :  { %25289 = vst [vmem:[#allocation27_spill] sm:$0xff] %v22358_v3 }
 0x610   :  { %v18555_v56 = vpop.f32.mrf.mxu1 }
 0x612   :  { %v22362_v62 = vpop.f32.mrf.mxu1 }
 0x613   :  { %25291 = vst [vmem:[#allocation29_spill] sm:$0xff] %v22362_v62 }
 0x618   :  { %v18536_v0 = vpop.f32.mrf.mxu0 }
 0x619   :  { %v5014_v19 = vadd.f32 %v18536_v0, %v4919_v48 }
 0x61a   :  { %v22364_v43 = vpop.f32.mrf.mxu0 }
 0x61b   :  { %v5103_v1 = vadd.f32 %v18555_v56, %v5014_v19  ;;  %25292 = vst [vmem:[#allocation30_spill] sm:$0xff] %v22364_v43 }
 0x622   :  { %v18593_v51 = vpop.f32.mrf.mxu1 }
 0x624   :  { %v22366_v47 = vpop.f32.mrf.mxu1 }
 0x625   :  { %25293 = vst [vmem:[#allocation31_spill] sm:$0xff] %v22366_v47 }
 0x628   :  { %v18607_v38 = vpop.f32.mrf.mxu1 }
 0x629   :  { %v18574_v9 = vpop.f32.mrf.mxu0 }
 0x62a   :  { %v5204_v52 = vadd.f32 %v18574_v9, %v5103_v1  ;;  %v5465_v11 = vpop.f32.mrf.mxu1 }
 0x62b   :  { %v22368_v57 = vpop.f32.mrf.mxu0 }
 0x62c   :  { %25294 = vst [vmem:[#allocation32_spill] sm:$0xff] %v22368_v57  ;;  %v22370_v32 = vadd.f32 %v18593_v51, %v5204_v52 }
 0x62d   :  { %v18600_v13 = vpop.f32.mrf.mxu0 }
 0x62e   :  { %25295 = vst [vmem:[#allocation33_spill] sm:$0xff] %v22370_v32  ;;  %v5472_v48 = vadd.f32 %v18607_v38, %v18600_v13 }
 0x62f   :  { %v5374_v3 = vpop.f32.mrf.mxu0 }
 0x630   :  { %v5466_v56 = vadd.f32 %v5465_v11, %v5374_v3 }
 0x631   :  { %v18614_v0 = vpop.f32.mrf.mxu0 }
 0x632   :  { %v5555_v19 = vadd.f32 %v18614_v0, %v5472_v48  ;;  %v18621_v62 = vpop.f32.mrf.mxu1 }
 0x633   :  { %v5547_v12 = vpop.f32.mrf.mxu0 }
 0x634   :  { %v5638_v22 = vadd.f32 %v18621_v62, %v5555_v19  ;;  %v5548_v43 = vadd.f32 %v5547_v12, %v5466_v56  ;;  %v5629_v36 = vpop.f32.mrf.mxu1 }
 0x636   :  { %v5630_v47 = vadd.f32 %v5629_v36, %v5548_v43  ;;  %v25308_v43 = vld [vmem:[#allocation33_spill] sm:$0xff] }
 0x637   :  { %v18628_v35 = vpop.f32.mrf.mxu0 }
 0x638   :  { %v5721_v1 = vadd.f32 %v18628_v35, %v5638_v22  ;;  %v18635_v9 = vpop.f32.mrf.mxu1 }
 0x639   :  { %v5714_v17 = vpop.f32.mrf.mxu0 }
 0x63a   :  { %v5800_v57 = vadd.f32 %v18635_v9, %v5721_v1  ;;  %v5715_v52 = vadd.f32 %v5714_v17, %v5630_v47  ;;  %v5793_v51 = vpop.f32.mrf.mxu1 }
 0x63c   :  { %v22372_v32 = vand.u32 4294901760, %v5800_v57  ;;  %v5794_v14 = vadd.f32 %v5793_v51, %v5715_v52 }
 0x63e   :  { %v22375_v38 = vsub.f32 %v5800_v57, %v22372_v32  ;;  %v22377_v11 = vand.u32 4294901760, %v5794_v14 }
 0x640   :  { %v5912_v3 = vand.u32 4294901760, %v22375_v38  ;;  %v5901_v12 = vsub.f32 %v5794_v14, %v22377_v11  ;;  %18703 = vmatprep.mubr.f32.mxu1 %v22377_v11 }
 0x641   :  { %18704 = vmatmul.mubr.f32.vlgmr.msra.gmra.mxu1 %v22372_v32 }
 0x642   :  { %18742 = vmatpush3.msra.mxu1 %v22119_v37  ;;  %v5902_v22 = vand.u32 4294901760, %v5901_v12  ;;  %v5913_v17 = vsub.f32 %v22375_v38, %v5912_v3 }
 0x643   :  { %18743 = vmatprep.subr.mxu1 %v22127_v18 }
 0x644   :  { %18744 = vmatpush3.msra.mxu1 %v22127_v18  ;;  %18773 = vmatprep.mubr.f32.mxu1 %v5902_v22  ;;  %v5903_v57 = vsub.f32 %v5901_v12, %v5902_v22  ;;  %v5914_v35 = vand.u32 4294901760, %v5913_v17 }
 0x645   :  { %18745 = vmatprep.subr.mxu1 %v22140_v42 }
 0x646   :  { %18746 = vmatpush3.msra.mxu1 %v22140_v42  ;;  %v5904_v14 = vand.u32 4294901760, %v5903_v57 }
 0x647   :  { %18747 = vmatprep.subr.mxu1 %v22155_v23 }
 0x648   :  { %18748 = vmatpush3.msra.mxu1 %v22155_v23  ;;  %18668 = vmatprep.mubr.f32.mxu0 %v5904_v14 }
 0x649   :  { %18749 = vmatprep.subr.mxu1 %v22171_v28  ;;  %18669 = vmatmul.mubr.f32.vlgmr.msra.gmra.mxu0 %v5914_v35 }
 0x64a   :  { %18707 = vmatpush3.msra.mxu0 %v22125_v8  ;;  %18750 = vmatpush3.msra.mxu1 %v22171_v28  ;;  %v25299_v8 = vld [vmem:[#allocation23_spill] sm:$0xff] }
 0x64b   :  { %18708 = vmatprep.subr.mxu0 %v22138_v4  ;;  %18738 = vmatprep.mubr.f32.mxu0 %v5901_v12 }
 0x64c   :  { %18751 = vmatprep.subr.mxu1 %v22182_v54  ;;  %18709 = vmatpush3.msra.mxu0 %v22138_v4  ;;  %v25302_v4 = vld [vmem:[#allocation26_spill] sm:$0xff] }
 0x64d   :  { %18752 = vmatpush3.msra.mxu1 %v22182_v54  ;;  %18710 = vmatprep.subr.mxu0 %v22153_v53 }
 0x64e   :  { %18753 = vmatprep.subr.mxu1 %v22196_v34  ;;  %18711 = vmatpush3.msra.mxu0 %v22153_v53  ;;  %v6516_v53 = vld [vmem:[%s25131_s11 + $0x10] sm:$0xff] }
 0x64f   :  { %18754 = vmatpush3.msra.mxu1 %v22196_v34  ;;  %18712 = vmatprep.subr.mxu0 %v22168_v45 }
 0x650   :  { %18755 = vmatprep.subr.mxu1 %v22212_v63  ;;  %18713 = vmatpush3.msra.mxu0 %v22168_v45  ;;  %v6515_v45 = vld [vmem:[%s25131_s11 + $0x8] sm:$0xff] }
 0x651   :  { %18756 = vmatpush3.msra.mxu1 %v22212_v63  ;;  %18714 = vmatprep.subr.mxu0 %v22185_v7 }
 0x652   :  { %18757 = vmatprep.subr.mxu1 %v22229_v10  ;;  %18715 = vmatpush3.msra.mxu0 %v22185_v7  ;;  %v6514_v7 = vld [vmem:[%s25131_s11] sm:$0xff] }
 0x653   :  { %18758 = vmatpush3.msra.mxu1 %v22229_v10  ;;  %18716 = vmatprep.subr.mxu0 %v22194_v41 }
 0x654   :  { %18759 = vmatprep.subr.mxu1 %v22245_v29  ;;  %18717 = vmatpush3.msra.mxu0 %v22194_v41 }
 0x655   :  { %18760 = vmatpush3.msra.mxu1 %v22245_v29  ;;  %18718 = vmatprep.subr.mxu0 %v22210_v25 }
 0x656   :  { %18761 = vmatprep.subr.mxu1 %v22256_v33  ;;  %18719 = vmatpush3.msra.mxu0 %v22210_v25 }
 0x657   :  { %18762 = vmatpush3.msra.mxu1 %v22256_v33  ;;  %18720 = vmatprep.subr.mxu0 %v22227_v55 }
 0x658   :  { %18763 = vmatprep.subr.mxu1 %v22271_v31  ;;  %18721 = vmatpush3.msra.mxu0 %v22227_v55 }
 0x659   :  { %18764 = vmatpush3.msra.mxu1 %v22271_v31  ;;  %18722 = vmatprep.subr.mxu0 %v22242_v58 }
 0x65a   :  { %18765 = vmatprep.subr.mxu1 %v22287_v46  ;;  %18723 = vmatpush3.msra.mxu0 %v22242_v58 }
 0x65b   :  { %18766 = vmatpush3.msra.mxu1 %v22287_v46  ;;  %18724 = vmatprep.subr.mxu0 %v22260_v2 }
 0x65c   :  { %18767 = vmatprep.subr.mxu1 %v22304_v24  ;;  %18725 = vmatpush3.msra.mxu0 %v22260_v2  ;;  %v25303_v2 = vld [vmem:[#allocation27_spill] sm:$0xff] }
 0x65d   :  { %18768 = vmatpush3.msra.mxu1 %v22304_v24  ;;  %18726 = vmatprep.subr.mxu0 %v22269_v27 }
 0x65e   :  { %18769 = vmatprep.subr.mxu1 %v22320_v26  ;;  %18727 = vmatpush3.msra.mxu0 %v22269_v27  ;;  %v25304_v27 = vld [vmem:[#allocation28_spill] sm:$0xff] }
 0x65f   :  { %18770 = vmatpush3.msra.mxu1 %v22320_v26  ;;  %18728 = vmatprep.subr.mxu0 %v22285_v60 }
 0x660   :  { %18771 = vmatprep.subr.mxu1 %v22331_v21  ;;  %18729 = vmatpush3.msra.mxu0 %v22285_v60  ;;  %v25305_v60 = vld [vmem:[#allocation30_spill] sm:$0xff] }
 0x661   :  { %18772 = vmatpush3.msra.mxu1 %v22331_v21  ;;  %18730 = vmatprep.subr.mxu0 %v22302_v50 }
 0x662   :  { %18774 = vmatmul.mubr.f32.vlgmr.msra.gmra.mxu1 %v5912_v3  ;;  %18811 = vmatprep.subr.mxu1 %v22119_v37 }
 0x663   :  { %18731 = vmatpush3.msra.mxu0 %v22302_v50  ;;  %18812 = vmatpush3.msra.mxu1 %v22119_v37  ;;  %v25298_v37 = vld [vmem:[#allocation22_spill] sm:$0xff]  ;;  %v25306_v50 = vld [vmem:[#allocation29_spill] sm:$0xff] }
 0x664   :  { %18843 = vmatprep.mubr.f32.mxu1 %v22377_v11  ;;  %18732 = vmatprep.subr.mxu0 %v22317_v30 }
 0x665   :  { %18813 = vmatprep.subr.mxu1 %v22127_v18  ;;  %18733 = vmatpush3.msra.mxu0 %v22317_v30  ;;  %v25297_v30 = vld [vmem:[#allocation21_spill] sm:$0xff] }
 0x666   :  { %18814 = vmatpush3.msra.mxu1 %v22127_v18  ;;  %18734 = vmatprep.subr.mxu0 %v22335_v59  ;;  %v25300_v18 = vld [vmem:[#allocation24_spill] sm:$0xff] }
 0x667   :  { %18815 = vmatprep.subr.mxu1 %v22140_v42  ;;  %18735 = vmatpush3.msra.mxu0 %v22335_v59  ;;  %v25296_v59 = vld [vmem:[#allocation20_spill] sm:$0xff] }
 0x668   :  { %18816 = vmatpush3.msra.mxu1 %v22140_v42  ;;  %18736 = vmatprep.subr.mxu0 %v22341_v5  ;;  %v6517_v42 = vld [vmem:[%s25131_s11 + $0x18] sm:$0xff] }
 0x669   :  { %18817 = vmatprep.subr.mxu1 %v22155_v23  ;;  %18737 = vmatpush3.msra.mxu0 %v22341_v5 }
 0x66a   :  { %18818 = vmatpush3.msra.mxu1 %v22155_v23  ;;  %18739 = vmatmul.mubr.f32.vlgmr.msra.gmra.mxu0 %v22375_v38 }
 0x66b   :  { %18776 = vmatprep.subr.mxu0 %v22135_v6  ;;  %18819 = vmatprep.subr.mxu1 %v22171_v28 }
 0x66c   :  { %18777 = vmatpush3.msra.mxu0 %v22135_v6  ;;  %18808 = vmatprep.mubr.f32.mxu0 %v22377_v11  ;;  %v25301_v6 = vld [vmem:[#allocation25_spill] sm:$0xff] }
 0x66d   :  { %18820 = vmatpush3.msra.mxu1 %v22171_v28  ;;  %18778 = vmatprep.subr.mxu0 %v22150_v20 }
 0x66e   :  { %18821 = vmatprep.subr.mxu1 %v22182_v54  ;;  %18779 = vmatpush3.msra.mxu0 %v22150_v20  ;;  %v22522_v20 = vand.u32 4294901760, %v6517_v42 }
 0x66f   :  { %18822 = vmatpush3.msra.mxu1 %v22182_v54  ;;  %18780 = vmatprep.subr.mxu0 %v22165_v39  ;;  %v22543_v54 = vand.u32 4294901760, %v6515_v45 }
 0x670   :  { %18823 = vmatprep.subr.mxu1 %v22196_v34  ;;  %18781 = vmatpush3.msra.mxu0 %v22165_v39  ;;  %v22528_v23 = vsub.f32 %v6517_v42, %v22522_v20  ;;  %v22530_v39 = vand.u32 4294901760, %v6516_v53 }
 0x671   :  { %18824 = vmatpush3.msra.mxu1 %v22196_v34  ;;  %18782 = vmatprep.subr.mxu0 %v22180_v16 }
 0x672   :  { %18825 = vmatprep.subr.mxu1 %v22212_v63  ;;  %18783 = vmatpush3.msra.mxu0 %v22180_v16  ;;  %v22538_v28 = vand.u32 4294901760, %v22528_v23  ;;  %v22541_v16 = vsub.f32 %v6516_v53, %v22530_v39 }
 0x673   :  { %18826 = vmatpush3.msra.mxu1 %v22212_v63  ;;  %18784 = vmatprep.subr.mxu0 %v22200_v44 }
 0x674   :  { %18827 = vmatprep.subr.mxu1 %v22229_v10  ;;  %18785 = vmatpush3.msra.mxu0 %v22200_v44  ;;  %v6642_v41 = vsub.f32 %v22528_v23, %v22538_v28  ;;  %v22553_v34 = vand.u32 4294901760, %v22541_v16  ;;  %v22556_v44 = vsub.f32 %v6515_v45, %v22543_v54 }
 0x675   :  { %18828 = vmatpush3.msra.mxu1 %v22229_v10  ;;  %18786 = vmatprep.subr.mxu0 %v22207_v49 }
 0x676   :  { %18829 = vmatprep.subr.mxu1 %v22245_v29  ;;  %18787 = vmatpush3.msra.mxu0 %v22207_v49  ;;  %v22558_v49 = vand.u32 4294901760, %v6514_v7  ;;  %v6643_v25 = vand.u32 4294901760, %v6642_v41  ;;  %v6649_v63 = vsub.f32 %v22541_v16, %v22553_v34 }
 0x677   :  { %18830 = vmatpush3.msra.mxu1 %v22245_v29  ;;  %18788 = vmatprep.subr.mxu0 %v22224_v15 }
 0x678   :  { %18831 = vmatprep.subr.mxu1 %v22256_v33  ;;  %18789 = vmatpush3.msra.mxu0 %v22224_v15  ;;  %v22565_v15 = vand.u32 4294901760, %v22556_v44  ;;  %v22569_v55 = vsub.f32 %v6514_v7, %v22558_v49  ;;  %v6650_v10 = vand.u32 4294901760, %v6649_v63  ;;  %v16219_v63 = vld [vmem:[%s25131_s11 + $0x38] sm:$0xff] }
 0x679   :  { %18832 = vmatpush3.msra.mxu1 %v22256_v33  ;;  %18790 = vmatprep.subr.mxu0 %v22239_v61 }
 0x67a   :  { %18833 = vmatprep.subr.mxu1 %v22271_v31  ;;  %18791 = vmatpush3.msra.mxu0 %v22239_v61  ;;  %v6656_v61 = vsub.f32 %v22556_v44, %v22565_v15  ;;  %v22576_v58 = vand.u32 4294901760, %v22569_v55 }
 0x67b   :  { %18834 = vmatpush3.msra.mxu1 %v22271_v31  ;;  %18792 = vmatprep.subr.mxu0 %v22254_v40  ;;  %v4913_v31 = vadd.f32 %v25304_v27, %v25303_v2 }
 0x67c   :  { %18835 = vmatprep.subr.mxu1 %v22287_v46  ;;  %18793 = vmatpush3.msra.mxu0 %v22254_v40  ;;  %v6657_v29 = vand.u32 4294901760, %v6656_v61  ;;  %v6663_v40 = vsub.f32 %v22569_v55, %v22576_v58 }
 0x67d   :  { %18836 = vmatpush3.msra.mxu1 %v22287_v46  ;;  %18794 = vmatprep.subr.mxu0 %v25296_v59  ;;  %v5007_v46 = vadd.f32 %v25305_v60, %v4913_v31  ;;  %v16217_v31 = vld [vmem:[%s25131_s11 + $0x28] sm:$0xff] }
 0x67e   :  { %18837 = vmatprep.subr.mxu1 %v22304_v24  ;;  %18795 = vmatpush3.msra.mxu0 %v25296_v59  ;;  %v6664_v33 = vand.u32 4294901760, %v6663_v40  ;;  %v22612_v40 = vand.u32 4294901760, %v16219_v63 }
 0x67f   :  { %18838 = vmatpush3.msra.mxu1 %v22304_v24  ;;  %18796 = vmatprep.subr.mxu0 %v25297_v30  ;;  %v5095_v24 = vadd.f32 %v25306_v50, %v5007_v46 }
 0x680   :  { %18839 = vmatprep.subr.mxu1 %v22320_v26  ;;  %18797 = vmatpush3.msra.mxu0 %v25297_v30 }
 0x681   :  { %18840 = vmatpush3.msra.mxu1 %v22320_v26  ;;  %18798 = vmatprep.subr.mxu0 %v25298_v37  ;;  %v25307_v26 = vld [vmem:[#allocation32_spill] sm:$0xff] }
 0x682   :  { %18841 = vmatprep.subr.mxu1 %v22331_v21  ;;  %18799 = vmatpush3.msra.mxu0 %v25298_v37 }
 0x683   :  { %18842 = vmatpush3.msra.mxu1 %v22331_v21  ;;  %18800 = vmatprep.subr.mxu0 %v25299_v8  ;;  %v5198_v21 = vadd.f32 %v25307_v26, %v5095_v24  ;;  %v22627_v24 = vsub.f32 %v16219_v63, %v22612_v40  ;;  %v22633_v26 = vand.u32 4294901760, %v16217_v31 }
 0x684   :  { %18844 = vmatmul.mubr.f32.vlgmr.msra.gmra.mxu1 %v22372_v32  ;;  %18801 = vmatpush3.msra.mxu0 %v25299_v8 }
 0x685   :  { %18802 = vmatprep.subr.mxu0 %v25300_v18  ;;  %18857 = vmatprep.subr.mxu1 %v6643_v25 }
 0x686   :  { %18803 = vmatpush3.msra.mxu0 %v25300_v18  ;;  %18858 = vmatpush3.msra.mxu1 %v6643_v25 }
 0x687   :  { %18804 = vmatprep.subr.mxu0 %v25301_v6  ;;  %18859 = vmatprep.subr.mxu1 %v6650_v10 }
 0x688   :  { %18805 = vmatpush3.msra.mxu0 %v25301_v6  ;;  %18860 = vmatpush3.msra.mxu1 %v6650_v10 }
 0x689   :  { %18806 = vmatprep.subr.mxu0 %v25302_v4  ;;  %18861 = vmatprep.subr.mxu1 %v6657_v29 }
 0x68a   :  { %18807 = vmatpush3.msra.mxu0 %v25302_v4  ;;  %18862 = vmatpush3.msra.mxu1 %v6657_v29 }
 0x68b   :  { %18809 = vmatmul.mubr.f32.vlgmr.msra.gmra.mxu0 %v22372_v32  ;;  %18846 = vmatprep.subr.mxu0 %v22522_v20  ;;  %v25309_v32 = vld [vmem:[#allocation31_spill] sm:$0xff] }
 0x68c   :  { %18847 = vmatpush3.msra.mxu0 %v22522_v20  ;;  %18863 = vmatprep.subr.mxu1 %v6664_v33  ;;  %v5283_v13 = vadd.f32 %v25309_v32, %v5198_v21  ;;  %v22648_v32 = vsub.f32 %v16217_v31, %v22633_v26 }
 0x68d   :  { %18848 = vmatprep.subr.mxu0 %v22530_v39  ;;  %18864 = vmatpush3.msra.mxu1 %v6664_v33  ;;  %v16218_v33 = vld [vmem:[%s25131_s11 + $0x30] sm:$0xff] }
 0x68e   :  { %18849 = vmatpush3.msra.mxu0 %v22530_v39  ;;  %18879 = vmatprep.subr.mxu1 %v22522_v20  ;;  %v22623_v60 = vand.u32 4294901760, %v16218_v33 }
 0x68f   :  { %18850 = vmatprep.subr.mxu0 %v22543_v54 }
 0x690   :  { %18851 = vmatpush3.msra.mxu0 %v22543_v54 }
 0x691   :  { %18852 = vmatprep.subr.mxu0 %v22558_v49 }
 0x692   :  { %18853 = vmatpush3.msra.mxu0 %v22558_v49 }
 0x693   :  { %18868 = vmatprep.subr.mxu0 %v22528_v23 }
 0x701   :  { %v18705_v5 = vpop.f32.mrf.mxu1 }
 0x703   :  { %v6067_v56 = vpop.f32.mrf.mxu1 }
 0x709   :  { %v18670_v36 = vpop.f32.mrf.mxu0 }
 0x70a   :  { %v5917_v47 = vadd.f32 %v18670_v36, %v25308_v43  ;;  %v16216_v36 = vld [vmem:[%s25131_s11 + $0x20] sm:$0xff] }
 0x70b   :  { %v5906_v62 = vpop.f32.mrf.mxu0 }
 0x70c   :  { %v5907_v0 = vadd.f32 %v5906_v62, %v5283_v13  ;;  %v6074_v19 = vadd.f32 %v18705_v5, %v5917_v47  ;;  %v22638_v5 = vsub.f32 %v16218_v33, %v22623_v60  ;;  %v22640_v62 = vand.u32 4294901760, %v16216_v36 }
 0x70d   :  { %v22644_v47 = vand.u32 4294901760, %v22627_v24 }
 0x70e   :  { %v6068_v51 = vadd.f32 %v6067_v56, %v5907_v0  ;;  %v22659_v0 = vsub.f32 %v16216_v36, %v22640_v62 }
 0x70f   :  { %v7176_v56 = vsub.f32 %v22627_v24, %v22644_v47 }
 0x722   :  { %v18775_v1 = vpop.f32.mrf.mxu1 }
 0x724   :  { %v6273_v11 = vpop.f32.mrf.mxu1 }
 0x72a   :  { %v18740_v48 = vpop.f32.mrf.mxu0 }
 0x72b   :  { %v6185_v52 = vadd.f32 %v18740_v48, %v6074_v19  ;;  %v22656_v48 = vand.u32 4294901760, %v22638_v5 }
 0x72c   :  { %v6177_v9 = vpop.f32.mrf.mxu0 }
 0x72d   :  { %v6178_v38 = vadd.f32 %v6177_v9, %v6068_v51  ;;  %v6282_v3 = vadd.f32 %v18775_v1, %v6185_v52  ;;  %v7183_v19 = vsub.f32 %v22638_v5, %v22656_v48  ;;  %v22678_v1 = vand.u32 4294901760, %v22659_v0 }
 0x72f   :  { %v6274_v57 = vadd.f32 %v6273_v11, %v6178_v38  ;;  %v7197_v52 = vsub.f32 %v22659_v0, %v22678_v1 }
 0x731   :  { %v7198_v38 = vand.u32 4294901760, %v7197_v52 }
 0x744   :  { %v18845_v12 = vpop.f32.mrf.mxu1 }
 0x746   :  { %v6493_v30 = vpop.f32.mrf.mxu1 }
 0x74b   :  { %v18810_v22 = vpop.f32.mrf.mxu0 }
 0x74c   :  { %v6407_v17 = vadd.f32 %v18810_v22, %v6282_v3 }
 0x74d   :  { %v6400_v14 = vpop.f32.mrf.mxu0 }
 0x74e   :  { %v22588_v35 = vadd.f32 %v18845_v12, %v6407_v17  ;;  %v6401_v59 = vadd.f32 %v6400_v14, %v6274_v57  ;;  %v16221_v17 = vld [vmem:[%s25131_s11 + $0x48] sm:$0xff] }
 0x750   :  { %v22590_v37 = vadd.f32 %v6493_v30, %v6401_v59  ;;  %v6509_v8 = vrot.slane %v22588_v35, 7  ;;  %v16220_v30 = vld [vmem:[%s25131_s11 + $0x40] sm:$0xff] }
 0x752   :  { %v6508_v18 = vrot.slane %v22590_v37, 7  ;;  %v7054_v13 = vsel %vm6518_vm6, %v22590_v37, 0  ;;  %v7587_v57 = vrot.slane %v22590_v37, 1  ;;  %v22748_v37 = vand.u32 4294901760, %v16221_v17 }
 0x754   :  { %v6511_v4 = vsel %vm1273_vm1, %v6509_v8, %v6508_v18  ;;  %v6510_v42 = vsel %vm1273_vm1, %v6508_v18, %v6509_v8  ;;  %v7588_v8 = vrot.slane %v22588_v35, 1 }
 0x755   :  { %v6512_v45 = vsel %vm1279_vm2, %v6511_v4, 0.0  ;;  %v6523_v7 = vsel %vm6518_vm6, %v6510_v42, 0  ;;  %v22759_v42 = vand.u32 4294901760, %v16220_v30 }
 0x756   :  { %v6520_v41 = vsel %vm6518_vm6, %v6512_v45, 0  ;;  %v22602_v25 = vand.u32 4294901760, %v6523_v7  ;;  %v7589_v4 = vsel %vm2470_vm3, %v7587_v57, %v7588_v8 }
 0x757   :  { %v22607_v10 = vand.u32 4294901760, %v6520_v41  ;;  %v22778_v63 = vsub.f32 %v16220_v30, %v22759_v42 }
 0x758   :  { %v6605_v61 = vsub.f32 %v6523_v7, %v22602_v25  ;;  %v22767_v7 = vsub.f32 %v16221_v17, %v22748_v37 }
 0x759   :  { %18865 = vmatprep.mubr.f32.mxu1 %v22607_v10  ;;  %v6595_v29 = vsub.f32 %v6520_v41, %v22607_v10  ;;  %v7599_v41 = vsel %vm6518_vm6, %v7589_v4, 0  ;;  %v22802_v31 = vand.u32 4294901760, %v22778_v63 }
 0x75a   :  { %18866 = vmatmul.mubr.f32.vlgmr.msra.gmra.mxu1 %v22602_v25  ;;  %v6606_v2 = vand.u32 4294901760, %v6605_v61 }
 0x75b   :  { %18880 = vmatpush3.msra.mxu1 %v22522_v20  ;;  %v6596_v27 = vand.u32 4294901760, %v6595_v29 }
 0x75c   :  { %18881 = vmatprep.subr.mxu1 %v22530_v39  ;;  %v6607_v50 = vsub.f32 %v6605_v61, %v6606_v2 }
 0x75d   :  { %18882 = vmatpush3.msra.mxu1 %v22530_v39  ;;  %18887 = vmatprep.mubr.f32.mxu1 %v6596_v27  ;;  %v6597_v46 = vsub.f32 %v6595_v29, %v6596_v27 }
 0x75e   :  { %18883 = vmatprep.subr.mxu1 %v22543_v54  ;;  %v6608_v43 = vand.u32 4294901760, %v6607_v50 }
 0x75f   :  { %18884 = vmatpush3.msra.mxu1 %v22543_v54  ;;  %v6598_v21 = vand.u32 4294901760, %v6597_v46 }
 0x760   :  { %18885 = vmatprep.subr.mxu1 %v22558_v49 }
 0x761   :  { %18886 = vmatpush3.msra.mxu1 %v22558_v49  ;;  %18854 = vmatprep.mubr.f32.mxu0 %v6598_v21 }
 0x762   :  { %18888 = vmatmul.mubr.f32.vlgmr.msra.gmra.mxu1 %v6606_v2  ;;  %18901 = vmatprep.subr.mxu1 %v22522_v20 }
 0x763   :  { %18855 = vmatmul.mubr.f32.vlgmr.msra.gmra.mxu0 %v6608_v43  ;;  %18902 = vmatpush3.msra.mxu1 %v22522_v20  ;;  %v22666_v20 = vand.u32 4294901760, %v7054_v13 }
 0x764   :  { %18869 = vmatpush3.msra.mxu0 %v22528_v23  ;;  %18909 = vmatprep.mubr.f32.mxu1 %v22607_v10  ;;  %v22669_v23 = vand.u32 4294901760, %v22648_v32 }
 0x765   :  { %18870 = vmatprep.subr.mxu0 %v22541_v16  ;;  %18876 = vmatprep.mubr.f32.mxu0 %v6595_v29  ;;  %v22689_v9 = vsub.f32 %v7054_v13, %v22666_v20  ;;  %v22788_v29 = vand.u32 4294901760, %v7599_v41 }
 0x766   :  { %18903 = vmatprep.subr.mxu1 %v22530_v39  ;;  %18871 = vmatpush3.msra.mxu0 %v22541_v16  ;;  %v7177_v16 = vand.u32 4294901760, %v7176_v56 }
 0x767   :  { %18904 = vmatpush3.msra.mxu1 %v22530_v39  ;;  %18872 = vmatprep.subr.mxu0 %v22556_v44  ;;  %v7057_v39 = vsel %vm6518_vm6, %v22588_v35, 0 }
 0x768   :  { %18905 = vmatprep.subr.mxu1 %v22543_v54  ;;  %18873 = vmatpush3.msra.mxu0 %v22556_v44  ;;  %v7190_v44 = vsub.f32 %v22648_v32, %v22669_v23 }
 0x769   :  { %18906 = vmatpush3.msra.mxu1 %v22543_v54  ;;  %18874 = vmatprep.subr.mxu0 %v22569_v55  ;;  %v7184_v54 = vand.u32 4294901760, %v7183_v19 }
 0x76a   :  { %18907 = vmatprep.subr.mxu1 %v22558_v49  ;;  %18875 = vmatpush3.msra.mxu0 %v22569_v55  ;;  %v22697_v55 = vand.u32 4294901760, %v7057_v39  ;;  %v7191_v51 = vand.u32 4294901760, %v7190_v44 }
 0x76b   :  { %18908 = vmatpush3.msra.mxu1 %v22558_v49  ;;  %18877 = vmatmul.mubr.f32.vlgmr.msra.gmra.mxu0 %v6605_v61  ;;  %v7130_v49 = vand.u32 4294901760, %v22689_v9 }
 0x76c   :  { %18890 = vmatprep.subr.mxu0 %v22538_v28  ;;  %18910 = vmatmul.mubr.f32.vlgmr.msra.gmra.mxu1 %v22602_v25 }
 0x76d   :  { %18923 = vmatprep.subr.mxu1 %v7177_v16  ;;  %18891 = vmatpush3.msra.mxu0 %v22538_v28  ;;  %v22706_v28 = vsub.f32 %v7057_v39, %v22697_v55  ;;  %v7131_v11 = vsub.f32 %v22689_v9, %v7130_v49 }
 0x76e   :  { %18898 = vmatprep.mubr.f32.mxu0 %v22607_v10  ;;  %18924 = vmatpush3.msra.mxu1 %v7177_v16  ;;  %v7590_v10 = vsel %vm2470_vm3, %v7588_v8, %v7587_v57 }
 0x76f   :  { %18931 = vmatprep.mubr.f32.mxu1 %v22666_v20  ;;  %18892 = vmatprep.subr.mxu0 %v22553_v34  ;;  %v7140_v3 = vand.u32 4294901760, %v22706_v28  ;;  %v7592_v2 = vsel %vm2478_vm5, %v7590_v10, 0.0 }
 0x770   :  { %18925 = vmatprep.subr.mxu1 %v7184_v54  ;;  %18893 = vmatpush3.msra.mxu0 %v22553_v34  ;;  %v16223_v34 = vld [vmem:[%s25131_s11 + $0x58] sm:$0xff]  ;;  %v7602_v50 = vsel %vm6518_vm6, %v7592_v2, 0 }
 0x771   :  { %18926 = vmatpush3.msra.mxu1 %v7184_v54  ;;  %18894 = vmatprep.subr.mxu0 %v22565_v15  ;;  %v22721_v12 = vand.u32 4294901760, %v16223_v34  ;;  %v7141_v22 = vsub.f32 %v22706_v28, %v7140_v3  ;;  %v22819_v21 = vand.u32 4294901760, %v7602_v50 }
 0x772   :  { %18927 = vmatprep.subr.mxu1 %v7191_v51  ;;  %18895 = vmatpush3.msra.mxu0 %v22565_v15  ;;  %v7132_v15 = vand.u32 4294901760, %v7131_v11 }
 0x773   :  { %18928 = vmatpush3.msra.mxu1 %v7191_v51  ;;  %18896 = vmatprep.subr.mxu0 %v22576_v58  ;;  %v22740_v59 = vsub.f32 %v16223_v34, %v22721_v12  ;;  %v7142_v18 = vand.u32 4294901760, %v7141_v22 }
 0x774   :  { %18929 = vmatprep.subr.mxu1 %v7198_v38  ;;  %18897 = vmatpush3.msra.mxu0 %v22576_v58  ;;  %v16222_v58 = vld [vmem:[%s25131_s11 + $0x50] sm:$0xff] }
 0x775   :  { %18930 = vmatpush3.msra.mxu1 %v7198_v38  ;;  %18899 = vmatmul.mubr.f32.vlgmr.msra.gmra.mxu0 %v22602_v25  ;;  %v22735_v14 = vand.u32 4294901760, %v16222_v58  ;;  %v22763_v45 = vand.u32 4294901760, %v22740_v59 }
 0x776   :  { %18912 = vmatprep.subr.mxu0 %v22612_v40  ;;  %18932 = vmatmul.mubr.f32.vlgmr.msra.gmra.mxu1 %v22697_v55 }
 0x777   :  { %18945 = vmatprep.subr.mxu1 %v22612_v40  ;;  %18913 = vmatpush3.msra.mxu0 %v22612_v40  ;;  %v22757_v35 = vsub.f32 %v16222_v58, %v22735_v14  ;;  %v7721_v61 = vsub.f32 %v22740_v59, %v22763_v45 }
 0x778   :  { %18920 = vmatprep.mubr.f32.mxu0 %v7132_v15  ;;  %18946 = vmatpush3.msra.mxu1 %v22612_v40 }
 0x779   :  { %18953 = vmatprep.mubr.f32.mxu1 %v7130_v49  ;;  %18914 = vmatprep.subr.mxu0 %v22623_v60  ;;  %v22775_v25 = vand.u32 4294901760, %v22757_v35 }
 0x77a   :  { %18947 = vmatprep.subr.mxu1 %v22623_v60  ;;  %18915 = vmatpush3.msra.mxu0 %v22623_v60 }
 0x77b   :  { %18948 = vmatpush3.msra.mxu1 %v22623_v60  ;;  %18916 = vmatprep.subr.mxu0 %v22633_v26  ;;  %v7728_v27 = vsub.f32 %v22757_v35, %v22775_v25 }
 0x77c   :  { %18949 = vmatprep.subr.mxu1 %v22633_v26  ;;  %18917 = vmatpush3.msra.mxu0 %v22633_v26 }
 0x77d   :  { %18950 = vmatpush3.msra.mxu1 %v22633_v26  ;;  %18918 = vmatprep.subr.mxu0 %v22640_v62  ;;  %v7729_v36 = vand.u32 4294901760, %v7728_v27  ;;  %v16225_v27 = vld [vmem:[%s25125_s1 + $0x48] sm:$0xff] }
 0x77e   :  { %18951 = vmatprep.subr.mxu1 %v22640_v62  ;;  %18919 = vmatpush3.msra.mxu0 %v22640_v62 }
 0x77f   :  { %18952 = vmatpush3.msra.mxu1 %v22640_v62  ;;  %18921 = vmatmul.mubr.f32.vlgmr.msra.gmra.mxu0 %v7142_v18 }
 0x780   :  { %18934 = vmatprep.subr.mxu0 %v22627_v24  ;;  %18954 = vmatmul.mubr.f32.vlgmr.msra.gmra.mxu1 %v7140_v3 }
 0x781   :  { %18967 = vmatprep.subr.mxu1 %v22612_v40  ;;  %18935 = vmatpush3.msra.mxu0 %v22627_v24  ;;  %v7674_v24 = vsub.f32 %v7599_v41, %v22788_v29 }
 0x782   :  { %18942 = vmatprep.mubr.f32.mxu0 %v22689_v9  ;;  %18968 = vmatpush3.msra.mxu1 %v22612_v40  ;;  %v22791_v40 = vand.u32 4294901760, %v22767_v7 }
 0x783   :  { %18975 = vmatprep.mubr.f32.mxu1 %v22666_v20  ;;  %18936 = vmatprep.subr.mxu0 %v22638_v5 }
 0x784   :  { %18969 = vmatprep.subr.mxu1 %v22623_v60  ;;  %18937 = vmatpush3.msra.mxu0 %v22638_v5  ;;  %v7735_v46 = vsub.f32 %v22767_v7, %v22791_v40 }
 0x785   :  { %18970 = vmatpush3.msra.mxu1 %v22623_v60  ;;  %18938 = vmatprep.subr.mxu0 %v22648_v32  ;;  %v7722_v60 = vand.u32 4294901760, %v7721_v61 }
 0x786   :  { %18971 = vmatprep.subr.mxu1 %v22633_v26  ;;  %18939 = vmatpush3.msra.mxu0 %v22648_v32  ;;  %v7736_v5 = vand.u32 4294901760, %v7735_v46 }
 0x787   :  { %18972 = vmatpush3.msra.mxu1 %v22633_v26  ;;  %18940 = vmatprep.subr.mxu0 %v22659_v0  ;;  %v7742_v26 = vsub.f32 %v22778_v63, %v22802_v31 }
 0x788   :  { %18973 = vmatprep.subr.mxu1 %v22640_v62  ;;  %18941 = vmatpush3.msra.mxu0 %v22659_v0 }
 0x789   :  { %18974 = vmatpush3.msra.mxu1 %v22640_v62  ;;  %18943 = vmatmul.mubr.f32.vlgmr.msra.gmra.mxu0 %v22706_v28  ;;  %v7675_v62 = vand.u32 4294901760, %v7674_v24  ;;  %v7743_v43 = vand.u32 4294901760, %v7742_v26 }
 0x78a   :  { %18956 = vmatprep.subr.mxu0 %v22644_v47  ;;  %18976 = vmatmul.mubr.f32.vlgmr.msra.gmra.mxu1 %v22697_v55 }
 0x78b   :  { %18989 = vmatprep.subr.mxu1 %v7722_v60  ;;  %18957 = vmatpush3.msra.mxu0 %v22644_v47  ;;  %v7684_v47 = vsub.f32 %v7602_v50, %v22819_v21  ;;  %v7676_v32 = vsub.f32 %v7674_v24, %v7675_v62  ;;  %v8141_v50 = vsel %vm51_vm0, %v16225_v27, 0 }
 0x78c   :  { %18964 = vmatprep.mubr.f32.mxu0 %v22666_v20  ;;  %18990 = vmatpush3.msra.mxu1 %v7722_v60  ;;  %v16224_v20 = vld [vmem:[%s25125_s1 + $0x40] sm:$0xff] }
 0x78d   :  { %18997 = vmatprep.mubr.f32.mxu1 %v22788_v29  ;;  %18958 = vmatprep.subr.mxu0 %v22656_v48  ;;  %v7685_v13 = vand.u32 4294901760, %v7684_v47 }
 0x78e   :  { %18991 = vmatprep.subr.mxu1 %v7729_v36  ;;  %18959 = vmatpush3.msra.mxu0 %v22656_v48  ;;  %v7677_v48 = vand.u32 4294901760, %v7676_v32 }
 0x78f   :  { %18992 = vmatpush3.msra.mxu1 %v7729_v36  ;;  %18960 = vmatprep.subr.mxu0 %v22669_v23  ;;  %v7686_v0 = vsub.f32 %v7684_v47, %v7685_v13 }
 0x790   :  { %18993 = vmatprep.subr.mxu1 %v7736_v5  ;;  %18961 = vmatpush3.msra.mxu0 %v22669_v23  ;;  %v8138_v23 = vsel %vm51_vm0, %v16224_v20, 0 }
 0x791   :  { %18994 = vmatpush3.msra.mxu1 %v7736_v5  ;;  %18962 = vmatprep.subr.mxu0 %v22678_v1  ;;  %v7687_v56 = vand.u32 4294901760, %v7686_v0  ;;  %v22880_v19 = vand.u32 4294901760, %v8138_v23 }
 0x792   :  { %18995 = vmatprep.subr.mxu1 %v7743_v43  ;;  %18963 = vmatpush3.msra.mxu0 %v22678_v1 }
 0x793   :  { %18996 = vmatpush3.msra.mxu1 %v7743_v43  ;;  %18965 = vmatmul.mubr.f32.vlgmr.msra.gmra.mxu0 %v22697_v55  ;;  %v22883_v1 = vsub.f32 %v8138_v23, %v22880_v19  ;;  %v22894_v43 = vand.u32 4294901760, %v8141_v50 }
 0x794   :  { %18978 = vmatprep.subr.mxu0 %v22721_v12  ;;  %18998 = vmatmul.mubr.f32.vlgmr.msra.gmra.mxu1 %v22819_v21 }
 0x795   :  { %19011 = vmatprep.subr.mxu1 %v22721_v12  ;;  %18979 = vmatpush3.msra.mxu0 %v22721_v12  ;;  %v8212_v16 = vand.u32 4294901760, %v22883_v1  ;;  %v8221_v23 = vsub.f32 %v8141_v50, %v22894_v43 }
 0x796   :  { %18986 = vmatprep.mubr.f32.mxu0 %v7677_v48  ;;  %19012 = vmatpush3.msra.mxu1 %v22721_v12 }
 0x797   :  { %19019 = vmatprep.mubr.f32.mxu1 %v7675_v62  ;;  %18980 = vmatprep.subr.mxu0 %v22735_v14  ;;  %v8213_v39 = vsub.f32 %v22883_v1, %v8212_v16 }
 0x798   :  { %19013 = vmatprep.subr.mxu1 %v22735_v14  ;;  %18981 = vmatpush3.msra.mxu0 %v22735_v14 }
 0x799   :  { %19014 = vmatpush3.msra.mxu1 %v22735_v14  ;;  %18982 = vmatprep.subr.mxu0 %v22748_v37  ;;  %v8214_v44 = vand.u32 4294901760, %v8213_v39 }
 0x79a   :  { %19015 = vmatprep.subr.mxu1 %v22748_v37  ;;  %18983 = vmatpush3.msra.mxu0 %v22748_v37 }
 0x79b   :  { %19016 = vmatpush3.msra.mxu1 %v22748_v37  ;;  %18984 = vmatprep.subr.mxu0 %v22759_v42 }
 0x79c   :  { %19017 = vmatprep.subr.mxu1 %v22759_v42  ;;  %18985 = vmatpush3.msra.mxu0 %v22759_v42 }
 0x79d   :  { %19018 = vmatpush3.msra.mxu1 %v22759_v42  ;;  %18987 = vmatmul.mubr.f32.vlgmr.msra.gmra.mxu0 %v7687_v56 }
 0x79e   :  { %19000 = vmatprep.subr.mxu0 %v22740_v59  ;;  %19020 = vmatmul.mubr.f32.vlgmr.msra.gmra.mxu1 %v7685_v13 }
 0x79f   :  { %19033 = vmatprep.subr.mxu1 %v22721_v12  ;;  %19001 = vmatpush3.msra.mxu0 %v22740_v59 }
 0x7a0   :  { %19008 = vmatprep.mubr.f32.mxu0 %v7674_v24  ;;  %19034 = vmatpush3.msra.mxu1 %v22721_v12 }
 0x7a1   :  { %19041 = vmatprep.mubr.f32.mxu1 %v22788_v29  ;;  %19002 = vmatprep.subr.mxu0 %v22757_v35 }
 0x7a2   :  { %19035 = vmatprep.subr.mxu1 %v22735_v14  ;;  %19003 = vmatpush3.msra.mxu0 %v22757_v35 }
 0x7a3   :  { %19036 = vmatpush3.msra.mxu1 %v22735_v14  ;;  %19004 = vmatprep.subr.mxu0 %v22767_v7 }
 0x7a4   :  { %19037 = vmatprep.subr.mxu1 %v22748_v37  ;;  %19005 = vmatpush3.msra.mxu0 %v22767_v7 }
 0x7a5   :  { %19038 = vmatpush3.msra.mxu1 %v22748_v37  ;;  %19006 = vmatprep.subr.mxu0 %v22778_v63 }
 0x7a6   :  { %19039 = vmatprep.subr.mxu1 %v22759_v42  ;;  %19007 = vmatpush3.msra.mxu0 %v22778_v63 }
 0x7a7   :  { %19040 = vmatpush3.msra.mxu1 %v22759_v42  ;;  %19009 = vmatmul.mubr.f32.vlgmr.msra.gmra.mxu0 %v7684_v47 }
 0x7a8   :  { %19022 = vmatprep.subr.mxu0 %v22763_v45  ;;  %19042 = vmatmul.mubr.f32.vlgmr.msra.gmra.mxu1 %v22819_v21 }
 0x7a9   :  { %19023 = vmatpush3.msra.mxu0 %v22763_v45  ;;  %19030 = vmatprep.mubr.f32.mxu0 %v22788_v29 }
 0x7aa   :  { %19024 = vmatprep.subr.mxu0 %v22775_v25  ;;  %19055 = vmatprep.mubr.f32.mxu1 %v22880_v19 }
 0x7ab   :  { %19025 = vmatpush3.msra.mxu0 %v22775_v25 }
 0x7ac   :  { %19026 = vmatprep.subr.mxu0 %v22791_v40 }
 0x7ad   :  { %19027 = vmatpush3.msra.mxu0 %v22791_v40 }
 0x7ae   :  { %19028 = vmatprep.subr.mxu0 %v22802_v31 }
 0x7af   :  { %19029 = vmatpush3.msra.mxu0 %v22802_v31 }
 0x7b0   :  { %19031 = vmatmul.mubr.f32.vlgmr.msra.gmra.mxu0 %v22819_v21 }
 0x7b1   :  { %19048 = vmatprep.mubr.f32.mxu0 %v8214_v44 }
 0x81a   :  { %v18867_v54 = vpop.f32.mrf.mxu1 }
 0x81c   :  { %v6701_v51 = vpop.f32.mrf.mxu1 }
 0x822   :  { %v18889_v49 = vpop.f32.mrf.mxu1 }
 0x823   :  { %v18856_v9 = vpop.f32.mrf.mxu0 }
 0x824   :  { %v6871_v11 = vpop.f32.mrf.mxu1  ;;  %v6708_v17 = vadd.f32 %v18867_v54, %v18856_v9 }
 0x825   :  { %v6600_v52 = vpop.f32.mrf.mxu0 }
 0x826   :  { %v6702_v59 = vadd.f32 %v6701_v51, %v6600_v52 }
 0x82b   :  { %v18878_v55 = vpop.f32.mrf.mxu0 }
 0x82c   :  { %v18911_v34 = vpop.f32.mrf.mxu1  ;;  %v6795_v30 = vadd.f32 %v18878_v55, %v6708_v17 }
 0x82d   :  { %v6787_v38 = vpop.f32.mrf.mxu0 }
 0x82e   :  { %v7043_v12 = vpop.f32.mrf.mxu1  ;;  %v6788_v37 = vadd.f32 %v6787_v38, %v6702_v59  ;;  %v6880_v4 = vadd.f32 %v18889_v49, %v6795_v30 }
 0x830   :  { %v6872_v7 = vadd.f32 %v6871_v11, %v6788_v37 }
 0x835   :  { %v18900_v28 = vpop.f32.mrf.mxu0 }
 0x836   :  { %v18933_v58 = vpop.f32.mrf.mxu1  ;;  %v6969_v45 = vadd.f32 %v18900_v28, %v6880_v4  ;;  %v8222_v28 = vand.u32 4294901760, %v8221_v23 }
 0x837   :  { %v6962_v3 = vpop.f32.mrf.mxu0 }
 0x838   :  { %v7235_v14 = vpop.f32.mrf.mxu1  ;;  %v6963_v25 = vadd.f32 %v6962_v3, %v6872_v7  ;;  %v7050_v10 = vadd.f32 %v18911_v34, %v6969_v45 }
 0x83a   :  { %v7044_v2 = vadd.f32 %v7043_v12, %v6963_v25  ;;  %v8647_v25 = vld [vmem:[%s25132_s6 + $0x10] sm:$0xff] }
 0x83f   :  { %v18922_v15 = vpop.f32.mrf.mxu0 }
 0x840   :  { %v18955_v8 = vpop.f32.mrf.mxu1  ;;  %v7145_v40 = vadd.f32 %v18922_v15, %v7050_v10  ;;  %v8646_v10 = vld [vmem:[%s25132_s6 + $0x8] sm:$0xff] }
 0x841   :  { %v7134_v22 = vpop.f32.mrf.mxu0 }
 0x842   :  { %v7405_v42 = vpop.f32.mrf.mxu1  ;;  %v7135_v60 = vadd.f32 %v7134_v22, %v7044_v2  ;;  %v7242_v24 = vadd.f32 %v18933_v58, %v7145_v40  ;;  %v22977_v40 = vand.u32 4294901760, %v8646_v10  ;;  %v8645_v2 = vld [vmem:[%s25132_s6] sm:$0xff] }
 0x844   :  { %v7236_v5 = vadd.f32 %v7235_v14, %v7135_v60  ;;  %v22990_v60 = vsub.f32 %v8646_v10, %v22977_v40 }
 0x849   :  { %v18944_v57 = vpop.f32.mrf.mxu0 }
 0x84a   :  { %v18977_v41 = vpop.f32.mrf.mxu1  ;;  %v7329_v21 = vadd.f32 %v18944_v57, %v7242_v24  ;;  %v8223_v57 = vsub.f32 %v8221_v23, %v8222_v28 }
 0x84b   :  { %v7321_v18 = vpop.f32.mrf.mxu0 }
 0x84c   :  { %v7577_v29 = vpop.f32.mrf.mxu1  ;;  %v7322_v13 = vadd.f32 %v7321_v18, %v7236_v5  ;;  %v7414_v56 = vadd.f32 %v18955_v8, %v7329_v21  ;;  %v8224_v37 = vand.u32 4294901760, %v8223_v57 }
 0x84e   :  { %v7406_v9 = vadd.f32 %v7405_v42, %v7322_v13 }
 0x853   :  { %v18966_v35 = vpop.f32.mrf.mxu0 }
 0x854   :  { %v18999_v31 = vpop.f32.mrf.mxu1  ;;  %v7503_v44 = vadd.f32 %v18966_v35, %v7414_v56 }
 0x855   :  { %v7496_v63 = vpop.f32.mrf.mxu0 }
 0x856   :  { %v7780_v26 = vpop.f32.mrf.mxu1  ;;  %v7497_v51 = vadd.f32 %v7496_v63, %v7406_v9  ;;  %v7584_v34 = vadd.f32 %v18977_v41, %v7503_v44 }
 0x858   :  { %v7578_v58 = vadd.f32 %v7577_v29, %v7497_v51 }
 0x85d   :  { %v18988_v61 = vpop.f32.mrf.mxu0 }
 0x85e   :  { %v7787_v62 = vadd.f32 %v18999_v31, %v18988_v61  ;;  %v19021_v47 = vpop.f32.mrf.mxu1 }
 0x85f   :  { %v7679_v46 = vpop.f32.mrf.mxu0 }
 0x860   :  { %v7781_v48 = vadd.f32 %v7780_v26, %v7679_v46  ;;  %v7950_v39 = vpop.f32.mrf.mxu1  ;;  %v22992_v46 = vand.u32 4294901760, %v8645_v2 }
 0x862   :  { %v23002_v26 = vsub.f32 %v8645_v2, %v22992_v46 }
 0x867   :  { %v19010_v36 = vpop.f32.mrf.mxu0 }
 0x868   :  { %v7874_v0 = vadd.f32 %v19010_v36, %v7787_v62  ;;  %v19043_v52 = vpop.f32.mrf.mxu1  ;;  %v22999_v36 = vand.u32 4294901760, %v22990_v60  ;;  %v23009_v62 = vand.u32 4294901760, %v23002_v26 }
 0x869   :  { %v7866_v32 = vpop.f32.mrf.mxu0 }
 0x86a   :  { %v7867_v20 = vadd.f32 %v7866_v32, %v7781_v48  ;;  %v7959_v54 = vadd.f32 %v19021_v47, %v7874_v0  ;;  %v8122_v12 = vpop.f32.mrf.mxu1  ;;  %v8786_v5 = vsub.f32 %v22990_v60, %v22999_v36  ;;  %v8793_v47 = vsub.f32 %v23002_v26, %v23009_v62 }
 0x86c   :  { %v7951_v38 = vadd.f32 %v7950_v39, %v7867_v20  ;;  %v8794_v32 = vand.u32 4294901760, %v8793_v47 }
 0x870   :  { %v19032_v55 = vpop.f32.mrf.mxu0 }
 0x871   :  { %v8048_v49 = vadd.f32 %v19032_v55, %v7959_v54 }
 0x872   :  { %v8041_v11 = vpop.f32.mrf.mxu0 }
 0x873   :  { %v8129_v3 = vadd.f32 %v19043_v52, %v8048_v49  ;;  %v8042_v15 = vadd.f32 %v8041_v11, %v7951_v38 }
 0x875   :  { %v8133_v22 = vadd.f32 %v8129_v3, %v7584_v34  ;;  %v8123_v17 = vadd.f32 %v8122_v12, %v8042_v15 }
 0x877   :  { %v22897_v14 = vand.u32 4294901760, %v8133_v22  ;;  %v8132_v59 = vadd.f32 %v8123_v17, %v7578_v58 }
 0x879   :  { %v22900_v30 = vsub.f32 %v8133_v22, %v22897_v14  ;;  %v22902_v8 = vand.u32 4294901760, %v8132_v59  ;;  %19044 = vmatprep.subr.mxu0 %v22897_v14 }
 0x87a   :  { %19045 = vmatpush3.msra.mxu0 %v22897_v14 }
 0x87b   :  { %v22907_v18 = vsub.f32 %v8132_v59, %v22902_v8  ;;  %19046 = vmatprep.subr.mxu0 %v22902_v8  ;;  %v22911_v4 = vand.u32 4294901760, %v22900_v30 }
 0x87c   :  { %19047 = vmatpush3.msra.mxu0 %v22902_v8 }
 0x87d   :  { %19058 = vmatprep.subr.mxu0 %v22900_v30  ;;  %19049 = vmatmul.mubr.f32.vlgmr.msra.gmra.mxu0 %v8224_v37  ;;  %v8262_v35 = vsub.f32 %v22900_v30, %v22911_v4  ;;  %v22918_v42 = vand.u32 4294901760, %v22907_v18 }
 0x87e   :  { %19059 = vmatpush3.msra.mxu0 %v22900_v30  ;;  %19062 = vmatprep.mubr.f32.mxu0 %v22883_v1  ;;  %v8648_v1 = vld [vmem:[%s25132_s6 + $0x18] sm:$0xff] }
 0x87f   :  { %19060 = vmatprep.subr.mxu0 %v22907_v18  ;;  %v22923_v45 = vand.u32 4294901760, %v8262_v35  ;;  %v8269_v7 = vsub.f32 %v22907_v18, %v22918_v42 }
 0x880   :  { %19061 = vmatpush3.msra.mxu0 %v22907_v18 }
 0x881   :  { %19051 = vmatprep.subr.mxu1 %v22923_v45  ;;  %19072 = vmatprep.subr.mxu0 %v22911_v4  ;;  %v22930_v41 = vand.u32 4294901760, %v8269_v7 }
 0x882   :  { %19052 = vmatpush3.msra.mxu1 %v22923_v45  ;;  %19063 = vmatmul.mubr.f32.vlgmr.msra.gmra.mxu0 %v8221_v23 }
 0x883   :  { %19073 = vmatpush3.msra.mxu0 %v22911_v4  ;;  %19053 = vmatprep.subr.mxu1 %v22930_v41 }
 0x884   :  { %19074 = vmatprep.subr.mxu0 %v22918_v42  ;;  %19054 = vmatpush3.msra.mxu1 %v22930_v41 }
 0x885   :  { %19075 = vmatpush3.msra.mxu0 %v22918_v42  ;;  %19056 = vmatmul.mubr.f32.vlgmr.msra.gmra.mxu1 %v22894_v43 }
 0x886   :  { %19065 = vmatprep.subr.mxu1 %v22897_v14  ;;  %19069 = vmatprep.mubr.f32.mxu1 %v8212_v16  ;;  %v22956_v16 = vand.u32 4294901760, %v8648_v1 }
 0x887   :  { %19066 = vmatpush3.msra.mxu1 %v22897_v14  ;;  %19076 = vmatprep.mubr.f32.mxu0 %v22880_v19 }
 0x888   :  { %19067 = vmatprep.subr.mxu1 %v22902_v8  ;;  %19077 = vmatmul.mubr.f32.vlgmr.msra.gmra.mxu0 %v22894_v43  ;;  %v22962_v63 = vsub.f32 %v8648_v1, %v22956_v16 }
 0x889   :  { %19068 = vmatpush3.msra.mxu1 %v22902_v8  ;;  %19086 = vmatprep.subr.mxu0 %v22956_v16 }
 0x88a   :  { %19070 = vmatmul.mubr.f32.vlgmr.msra.gmra.mxu1 %v8222_v28  ;;  %19079 = vmatprep.subr.mxu1 %v22897_v14  ;;  %v22972_v61 = vand.u32 4294901760, %v22962_v63 }
 0x88b   :  { %19080 = vmatpush3.msra.mxu1 %v22897_v14  ;;  %19083 = vmatprep.mubr.f32.mxu1 %v22880_v19  ;;  %v22964_v19 = vand.u32 4294901760, %v8647_v25 }
 0x88c   :  { %19081 = vmatprep.subr.mxu1 %v22902_v8  ;;  %19087 = vmatpush3.msra.mxu0 %v22956_v16  ;;  %v8772_v27 = vsub.f32 %v22962_v63, %v22972_v61 }
 0x88d   :  { %19082 = vmatpush3.msra.mxu1 %v22902_v8  ;;  %v22975_v29 = vsub.f32 %v8647_v25, %v22964_v19  ;;  %19088 = vmatprep.subr.mxu0 %v22964_v19 }
 0x88e   :  { %19084 = vmatmul.mubr.f32.vlgmr.msra.gmra.mxu1 %v22894_v43  ;;  %19089 = vmatpush3.msra.mxu0 %v22964_v19  ;;  %v8773_v50 = vand.u32 4294901760, %v8772_v27  ;;  %v8787_v43 = vand.u32 4294901760, %v8786_v5 }
 0x88f   :  { %v22987_v31 = vand.u32 4294901760, %v22975_v29  ;;  %19090 = vmatprep.subr.mxu0 %v22977_v40 }
 0x890   :  { %19091 = vmatpush3.msra.mxu0 %v22977_v40  ;;  %19097 = vmatprep.subr.mxu1 %v8773_v50 }
 0x891   :  { %v8779_v24 = vsub.f32 %v22975_v29, %v22987_v31  ;;  %19092 = vmatprep.subr.mxu0 %v22992_v46  ;;  %19098 = vmatpush3.msra.mxu1 %v8773_v50  ;;  %v16226_v50 = vld [vmem:[%s25125_s1 + $0x70] sm:$0xff] }
 0x892   :  { %19093 = vmatpush3.msra.mxu0 %v22992_v46 }
 0x893   :  { %v8780_v21 = vand.u32 4294901760, %v8779_v24  ;;  %19108 = vmatprep.subr.mxu0 %v22962_v63  ;;  %v16227_v24 = vld [vmem:[%s25125_s1 + $0x78] sm:$0xff] }
 0x894   :  { %v9192_v5 = vsel %vm51_vm0, %v16227_v24, 0 }
 0x895   :  { %19099 = vmatprep.subr.mxu1 %v8780_v21 }
 0x896   :  { %19100 = vmatpush3.msra.mxu1 %v8780_v21  ;;  %v9189_v21 = vsel %vm51_vm0, %v16226_v50, 0 }
 0x897   :  { %19101 = vmatprep.subr.mxu1 %v8787_v43 }
 0x898   :  { %19102 = vmatpush3.msra.mxu1 %v8787_v43  ;;  %v9261_v43 = vand.u32 4294901760, %v9189_v21 }
 0x899   :  { %19103 = vmatprep.subr.mxu1 %v8794_v32 }
 0x89a   :  { %19104 = vmatpush3.msra.mxu1 %v8794_v32 }
 0x89b   :  { %19119 = vmatprep.subr.mxu1 %v22956_v16 }
 0x93d   :  { %v19050_v13 = vpop.f32.mrf.mxu0 }
 0x93f   :  { %v8216_v48 = vpop.f32.mrf.mxu0 }
 0x942   :  { %v19064_v0 = vpop.f32.mrf.mxu0 }
 0x944   :  { %v8389_v23 = vpop.f32.mrf.mxu0 }
 0x945   :  { %v19057_v56 = vpop.f32.mrf.mxu1 }
 0x946   :  { %v8314_v20 = vadd.f32 %v19057_v56, %v19050_v13 }
 0x947   :  { %v8307_v39 = vpop.f32.mrf.mxu1 }
 0x948   :  { %v8397_v44 = vadd.f32 %v19064_v0, %v8314_v20  ;;  %v8308_v9 = vadd.f32 %v8307_v39, %v8216_v48  ;;  %v19078_v55 = vpop.f32.mrf.mxu0 }
 0x94a   :  { %v8390_v54 = vadd.f32 %v8389_v23, %v8308_v9  ;;  %v19071_v52 = vpop.f32.mrf.mxu1  ;;  %v8556_v11 = vpop.f32.mrf.mxu0 }
 0x94b   :  { %v8480_v51 = vadd.f32 %v19071_v52, %v8397_v44 }
 0x94c   :  { %v8471_v49 = vpop.f32.mrf.mxu1 }
 0x94d   :  { %v8563_v38 = vadd.f32 %v19078_v55, %v8480_v51  ;;  %v8472_v28 = vadd.f32 %v8471_v49, %v8390_v54 }
 0x94e   :  { %v19085_v34 = vpop.f32.mrf.mxu1 }
 0x94f   :  { %v8557_v3 = vadd.f32 %v8556_v11, %v8472_v28  ;;  %v8642_v15 = vadd.f32 %v19085_v34, %v8563_v38 }
 0x950   :  { %v8635_v12 = vpop.f32.mrf.mxu1 }
 0x951   :  { %v8653_v58 = vsel %vm6518_vm6, %v8642_v15, 0  ;;  %v8636_v22 = vadd.f32 %v8635_v12, %v8557_v3 }
 0x952   :  { %v23016_v17 = vand.u32 4294901760, %v8653_v58 }
 0x953   :  { %v8650_v57 = vsel %vm6518_vm6, %v8636_v22, 0 }
 0x954   :  { %v8735_v59 = vsub.f32 %v8653_v58, %v23016_v17  ;;  %v8724_v37 = vand.u32 4294901760, %v8650_v57 }
 0x956   :  { %v8725_v35 = vsub.f32 %v8650_v57, %v8724_v37  ;;  %19105 = vmatprep.mubr.f32.mxu1 %v8724_v37  ;;  %v8736_v7 = vand.u32 4294901760, %v8735_v59 }
 0x957   :  { %19106 = vmatmul.mubr.f32.vlgmr.msra.gmra.mxu1 %v23016_v17 }
 0x958   :  { %19120 = vmatpush3.msra.mxu1 %v22956_v16  ;;  %v8726_v1 = vand.u32 4294901760, %v8725_v35  ;;  %v8737_v10 = vsub.f32 %v8735_v59, %v8736_v7 }
 0x959   :  { %19121 = vmatprep.subr.mxu1 %v22964_v19 }
 0x95a   :  { %19122 = vmatpush3.msra.mxu1 %v22964_v19  ;;  %19127 = vmatprep.mubr.f32.mxu1 %v8726_v1  ;;  %v8727_v25 = vsub.f32 %v8725_v35, %v8726_v1  ;;  %v8738_v27 = vand.u32 4294901760, %v8737_v10  ;;  %v20360_v10 = vld [vmem:[%s25124_s0 + $0x8] sm:$0xff] }
 0x95b   :  { %19123 = vmatprep.subr.mxu1 %v22977_v40 }
 0x95c   :  { %19124 = vmatpush3.msra.mxu1 %v22977_v40  ;;  %v8728_v2 = vand.u32 4294901760, %v8727_v25 }
 0x95d   :  { %19125 = vmatprep.subr.mxu1 %v22992_v46 }
 0x95e   :  { %19126 = vmatpush3.msra.mxu1 %v22992_v46  ;;  %19094 = vmatprep.mubr.f32.mxu0 %v8728_v2  ;;  %v25313_v2 = vld [vmem:[#allocation18_spill] sm:$0xff] }
 0x95f   :  { %19128 = vmatmul.mubr.f32.vlgmr.msra.gmra.mxu1 %v8736_v7  ;;  %19141 = vmatprep.subr.mxu1 %v22956_v16 }
 0x960   :  { %19095 = vmatmul.mubr.f32.vlgmr.msra.gmra.mxu0 %v8738_v27  ;;  %19142 = vmatpush3.msra.mxu1 %v22956_v16  ;;  %v9271_v16 = vand.u32 4294901760, %v9192_v5  ;;  %v4186_v27 = vadd.f32 %v20360_v10, %v25313_v2  ;;  %v25323_v10 = vld [vmem:[#allocation7_spill] sm:$0xff]  ;;  %v10760_v2 = vld [vmem:[%s25134_s4 + $0x78] sm:$0xff] }
 0x961   :  { %19109 = vmatpush3.msra.mxu0 %v22962_v63  ;;  %19149 = vmatprep.mubr.f32.mxu1 %v8724_v37  ;;  %v9262_v63 = vsub.f32 %v9189_v21, %v9261_v43 }
 0x962   :  { %19110 = vmatprep.subr.mxu0 %v22975_v29  ;;  %19116 = vmatprep.mubr.f32.mxu0 %v8725_v35 }
 0x963   :  { %19143 = vmatprep.subr.mxu1 %v22964_v19  ;;  %19111 = vmatpush3.msra.mxu0 %v22975_v29  ;;  %v9263_v29 = vand.u32 4294901760, %v9262_v63 }
 0x964   :  { %19144 = vmatpush3.msra.mxu1 %v22964_v19  ;;  %19112 = vmatprep.subr.mxu0 %v22990_v60  ;;  %v9272_v19 = vsub.f32 %v9192_v5, %v9271_v16 }
 0x965   :  { %19145 = vmatprep.subr.mxu1 %v22977_v40  ;;  %19113 = vmatpush3.msra.mxu0 %v22990_v60 }
 0x966   :  { %19146 = vmatpush3.msra.mxu1 %v22977_v40  ;;  %19114 = vmatprep.subr.mxu0 %v23002_v26  ;;  %v9273_v40 = vand.u32 4294901760, %v9272_v19 }
 0x967   :  { %19147 = vmatprep.subr.mxu1 %v22992_v46  ;;  %19115 = vmatpush3.msra.mxu0 %v23002_v26  ;;  %v9696_v26 = vld [vmem:[%s25133_s9] sm:$0xff] }
 0x968   :  { %19148 = vmatpush3.msra.mxu1 %v22992_v46  ;;  %19117 = vmatmul.mubr.f32.vlgmr.msra.gmra.mxu0 %v8735_v59  ;;  %v23124_v13 = vand.u32 4294901760, %v9696_v26 }
 0x969   :  { %19130 = vmatprep.subr.mxu0 %v22972_v61  ;;  %19150 = vmatmul.mubr.f32.vlgmr.msra.gmra.mxu1 %v23016_v17 }
 0x96a   :  { %19159 = vmatprep.subr.mxu1 %v22923_v45  ;;  %19131 = vmatpush3.msra.mxu0 %v22972_v61  ;;  %v9274_v61 = vsub.f32 %v9272_v19, %v9273_v40  ;;  %v23134_v20 = vsub.f32 %v9696_v26, %v23124_v13 }
 0x96b   :  { %19138 = vmatprep.mubr.f32.mxu0 %v8724_v37  ;;  %19160 = vmatpush3.msra.mxu1 %v22923_v45  ;;  %v9264_v45 = vsub.f32 %v9262_v63, %v9263_v29 }
 0x96c   :  { %19132 = vmatprep.subr.mxu0 %v22987_v31  ;;  %19161 = vmatprep.subr.mxu1 %v22930_v41  ;;  %v23141_v44 = vand.u32 4294901760, %v23134_v20 }
 0x96d   :  { %19133 = vmatpush3.msra.mxu0 %v22987_v31  ;;  %19162 = vmatpush3.msra.mxu1 %v22930_v41  ;;  %v9265_v41 = vand.u32 4294901760, %v9264_v45  ;;  %v9275_v31 = vand.u32 4294901760, %v9274_v61 }
 0x96e   :  { %19134 = vmatprep.subr.mxu0 %v22999_v36  ;;  %19163 = vmatprep.mubr.f32.mxu1 %v9261_v43  ;;  %v9844_v54 = vsub.f32 %v23134_v20, %v23141_v44 }
 0x96f   :  { %19173 = vmatprep.subr.mxu1 %v22897_v14  ;;  %19135 = vmatpush3.msra.mxu0 %v22999_v36 }
 0x970   :  { %19164 = vmatmul.mubr.f32.vlgmr.msra.gmra.mxu1 %v9271_v16  ;;  %19136 = vmatprep.subr.mxu0 %v23009_v62  ;;  %v9845_v52 = vand.u32 4294901760, %v9844_v54 }
 0x971   :  { %19174 = vmatpush3.msra.mxu1 %v22897_v14  ;;  %19137 = vmatpush3.msra.mxu0 %v23009_v62 }
 0x972   :  { %19175 = vmatprep.subr.mxu1 %v22902_v8  ;;  %19139 = vmatmul.mubr.f32.vlgmr.msra.gmra.mxu0 %v23016_v17 }
 0x973   :  { %19176 = vmatpush3.msra.mxu1 %v22902_v8  ;;  %19152 = vmatprep.subr.mxu0 %v22897_v14 }
 0x974   :  { %19177 = vmatprep.mubr.f32.mxu1 %v9263_v29  ;;  %19187 = vmatprep.subr.mxu1 %v22897_v14 }
 0x975   :  { %19153 = vmatpush3.msra.mxu0 %v22897_v14  ;;  %19178 = vmatmul.mubr.f32.vlgmr.msra.gmra.mxu1 %v9273_v40 }
 0x976   :  { %19188 = vmatpush3.msra.mxu1 %v22897_v14  ;;  %19154 = vmatprep.subr.mxu0 %v22902_v8  ;;  %v9699_v14 = vld [vmem:[%s25133_s9 + $0x18] sm:$0xff] }
 0x977   :  { %19189 = vmatprep.subr.mxu1 %v22902_v8  ;;  %19155 = vmatpush3.msra.mxu0 %v22902_v8 }
 0x978   :  { %19156 = vmatprep.mubr.f32.mxu0 %v9265_v41  ;;  %19190 = vmatpush3.msra.mxu1 %v22902_v8  ;;  %v9698_v8 = vld [vmem:[%s25133_s9 + $0x10] sm:$0xff] }
 0x979   :  { %19157 = vmatmul.mubr.f32.vlgmr.msra.gmra.mxu0 %v9275_v31  ;;  %19166 = vmatprep.subr.mxu0 %v22900_v30 }
 0x97a   :  { %19167 = vmatpush3.msra.mxu0 %v22900_v30  ;;  %19170 = vmatprep.mubr.f32.mxu0 %v9262_v63  ;;  %v23088_v30 = vand.u32 4294901760, %v9699_v14 }
 0x97b   :  { %19168 = vmatprep.subr.mxu0 %v22907_v18  ;;  %19191 = vmatprep.mubr.f32.mxu1 %v9261_v43 }
 0x97c   :  { %19169 = vmatpush3.msra.mxu0 %v22907_v18  ;;  %19192 = vmatmul.mubr.f32.vlgmr.msra.gmra.mxu1 %v9271_v16  ;;  %v23094_v18 = vsub.f32 %v9699_v14, %v23088_v30 }
 0x97d   :  { %19171 = vmatmul.mubr.f32.vlgmr.msra.gmra.mxu0 %v9272_v19  ;;  %19180 = vmatprep.subr.mxu0 %v22911_v4 }
 0x97e   :  { %19181 = vmatpush3.msra.mxu0 %v22911_v4  ;;  %19184 = vmatprep.mubr.f32.mxu0 %v9261_v43  ;;  %v23096_v4 = vand.u32 4294901760, %v9698_v8  ;;  %v23104_v60 = vand.u32 4294901760, %v23094_v18 }
 0x97f   :  { %19182 = vmatprep.subr.mxu0 %v22918_v42 }
 0x980   :  { %19183 = vmatpush3.msra.mxu0 %v22918_v42  ;;  %v9697_v42 = vld [vmem:[%s25133_s9 + $0x8] sm:$0xff]  ;;  %v23107_v46 = vsub.f32 %v9698_v8, %v23096_v4  ;;  %v9823_v62 = vsub.f32 %v23094_v18, %v23104_v60 }
 0x981   :  { %19185 = vmatmul.mubr.f32.vlgmr.msra.gmra.mxu0 %v9271_v16  ;;  %19194 = vmatprep.subr.mxu0 %v23088_v30  ;;  %v23109_v36 = vand.u32 4294901760, %v9697_v42 }
 0x982   :  { %19195 = vmatpush3.msra.mxu0 %v23088_v30  ;;  %v23119_v47 = vand.u32 4294901760, %v23107_v46  ;;  %v9824_v48 = vand.u32 4294901760, %v9823_v62 }
 0x983   :  { %19196 = vmatprep.subr.mxu0 %v23096_v4  ;;  %v23122_v32 = vsub.f32 %v9697_v42, %v23109_v36 }
 0x984   :  { %19197 = vmatpush3.msra.mxu0 %v23096_v4  ;;  %v9830_v0 = vsub.f32 %v23107_v46, %v23119_v47  ;;  %19205 = vmatprep.subr.mxu1 %v9824_v48 }
 0x985   :  { %19198 = vmatprep.subr.mxu0 %v23109_v36  ;;  %v23131_v56 = vand.u32 4294901760, %v23122_v32  ;;  %19206 = vmatpush3.msra.mxu1 %v9824_v48 }
 0x986   :  { %19199 = vmatpush3.msra.mxu0 %v23109_v36  ;;  %v9831_v23 = vand.u32 4294901760, %v9830_v0 }
 0x987   :  { %19200 = vmatprep.subr.mxu0 %v23124_v13  ;;  %v9837_v39 = vsub.f32 %v23122_v32, %v23131_v56 }
 0x988   :  { %19201 = vmatpush3.msra.mxu0 %v23124_v13  ;;  %19207 = vmatprep.subr.mxu1 %v9831_v23 }
 0x989   :  { %19216 = vmatprep.subr.mxu0 %v23094_v18  ;;  %v9838_v9 = vand.u32 4294901760, %v9837_v39  ;;  %19208 = vmatpush3.msra.mxu1 %v9831_v23 }
 0x98b   :  { %19209 = vmatprep.subr.mxu1 %v9838_v9 }
 0x98c   :  { %19210 = vmatpush3.msra.mxu1 %v9838_v9 }
 0x98d   :  { %19211 = vmatprep.subr.mxu1 %v9845_v52 }
 0x98e   :  { %19212 = vmatpush3.msra.mxu1 %v9845_v52 }
 0x98f   :  { %19227 = vmatprep.subr.mxu1 %v23088_v30 }
 0xa17   :  { %v19107_v55 = vpop.f32.mrf.mxu1 }
 0xa19   :  { %v8831_v38 = vpop.f32.mrf.mxu1 }
 0xa1f   :  { %v19129_v34 = vpop.f32.mrf.mxu1 }
 0xa20   :  { %v19096_v51 = vpop.f32.mrf.mxu0 }
 0xa21   :  { %v8838_v49 = vadd.f32 %v19107_v55, %v19096_v51  ;;  %v9001_v15 = vpop.f32.mrf.mxu1 }
 0xa22   :  { %v8730_v28 = vpop.f32.mrf.mxu0 }
 0xa23   :  { %v8832_v11 = vadd.f32 %v8831_v38, %v8730_v28 }
 0xa28   :  { %v19118_v3 = vpop.f32.mrf.mxu0 }
 0xa29   :  { %v8925_v12 = vadd.f32 %v19118_v3, %v8838_v49  ;;  %v19151_v22 = vpop.f32.mrf.mxu1  ;;  %v16228_v3 = vld [vmem:[%s25125_s1 + $0x20] sm:$0xff] }
 0xa2a   :  { %v8917_v58 = vpop.f32.mrf.mxu0 }
 0xa2b   :  { %v8918_v17 = vadd.f32 %v8917_v58, %v8832_v11  ;;  %v9010_v57 = vadd.f32 %v19129_v34, %v8925_v12  ;;  %v9173_v37 = vpop.f32.mrf.mxu1  ;;  %v10238_v58 = vsel %vm51_vm0, %v16228_v3, 0 }
 0xa2d   :  { %v9002_v59 = vadd.f32 %v9001_v15, %v8918_v17 }
 0xa30   :  { %v19165_v35 = vpop.f32.mrf.mxu1 }
 0xa32   :  { %v19140_v7 = vpop.f32.mrf.mxu0  ;;  %v9358_v21 = vpop.f32.mrf.mxu1 }
 0xa33   :  { %v9099_v1 = vadd.f32 %v19140_v7, %v9010_v57 }
 0xa34   :  { %v9092_v25 = vpop.f32.mrf.mxu0 }
 0xa35   :  { %v9180_v50 = vadd.f32 %v19151_v22, %v9099_v1  ;;  %v9093_v24 = vadd.f32 %v9092_v25, %v9002_v59  ;;  %v19179_v63 = vpop.f32.mrf.mxu1  ;;  %v16229_v22 = vld [vmem:[%s25125_s1 + $0x28] sm:$0xff]  ;;  %v23175_v59 = vand.u32 4294901760, %v10238_v58  ;;  %v25321_v1 = vld [vmem:[#allocation5_spill] sm:$0xff]  ;;  %v25322_v25 = vld [vmem:[#allocation6_spill] sm:$0xff] }
 0xa37   :  { %v23151_v5 = vadd.f32 %v9180_v50, %v4186_v27  ;;  %v23153_v43 = vadd.f32 %v9173_v37, %v9093_v24  ;;  %v9522_v45 = vpop.f32.mrf.mxu1  ;;  %v10241_v37 = vsel %vm51_vm0, %v16229_v22, 0  ;;  %v10311_v7 = vsub.f32 %v10238_v58, %v23175_v59  ;;  %v10759_v50 = vld [vmem:[%s25134_s4 + $0x70] sm:$0xff] }
 0xa38   :  { %v23240_v27 = vand.u32 4294901760, %v10760_v2 }
 0xa39   :  { %25314 = vst [vmem:[#allocation20_spill] sm:$0xff] %v23151_v5  ;;  %25315 = vst [vmem:[#allocation21_spill] sm:$0xff] %v23153_v43  ;;  %v19158_v16 = vpop.f32.mrf.mxu0 }
 0xa3a   :  { %v9365_v29 = vadd.f32 %v19165_v35, %v19158_v16  ;;  %v23181_v35 = vand.u32 4294901760, %v10241_v37  ;;  %v23246_v24 = vsub.f32 %v10760_v2, %v23240_v27  ;;  %v10758_v16 = vld [vmem:[%s25134_s4 + $0x68] sm:$0xff] }
 0xa3b   :  { %v9267_v19 = vpop.f32.mrf.mxu0 }
 0xa3c   :  { %v9359_v61 = vadd.f32 %v9358_v21, %v9267_v19  ;;  %v19193_v26 = vpop.f32.mrf.mxu1  ;;  %v23248_v21 = vand.u32 4294901760, %v10759_v50 }
 0xa3d   :  { %v19172_v40 = vpop.f32.mrf.mxu0 }
 0xa3e   :  { %v9448_v41 = vadd.f32 %v19172_v40, %v9365_v29  ;;  %v9686_v9 = vpop.f32.mrf.mxu1  ;;  %v23259_v19 = vsub.f32 %v10759_v50, %v23248_v21  ;;  %v23261_v29 = vand.u32 4294901760, %v10758_v16  ;;  %v10757_v40 = vld [vmem:[%s25134_s4 + $0x60] sm:$0xff] }
 0xa3f   :  { %v9440_v31 = vpop.f32.mrf.mxu0 }
 0xa40   :  { %v9531_v14 = vadd.f32 %v19179_v63, %v9448_v41  ;;  %v9441_v8 = vadd.f32 %v9440_v31, %v9359_v61  ;;  %v23256_v63 = vand.u32 4294901760, %v23246_v24  ;;  %v23271_v61 = vand.u32 4294901760, %v23259_v19 }
 0xa41   :  { %v19186_v42 = vpop.f32.mrf.mxu0  ;;  %v23274_v41 = vsub.f32 %v10758_v16, %v23261_v29  ;;  %v23276_v31 = vand.u32 4294901760, %v10757_v40 }
 0xa42   :  { %v9523_v62 = vadd.f32 %v9522_v45, %v9441_v8  ;;  %v9614_v48 = vadd.f32 %v19186_v42, %v9531_v14  ;;  %v10866_v45 = vsub.f32 %v23246_v24, %v23256_v63  ;;  %v10756_v14 = vld [vmem:[%s25134_s4 + $0x58] sm:$0xff]  ;;  %v10873_v42 = vsub.f32 %v23259_v19, %v23271_v61 }
 0xa43   :  { %v9607_v0 = vpop.f32.mrf.mxu0 }
 0xa44   :  { %v9693_v23 = vadd.f32 %v19193_v26, %v9614_v48  ;;  %v9608_v39 = vadd.f32 %v9607_v0, %v9523_v62  ;;  %v10867_v8 = vand.u32 4294901760, %v10866_v45  ;;  %v23286_v26 = vand.u32 4294901760, %v23274_v41  ;;  %v10755_v0 = vld [vmem:[%s25134_s4 + $0x50] sm:$0xff] }
 0xa45   :  { %v23289_v62 = vsub.f32 %v10757_v40, %v23276_v31  ;;  %v23292_v48 = vand.u32 4294901760, %v10756_v14  ;;  %v10748_v40 = vld [vmem:[%s25134_s4 + $0x18] sm:$0xff] }
 0xa46   :  { %v9704_v54 = vsel %vm6518_vm6, %v9693_v23, 0  ;;  %v9687_v52 = vadd.f32 %v9686_v9, %v9608_v39  ;;  %v10874_v23 = vand.u32 4294901760, %v10873_v42  ;;  %v10880_v39 = vsub.f32 %v23274_v41, %v23286_v26 }
 0xa47   :  { %v23156_v55 = vand.u32 4294901760, %v9704_v54  ;;  %v23301_v9 = vand.u32 4294901760, %v23289_v62  ;;  %v23408_v42 = vand.u32 4294901760, %v10748_v40 }
 0xa48   :  { %v9701_v51 = vsel %vm6518_vm6, %v9687_v52, 0  ;;  %v23306_v52 = vsub.f32 %v10756_v14, %v23292_v48 }
 0xa49   :  { %v9786_v49 = vsub.f32 %v9704_v54, %v23156_v55  ;;  %v9775_v38 = vand.u32 4294901760, %v9701_v51  ;;  %v23303_v54 = vand.u32 4294901760, %v10755_v0 }
 0xa4b   :  { %v9776_v28 = vsub.f32 %v9701_v51, %v9775_v38  ;;  %19213 = vmatprep.mubr.f32.mxu1 %v9775_v38  ;;  %v9787_v11 = vand.u32 4294901760, %v9786_v49  ;;  %v10881_v51 = vand.u32 4294901760, %v10880_v39 }
 0xa4c   :  { %19214 = vmatmul.mubr.f32.vlgmr.msra.gmra.mxu1 %v23156_v55 }
 0xa4d   :  { %19228 = vmatpush3.msra.mxu1 %v23088_v30  ;;  %v9777_v34 = vand.u32 4294901760, %v9776_v28  ;;  %v9788_v12 = vsub.f32 %v9786_v49, %v9787_v11 }
 0xa4e   :  { %19229 = vmatprep.subr.mxu1 %v23096_v4 }
 0xa4f   :  { %19230 = vmatpush3.msra.mxu1 %v23096_v4  ;;  %19235 = vmatprep.mubr.f32.mxu1 %v9777_v34  ;;  %v9778_v15 = vsub.f32 %v9776_v28, %v9777_v34  ;;  %v9789_v57 = vand.u32 4294901760, %v9788_v12  ;;  %v10753_v34 = vld [vmem:[%s25134_s4 + $0x40] sm:$0xff] }
 0xa50   :  { %19231 = vmatprep.subr.mxu1 %v23109_v36  ;;  %v23333_v58 = vand.u32 4294901760, %v10753_v34 }
 0xa51   :  { %19232 = vmatpush3.msra.mxu1 %v23109_v36  ;;  %v9779_v17 = vand.u32 4294901760, %v9778_v15 }
 0xa52   :  { %19233 = vmatprep.subr.mxu1 %v23124_v13 }
 0xa53   :  { %19234 = vmatpush3.msra.mxu1 %v23124_v13  ;;  %19202 = vmatprep.mubr.f32.mxu0 %v9779_v17  ;;  %v10752_v17 = vld [vmem:[%s25134_s4 + $0x38] sm:$0xff] }
 0xa54   :  { %19236 = vmatmul.mubr.f32.vlgmr.msra.gmra.mxu1 %v9787_v11  ;;  %19249 = vmatprep.subr.mxu1 %v23088_v30  ;;  %v23321_v11 = vand.u32 4294901760, %v23306_v52 }
 0xa55   :  { %19203 = vmatmul.mubr.f32.vlgmr.msra.gmra.mxu0 %v9789_v57  ;;  %19250 = vmatpush3.msra.mxu1 %v23088_v30  ;;  %v10321_v30 = vsub.f32 %v10241_v37, %v23181_v35  ;;  %v23348_v37 = vsub.f32 %v10753_v34, %v23333_v58 }
 0xa56   :  { %19217 = vmatpush3.msra.mxu0 %v23094_v18  ;;  %19257 = vmatprep.mubr.f32.mxu1 %v9775_v38  ;;  %v10312_v18 = vand.u32 4294901760, %v10311_v7  ;;  %v10894_v22 = vsub.f32 %v23306_v52, %v23321_v11 }
 0xa57   :  { %19218 = vmatprep.subr.mxu0 %v23107_v46  ;;  %19224 = vmatprep.mubr.f32.mxu0 %v9776_v28 }
 0xa58   :  { %19251 = vmatprep.subr.mxu1 %v23096_v4  ;;  %19219 = vmatpush3.msra.mxu0 %v23107_v46  ;;  %v10313_v46 = vsub.f32 %v10311_v7, %v10312_v18 }
 0xa59   :  { %19252 = vmatpush3.msra.mxu1 %v23096_v4  ;;  %19220 = vmatprep.subr.mxu0 %v23122_v32  ;;  %v10322_v4 = vand.u32 4294901760, %v10321_v30 }
 0xa5a   :  { %19253 = vmatprep.subr.mxu1 %v23109_v36  ;;  %19221 = vmatpush3.msra.mxu0 %v23122_v32  ;;  %v25317_v32 = vld [vmem:[#allocation9_spill] sm:$0xff] }
 0xa5b   :  { %19254 = vmatpush3.msra.mxu1 %v23109_v36  ;;  %19222 = vmatprep.subr.mxu0 %v23134_v20  ;;  %v25316_v36 = vld [vmem:[#allocation8_spill] sm:$0xff] }
 0xa5c   :  { %19255 = vmatprep.subr.mxu1 %v23124_v13  ;;  %19223 = vmatpush3.msra.mxu0 %v23134_v20  ;;  %v10314_v20 = vand.u32 4294901760, %v10313_v46  ;;  %v23360_v46 = vand.u32 4294901760, %v23348_v37 }
 0xa5d   :  { %19256 = vmatpush3.msra.mxu1 %v23124_v13  ;;  %19225 = vmatmul.mubr.f32.vlgmr.msra.gmra.mxu0 %v9786_v49  ;;  %v10323_v13 = vsub.f32 %v10321_v30, %v10322_v4  ;;  %v10887_v49 = vsub.f32 %v23289_v62, %v23301_v9 }
 0xa5e   :  { %19238 = vmatprep.subr.mxu0 %v23104_v60  ;;  %19258 = vmatmul.mubr.f32.vlgmr.msra.gmra.mxu1 %v23156_v55 }
 0xa5f   :  { %19239 = vmatpush3.msra.mxu0 %v23104_v60  ;;  %19246 = vmatprep.mubr.f32.mxu0 %v9775_v38  ;;  %v25318_v60 = vld [vmem:[#allocation2_spill] sm:$0xff]  ;;  %v23315_v38 = vsub.f32 %v10755_v0, %v23303_v54  ;;  %v10888_v3 = vand.u32 4294901760, %v10887_v49 }
 0xa60   :  { %19240 = vmatprep.subr.mxu0 %v23119_v47  ;;  %19267 = vmatprep.subr.mxu1 %v25316_v36 }
 0xa61   :  { %19241 = vmatpush3.msra.mxu0 %v23119_v47  ;;  %19268 = vmatpush3.msra.mxu1 %v25316_v36  ;;  %v10324_v47 = vand.u32 4294901760, %v10323_v13  ;;  %v23328_v15 = vand.u32 4294901760, %v23315_v38  ;;  %v10750_v13 = vld [vmem:[%s25134_s4 + $0x28] sm:$0xff] }
 0xa62   :  { %19242 = vmatprep.subr.mxu0 %v23131_v56  ;;  %19269 = vmatprep.subr.mxu1 %v25317_v32 }
 0xa63   :  { %19243 = vmatpush3.msra.mxu0 %v23131_v56  ;;  %19270 = vmatpush3.msra.mxu1 %v25317_v32  ;;  %v25319_v56 = vld [vmem:[#allocation3_spill] sm:$0xff]  ;;  %v10901_v57 = vsub.f32 %v23315_v38, %v23328_v15 }
 0xa64   :  { %19244 = vmatprep.subr.mxu0 %v23141_v44  ;;  %19271 = vmatprep.mubr.f32.mxu1 %v23175_v59 }
 0xa65   :  { %19245 = vmatpush3.msra.mxu0 %v23141_v44  ;;  %19272 = vmatmul.mubr.f32.vlgmr.msra.gmra.mxu1 %v23181_v35  ;;  %v25320_v44 = vld [vmem:[#allocation4_spill] sm:$0xff] }
 0xa66   :  { %19247 = vmatmul.mubr.f32.vlgmr.msra.gmra.mxu0 %v23156_v55  ;;  %19260 = vmatprep.subr.mxu0 %v25318_v60  ;;  %v10754_v55 = vld [vmem:[%s25134_s4 + $0x48] sm:$0xff] }
 0xa67   :  { %19261 = vmatpush3.msra.mxu0 %v25318_v60  ;;  %19264 = vmatprep.mubr.f32.mxu0 %v10314_v20  ;;  %v23317_v28 = vand.u32 4294901760, %v10754_v55 }
 0xa68   :  { %19262 = vmatprep.subr.mxu0 %v25319_v56  ;;  %19281 = vmatprep.subr.mxu1 %v25318_v60 }
 0xa69   :  { %19263 = vmatpush3.msra.mxu0 %v25319_v56  ;;  %19282 = vmatpush3.msra.mxu1 %v25318_v60  ;;  %v23331_v12 = vsub.f32 %v10754_v55, %v23317_v28 }
 0xa6a   :  { %19265 = vmatmul.mubr.f32.vlgmr.msra.gmra.mxu0 %v10324_v47  ;;  %19274 = vmatprep.subr.mxu0 %v25320_v44 }
 0xa6b   :  { %19275 = vmatpush3.msra.mxu0 %v25320_v44  ;;  %19283 = vmatprep.subr.mxu1 %v25319_v56 }
 0xa6c   :  { %19276 = vmatprep.subr.mxu0 %v25321_v1  ;;  %19278 = vmatprep.mubr.f32.mxu0 %v10311_v7  ;;  %v10895_v7 = vand.u32 4294901760, %v10894_v22 }
 0xa6d   :  { %19277 = vmatpush3.msra.mxu0 %v25321_v1  ;;  %19284 = vmatpush3.msra.mxu1 %v25319_v56  ;;  %v10749_v1 = vld [vmem:[%s25134_s4 + $0x20] sm:$0xff] }
 0xa6e   :  { %19285 = vmatprep.mubr.f32.mxu1 %v10312_v18  ;;  %19279 = vmatmul.mubr.f32.vlgmr.msra.gmra.mxu0 %v10321_v30  ;;  %v10751_v30 = vld [vmem:[%s25134_s4 + $0x30] sm:$0xff]  ;;  %v10902_v18 = vand.u32 4294901760, %v10901_v57  ;;  %v23392_v50 = vand.u32 4294901760, %v10749_v1 }
 0xa6f   :  { %19286 = vmatmul.mubr.f32.vlgmr.msra.gmra.mxu1 %v10322_v4  ;;  %19288 = vmatprep.subr.mxu0 %v25322_v25  ;;  %v23366_v32 = vand.u32 4294901760, %v10751_v30 }
 0xa70   :  { %19295 = vmatprep.subr.mxu1 %v25318_v60  ;;  %19289 = vmatpush3.msra.mxu0 %v25322_v25 }
 0xa71   :  { %19296 = vmatpush3.msra.mxu1 %v25318_v60  ;;  %19290 = vmatprep.subr.mxu0 %v25323_v10  ;;  %v10915_v60 = vsub.f32 %v23348_v37, %v23360_v46  ;;  %v23381_v44 = vsub.f32 %v10751_v30, %v23366_v32 }
 0xa72   :  { %19297 = vmatprep.subr.mxu1 %v25319_v56  ;;  %19291 = vmatpush3.msra.mxu0 %v25323_v10 }
 0xa73   :  { %19292 = vmatprep.mubr.f32.mxu0 %v23175_v59  ;;  %19298 = vmatpush3.msra.mxu1 %v25319_v56  ;;  %v23377_v56 = vand.u32 4294901760, %v10750_v13  ;;  %v10916_v25 = vand.u32 4294901760, %v10915_v60  ;;  %v23396_v16 = vand.u32 4294901760, %v23381_v44 }
 0xa74   :  { %19299 = vmatprep.mubr.f32.mxu1 %v23175_v59  ;;  %19293 = vmatmul.mubr.f32.vlgmr.msra.gmra.mxu0 %v23181_v35  ;;  %v23345_v59 = vand.u32 4294901760, %v23331_v12 }
 0xa75   :  { %19300 = vmatmul.mubr.f32.vlgmr.msra.gmra.mxu1 %v23181_v35  ;;  %19302 = vmatprep.subr.mxu0 %v23240_v27  ;;  %v23350_v35 = vand.u32 4294901760, %v10752_v17  ;;  %v23390_v2 = vsub.f32 %v10750_v13, %v23377_v56  ;;  %25325 = vst [vmem:[#allocation23_spill] sm:$0xff] %v23396_v16  ;;  %v10929_v0 = vsub.f32 %v23381_v44, %v23396_v16 }
 0xa76   :  { %19303 = vmatpush3.msra.mxu0 %v23240_v27  ;;  %19337 = vmatprep.subr.mxu1 %v10867_v8  ;;  %v10908_v4 = vsub.f32 %v23331_v12, %v23345_v59 }
 0xa77   :  { %19304 = vmatprep.subr.mxu0 %v23248_v21  ;;  %19338 = vmatpush3.msra.mxu1 %v10867_v8  ;;  %v23363_v36 = vsub.f32 %v10752_v17, %v23350_v35  ;;  %v23403_v14 = vand.u32 4294901760, %v23390_v2  ;;  %v23406_v8 = vsub.f32 %v10749_v1, %v23392_v50  ;;  %v10930_v34 = vand.u32 4294901760, %v10929_v0 }
 0xa78   :  { %19305 = vmatpush3.msra.mxu0 %v23248_v21  ;;  %19339 = vmatprep.subr.mxu1 %v10874_v23  ;;  %v10909_v20 = vand.u32 4294901760, %v10908_v4 }
 0xa79   :  { %19306 = vmatprep.subr.mxu0 %v23261_v29  ;;  %19340 = vmatpush3.msra.mxu1 %v10874_v23  ;;  %v23375_v47 = vand.u32 4294901760, %v23363_v36  ;;  %25326 = vst [vmem:[#allocation24_spill] sm:$0xff] %v23403_v14  ;;  %v10747_v23 = vld [vmem:[%s25134_s4 + $0x10] sm:$0xff]  ;;  %v10936_v39 = vsub.f32 %v23390_v2, %v23403_v14  ;;  %v23420_v55 = vand.u32 4294901760, %v23406_v8 }
 0xa7a   :  { %19307 = vmatpush3.msra.mxu0 %v23261_v29  ;;  %19341 = vmatprep.subr.mxu1 %v10881_v51  ;;  %v23425_v49 = vand.u32 4294901760, %v10747_v23 }
 0xa7b   :  { %19308 = vmatprep.subr.mxu0 %v23276_v31  ;;  %19342 = vmatpush3.msra.mxu1 %v10881_v51  ;;  %25324 = vst [vmem:[#allocation22_spill] sm:$0xff] %v23375_v47  ;;  %v10922_v10 = vsub.f32 %v23363_v36, %v23375_v47  ;;  %25327 = vst [vmem:[#allocation25_spill] sm:$0xff] %v23420_v55  ;;  %v23423_v51 = vsub.f32 %v10748_v40, %v23408_v42  ;;  %v10937_v22 = vand.u32 4294901760, %v10936_v39 }
 0xa7c   :  { %19309 = vmatpush3.msra.mxu0 %v23276_v31  ;;  %19343 = vmatprep.subr.mxu1 %v10888_v3  ;;  %v10943_v17 = vsub.f32 %v23406_v8, %v23420_v55 }
 0xa7d   :  { %19310 = vmatprep.subr.mxu0 %v23292_v48  ;;  %19344 = vmatpush3.msra.mxu1 %v10888_v3  ;;  %v10923_v45 = vand.u32 4294901760, %v10922_v10  ;;  %v10746_v3 = vld [vmem:[%s25134_s4 + $0x8] sm:$0xff]  ;;  %v23435_v57 = vand.u32 4294901760, %v23423_v51 }
 0xa7e   :  { %19311 = vmatpush3.msra.mxu0 %v23292_v48  ;;  %19345 = vmatprep.subr.mxu1 %v10895_v7  ;;  %v23441_v30 = vand.u32 4294901760, %v10746_v3  ;;  %v10944_v4 = vand.u32 4294901760, %v10943_v17 }
 0xa7f   :  { %19312 = vmatprep.subr.mxu0 %v23303_v54  ;;  %19346 = vmatpush3.msra.mxu1 %v10895_v7  ;;  %25328 = vst [vmem:[#allocation26_spill] sm:$0xff] %v23435_v57  ;;  %v23438_v7 = vsub.f32 %v10747_v23, %v23425_v49  ;;  %v10950_v13 = vsub.f32 %v23423_v51, %v23435_v57 }
 0xa80   :  { %19313 = vmatpush3.msra.mxu0 %v23303_v54  ;;  %19347 = vmatprep.subr.mxu1 %v10902_v18  ;;  %v23456_v1 = vsub.f32 %v10746_v3, %v23441_v30 }
 0xa81   :  { %19314 = vmatprep.subr.mxu0 %v23317_v28  ;;  %19348 = vmatpush3.msra.mxu1 %v10902_v18  ;;  %v10745_v18 = vld [vmem:[%s25134_s4] sm:$0xff] }
 0xa82   :  { %19315 = vmatpush3.msra.mxu0 %v23317_v28  ;;  %19349 = vmatprep.subr.mxu1 %v10909_v20  ;;  %v23452_v60 = vand.u32 4294901760, %v10745_v18 }
 0xa83   :  { %19316 = vmatprep.subr.mxu0 %v23333_v58  ;;  %19350 = vmatpush3.msra.mxu1 %v10909_v20  ;;  %v23450_v20 = vand.u32 4294901760, %v23438_v7 }
 0xa84   :  { %19317 = vmatpush3.msra.mxu0 %v23333_v58  ;;  %19351 = vmatprep.subr.mxu1 %v10916_v25  ;;  %v23462_v40 = vsub.f32 %v10745_v18, %v23452_v60 }
 0xa85   :  { %19318 = vmatprep.subr.mxu0 %v23350_v35  ;;  %19352 = vmatpush3.msra.mxu1 %v10916_v25  ;;  %25329 = vst [vmem:[#allocation27_spill] sm:$0xff] %v23450_v20  ;;  %v10951_v25 = vand.u32 4294901760, %v10950_v13  ;;  %v10957_v10 = vsub.f32 %v23438_v7, %v23450_v20 }
 0xa86   :  { %19319 = vmatpush3.msra.mxu0 %v23350_v35  ;;  %19353 = vmatprep.subr.mxu1 %v10923_v45  ;;  %v23470_v23 = vand.u32 4294901760, %v23462_v40 }
 0xa87   :  { %19320 = vmatprep.subr.mxu0 %v23366_v32  ;;  %19354 = vmatpush3.msra.mxu1 %v10923_v45  ;;  %v23466_v45 = vand.u32 4294901760, %v23456_v1  ;;  %v10958_v0 = vand.u32 4294901760, %v10957_v10 }
 0xa88   :  { %19321 = vmatpush3.msra.mxu0 %v23366_v32  ;;  %19355 = vmatprep.subr.mxu1 %v10930_v34  ;;  %25331 = vst [vmem:[#allocation30_spill] sm:$0xff] %v23470_v23 }
 0xa89   :  { %19322 = vmatprep.subr.mxu0 %v23377_v56  ;;  %19356 = vmatpush3.msra.mxu1 %v10930_v34  ;;  %25330 = vst [vmem:[#allocation28_spill] sm:$0xff] %v23466_v45  ;;  %v10964_v39 = vsub.f32 %v23456_v1, %v23466_v45  ;;  %v10971_v34 = vsub.f32 %v23462_v40, %v23470_v23 }
 0xa8a   :  { %19323 = vmatpush3.msra.mxu0 %v23377_v56  ;;  %19357 = vmatprep.subr.mxu1 %v10937_v22 }
 0xa8b   :  { %19324 = vmatprep.subr.mxu0 %v23392_v50  ;;  %19358 = vmatpush3.msra.mxu1 %v10937_v22  ;;  %v10965_v3 = vand.u32 4294901760, %v10964_v39  ;;  %v10972_v22 = vand.u32 4294901760, %v10971_v34 }
 0xa8c   :  { %19325 = vmatpush3.msra.mxu0 %v23392_v50  ;;  %19359 = vmatprep.subr.mxu1 %v10944_v4 }
 0xa8d   :  { %19326 = vmatprep.subr.mxu0 %v23408_v42  ;;  %19360 = vmatpush3.msra.mxu1 %v10944_v4 }
 0xa8e   :  { %19327 = vmatpush3.msra.mxu0 %v23408_v42  ;;  %19361 = vmatprep.subr.mxu1 %v10951_v25 }
 0xa8f   :  { %19328 = vmatprep.subr.mxu0 %v23425_v49  ;;  %19362 = vmatpush3.msra.mxu1 %v10951_v25 }
 0xa90   :  { %19329 = vmatpush3.msra.mxu0 %v23425_v49  ;;  %19363 = vmatprep.subr.mxu1 %v10958_v0 }
 0xa91   :  { %19330 = vmatprep.subr.mxu0 %v23441_v30  ;;  %19364 = vmatpush3.msra.mxu1 %v10958_v0 }
 0xa92   :  { %19331 = vmatpush3.msra.mxu0 %v23441_v30  ;;  %19365 = vmatprep.subr.mxu1 %v10965_v3 }
 0xa93   :  { %19332 = vmatprep.subr.mxu0 %v23452_v60  ;;  %19366 = vmatpush3.msra.mxu1 %v10965_v3 }
 0xa94   :  { %19333 = vmatpush3.msra.mxu0 %v23452_v60  ;;  %19367 = vmatprep.subr.mxu1 %v10972_v22 }
 0xa95   :  { %19372 = vmatprep.subr.mxu0 %v23246_v24  ;;  %19368 = vmatpush3.msra.mxu1 %v10972_v22 }
 0xa96   :  { %19407 = vmatprep.subr.mxu1 %v23240_v27 }
 0xb0c   :  { %v19215_v17 = vpop.f32.mrf.mxu1 }
 0xb0e   :  { %v9882_v13 = vpop.f32.mrf.mxu1 }
 0xb14   :  { %v19237_v25 = vpop.f32.mrf.mxu1 }
 0xb15   :  { %v19204_v18 = vpop.f32.mrf.mxu0 }
 0xb16   :  { %v9889_v4 = vadd.f32 %v19215_v17, %v19204_v18  ;;  %v10052_v53 = vpop.f32.mrf.mxu1 }
 0xb17   :  { %v9781_v10 = vpop.f32.mrf.mxu0 }
 0xb18   :  { %v9883_v5 = vadd.f32 %v9882_v13, %v9781_v10 }
 0xb1d   :  { %v19226_v43 = vpop.f32.mrf.mxu0 }
 0xb1e   :  { %v9976_v33 = vadd.f32 %v19226_v43, %v9889_v4  ;;  %v19259_v34 = vpop.f32.mrf.mxu1 }
 0xb1f   :  { %v9968_v6 = vpop.f32.mrf.mxu0 }
 0xb20   :  { %v9969_v39 = vadd.f32 %v9968_v6, %v9883_v5  ;;  %v10061_v0 = vadd.f32 %v19237_v25, %v9976_v33  ;;  %v10224_v3 = vpop.f32.mrf.mxu1 }
 0xb22   :  { %v10053_v23 = vadd.f32 %v10052_v53, %v9969_v39 }
 0xb25   :  { %v19273_v20 = vpop.f32.mrf.mxu1 }
 0xb26   :  { %v19248_v45 = vpop.f32.mrf.mxu0 }
 0xb27   :  { %v10150_v22 = vadd.f32 %v19248_v45, %v10061_v0  ;;  %v10407_v18 = vpop.f32.mrf.mxu1 }
 0xb28   :  { %v10143_v57 = vpop.f32.mrf.mxu0 }
 0xb29   :  { %v10144_v55 = vadd.f32 %v10143_v57, %v10053_v23  ;;  %v23479_v14 = vadd.f32 %v19259_v34, %v10150_v22 }
 0xb2a   :  { %v19266_v17 = vpop.f32.mrf.mxu0 }
 0xb2b   :  { %25332 = vst [vmem:[#allocation29_spill] sm:$0xff] %v23479_v14  ;;  %v23481_v13 = vadd.f32 %v10224_v3, %v10144_v55  ;;  %v10414_v43 = vadd.f32 %v19273_v20, %v19266_v17 }
 0xb2c   :  { %v10316_v10 = vpop.f32.mrf.mxu0 }
 0xb2d   :  { %v10408_v16 = vadd.f32 %v10407_v18, %v10316_v10 }
 0xb2e   :  { %v19280_v4 = vpop.f32.mrf.mxu0 }
 0xb2f   :  { %v10497_v6 = vadd.f32 %v19280_v4, %v10414_v43  ;;  %v19287_v33 = vpop.f32.mrf.mxu1 }
 0xb30   :  { %v10489_v5 = vpop.f32.mrf.mxu0 }
 0xb31   :  { %v10580_v53 = vadd.f32 %v19287_v33, %v10497_v6  ;;  %v10490_v25 = vadd.f32 %v10489_v5, %v10408_v16  ;;  %v10571_v39 = vpop.f32.mrf.mxu1  ;;  %v16231_v6 = vld [vmem:[%s25135_s12 + $0x18] sm:$0xff] }
 0xb33   :  { %v10572_v45 = vadd.f32 %v10571_v39, %v10490_v25  ;;  %v23670_v39 = vand.u32 4294901760, %v16231_v6 }
 0xb34   :  { %v19294_v0 = vpop.f32.mrf.mxu0 }
 0xb35   :  { %v10663_v47 = vadd.f32 %v19294_v0, %v10580_v53  ;;  %v19301_v57 = vpop.f32.mrf.mxu1  ;;  %v16230_v53 = vld [vmem:[%s25135_s12 + $0x10] sm:$0xff] }
 0xb36   :  { %v10656_v23 = vpop.f32.mrf.mxu0  ;;  %v23672_v0 = vand.u32 4294901760, %v16230_v53 }
 0xb37   :  { %v10742_v34 = vadd.f32 %v19301_v57, %v10663_v47  ;;  %v10657_v22 = vadd.f32 %v10656_v23, %v10572_v45  ;;  %v10735_v14 = vpop.f32.mrf.mxu1 }
 0xb39   :  { %v23483_v55 = vand.u32 4294901760, %v10742_v34  ;;  %v10736_v3 = vadd.f32 %v10735_v14, %v10657_v22 }
 0xb3b   :  { %v23486_v20 = vsub.f32 %v10742_v34, %v23483_v55  ;;  %v23488_v17 = vand.u32 4294901760, %v10736_v3 }
 0xb3d   :  { %v10854_v18 = vand.u32 4294901760, %v23486_v20  ;;  %v10843_v16 = vsub.f32 %v10736_v3, %v23488_v17  ;;  %19369 = vmatprep.mubr.f32.mxu1 %v23488_v17 }
 0xb3e   :  { %19370 = vmatmul.mubr.f32.vlgmr.msra.gmra.mxu1 %v23483_v55 }
 0xb3f   :  { %19408 = vmatpush3.msra.mxu1 %v23240_v27  ;;  %v10844_v47 = vand.u32 4294901760, %v10843_v16  ;;  %v10855_v14 = vsub.f32 %v23486_v20, %v10854_v18 }
 0xb40   :  { %19409 = vmatprep.subr.mxu1 %v23248_v21 }
 0xb41   :  { %19410 = vmatpush3.msra.mxu1 %v23248_v21  ;;  %19439 = vmatprep.mubr.f32.mxu1 %v10844_v47  ;;  %v10845_v10 = vsub.f32 %v10843_v16, %v10844_v47  ;;  %v10856_v4 = vand.u32 4294901760, %v10855_v14 }
 0xb42   :  { %19411 = vmatprep.subr.mxu1 %v23261_v29 }
 0xb43   :  { %19412 = vmatpush3.msra.mxu1 %v23261_v29  ;;  %v10846_v43 = vand.u32 4294901760, %v10845_v10 }
 0xb44   :  { %19413 = vmatprep.subr.mxu1 %v23276_v31 }
 0xb45   :  { %19414 = vmatpush3.msra.mxu1 %v23276_v31  ;;  %19334 = vmatprep.mubr.f32.mxu0 %v10846_v43 }
 0xb46   :  { %19415 = vmatprep.subr.mxu1 %v23292_v48  ;;  %19335 = vmatmul.mubr.f32.vlgmr.msra.gmra.mxu0 %v10856_v4 }
 0xb47   :  { %19373 = vmatpush3.msra.mxu0 %v23246_v24  ;;  %19416 = vmatpush3.msra.mxu1 %v23292_v48  ;;  %v25334_v24 = vld [vmem:[#allocation23_spill] sm:$0xff] }
 0xb48   :  { %19374 = vmatprep.subr.mxu0 %v23259_v19  ;;  %19404 = vmatprep.mubr.f32.mxu0 %v10843_v16 }
 0xb49   :  { %19417 = vmatprep.subr.mxu1 %v23303_v54  ;;  %19375 = vmatpush3.msra.mxu0 %v23259_v19  ;;  %v25337_v19 = vld [vmem:[#allocation26_spill] sm:$0xff] }
 0xb4a   :  { %19418 = vmatpush3.msra.mxu1 %v23303_v54  ;;  %19376 = vmatprep.subr.mxu0 %v23274_v41 }
 0xb4b   :  { %19419 = vmatprep.subr.mxu1 %v23317_v28  ;;  %19377 = vmatpush3.msra.mxu0 %v23274_v41  ;;  %v25340_v41 = vld [vmem:[#allocation30_spill] sm:$0xff] }
 0xb4c   :  { %19420 = vmatpush3.msra.mxu1 %v23317_v28  ;;  %19378 = vmatprep.subr.mxu0 %v23289_v62 }
 0xb4d   :  { %19421 = vmatprep.subr.mxu1 %v23333_v58  ;;  %19379 = vmatpush3.msra.mxu0 %v23289_v62  ;;  %v11454_v62 = vld [vmem:[%s25135_s12] sm:$0xff] }
 0xb4e   :  { %19422 = vmatpush3.msra.mxu1 %v23333_v58  ;;  %19380 = vmatprep.subr.mxu0 %v23306_v52 }
 0xb4f   :  { %19423 = vmatprep.subr.mxu1 %v23350_v35  ;;  %19381 = vmatpush3.msra.mxu0 %v23306_v52 }
 0xb50   :  { %19424 = vmatpush3.msra.mxu1 %v23350_v35  ;;  %19382 = vmatprep.subr.mxu0 %v23315_v38 }
 0xb51   :  { %19425 = vmatprep.subr.mxu1 %v23366_v32  ;;  %19383 = vmatpush3.msra.mxu0 %v23315_v38 }
 0xb52   :  { %19426 = vmatpush3.msra.mxu1 %v23366_v32  ;;  %19384 = vmatprep.subr.mxu0 %v23331_v12 }
 0xb53   :  { %19427 = vmatprep.subr.mxu1 %v23377_v56  ;;  %19385 = vmatpush3.msra.mxu0 %v23331_v12 }
 0xb54   :  { %19428 = vmatpush3.msra.mxu1 %v23377_v56  ;;  %19386 = vmatprep.subr.mxu0 %v23348_v37 }
 0xb55   :  { %19429 = vmatprep.subr.mxu1 %v23392_v50  ;;  %19387 = vmatpush3.msra.mxu0 %v23348_v37 }
 0xb56   :  { %19430 = vmatpush3.msra.mxu1 %v23392_v50  ;;  %19388 = vmatprep.subr.mxu0 %v23363_v36 }
 0xb57   :  { %19431 = vmatprep.subr.mxu1 %v23408_v42  ;;  %19389 = vmatpush3.msra.mxu0 %v23363_v36 }
 0xb58   :  { %19432 = vmatpush3.msra.mxu1 %v23408_v42  ;;  %19390 = vmatprep.subr.mxu0 %v23381_v44 }
 0xb59   :  { %19433 = vmatprep.subr.mxu1 %v23425_v49  ;;  %19391 = vmatpush3.msra.mxu0 %v23381_v44 }
 0xb5a   :  { %19434 = vmatpush3.msra.mxu1 %v23425_v49  ;;  %19392 = vmatprep.subr.mxu0 %v23390_v2 }
 0xb5b   :  { %19435 = vmatprep.subr.mxu1 %v23441_v30  ;;  %19393 = vmatpush3.msra.mxu0 %v23390_v2 }
 0xb5c   :  { %19436 = vmatpush3.msra.mxu1 %v23441_v30  ;;  %19394 = vmatprep.subr.mxu0 %v23406_v8 }
 0xb5d   :  { %19437 = vmatprep.subr.mxu1 %v23452_v60  ;;  %19395 = vmatpush3.msra.mxu0 %v23406_v8 }
 0xb5e   :  { %19438 = vmatpush3.msra.mxu1 %v23452_v60  ;;  %19396 = vmatprep.subr.mxu0 %v23423_v51 }
 0xb5f   :  { %19440 = vmatmul.mubr.f32.vlgmr.msra.gmra.mxu1 %v10854_v18  ;;  %19477 = vmatprep.subr.mxu1 %v23240_v27 }
 0xb60   :  { %19397 = vmatpush3.msra.mxu0 %v23423_v51  ;;  %19478 = vmatpush3.msra.mxu1 %v23240_v27  ;;  %v25333_v27 = vld [vmem:[#allocation22_spill] sm:$0xff] }
 0xb61   :  { %19509 = vmatprep.mubr.f32.mxu1 %v23488_v17  ;;  %19398 = vmatprep.subr.mxu0 %v23438_v7 }
 0xb62   :  { %19479 = vmatprep.subr.mxu1 %v23248_v21  ;;  %19399 = vmatpush3.msra.mxu0 %v23438_v7 }
 0xb63   :  { %19480 = vmatpush3.msra.mxu1 %v23248_v21  ;;  %19400 = vmatprep.subr.mxu0 %v23456_v1  ;;  %v25335_v21 = vld [vmem:[#allocation24_spill] sm:$0xff] }
 0xb64   :  { %19481 = vmatprep.subr.mxu1 %v23261_v29  ;;  %19401 = vmatpush3.msra.mxu0 %v23456_v1 }
 0xb65   :  { %19482 = vmatpush3.msra.mxu1 %v23261_v29  ;;  %19402 = vmatprep.subr.mxu0 %v23462_v40  ;;  %v25338_v29 = vld [vmem:[#allocation27_spill] sm:$0xff] }
 0xb66   :  { %19483 = vmatprep.subr.mxu1 %v23276_v31  ;;  %19403 = vmatpush3.msra.mxu0 %v23462_v40 }
 0xb67   :  { %19484 = vmatpush3.msra.mxu1 %v23276_v31  ;;  %19405 = vmatmul.mubr.f32.vlgmr.msra.gmra.mxu0 %v23486_v20  ;;  %v11455_v31 = vld [vmem:[%s25135_s12 + $0x8] sm:$0xff] }
 0xb68   :  { %19442 = vmatprep.subr.mxu0 %v23256_v63  ;;  %19485 = vmatprep.subr.mxu1 %v23292_v48 }
 0xb69   :  { %19443 = vmatpush3.msra.mxu0 %v23256_v63  ;;  %19474 = vmatprep.mubr.f32.mxu0 %v23488_v17  ;;  %v25336_v63 = vld [vmem:[#allocation25_spill] sm:$0xff] }
 0xb6a   :  { %19486 = vmatpush3.msra.mxu1 %v23292_v48  ;;  %19444 = vmatprep.subr.mxu0 %v23271_v61 }
 0xb6b   :  { %19487 = vmatprep.subr.mxu1 %v23303_v54  ;;  %19445 = vmatpush3.msra.mxu0 %v23271_v61  ;;  %v25339_v61 = vld [vmem:[#allocation28_spill] sm:$0xff] }
 0xb6c   :  { %19488 = vmatpush3.msra.mxu1 %v23303_v54  ;;  %19446 = vmatprep.subr.mxu0 %v23286_v26 }
 0xb6d   :  { %19489 = vmatprep.subr.mxu1 %v23317_v28  ;;  %19447 = vmatpush3.msra.mxu0 %v23286_v26  ;;  %v23633_v26 = vand.u32 4294901760, %v11455_v31 }
 0xb6e   :  { %19490 = vmatpush3.msra.mxu1 %v23317_v28  ;;  %19448 = vmatprep.subr.mxu0 %v23301_v9 }
 0xb6f   :  { %19491 = vmatprep.subr.mxu1 %v23333_v58  ;;  %19449 = vmatpush3.msra.mxu0 %v23301_v9  ;;  %v23639_v48 = vsub.f32 %v11455_v31, %v23633_v26  ;;  %v23641_v9 = vand.u32 4294901760, %v11454_v62 }
 0xb70   :  { %19492 = vmatpush3.msra.mxu1 %v23333_v58  ;;  %19450 = vmatprep.subr.mxu0 %v23321_v11 }
 0xb71   :  { %19493 = vmatprep.subr.mxu1 %v23350_v35  ;;  %19451 = vmatpush3.msra.mxu0 %v23321_v11  ;;  %v23646_v54 = vand.u32 4294901760, %v23639_v48  ;;  %v23649_v52 = vsub.f32 %v11454_v62, %v23641_v9 }
 0xb72   :  { %19494 = vmatpush3.msra.mxu1 %v23350_v35  ;;  %19452 = vmatprep.subr.mxu0 %v23328_v15  ;;  %v25341_v35 = vld [vmem:[#allocation29_spill] sm:$0xff] }
 0xb73   :  { %19495 = vmatprep.subr.mxu1 %v23366_v32  ;;  %19453 = vmatpush3.msra.mxu0 %v23328_v15  ;;  %v11581_v38 = vsub.f32 %v23639_v48, %v23646_v54  ;;  %v23656_v28 = vand.u32 4294901760, %v23649_v52 }
 0xb74   :  { %19496 = vmatpush3.msra.mxu1 %v23366_v32  ;;  %19454 = vmatprep.subr.mxu0 %v23345_v59 }
 0xb75   :  { %19497 = vmatprep.subr.mxu1 %v23377_v56  ;;  %19455 = vmatpush3.msra.mxu0 %v23345_v59  ;;  %v11582_v11 = vand.u32 4294901760, %v11581_v38  ;;  %v11588_v15 = vsub.f32 %v23649_v52, %v23656_v28 }
 0xb76   :  { %19498 = vmatpush3.msra.mxu1 %v23377_v56  ;;  %19456 = vmatprep.subr.mxu0 %v23360_v46 }
 0xb77   :  { %19499 = vmatprep.subr.mxu1 %v23392_v50  ;;  %19457 = vmatpush3.msra.mxu0 %v23360_v46  ;;  %v11589_v12 = vand.u32 4294901760, %v11588_v15 }
 0xb78   :  { %19500 = vmatpush3.msra.mxu1 %v23392_v50  ;;  %19458 = vmatprep.subr.mxu0 %v25333_v27 }
 0xb79   :  { %19501 = vmatprep.subr.mxu1 %v23408_v42  ;;  %19459 = vmatpush3.msra.mxu0 %v25333_v27  ;;  %v23696_v27 = vsub.f32 %v16230_v53, %v23672_v0 }
 0xb7a   :  { %19502 = vmatpush3.msra.mxu1 %v23408_v42  ;;  %19460 = vmatprep.subr.mxu0 %v25334_v24 }
 0xb7b   :  { %19503 = vmatprep.subr.mxu1 %v23425_v49  ;;  %19461 = vmatpush3.msra.mxu0 %v25334_v24 }
 0xb7c   :  { %19504 = vmatpush3.msra.mxu1 %v23425_v49  ;;  %19462 = vmatprep.subr.mxu0 %v25335_v21 }
 0xb7d   :  { %19505 = vmatprep.subr.mxu1 %v23441_v30  ;;  %19463 = vmatpush3.msra.mxu0 %v25335_v21 }
 0xb7e   :  { %19506 = vmatpush3.msra.mxu1 %v23441_v30  ;;  %19464 = vmatprep.subr.mxu0 %v25336_v63 }
 0xb7f   :  { %19507 = vmatprep.subr.mxu1 %v23452_v60  ;;  %19465 = vmatpush3.msra.mxu0 %v25336_v63 }
 0xb80   :  { %19508 = vmatpush3.msra.mxu1 %v23452_v60  ;;  %19466 = vmatprep.subr.mxu0 %v25337_v19 }
 0xb81   :  { %19510 = vmatmul.mubr.f32.vlgmr.msra.gmra.mxu1 %v23483_v55  ;;  %19467 = vmatpush3.msra.mxu0 %v25337_v19 }
 0xb82   :  { %19468 = vmatprep.subr.mxu0 %v25338_v29  ;;  %19519 = vmatprep.subr.mxu1 %v11582_v11 }
 0xb83   :  { %19469 = vmatpush3.msra.mxu0 %v25338_v29  ;;  %19520 = vmatpush3.msra.mxu1 %v11582_v11 }
 0xb84   :  { %19470 = vmatprep.subr.mxu0 %v25339_v61  ;;  %19521 = vmatprep.subr.mxu1 %v11589_v12 }
 0xb85   :  { %19471 = vmatpush3.msra.mxu0 %v25339_v61  ;;  %19522 = vmatpush3.msra.mxu1 %v11589_v12  ;;  %v23704_v61 = vand.u32 4294901760, %v23696_v27 }
 0xb86   :  { %19472 = vmatprep.subr.mxu0 %v25340_v41  ;;  %19533 = vmatprep.subr.mxu1 %v23633_v26 }
 0xb87   :  { %19473 = vmatpush3.msra.mxu0 %v25340_v41 }
 0xb88   :  { %19475 = vmatmul.mubr.f32.vlgmr.msra.gmra.mxu0 %v23483_v55  ;;  %19512 = vmatprep.subr.mxu0 %v23633_v26  ;;  %v23675_v55 = vsub.f32 %v16231_v6, %v23670_v39 }
 0xb89   :  { %19513 = vmatpush3.msra.mxu0 %v23633_v26 }
 0xb8a   :  { %19514 = vmatprep.subr.mxu0 %v23641_v9  ;;  %v23699_v21 = vand.u32 4294901760, %v23675_v55 }
 0xb8b   :  { %19515 = vmatpush3.msra.mxu0 %v23641_v9 }
 0xb8c   :  { %19526 = vmatprep.subr.mxu0 %v23639_v48  ;;  %v12089_v62 = vsub.f32 %v23675_v55, %v23699_v21 }
 0xbfe   :  { %v19371_v59 = vpop.f32.mrf.mxu1 }
 0xc00   :  { %v11009_v56 = vpop.f32.mrf.mxu1 }
 0xc06   :  { %v19336_v58 = vpop.f32.mrf.mxu0 }
 0xc07   :  { %v10859_v46 = vadd.f32 %v19336_v58, %v25341_v35  ;;  %v12096_v58 = vsub.f32 %v23696_v27, %v23704_v61  ;;  %v12090_v35 = vand.u32 4294901760, %v12089_v62 }
 0xc08   :  { %v10848_v37 = vpop.f32.mrf.mxu0 }
 0xc09   :  { %v10849_v32 = vadd.f32 %v10848_v37, %v23481_v13  ;;  %v11016_v44 = vadd.f32 %v19371_v59, %v10859_v46  ;;  %v16233_v59 = vld [vmem:[%s25135_s12 + $0x28] sm:$0xff] }
 0xc0b   :  { %v11010_v42 = vadd.f32 %v11009_v56, %v10849_v32  ;;  %v23726_v32 = vand.u32 4294901760, %v16233_v59  ;;  %v16232_v56 = vld [vmem:[%s25135_s12 + $0x20] sm:$0xff] }
 0xc1f   :  { %v19441_v2 = vpop.f32.mrf.mxu1 }
 0xc21   :  { %v11215_v49 = vpop.f32.mrf.mxu1 }
 0xc27   :  { %v19406_v36 = vpop.f32.mrf.mxu0 }
 0xc28   :  { %v11127_v8 = vadd.f32 %v19406_v36, %v11016_v44 }
 0xc29   :  { %v11119_v50 = vpop.f32.mrf.mxu0 }
 0xc2a   :  { %v11120_v51 = vadd.f32 %v11119_v50, %v11010_v42  ;;  %v11224_v7 = vadd.f32 %v19441_v2, %v11127_v8  ;;  %v23734_v2 = vand.u32 4294901760, %v16232_v56  ;;  %v23742_v50 = vsub.f32 %v16233_v59, %v23726_v32 }
 0xc2c   :  { %v11216_v40 = vadd.f32 %v11215_v49, %v11120_v51  ;;  %v23754_v51 = vand.u32 4294901760, %v23742_v50 }
 0xc41   :  { %v19511_v30 = vpop.f32.mrf.mxu1 }
 0xc43   :  { %v11435_v25 = vpop.f32.mrf.mxu1 }
 0xc48   :  { %v19476_v60 = vpop.f32.mrf.mxu0 }
 0xc49   :  { %v11349_v1 = vadd.f32 %v19476_v60, %v11224_v7  ;;  %v12606_v60 = vsub.f32 %v23742_v50, %v23754_v51 }
 0xc4a   :  { %v11342_v33 = vpop.f32.mrf.mxu0 }
 0xc4b   :  { %v11442_v5 = vadd.f32 %v19511_v30, %v11349_v1  ;;  %v11343_v13 = vadd.f32 %v11342_v33, %v11216_v40 }
 0xc4d   :  { %v11436_v45 = vadd.f32 %v11435_v25, %v11343_v13  ;;  %v11449_v57 = vrot.slane %v11442_v5, 7  ;;  %v12473_v23 = vrot.slane %v11442_v5, 1  ;;  %v11968_v15 = vsel %vm51_vm0, %v11442_v5, 0 }
 0xc4e   :  { %v23723_v36 = vand.u32 4294901760, %v11968_v15  ;;  %v12607_v13 = vand.u32 4294901760, %v12606_v60 }
 0xc4f   :  { %v11448_v34 = vrot.slane %v11436_v45, 7  ;;  %v12472_v22 = vrot.slane %v11436_v45, 1  ;;  %v11965_v41 = vsel %vm51_vm0, %v11436_v45, 0 }
 0xc50   :  { %v23714_v12 = vand.u32 4294901760, %v11965_v41 }
 0xc51   :  { %v11450_v20 = vsel %vm1273_vm1, %v11448_v34, %v11449_v57  ;;  %v23681_v17 = vsel %vm2470_vm3, %v12473_v23, %v12472_v22  ;;  %v11451_v18 = vsel %vm1273_vm1, %v11449_v57, %v11448_v34  ;;  %v23687_v16 = vsel %vm2470_vm3, %v12472_v22, %v12473_v23 }
 0xc52   :  { %v11460_v47 = vsel %vm51_vm0, %v11450_v20, 0  ;;  %v11452_v10 = vsel %vm1279_vm2, %v11451_v18, 0.0  ;;  %v12038_v44 = vsub.f32 %v11965_v41, %v23714_v12  ;;  %v12477_v7 = vsel %vm2478_vm5, %v23681_v17, 0.0  ;;  %v16234_v20 = vld [vmem:[%s25125_s1 + $0x50] sm:$0xff] }
 0xc53   :  { %v11457_v43 = vsel %vm51_vm0, %v11452_v10, 0  ;;  %v23693_v4 = vand.u32 4294901760, %v11460_v47  ;;  %v12482_v1 = vsel %vm51_vm0, %v23687_v16, 0  ;;  %v12485_v33 = vsel %vm51_vm0, %v12477_v7, 0 }
 0xc54   :  { %v11529_v24 = vand.u32 4294901760, %v11457_v43  ;;  %v12039_v8 = vand.u32 4294901760, %v12038_v44  ;;  %v23777_v40 = vand.u32 4294901760, %v12482_v1  ;;  %v12564_v53 = vand.u32 4294901760, %v12485_v33 }
 0xc55   :  { %v11540_v63 = vsub.f32 %v11460_v47, %v23693_v4  ;;  %v12995_v17 = vsel %vm51_vm0, %v16234_v20, 0 }
 0xc56   :  { %19523 = vmatprep.mubr.f32.mxu1 %v11529_v24  ;;  %v11530_v19 = vsub.f32 %v11457_v43, %v11529_v24  ;;  %v12565_v45 = vsub.f32 %v12485_v33, %v12564_v53  ;;  %v23827_v18 = vand.u32 4294901760, %v12995_v17 }
 0xc57   :  { %19524 = vmatmul.mubr.f32.vlgmr.msra.gmra.mxu1 %v23693_v4  ;;  %v11541_v29 = vand.u32 4294901760, %v11540_v63 }
 0xc58   :  { %19534 = vmatpush3.msra.mxu1 %v23633_v26  ;;  %v11531_v31 = vand.u32 4294901760, %v11530_v19  ;;  %v12566_v57 = vand.u32 4294901760, %v12565_v45  ;;  %v23830_v16 = vsub.f32 %v12995_v17, %v23827_v18 }
 0xc59   :  { %19535 = vmatprep.subr.mxu1 %v23641_v9  ;;  %v11542_v38 = vsub.f32 %v11540_v63, %v11541_v29 }
 0xc5a   :  { %19536 = vmatpush3.msra.mxu1 %v23641_v9  ;;  %19537 = vmatprep.mubr.f32.mxu1 %v11531_v31  ;;  %v11532_v11 = vsub.f32 %v11530_v19, %v11531_v31  ;;  %v12567_v34 = vsub.f32 %v12565_v45, %v12566_v57  ;;  %v13069_v47 = vand.u32 4294901760, %v23830_v16 }
 0xc5b   :  { %19538 = vmatmul.mubr.f32.vlgmr.msra.gmra.mxu1 %v11541_v29  ;;  %19547 = vmatprep.subr.mxu1 %v23633_v26  ;;  %v11543_v46 = vand.u32 4294901760, %v11542_v38 }
 0xc5c   :  { %19548 = vmatpush3.msra.mxu1 %v23633_v26  ;;  %19551 = vmatprep.mubr.f32.mxu1 %v11529_v24  ;;  %v11533_v37 = vand.u32 4294901760, %v11532_v11  ;;  %v12097_v26 = vand.u32 4294901760, %v12096_v58  ;;  %v13070_v10 = vsub.f32 %v23830_v16, %v13069_v47 }
 0xc5d   :  { %19549 = vmatprep.subr.mxu1 %v23641_v9 }
 0xc5e   :  { %19516 = vmatprep.mubr.f32.mxu0 %v11533_v37  ;;  %19550 = vmatpush3.msra.mxu1 %v23641_v9  ;;  %v23737_v9 = vsub.f32 %v11968_v15, %v23723_v36  ;;  %v13071_v43 = vand.u32 4294901760, %v13070_v10 }
 0xc5f   :  { %19517 = vmatmul.mubr.f32.vlgmr.msra.gmra.mxu0 %v11543_v46  ;;  %19552 = vmatmul.mubr.f32.vlgmr.msra.gmra.mxu1 %v23693_v4 }
 0xc60   :  { %19561 = vmatprep.subr.mxu1 %v12090_v35  ;;  %19527 = vmatpush3.msra.mxu0 %v23639_v48  ;;  %v23748_v48 = vsub.f32 %v16232_v56, %v23734_v2  ;;  %v12049_v42 = vand.u32 4294901760, %v23737_v9 }
 0xc61   :  { %19530 = vmatprep.mubr.f32.mxu0 %v11530_v19  ;;  %19562 = vmatpush3.msra.mxu1 %v12090_v35 }
 0xc62   :  { %19565 = vmatprep.mubr.f32.mxu1 %v23714_v12  ;;  %19528 = vmatprep.subr.mxu0 %v23649_v52  ;;  %v23761_v49 = vand.u32 4294901760, %v23748_v48  ;;  %v12050_v30 = vsub.f32 %v23737_v9, %v12049_v42 }
 0xc63   :  { %19563 = vmatprep.subr.mxu1 %v12097_v26  ;;  %19529 = vmatpush3.msra.mxu0 %v23649_v52  ;;  %v12040_v52 = vsub.f32 %v12038_v44, %v12039_v8 }
 0xc64   :  { %19564 = vmatpush3.msra.mxu1 %v12097_v26  ;;  %19531 = vmatmul.mubr.f32.vlgmr.msra.gmra.mxu0 %v11540_v63  ;;  %v12613_v6 = vsub.f32 %v23748_v48, %v23761_v49  ;;  %v12051_v5 = vand.u32 4294901760, %v12050_v30 }
 0xc65   :  { %19540 = vmatprep.subr.mxu0 %v23646_v54  ;;  %19566 = vmatmul.mubr.f32.vlgmr.msra.gmra.mxu1 %v23723_v36 }
 0xc66   :  { %19575 = vmatprep.subr.mxu1 %v23670_v39  ;;  %19541 = vmatpush3.msra.mxu0 %v23646_v54  ;;  %v12614_v25 = vand.u32 4294901760, %v12613_v6 }
 0xc67   :  { %19544 = vmatprep.mubr.f32.mxu0 %v11529_v24  ;;  %19576 = vmatpush3.msra.mxu1 %v23670_v39 }
 0xc68   :  { %19579 = vmatprep.mubr.f32.mxu1 %v12039_v8  ;;  %19542 = vmatprep.subr.mxu0 %v23656_v28 }
 0xc69   :  { %19577 = vmatprep.subr.mxu1 %v23672_v0  ;;  %19543 = vmatpush3.msra.mxu0 %v23656_v28  ;;  %v12041_v28 = vand.u32 4294901760, %v12040_v52 }
 0xc6a   :  { %19578 = vmatpush3.msra.mxu1 %v23672_v0  ;;  %19545 = vmatmul.mubr.f32.vlgmr.msra.gmra.mxu0 %v23693_v4 }
 0xc6b   :  { %19554 = vmatprep.subr.mxu0 %v23670_v39  ;;  %19580 = vmatmul.mubr.f32.vlgmr.msra.gmra.mxu1 %v12049_v42 }
 0xc6c   :  { %19589 = vmatprep.subr.mxu1 %v23670_v39  ;;  %19555 = vmatpush3.msra.mxu0 %v23670_v39 }
 0xc6d   :  { %19558 = vmatprep.mubr.f32.mxu0 %v12041_v28  ;;  %19590 = vmatpush3.msra.mxu1 %v23670_v39  ;;  %v12555_v39 = vsub.f32 %v12482_v1, %v23777_v40  ;;  %v16235_v28 = vld [vmem:[%s25125_s1 + $0x58] sm:$0xff] }
 0xc6e   :  { %19593 = vmatprep.mubr.f32.mxu1 %v23714_v12  ;;  %19556 = vmatprep.subr.mxu0 %v23672_v0  ;;  %v12998_v33 = vsel %vm51_vm0, %v16235_v28, 0 }
 0xc6f   :  { %19591 = vmatprep.subr.mxu1 %v23672_v0  ;;  %19557 = vmatpush3.msra.mxu0 %v23672_v0 }
 0xc70   :  { %19592 = vmatpush3.msra.mxu1 %v23672_v0  ;;  %19559 = vmatmul.mubr.f32.vlgmr.msra.gmra.mxu0 %v12051_v5  ;;  %v12556_v0 = vand.u32 4294901760, %v12555_v39 }
 0xc71   :  { %19568 = vmatprep.subr.mxu0 %v23675_v55  ;;  %19594 = vmatmul.mubr.f32.vlgmr.msra.gmra.mxu1 %v23723_v36 }
 0xc72   :  { %19603 = vmatprep.subr.mxu1 %v12607_v13  ;;  %19569 = vmatpush3.msra.mxu0 %v23675_v55  ;;  %v12557_v23 = vsub.f32 %v12555_v39, %v12556_v0  ;;  %v12568_v55 = vand.u32 4294901760, %v12567_v34 }
 0xc73   :  { %19572 = vmatprep.mubr.f32.mxu0 %v12038_v44  ;;  %19604 = vmatpush3.msra.mxu1 %v12607_v13 }
 0xc74   :  { %19607 = vmatprep.mubr.f32.mxu1 %v23777_v40  ;;  %19570 = vmatprep.subr.mxu0 %v23696_v27  ;;  %v12558_v22 = vand.u32 4294901760, %v12557_v23 }
 0xc75   :  { %19605 = vmatprep.subr.mxu1 %v12614_v25  ;;  %19571 = vmatpush3.msra.mxu0 %v23696_v27 }
 0xc76   :  { %19606 = vmatpush3.msra.mxu1 %v12614_v25  ;;  %19573 = vmatmul.mubr.f32.vlgmr.msra.gmra.mxu0 %v23737_v9 }
 0xc77   :  { %19582 = vmatprep.subr.mxu0 %v23699_v21  ;;  %19608 = vmatmul.mubr.f32.vlgmr.msra.gmra.mxu1 %v12564_v53 }
 0xc78   :  { %19617 = vmatprep.subr.mxu1 %v23726_v32  ;;  %19583 = vmatpush3.msra.mxu0 %v23699_v21 }
 0xc79   :  { %19586 = vmatprep.mubr.f32.mxu0 %v23714_v12  ;;  %19618 = vmatpush3.msra.mxu1 %v23726_v32 }
 0xc7a   :  { %19621 = vmatprep.mubr.f32.mxu1 %v12556_v0  ;;  %19584 = vmatprep.subr.mxu0 %v23704_v61 }
 0xc7b   :  { %19619 = vmatprep.subr.mxu1 %v23734_v2  ;;  %19585 = vmatpush3.msra.mxu0 %v23704_v61 }
 0xc7c   :  { %19620 = vmatpush3.msra.mxu1 %v23734_v2  ;;  %19587 = vmatmul.mubr.f32.vlgmr.msra.gmra.mxu0 %v23723_v36 }
 0xc7d   :  { %19596 = vmatprep.subr.mxu0 %v23726_v32  ;;  %19622 = vmatmul.mubr.f32.vlgmr.msra.gmra.mxu1 %v12566_v57 }
 0xc7e   :  { %19631 = vmatprep.subr.mxu1 %v23726_v32  ;;  %19597 = vmatpush3.msra.mxu0 %v23726_v32 }
 0xc7f   :  { %19600 = vmatprep.mubr.f32.mxu0 %v12558_v22  ;;  %19632 = vmatpush3.msra.mxu1 %v23726_v32 }
 0xc80   :  { %19635 = vmatprep.mubr.f32.mxu1 %v23777_v40  ;;  %19598 = vmatprep.subr.mxu0 %v23734_v2 }
 0xc81   :  { %19633 = vmatprep.subr.mxu1 %v23734_v2  ;;  %19599 = vmatpush3.msra.mxu0 %v23734_v2 }
 0xc82   :  { %19634 = vmatpush3.msra.mxu1 %v23734_v2  ;;  %19601 = vmatmul.mubr.f32.vlgmr.msra.gmra.mxu0 %v12568_v55 }
 0xc83   :  { %19610 = vmatprep.subr.mxu0 %v23742_v50  ;;  %19636 = vmatmul.mubr.f32.vlgmr.msra.gmra.mxu1 %v12564_v53 }
 0xc84   :  { %19611 = vmatpush3.msra.mxu0 %v23742_v50  ;;  %19614 = vmatprep.mubr.f32.mxu0 %v12555_v39 }
 0xc85   :  { %19612 = vmatprep.subr.mxu0 %v23748_v48  ;;  %19649 = vmatprep.mubr.f32.mxu1 %v23827_v18 }
 0xc86   :  { %19613 = vmatpush3.msra.mxu0 %v23748_v48 }
 0xc87   :  { %19615 = vmatmul.mubr.f32.vlgmr.msra.gmra.mxu0 %v12565_v45  ;;  %19624 = vmatprep.subr.mxu0 %v23754_v51  ;;  %v23841_v45 = vand.u32 4294901760, %v12998_v33 }
 0xc88   :  { %19625 = vmatpush3.msra.mxu0 %v23754_v51  ;;  %19628 = vmatprep.mubr.f32.mxu0 %v23777_v40 }
 0xc89   :  { %19626 = vmatprep.subr.mxu0 %v23761_v49  ;;  %v13078_v17 = vsub.f32 %v12998_v33, %v23841_v45 }
 0xc8a   :  { %19627 = vmatpush3.msra.mxu0 %v23761_v49 }
 0xc8b   :  { %19629 = vmatmul.mubr.f32.vlgmr.msra.gmra.mxu0 %v12564_v53 }
 0xc8c   :  { %19642 = vmatprep.mubr.f32.mxu0 %v13071_v43 }
 0xd17   :  { %v19525_v4 = vpop.f32.mrf.mxu1 }
 0xd19   :  { %v11626_v27 = vpop.f32.mrf.mxu1 }
 0xd1b   :  { %v19539_v24 = vpop.f32.mrf.mxu1 }
 0xd1d   :  { %v11790_v21 = vpop.f32.mrf.mxu1 }
 0xd1f   :  { %v19518_v63 = vpop.f32.mrf.mxu0  ;;  %v19553_v19 = vpop.f32.mrf.mxu1 }
 0xd20   :  { %v11633_v11 = vadd.f32 %v19525_v4, %v19518_v63 }
 0xd21   :  { %v11535_v29 = vpop.f32.mrf.mxu0  ;;  %v11954_v61 = vpop.f32.mrf.mxu1 }
 0xd22   :  { %v11627_v15 = vadd.f32 %v11626_v27, %v11535_v29 }
 0xd24   :  { %v19532_v41 = vpop.f32.mrf.mxu0 }
 0xd25   :  { %v19567_v31 = vpop.f32.mrf.mxu1  ;;  %v11716_v12 = vadd.f32 %v19532_v41, %v11633_v11 }
 0xd26   :  { %v11708_v62 = vpop.f32.mrf.mxu0 }
 0xd27   :  { %v12134_v38 = vpop.f32.mrf.mxu1  ;;  %v11709_v37 = vadd.f32 %v11708_v62, %v11627_v15  ;;  %v11799_v46 = vadd.f32 %v19539_v24, %v11716_v12 }
 0xd29   :  { %v11791_v32 = vadd.f32 %v11790_v21, %v11709_v37 }
 0xd2a   :  { %v19546_v58 = vpop.f32.mrf.mxu0 }
 0xd2b   :  { %v19581_v59 = vpop.f32.mrf.mxu1  ;;  %v11882_v26 = vadd.f32 %v19546_v58, %v11799_v46 }
 0xd2c   :  { %v11875_v35 = vpop.f32.mrf.mxu0 }
 0xd2d   :  { %v12298_v36 = vpop.f32.mrf.mxu1  ;;  %v11876_v9 = vadd.f32 %v11875_v35, %v11791_v32  ;;  %v11961_v50 = vadd.f32 %v19553_v19, %v11882_v26 }
 0xd2f   :  { %v11955_v42 = vadd.f32 %v11954_v61, %v11876_v9  ;;  %v13079_v61 = vand.u32 4294901760, %v13078_v17 }
 0xd30   :  { %v19560_v56 = vpop.f32.mrf.mxu0 }
 0xd31   :  { %v19595_v2 = vpop.f32.mrf.mxu1  ;;  %v12054_v52 = vadd.f32 %v19560_v56, %v11961_v50 }
 0xd32   :  { %v12043_v44 = vpop.f32.mrf.mxu0 }
 0xd33   :  { %v12462_v48 = vpop.f32.mrf.mxu1  ;;  %v12044_v7 = vadd.f32 %v12043_v44, %v11955_v42  ;;  %v12141_v60 = vadd.f32 %v19567_v31, %v12054_v52 }
 0xd35   :  { %v12135_v6 = vadd.f32 %v12134_v38, %v12044_v7 }
 0xd36   :  { %v19574_v8 = vpop.f32.mrf.mxu0 }
 0xd37   :  { %v19609_v49 = vpop.f32.mrf.mxu1  ;;  %v12224_v5 = vadd.f32 %v19574_v8, %v12141_v60 }
 0xd38   :  { %v12216_v51 = vpop.f32.mrf.mxu0 }
 0xd39   :  { %v12651_v40 = vpop.f32.mrf.mxu1  ;;  %v12217_v25 = vadd.f32 %v12216_v51, %v12135_v6  ;;  %v12307_v0 = vadd.f32 %v19581_v59, %v12224_v5  ;;  %v13080_v59 = vsub.f32 %v13078_v17, %v13079_v61 }
 0xd3b   :  { %v12299_v22 = vadd.f32 %v12298_v36, %v12217_v25  ;;  %v13081_v32 = vand.u32 4294901760, %v13080_v59  ;;  %v14109_v59 = vld [vmem:[%s25137_s13 + $0x70] sm:$0xff] }
 0xd3c   :  { %v19588_v30 = vpop.f32.mrf.mxu0 }
 0xd3d   :  { %v19623_v53 = vpop.f32.mrf.mxu1  ;;  %v12390_v43 = vadd.f32 %v19588_v30, %v12307_v0 }
 0xd3e   :  { %v12383_v1 = vpop.f32.mrf.mxu0 }
 0xd3f   :  { %v12815_v23 = vpop.f32.mrf.mxu1  ;;  %v12384_v63 = vadd.f32 %v12383_v1, %v12299_v22  ;;  %v12469_v31 = vadd.f32 %v19595_v2, %v12390_v43 }
 0xd41   :  { %v12463_v15 = vadd.f32 %v12462_v48, %v12384_v63  ;;  %v13502_v48 = vld [vmem:[%s25136_s7] sm:$0xff] }
 0xd42   :  { %v19602_v13 = vpop.f32.mrf.mxu0  ;;  %v23860_v51 = vand.u32 4294901760, %v13502_v48 }
 0xd43   :  { %v12658_v57 = vadd.f32 %v19609_v49, %v19602_v13  ;;  %v19637_v24 = vpop.f32.mrf.mxu1 }
 0xd44   :  { %v12560_v39 = vpop.f32.mrf.mxu0  ;;  %v23866_v52 = vsub.f32 %v13502_v48, %v23860_v51 }
 0xd45   :  { %v12652_v55 = vadd.f32 %v12651_v40, %v12560_v39  ;;  %v12979_v11 = vpop.f32.mrf.mxu1 }
 0xd46   :  { %v23873_v7 = vand.u32 4294901760, %v23866_v52 }
 0xd47   :  { %v19616_v34 = vpop.f32.mrf.mxu0 }
 0xd48   :  { %v12741_v20 = vadd.f32 %v19616_v34, %v12658_v57  ;;  %v13636_v60 = vsub.f32 %v23866_v52, %v23873_v7 }
 0xd49   :  { %v12733_v10 = vpop.f32.mrf.mxu0 }
 0xd4a   :  { %v12734_v4 = vadd.f32 %v12733_v10, %v12652_v55  ;;  %v12824_v27 = vadd.f32 %v19623_v53, %v12741_v20  ;;  %v13637_v1 = vand.u32 4294901760, %v13636_v60 }
 0xd4b   :  { %v19630_v21 = vpop.f32.mrf.mxu0 }
 0xd4c   :  { %v12907_v19 = vadd.f32 %v19630_v21, %v12824_v27  ;;  %v12816_v29 = vadd.f32 %v12815_v23, %v12734_v4 }
 0xd4d   :  { %v12900_v41 = vpop.f32.mrf.mxu0 }
 0xd4e   :  { %v12986_v62 = vadd.f32 %v19637_v24, %v12907_v19  ;;  %v12901_v38 = vadd.f32 %v12900_v41, %v12816_v29 }
 0xd50   :  { %v12990_v12 = vadd.f32 %v12986_v62, %v12469_v31  ;;  %v12980_v58 = vadd.f32 %v12979_v11, %v12901_v38 }
 0xd52   :  { %v13029_v37 = vand.u32 4294901760, %v12990_v12  ;;  %v12989_v35 = vadd.f32 %v12980_v58, %v12463_v15 }
 0xd54   :  { %v13117_v46 = vsub.f32 %v12990_v12, %v13029_v37  ;;  %v13032_v36 = vand.u32 4294901760, %v12989_v35  ;;  %19638 = vmatprep.subr.mxu0 %v13029_v37  ;;  %v14110_v12 = vld [vmem:[%s25137_s13 + $0x78] sm:$0xff] }
 0xd55   :  { %19639 = vmatpush3.msra.mxu0 %v13029_v37  ;;  %v23894_v58 = vand.u32 4294901760, %v14110_v12 }
 0xd56   :  { %v13124_v56 = vsub.f32 %v12989_v35, %v13032_v36  ;;  %19640 = vmatprep.subr.mxu0 %v13032_v36  ;;  %v13118_v26 = vand.u32 4294901760, %v13117_v46  ;;  %v23902_v35 = vand.u32 4294901760, %v14109_v59 }
 0xd57   :  { %19641 = vmatpush3.msra.mxu0 %v13032_v36 }
 0xd58   :  { %19652 = vmatprep.subr.mxu0 %v13117_v46  ;;  %19643 = vmatmul.mubr.f32.vlgmr.msra.gmra.mxu0 %v13081_v32  ;;  %v13119_v44 = vsub.f32 %v13117_v46, %v13118_v26  ;;  %v13125_v2 = vand.u32 4294901760, %v13124_v56  ;;  %v23913_v32 = vsub.f32 %v14109_v59, %v23902_v35  ;;  %v14098_v59 = vld [vmem:[%s25137_s13 + $0x18] sm:$0xff] }
 0xd59   :  { %19653 = vmatpush3.msra.mxu0 %v13117_v46  ;;  %19656 = vmatprep.mubr.f32.mxu0 %v23830_v16  ;;  %v13503_v16 = vld [vmem:[%s25136_s7 + $0x8] sm:$0xff] }
 0xd5a   :  { %19654 = vmatprep.subr.mxu0 %v13124_v56  ;;  %v13120_v9 = vand.u32 4294901760, %v13119_v44  ;;  %v13126_v50 = vsub.f32 %v13124_v56, %v13125_v2  ;;  %v14108_v46 = vld [vmem:[%s25137_s13 + $0x68] sm:$0xff] }
 0xd5b   :  { %19655 = vmatpush3.msra.mxu0 %v13124_v56  ;;  %v23915_v56 = vand.u32 4294901760, %v14108_v46 }
 0xd5c   :  { %19645 = vmatprep.subr.mxu1 %v13120_v9  ;;  %19666 = vmatprep.subr.mxu0 %v13118_v26  ;;  %v13127_v8 = vand.u32 4294901760, %v13126_v50 }
 0xd5d   :  { %19646 = vmatpush3.msra.mxu1 %v13120_v9  ;;  %19657 = vmatmul.mubr.f32.vlgmr.msra.gmra.mxu0 %v13078_v17  ;;  %v23928_v9 = vsub.f32 %v14108_v46, %v23915_v56 }
 0xd5e   :  { %19667 = vmatpush3.msra.mxu0 %v13118_v26  ;;  %19647 = vmatprep.subr.mxu1 %v13127_v8  ;;  %v14107_v26 = vld [vmem:[%s25137_s13 + $0x60] sm:$0xff] }
 0xd5f   :  { %19668 = vmatprep.subr.mxu0 %v13125_v2  ;;  %19648 = vmatpush3.msra.mxu1 %v13127_v8  ;;  %v23930_v50 = vand.u32 4294901760, %v14107_v26  ;;  %v14106_v8 = vld [vmem:[%s25137_s13 + $0x58] sm:$0xff]  ;;  %v23940_v48 = vand.u32 4294901760, %v23928_v9 }
 0xd60   :  { %19669 = vmatpush3.msra.mxu0 %v13125_v2  ;;  %19650 = vmatmul.mubr.f32.vlgmr.msra.gmra.mxu1 %v23841_v45  ;;  %v23925_v2 = vand.u32 4294901760, %v23913_v32 }
 0xd61   :  { %19659 = vmatprep.subr.mxu1 %v13029_v37  ;;  %19663 = vmatprep.mubr.f32.mxu1 %v13069_v47  ;;  %v13539_v47 = vand.u32 4294901760, %v13503_v16  ;;  %25347 = vst [vmem:[#allocation31_spill] sm:$0xff] %v23940_v48 }
 0xd62   :  { %19660 = vmatpush3.msra.mxu1 %v13029_v37  ;;  %19670 = vmatprep.mubr.f32.mxu0 %v23827_v18  ;;  %25346 = vst [vmem:[#allocation33_spill] sm:$0xff] %v23925_v2 }
 0xd63   :  { %19661 = vmatprep.subr.mxu1 %v13032_v36  ;;  %19671 = vmatmul.mubr.f32.vlgmr.msra.gmra.mxu0 %v23841_v45  ;;  %v23858_v42 = vsub.f32 %v13503_v16, %v13539_v47 }
 0xd64   :  { %19662 = vmatpush3.msra.mxu1 %v13032_v36  ;;  %19680 = vmatprep.subr.mxu0 %v13539_v47 }
 0xd65   :  { %19664 = vmatmul.mubr.f32.vlgmr.msra.gmra.mxu1 %v13079_v61  ;;  %19673 = vmatprep.subr.mxu1 %v13029_v37 }
 0xd66   :  { %19674 = vmatpush3.msra.mxu1 %v13029_v37  ;;  %19677 = vmatprep.mubr.f32.mxu1 %v23827_v18  ;;  %v23863_v18 = vand.u32 4294901760, %v23858_v42  ;;  %v23900_v37 = vsub.f32 %v14110_v12, %v23894_v58 }
 0xd67   :  { %19675 = vmatprep.subr.mxu1 %v13032_v36  ;;  %19681 = vmatpush3.msra.mxu0 %v13539_v47 }
 0xd68   :  { %19676 = vmatpush3.msra.mxu1 %v13032_v36  ;;  %19682 = vmatprep.subr.mxu0 %v23860_v51  ;;  %v13629_v49 = vsub.f32 %v23858_v42, %v23863_v18  ;;  %v23910_v36 = vand.u32 4294901760, %v23900_v37 }
 0xd69   :  { %19678 = vmatmul.mubr.f32.vlgmr.msra.gmra.mxu1 %v23841_v45  ;;  %19683 = vmatpush3.msra.mxu0 %v23860_v51 }
 0xd6a   :  { %19694 = vmatprep.subr.mxu0 %v23858_v42  ;;  %v13630_v30 = vand.u32 4294901760, %v13629_v49  ;;  %25345 = vst [vmem:[#allocation32_spill] sm:$0xff] %v23910_v36  ;;  %v14216_v44 = vsub.f32 %v23900_v37, %v23910_v36  ;;  %v14230_v49 = vsub.f32 %v23928_v9, %v23940_v48 }
 0xd6c   :  { %19687 = vmatprep.subr.mxu1 %v13630_v30  ;;  %v14217_v16 = vand.u32 4294901760, %v14216_v44 }
 0xd6d   :  { %19688 = vmatpush3.msra.mxu1 %v13630_v30 }
 0xd6e   :  { %19689 = vmatprep.subr.mxu1 %v13637_v1 }
 0xd6f   :  { %19690 = vmatpush3.msra.mxu1 %v13637_v1  ;;  %v14104_v1 = vld [vmem:[%s25137_s13 + $0x48] sm:$0xff] }
 0xd70   :  { %19701 = vmatprep.subr.mxu1 %v13539_v47 }
 0xe18   :  { %v19644_v28 = vpop.f32.mrf.mxu0 }
 0xe1a   :  { %v13073_v40 = vpop.f32.mrf.mxu0 }
 0xe1d   :  { %v19658_v6 = vpop.f32.mrf.mxu0 }
 0xe1f   :  { %v13246_v13 = vpop.f32.mrf.mxu0 }
 0xe20   :  { %v19651_v33 = vpop.f32.mrf.mxu1 }
 0xe21   :  { %v13171_v5 = vadd.f32 %v19651_v33, %v19644_v28  ;;  %v14231_v28 = vand.u32 4294901760, %v14230_v49  ;;  %v23971_v33 = vand.u32 4294901760, %v14104_v1 }
 0xe22   :  { %v13164_v53 = vpop.f32.mrf.mxu1 }
 0xe23   :  { %v13254_v25 = vadd.f32 %v19658_v6, %v13171_v5  ;;  %v13165_v39 = vadd.f32 %v13164_v53, %v13073_v40  ;;  %v19672_v57 = vpop.f32.mrf.mxu0 }
 0xe25   :  { %v13247_v45 = vadd.f32 %v13246_v13, %v13165_v39  ;;  %v19665_v0 = vpop.f32.mrf.mxu1  ;;  %v13413_v20 = vpop.f32.mrf.mxu0  ;;  %v14103_v13 = vld [vmem:[%s25137_s13 + $0x40] sm:$0xff]  ;;  %v23985_v39 = vsub.f32 %v14104_v1, %v23971_v33 }
 0xe26   :  { %v13337_v23 = vadd.f32 %v19665_v0, %v13254_v25 }
 0xe27   :  { %v13328_v34 = vpop.f32.mrf.mxu1 }
 0xe28   :  { %v13420_v22 = vadd.f32 %v19672_v57, %v13337_v23  ;;  %v13329_v55 = vadd.f32 %v13328_v34, %v13247_v45  ;;  %v23987_v45 = vand.u32 4294901760, %v14103_v13  ;;  %v14102_v57 = vld [vmem:[%s25137_s13 + $0x38] sm:$0xff]  ;;  %v23999_v34 = vand.u32 4294901760, %v23985_v39 }
 0xe29   :  { %v19679_v17 = vpop.f32.mrf.mxu1 }
 0xe2a   :  { %v13414_v10 = vadd.f32 %v13413_v20, %v13329_v55  ;;  %v13499_v43 = vadd.f32 %v19679_v17, %v13420_v22  ;;  %25351 = vst [vmem:[#allocation2_spill] sm:$0xff] %v23999_v34  ;;  %v24002_v22 = vsub.f32 %v14103_v13, %v23987_v45  ;;  %v24004_v55 = vand.u32 4294901760, %v14102_v57  ;;  %v14101_v17 = vld [vmem:[%s25137_s13 + $0x30] sm:$0xff] }
 0xe2b   :  { %v13492_v4 = vpop.f32.mrf.mxu1 }
 0xe2c   :  { %v13508_v27 = vsel %vm51_vm0, %v13499_v43, 0  ;;  %v13493_v24 = vadd.f32 %v13492_v4, %v13414_v10  ;;  %v14258_v43 = vsub.f32 %v23985_v39, %v23999_v34  ;;  %v24014_v4 = vand.u32 4294901760, %v24002_v22 }
 0xe2d   :  { %v13587_v21 = vand.u32 4294901760, %v13508_v27 }
 0xe2e   :  { %v13505_v63 = vsel %vm51_vm0, %v13493_v24, 0  ;;  %25352 = vst [vmem:[#allocation3_spill] sm:$0xff] %v24014_v4  ;;  %v24020_v24 = vand.u32 4294901760, %v14101_v17 }
 0xe2f   :  { %v13588_v19 = vsub.f32 %v13508_v27, %v13587_v21  ;;  %v13577_v29 = vand.u32 4294901760, %v13505_v63  ;;  %v24017_v27 = vsub.f32 %v14102_v57, %v24004_v55 }
 0xe31   :  { %v13589_v61 = vand.u32 4294901760, %v13588_v19  ;;  %v13578_v41 = vsub.f32 %v13505_v63, %v13577_v29  ;;  %19691 = vmatprep.mubr.f32.mxu1 %v13577_v29  ;;  %v14259_v63 = vand.u32 4294901760, %v14258_v43 }
 0xe32   :  { %19692 = vmatmul.mubr.f32.vlgmr.msra.gmra.mxu1 %v13587_v21 }
 0xe33   :  { %19702 = vmatpush3.msra.mxu1 %v13539_v47  ;;  %v13579_v31 = vand.u32 4294901760, %v13578_v41  ;;  %v13590_v62 = vsub.f32 %v13588_v19, %v13589_v61 }
 0xe34   :  { %19703 = vmatprep.subr.mxu1 %v23860_v51 }
 0xe35   :  { %19704 = vmatpush3.msra.mxu1 %v23860_v51  ;;  %19705 = vmatprep.mubr.f32.mxu1 %v13579_v31  ;;  %v13580_v38 = vsub.f32 %v13578_v41, %v13579_v31  ;;  %v13591_v15 = vand.u32 4294901760, %v13590_v62  ;;  %v14099_v31 = vld [vmem:[%s25137_s13 + $0x20] sm:$0xff] }
 0xe36   :  { %19706 = vmatmul.mubr.f32.vlgmr.msra.gmra.mxu1 %v13589_v61  ;;  %19715 = vmatprep.subr.mxu1 %v13539_v47 }
 0xe37   :  { %19716 = vmatpush3.msra.mxu1 %v13539_v47  ;;  %19719 = vmatprep.mubr.f32.mxu1 %v13577_v29  ;;  %v13581_v11 = vand.u32 4294901760, %v13580_v38  ;;  %v14223_v47 = vsub.f32 %v23913_v32, %v23925_v2 }
 0xe38   :  { %19717 = vmatprep.subr.mxu1 %v23860_v51 }
 0xe39   :  { %19684 = vmatprep.mubr.f32.mxu0 %v13581_v11  ;;  %19718 = vmatpush3.msra.mxu1 %v23860_v51  ;;  %v23946_v51 = vand.u32 4294901760, %v14106_v8 }
 0xe3a   :  { %19685 = vmatmul.mubr.f32.vlgmr.msra.gmra.mxu0 %v13591_v15  ;;  %19720 = vmatmul.mubr.f32.vlgmr.msra.gmra.mxu1 %v13587_v21  ;;  %v24046_v15 = vand.u32 4294901760, %v14099_v31 }
 0xe3b   :  { %19695 = vmatpush3.msra.mxu0 %v23858_v42  ;;  %19698 = vmatprep.mubr.f32.mxu0 %v13578_v41  ;;  %v23943_v42 = vsub.f32 %v14107_v26, %v23930_v50  ;;  %v23960_v60 = vsub.f32 %v14106_v8, %v23946_v51  ;;  %v24035_v41 = vsub.f32 %v14101_v17, %v24020_v24  ;;  %v24062_v8 = vand.u32 4294901760, %v14098_v59 }
 0xe3c   :  { %19696 = vmatprep.subr.mxu0 %v23866_v52  ;;  %19757 = vmatprep.subr.mxu1 %v14217_v16  ;;  %v24060_v44 = vsub.f32 %v14099_v31, %v24046_v15 }
 0xe3d   :  { %19697 = vmatpush3.msra.mxu0 %v23866_v52  ;;  %v14224_v52 = vand.u32 4294901760, %v14223_v47  ;;  %19758 = vmatpush3.msra.mxu1 %v14217_v16  ;;  %v23975_v5 = vand.u32 4294901760, %v23960_v60  ;;  %v24050_v12 = vand.u32 4294901760, %v24035_v41  ;;  %v14097_v47 = vld [vmem:[%s25137_s13 + $0x10] sm:$0xff]  ;;  %v24077_v49 = vsub.f32 %v14098_v59, %v24062_v8 }
 0xe3e   :  { %19699 = vmatmul.mubr.f32.vlgmr.msra.gmra.mxu0 %v13588_v19  ;;  %19708 = vmatprep.subr.mxu0 %v23863_v18  ;;  %v14265_v19 = vsub.f32 %v24002_v22, %v24014_v4  ;;  %v24079_v1 = vand.u32 4294901760, %v14097_v47 }
 0xe3f   :  { %19709 = vmatpush3.msra.mxu0 %v23863_v18  ;;  %19712 = vmatprep.mubr.f32.mxu0 %v13577_v29  ;;  %v14105_v18 = vld [vmem:[%s25137_s13 + $0x50] sm:$0xff]  ;;  %25349 = vst [vmem:[#allocation8_spill] sm:$0xff] %v23975_v5  ;;  %v14244_v0 = vsub.f32 %v23960_v60, %v23975_v5  ;;  %v24029_v29 = vand.u32 4294901760, %v24017_v27  ;;  %25354 = vst [vmem:[#allocation5_spill] sm:$0xff] %v24050_v12  ;;  %v14279_v16 = vsub.f32 %v24035_v41, %v24050_v12 }
 0xe40   :  { %19710 = vmatprep.subr.mxu0 %v23873_v7  ;;  %v23957_v30 = vand.u32 4294901760, %v14105_v18  ;;  %19759 = vmatprep.subr.mxu1 %v14224_v52  ;;  %v14266_v62 = vand.u32 4294901760, %v14265_v19  ;;  %v24092_v57 = vsub.f32 %v14097_v47, %v24079_v1  ;;  %v25366_v12 = vld [vmem:[#allocation16_spill] sm:$0xff] }
 0xe41   :  { %19711 = vmatpush3.msra.mxu0 %v23873_v7  ;;  %v23955_v7 = vand.u32 4294901760, %v23943_v42  ;;  %19760 = vmatpush3.msra.mxu1 %v14224_v52  ;;  %v14245_v20 = vand.u32 4294901760, %v14244_v0  ;;  %25353 = vst [vmem:[#allocation4_spill] sm:$0xff] %v24029_v29  ;;  %v14272_v38 = vsub.f32 %v24017_v27, %v24029_v29  ;;  %v24074_v52 = vand.u32 4294901760, %v24060_v44 }
 0xe42   :  { %19713 = vmatmul.mubr.f32.vlgmr.msra.gmra.mxu0 %v13587_v21  ;;  %19722 = vmatprep.subr.mxu0 %v23894_v58  ;;  %v23969_v6 = vsub.f32 %v14105_v18, %v23957_v30  ;;  %v14100_v21 = vld [vmem:[%s25137_s13 + $0x28] sm:$0xff]  ;;  %v24089_v0 = vand.u32 4294901760, %v24077_v49  ;;  %v24104_v43 = vand.u32 4294901760, %v24092_v57 }
 0xe43   :  { %19723 = vmatpush3.msra.mxu0 %v23894_v58  ;;  %25348 = vst [vmem:[#allocation18_spill] sm:$0xff] %v23955_v7  ;;  %v14237_v40 = vsub.f32 %v23943_v42, %v23955_v7  ;;  %19761 = vmatprep.subr.mxu1 %v14231_v28  ;;  %v24031_v61 = vand.u32 4294901760, %v14100_v21  ;;  %v14273_v46 = vand.u32 4294901760, %v14272_v38  ;;  %25356 = vst [vmem:[#allocation7_spill] sm:$0xff] %v24074_v52 }
 0xe44   :  { %19724 = vmatprep.subr.mxu0 %v23902_v35  ;;  %v23982_v25 = vand.u32 4294901760, %v23969_v6  ;;  %19762 = vmatpush3.msra.mxu1 %v14231_v28  ;;  %v14280_v28 = vand.u32 4294901760, %v14279_v16  ;;  %25357 = vst [vmem:[#allocation22_spill] sm:$0xff] %v24089_v0  ;;  %25358 = vst [vmem:[#allocation23_spill] sm:$0xff] %v24104_v43  ;;  %v14307_v31 = vsub.f32 %v24092_v57, %v24104_v43 }
 0xe45   :  { %19725 = vmatpush3.msra.mxu0 %v23902_v35  ;;  %v14238_v53 = vand.u32 4294901760, %v14237_v40  ;;  %v24044_v11 = vsub.f32 %v14100_v21, %v24031_v61  ;;  %v14096_v40 = vld [vmem:[%s25137_s13 + $0x8] sm:$0xff] }
 0xe46   :  { %19726 = vmatprep.subr.mxu0 %v23915_v56  ;;  %25350 = vst [vmem:[#allocation9_spill] sm:$0xff] %v23982_v25  ;;  %v14251_v23 = vsub.f32 %v23969_v6, %v23982_v25  ;;  %v14308_v59 = vand.u32 4294901760, %v14307_v31 }
 0xe47   :  { %19727 = vmatpush3.msra.mxu0 %v23915_v56  ;;  %19763 = vmatprep.subr.mxu1 %v14238_v53  ;;  %v24057_v26 = vand.u32 4294901760, %v24044_v11 }
 0xe48   :  { %19728 = vmatprep.subr.mxu0 %v23930_v50  ;;  %19764 = vmatpush3.msra.mxu1 %v14238_v53  ;;  %v14252_v10 = vand.u32 4294901760, %v14251_v23  ;;  %v14293_v53 = vsub.f32 %v24060_v44, %v24074_v52  ;;  %v24095_v23 = vand.u32 4294901760, %v14096_v40 }
 0xe49   :  { %19729 = vmatpush3.msra.mxu0 %v23930_v50  ;;  %19765 = vmatprep.subr.mxu1 %v14245_v20  ;;  %25355 = vst [vmem:[#allocation6_spill] sm:$0xff] %v24057_v26  ;;  %v14286_v18 = vsub.f32 %v24044_v11, %v24057_v26 }
 0xe4a   :  { %19730 = vmatprep.subr.mxu0 %v23946_v51  ;;  %19766 = vmatpush3.msra.mxu1 %v14245_v20  ;;  %v14095_v20 = vld [vmem:[%s25137_s13] sm:$0xff]  ;;  %v14294_v17 = vand.u32 4294901760, %v14293_v53 }
 0xe4b   :  { %19731 = vmatpush3.msra.mxu0 %v23946_v51  ;;  %19767 = vmatprep.subr.mxu1 %v14252_v10  ;;  %v14287_v13 = vand.u32 4294901760, %v14286_v18  ;;  %v24106_v21 = vand.u32 4294901760, %v14095_v20  ;;  %v25362_v53 = vld [vmem:[#allocation14_spill] sm:$0xff] }
 0xe4c   :  { %19732 = vmatprep.subr.mxu0 %v23957_v30  ;;  %19768 = vmatpush3.msra.mxu1 %v14252_v10  ;;  %v14300_v10 = vsub.f32 %v24077_v49, %v24089_v0 }
 0xe4d   :  { %19733 = vmatpush3.msra.mxu0 %v23957_v30  ;;  %19769 = vmatprep.subr.mxu1 %v14259_v63 }
 0xe4e   :  { %19734 = vmatprep.subr.mxu0 %v23971_v33  ;;  %19770 = vmatpush3.msra.mxu1 %v14259_v63  ;;  %v24110_v63 = vsub.f32 %v14096_v40, %v24095_v23  ;;  %v14301_v19 = vand.u32 4294901760, %v14300_v10  ;;  %v25363_v10 = vld [vmem:[#allocation17_spill] sm:$0xff] }
 0xe4f   :  { %19735 = vmatpush3.msra.mxu0 %v23971_v33  ;;  %19771 = vmatprep.subr.mxu1 %v14266_v62 }
 0xe50   :  { %19736 = vmatprep.subr.mxu0 %v23987_v45  ;;  %19772 = vmatpush3.msra.mxu1 %v14266_v62  ;;  %v24116_v62 = vsub.f32 %v14095_v20, %v24106_v21  ;;  %v24120_v38 = vand.u32 4294901760, %v24110_v63 }
 0xe51   :  { %19737 = vmatpush3.msra.mxu0 %v23987_v45  ;;  %19773 = vmatprep.subr.mxu1 %v14273_v46 }
 0xe52   :  { %19738 = vmatprep.subr.mxu0 %v24004_v55  ;;  %19774 = vmatpush3.msra.mxu1 %v14273_v46  ;;  %25359 = vst [vmem:[#allocation24_spill] sm:$0xff] %v24120_v38  ;;  %v24124_v46 = vand.u32 4294901760, %v24116_v62  ;;  %v14314_v16 = vsub.f32 %v24110_v63, %v24120_v38 }
 0xe53   :  { %19739 = vmatpush3.msra.mxu0 %v24004_v55  ;;  %19775 = vmatprep.subr.mxu1 %v14280_v28 }
 0xe54   :  { %19740 = vmatprep.subr.mxu0 %v24020_v24  ;;  %19776 = vmatpush3.msra.mxu1 %v14280_v28  ;;  %25360 = vst [vmem:[#allocation25_spill] sm:$0xff] %v24124_v46  ;;  %v14321_v47 = vsub.f32 %v24116_v62, %v24124_v46  ;;  %v14315_v18 = vand.u32 4294901760, %v14314_v16  ;;  %v25364_v46 = vld [vmem:[#allocation15_spill] sm:$0xff] }
 0xe55   :  { %19741 = vmatpush3.msra.mxu0 %v24020_v24  ;;  %19777 = vmatprep.subr.mxu1 %v14287_v13 }
 0xe56   :  { %19742 = vmatprep.subr.mxu0 %v24031_v61  ;;  %19778 = vmatpush3.msra.mxu1 %v14287_v13  ;;  %v14322_v28 = vand.u32 4294901760, %v14321_v47  ;;  %v25361_v13 = vld [vmem:[#allocation13_spill] sm:$0xff] }
 0xe57   :  { %19743 = vmatpush3.msra.mxu0 %v24031_v61  ;;  %19779 = vmatprep.subr.mxu1 %v14294_v17  ;;  %v3806_v20 = vadd.f32 %v25362_v53, %v25361_v13 }
 0xe58   :  { %19744 = vmatprep.subr.mxu0 %v24046_v15  ;;  %19780 = vmatpush3.msra.mxu1 %v14294_v17 }
 0xe59   :  { %19745 = vmatpush3.msra.mxu0 %v24046_v15  ;;  %19781 = vmatprep.subr.mxu1 %v14301_v19 }
 0xe5a   :  { %19746 = vmatprep.subr.mxu0 %v24062_v8  ;;  %19782 = vmatpush3.msra.mxu1 %v14301_v19  ;;  %v3900_v19 = vadd.f32 %v25363_v10, %v3806_v20 }
 0xe5b   :  { %19747 = vmatpush3.msra.mxu0 %v24062_v8  ;;  %19783 = vmatprep.subr.mxu1 %v14308_v59 }
 0xe5c   :  { %19748 = vmatprep.subr.mxu0 %v24079_v1  ;;  %19784 = vmatpush3.msra.mxu1 %v14308_v59  ;;  %v3988_v38 = vadd.f32 %v25364_v46, %v3900_v19  ;;  %v25365_v59 = vld [vmem:[#allocation19_spill] sm:$0xff]  ;;  %v20361_v46 = vld [vmem:[%s25124_s0] sm:$0xff] }
 0xe5d   :  { %19749 = vmatpush3.msra.mxu0 %v24079_v1  ;;  %19785 = vmatprep.subr.mxu1 %v14315_v18 }
 0xe5e   :  { %19750 = vmatprep.subr.mxu0 %v24095_v23  ;;  %19786 = vmatpush3.msra.mxu1 %v14315_v18  ;;  %v4091_v47 = vadd.f32 %v25365_v59, %v3988_v38 }
 0xe5f   :  { %19751 = vmatpush3.msra.mxu0 %v24095_v23  ;;  %19787 = vmatprep.subr.mxu1 %v14322_v28 }
 0xe60   :  { %19752 = vmatprep.subr.mxu0 %v24106_v21  ;;  %19788 = vmatpush3.msra.mxu1 %v14322_v28  ;;  %v4176_v29 = vadd.f32 %v25366_v12, %v4091_v47 }
 0xe61   :  { %19753 = vmatpush3.msra.mxu0 %v24106_v21  ;;  %19827 = vmatprep.subr.mxu1 %v23894_v58 }
 0xe62   :  { %19792 = vmatprep.subr.mxu0 %v23900_v37  ;;  %v4185_v38 = vadd.f32 %v20361_v46, %v4176_v29 }
 0xef2   :  { %v19693_v40 = vpop.f32.mrf.mxu1 }
 0xef4   :  { %v13674_v17 = vpop.f32.mrf.mxu1 }
 0xef6   :  { %v19707_v31 = vpop.f32.mrf.mxu1 }
 0xef8   :  { %v13838_v18 = vpop.f32.mrf.mxu1 }
 0xefa   :  { %v19686_v54 = vpop.f32.mrf.mxu0  ;;  %v19721_v53 = vpop.f32.mrf.mxu1 }
 0xefb   :  { %v13681_v43 = vadd.f32 %v19693_v40, %v19686_v54 }
 0xefc   :  { %v13583_v16 = vpop.f32.mrf.mxu0  ;;  %v14002_v19 = vpop.f32.mrf.mxu1 }
 0xefd   :  { %v13675_v28 = vadd.f32 %v13674_v17, %v13583_v16  ;;  %v25367_v17 = vld [vmem:[#allocation21_spill] sm:$0xff] }
 0xefe   :  { %v19700_v0 = vpop.f32.mrf.mxu0 }
 0xeff   :  { %v13764_v52 = vadd.f32 %v19700_v0, %v13681_v43  ;;  %v9183_v0 = vadd.f32 %v25367_v17, %v4185_v38  ;;  %v25368_v43 = vld [vmem:[#allocation20_spill] sm:$0xff] }
 0xf00   :  { %v13756_v26 = vpop.f32.mrf.mxu0 }
 0xf01   :  { %v13757_v4 = vadd.f32 %v13756_v26, %v13675_v28  ;;  %v13847_v13 = vadd.f32 %v19707_v31, %v13764_v52 }
 0xf02   :  { %v19714_v34 = vpop.f32.mrf.mxu0 }
 0xf03   :  { %v13930_v20 = vadd.f32 %v19714_v34, %v13847_v13  ;;  %v13839_v10 = vadd.f32 %v13838_v18, %v13757_v4 }
 0xf04   :  { %v13923_v25 = vpop.f32.mrf.mxu0 }
 0xf05   :  { %v14009_v54 = vadd.f32 %v19721_v53, %v13930_v20  ;;  %v13924_v40 = vadd.f32 %v13923_v25, %v13839_v10 }
 0xf07   :  { %v14013_v16 = vadd.f32 %v14009_v54, %v25368_v43  ;;  %v14003_v12 = vadd.f32 %v14002_v19, %v13924_v40 }
 0xf09   :  { %v14015_v26 = vmul.f32 0.70710677, %v14013_v16  ;;  %v14012_v52 = vadd.f32 %v14003_v12, %v9183_v0 }
 0xf0b   :  { %v14017_v31 = vand.u32 2147483647, %v14015_v26  ;;  %v14014_v59 = vmul.f32 0.70710677, %v14012_v52  ;;  %vm14061_vm7 = vcmp.lt.f32.partialorder %v14015_v26, 0.0 }
 0xf0d   :  { %v14019_v34 = vmul.f32 0.3275911, %v14017_v31  ;;  %v14016_v4 = vand.u32 2147483647, %v14014_v59  ;;  %v14049_v29 = vsub.f32 0.0, %v14017_v31  ;;  %vm14060_vm8 = vcmp.lt.f32.partialorder %v14014_v59, 0.0 }
 0xf0f   :  { %v14021_v47 = vadd.f32 1.0, %v14019_v34  ;;  %v14018_v18 = vmul.f32 0.3275911, %v14016_v4  ;;  %v14048_v53 = vsub.f32 0.0, %v14016_v4  ;;  %v14051_v46 = vmul.f32 %v14049_v29, %v14017_v31 }
 0xf11   :  { %20352 = vrcp.f32 %v14021_v47  ;;  %v14020_v28 = vadd.f32 1.0, %v14018_v18  ;;  %v14050_v19 = vmul.f32 %v14048_v53, %v14016_v4  ;;  %v14054_v0 = vmul.f32 1.442695, %v14051_v46 }
 0xf13   :  { %20354 = vrcp.f32 %v14020_v28  ;;  %v14052_v5 = vmul.f32 1.442695, %v14050_v19 }
 0xf14   :  { %20356 = vpow2.f32 %v14054_v0 }
 0xf15   :  { %20358 = vpow2.f32 %v14052_v5 }
 0xf1e   :  { %v20353_v13 = vpop.eup %20352 }
 0xf1f   :  { %v14025_v25 = vmul.f32 %v20353_v13, %v14021_v47 }
 0xf20   :  { %v20355_v20 = vpop.eup %20354 }
 0xf21   :  { %v14027_v10 = vsub.f32 2.0, %v14025_v25  ;;  %v14024_v38 = vmul.f32 %v20355_v20, %v14020_v28 }
 0xf23   :  { %v14029_v54 = vmul.f32 %v20353_v13, %v14027_v10  ;;  %v14026_v40 = vsub.f32 2.0, %v14024_v38  ;;  %v20357_v10 = vpop.eup %20356 }
 0xf25   :  { %v14031_v17 = vmul.f32 1.0614054, %v14029_v54  ;;  %v14028_v43 = vmul.f32 %v20355_v20, %v14026_v40  ;;  %v20359_v40 = vpop.eup %20358 }
 0xf27   :  { %v16237_v12 = vadd.f32 -1.4531521, %v14031_v17  ;;  %v14030_v34 = vmul.f32 1.0614054, %v14028_v43 }
 0xf29   :  { %v14035_v7 = vmul.f32 %v16237_v12, %v14029_v54  ;;  %v16236_v18 = vadd.f32 -1.4531521, %v14030_v34  ;;  %v14067_v12 = vmul.f32 0.5, %v14013_v16 }
 0xf2b   :  { %v14037_v48 = vadd.f32 1.4214138, %v14035_v7  ;;  %v14034_v2 = vmul.f32 %v16236_v18, %v14028_v43  ;;  %v14066_v18 = vmul.f32 0.5, %v14012_v52 }
 0xf2d   :  { %v14039_v47 = vmul.f32 %v14037_v48, %v14029_v54  ;;  %v14036_v36 = vadd.f32 1.4214138, %v14034_v2 }
 0xf2f   :  { %v16239_v25 = vadd.f32 -0.28449672, %v14039_v47  ;;  %v14038_v31 = vmul.f32 %v14036_v36, %v14028_v43 }
 0xf31   :  { %v14043_v28 = vmul.f32 %v16239_v25, %v14029_v54  ;;  %v16238_v29 = vadd.f32 -0.28449672, %v14038_v31 }
 0xf33   :  { %v14045_v13 = vadd.f32 0.2548296, %v14043_v28  ;;  %v14042_v4 = vmul.f32 %v16238_v29, %v14028_v43 }
 0xf35   :  { %v14047_v53 = vmul.f32 %v14045_v13, %v14029_v54  ;;  %v14044_v20 = vadd.f32 0.2548296, %v14042_v4 }
 0xf37   :  { %v14057_v46 = vmul.f32 %v20357_v10, %v14047_v53  ;;  %v14046_v38 = vmul.f32 %v14044_v20, %v14028_v43 }
 0xf39   :  { %v14059_v19 = vsub.f32 1.0, %v14057_v46  ;;  %v14056_v17 = vmul.f32 %v20359_v40, %v14046_v38 }
 0xf3b   :  { %v14063_v0 = vsub.f32 0.0, %v14059_v19  ;;  %v14058_v7 = vsub.f32 1.0, %v14056_v17 }
 0xf3d   :  { %v14065_v5 = vsel %vm14061_vm7, %v14063_v0, %v14059_v19  ;;  %v14062_v2 = vsub.f32 0.0, %v14058_v7 }
 0xf3e   :  { %v14069_v48 = vadd.f32 1.0, %v14065_v5 }
 0xf3f   :  { %v14064_v36 = vsel %vm14060_vm8, %v14062_v2, %v14058_v7  ;;  %v25378_v7 = vld [vmem:[#allocation5_spill] sm:$0xff] }
 0xf40   :  { %v24144_v34 = vmul.f32 %v14069_v48, %v14067_v12  ;;  %v14068_v54 = vadd.f32 1.0, %v14064_v36  ;;  %v25379_v12 = vld [vmem:[#allocation6_spill] sm:$0xff] }
 0xf42   :  { %v24146_v47 = vmul.f32 %v14068_v54, %v14066_v18  ;;  %v14090_v25 = vrot.slane %v24144_v34, 7  ;;  %v15480_v26 = vrot.slane %v24144_v34, 1 }
 0xf44   :  { %v14089_v43 = vrot.slane %v24146_v47, 7  ;;  %v15479_v31 = vrot.slane %v24146_v47, 1  ;;  %v24344_v0 = vand.u32 4294901760, %v24146_v47 }
 0xf46   :  { %v14092_v28 = vsel %vm1273_vm1, %v14090_v25, %v14089_v43  ;;  %v14091_v16 = vsel %vm1273_vm1, %v14089_v43, %v14090_v25  ;;  %v24158_v52 = vsel %vm2470_vm3, %v15479_v31, %v15480_v26  ;;  %v24168_v4 = vsel %vm2470_vm3, %v15480_v26, %v15479_v31  ;;  %v16247_v43 = vld [vmem:[%s25137_s13 + $0xb8] sm:$0xff]  ;;  %v25380_v31 = vld [vmem:[#allocation7_spill] sm:$0xff] }
 0xf47   :  { %v14093_v59 = vsel %vm1279_vm2, %v14092_v28, 0.0  ;;  %v24162_v29 = vand.u32 4294901760, %v14091_v16  ;;  %v24380_v25 = vsub.f32 %v24146_v47, %v24344_v0  ;;  %v25381_v47 = vld [vmem:[#allocation22_spill] sm:$0xff] }
 0xf48   :  { %v24164_v13 = vand.u32 4294901760, %v14093_v59 }
 0xf49   :  { %v24171_v53 = vsub.f32 %v14091_v16, %v24162_v29 }
 0xf4a   :  { %19789 = vmatprep.mubr.f32.mxu1 %v24164_v13  ;;  %v14193_v10 = vsub.f32 %v14093_v59, %v24164_v13  ;;  %v16246_v59 = vld [vmem:[%s25137_s13 + $0xb0] sm:$0xff] }
 0xf4b   :  { %19790 = vmatmul.mubr.f32.vlgmr.msra.gmra.mxu1 %v24162_v29  ;;  %v14204_v14 = vand.u32 4294901760, %v24171_v53 }
 0xf4c   :  { %19828 = vmatpush3.msra.mxu1 %v23894_v58  ;;  %v14194_v20 = vand.u32 4294901760, %v14193_v10 }
 0xf4d   :  { %19829 = vmatprep.subr.mxu1 %v23902_v35  ;;  %v14205_v3 = vsub.f32 %v24171_v53, %v14204_v14 }
 0xf4e   :  { %19830 = vmatpush3.msra.mxu1 %v23902_v35  ;;  %19859 = vmatprep.mubr.f32.mxu1 %v14194_v20  ;;  %v14195_v46 = vsub.f32 %v14193_v10, %v14194_v20  ;;  %v16245_v20 = vld [vmem:[%s25137_s13 + $0xa8] sm:$0xff] }
 0xf4f   :  { %19831 = vmatprep.subr.mxu1 %v23915_v56  ;;  %v14206_v40 = vand.u32 4294901760, %v14205_v3  ;;  %v24414_v3 = vand.u32 4294901760, %v16246_v59 }
 0xf50   :  { %19832 = vmatpush3.msra.mxu1 %v23915_v56  ;;  %v14196_v38 = vand.u32 4294901760, %v14195_v46 }
 0xf51   :  { %19833 = vmatprep.subr.mxu1 %v23930_v50 }
 0xf52   :  { %19834 = vmatpush3.msra.mxu1 %v23930_v50  ;;  %19754 = vmatprep.mubr.f32.mxu0 %v14196_v38 }
 0xf53   :  { %19835 = vmatprep.subr.mxu1 %v23946_v51  ;;  %19755 = vmatmul.mubr.f32.vlgmr.msra.gmra.mxu0 %v14206_v40 }
 0xf54   :  { %19793 = vmatpush3.msra.mxu0 %v23900_v37  ;;  %19836 = vmatpush3.msra.mxu1 %v23946_v51  ;;  %v25370_v37 = vld [vmem:[#allocation33_spill] sm:$0xff] }
 0xf55   :  { %19794 = vmatprep.subr.mxu0 %v23913_v32  ;;  %19824 = vmatprep.mubr.f32.mxu0 %v14193_v10 }
 0xf56   :  { %19837 = vmatprep.subr.mxu1 %v23957_v30  ;;  %19795 = vmatpush3.msra.mxu0 %v23913_v32  ;;  %v25371_v32 = vld [vmem:[#allocation31_spill] sm:$0xff] }
 0xf57   :  { %19838 = vmatpush3.msra.mxu1 %v23957_v30  ;;  %19796 = vmatprep.subr.mxu0 %v23928_v9 }
 0xf58   :  { %19839 = vmatprep.subr.mxu1 %v23971_v33  ;;  %19797 = vmatpush3.msra.mxu0 %v23928_v9  ;;  %v16254_v9 = vld [vmem:[%s25137_s13 + $0xf0] sm:$0xff] }
 0xf59   :  { %19840 = vmatpush3.msra.mxu1 %v23971_v33  ;;  %19798 = vmatprep.subr.mxu0 %v23943_v42 }
 0xf5a   :  { %19841 = vmatprep.subr.mxu1 %v23987_v45  ;;  %19799 = vmatpush3.msra.mxu0 %v23943_v42  ;;  %v16253_v42 = vld [vmem:[%s25137_s13 + $0xe8] sm:$0xff] }
 0xf5b   :  { %19842 = vmatpush3.msra.mxu1 %v23987_v45  ;;  %19800 = vmatprep.subr.mxu0 %v23960_v60 }
 0xf5c   :  { %19843 = vmatprep.subr.mxu1 %v24004_v55  ;;  %19801 = vmatpush3.msra.mxu0 %v23960_v60 }
 0xf5d   :  { %19844 = vmatpush3.msra.mxu1 %v24004_v55  ;;  %19802 = vmatprep.subr.mxu0 %v23969_v6 }
 0xf5e   :  { %19845 = vmatprep.subr.mxu1 %v24020_v24  ;;  %19803 = vmatpush3.msra.mxu0 %v23969_v6  ;;  %v16252_v6 = vld [vmem:[%s25137_s13 + $0xe0] sm:$0xff] }
 0xf5f   :  { %19846 = vmatpush3.msra.mxu1 %v24020_v24  ;;  %19804 = vmatprep.subr.mxu0 %v23985_v39 }
 0xf60   :  { %19847 = vmatprep.subr.mxu1 %v24031_v61  ;;  %19805 = vmatpush3.msra.mxu0 %v23985_v39  ;;  %v24295_v39 = vand.u32 4294901760, %v16253_v42 }
 0xf61   :  { %19848 = vmatpush3.msra.mxu1 %v24031_v61  ;;  %19806 = vmatprep.subr.mxu0 %v24002_v22 }
 0xf62   :  { %19849 = vmatprep.subr.mxu1 %v24046_v15  ;;  %19807 = vmatpush3.msra.mxu0 %v24002_v22  ;;  %v25375_v22 = vld [vmem:[#allocation2_spill] sm:$0xff] }
 0xf63   :  { %19850 = vmatpush3.msra.mxu1 %v24046_v15  ;;  %19808 = vmatprep.subr.mxu0 %v24017_v27 }
 0xf64   :  { %19851 = vmatprep.subr.mxu1 %v24062_v8  ;;  %19809 = vmatpush3.msra.mxu0 %v24017_v27 }
 0xf65   :  { %19852 = vmatpush3.msra.mxu1 %v24062_v8  ;;  %19810 = vmatprep.subr.mxu0 %v24035_v41 }
 0xf66   :  { %19853 = vmatprep.subr.mxu1 %v24079_v1  ;;  %19811 = vmatpush3.msra.mxu0 %v24035_v41 }
 0xf67   :  { %19854 = vmatpush3.msra.mxu1 %v24079_v1  ;;  %19812 = vmatprep.subr.mxu0 %v24044_v11 }
 0xf68   :  { %19855 = vmatprep.subr.mxu1 %v24095_v23  ;;  %19813 = vmatpush3.msra.mxu0 %v24044_v11  ;;  %v16250_v11 = vld [vmem:[%s25137_s13 + $0xd0] sm:$0xff] }
 0xf69   :  { %19856 = vmatpush3.msra.mxu1 %v24095_v23  ;;  %19814 = vmatprep.subr.mxu0 %v24060_v44  ;;  %v24337_v19 = vand.u32 4294901760, %v16250_v11 }
 0xf6a   :  { %19857 = vmatprep.subr.mxu1 %v24106_v21  ;;  %19815 = vmatpush3.msra.mxu0 %v24060_v44  ;;  %v24320_v44 = vsub.f32 %v16253_v42, %v24295_v39 }
 0xf6b   :  { %19858 = vmatpush3.msra.mxu1 %v24106_v21  ;;  %19816 = vmatprep.subr.mxu0 %v24077_v49  ;;  %v24369_v18 = vsub.f32 %v16250_v11, %v24337_v19 }
 0xf6c   :  { %19860 = vmatmul.mubr.f32.vlgmr.msra.gmra.mxu1 %v14204_v14  ;;  %19897 = vmatprep.subr.mxu1 %v23894_v58  ;;  %v24352_v5 = vand.u32 4294901760, %v24320_v44 }
 0xf6d   :  { %19817 = vmatpush3.msra.mxu0 %v24077_v49  ;;  %19898 = vmatpush3.msra.mxu1 %v23894_v58  ;;  %v25369_v58 = vld [vmem:[#allocation32_spill] sm:$0xff]  ;;  %v24404_v10 = vand.u32 4294901760, %v24369_v18 }
 0xf6e   :  { %19929 = vmatprep.mubr.f32.mxu1 %v24164_v13  ;;  %19818 = vmatprep.subr.mxu0 %v24092_v57  ;;  %v14914_v26 = vsub.f32 %v24320_v44, %v24352_v5 }
 0xf6f   :  { %19899 = vmatprep.subr.mxu1 %v23902_v35  ;;  %19819 = vmatpush3.msra.mxu0 %v24092_v57  ;;  %v16249_v57 = vld [vmem:[%s25137_s13 + $0xc8] sm:$0xff] }
 0xf70   :  { %19900 = vmatpush3.msra.mxu1 %v23902_v35  ;;  %19820 = vmatprep.subr.mxu0 %v24110_v63  ;;  %v16255_v35 = vld [vmem:[%s25137_s13 + $0xf8] sm:$0xff]  ;;  %v24357_v2 = vand.u32 4294901760, %v16249_v57  ;;  %v14915_v46 = vand.u32 4294901760, %v14914_v26 }
 0xf71   :  { %19901 = vmatprep.subr.mxu1 %v23915_v56  ;;  %19821 = vmatpush3.msra.mxu0 %v24110_v63  ;;  %v25377_v63 = vld [vmem:[#allocation4_spill] sm:$0xff] }
 0xf72   :  { %19902 = vmatpush3.msra.mxu1 %v23915_v56  ;;  %19822 = vmatprep.subr.mxu0 %v24116_v62  ;;  %v24269_v56 = vand.u32 4294901760, %v16255_v35  ;;  %v24390_v16 = vsub.f32 %v16249_v57, %v24357_v2  ;;  %v16242_v57 = vld [vmem:[%s25137_s13 + $0x90] sm:$0xff] }
 0xf73   :  { %19903 = vmatprep.subr.mxu1 %v23930_v50  ;;  %19823 = vmatpush3.msra.mxu0 %v24116_v62 }
 0xf74   :  { %19904 = vmatpush3.msra.mxu1 %v23930_v50  ;;  %19825 = vmatmul.mubr.f32.vlgmr.msra.gmra.mxu0 %v24171_v53  ;;  %v25372_v50 = vld [vmem:[#allocation18_spill] sm:$0xff]  ;;  %v24288_v60 = vsub.f32 %v16255_v35, %v24269_v56  ;;  %v24420_v40 = vand.u32 4294901760, %v24390_v16 }
 0xf75   :  { %19862 = vmatprep.subr.mxu0 %v25369_v58  ;;  %19905 = vmatprep.subr.mxu1 %v23946_v51 }
 0xf76   :  { %19863 = vmatpush3.msra.mxu0 %v25369_v58  ;;  %19894 = vmatprep.mubr.f32.mxu0 %v24164_v13  ;;  %v24312_v41 = vand.u32 4294901760, %v24288_v60  ;;  %v16244_v58 = vld [vmem:[%s25137_s13 + $0xa0] sm:$0xff] }
 0xf77   :  { %19906 = vmatpush3.msra.mxu1 %v23946_v51  ;;  %19864 = vmatprep.subr.mxu0 %v25370_v37  ;;  %v25373_v51 = vld [vmem:[#allocation8_spill] sm:$0xff] }
 0xf78   :  { %19907 = vmatprep.subr.mxu1 %v23957_v30  ;;  %19865 = vmatpush3.msra.mxu0 %v25370_v37  ;;  %v14900_v17 = vsub.f32 %v24288_v60, %v24312_v41  ;;  %v25382_v37 = vld [vmem:[#allocation23_spill] sm:$0xff] }
 0xf79   :  { %19908 = vmatpush3.msra.mxu1 %v23957_v30  ;;  %19866 = vmatprep.subr.mxu0 %v25371_v32  ;;  %v24283_v30 = vand.u32 4294901760, %v16254_v9 }
 0xf7a   :  { %19909 = vmatprep.subr.mxu1 %v23971_v33  ;;  %19867 = vmatpush3.msra.mxu0 %v25371_v32  ;;  %v24430_v32 = vand.u32 4294901760, %v16245_v20 }
 0xf7b   :  { %19910 = vmatpush3.msra.mxu1 %v23971_v33  ;;  %19868 = vmatprep.subr.mxu0 %v25372_v50  ;;  %v25374_v33 = vld [vmem:[#allocation9_spill] sm:$0xff]  ;;  %v24305_v27 = vsub.f32 %v16254_v9, %v24283_v30 }
 0xf7c   :  { %19911 = vmatprep.subr.mxu1 %v23987_v45  ;;  %19869 = vmatpush3.msra.mxu0 %v25372_v50  ;;  %v14935_v50 = vsub.f32 %v24369_v18, %v24404_v10 }
 0xf7d   :  { %19912 = vmatpush3.msra.mxu1 %v23987_v45  ;;  %19870 = vmatprep.subr.mxu0 %v25373_v51  ;;  %v16251_v45 = vld [vmem:[%s25137_s13 + $0xd8] sm:$0xff] }
 0xf7e   :  { %19913 = vmatprep.subr.mxu1 %v24004_v55  ;;  %19871 = vmatpush3.msra.mxu0 %v25373_v51  ;;  %v24322_v49 = vand.u32 4294901760, %v16251_v45  ;;  %v16243_v51 = vld [vmem:[%s25137_s13 + $0x98] sm:$0xff] }
 0xf7f   :  { %19914 = vmatpush3.msra.mxu1 %v24004_v55  ;;  %19872 = vmatprep.subr.mxu0 %v25374_v33  ;;  %v24307_v55 = vand.u32 4294901760, %v16252_v6 }
 0xf80   :  { %19915 = vmatprep.subr.mxu1 %v24020_v24  ;;  %19873 = vmatpush3.msra.mxu0 %v25374_v33  ;;  %v24355_v48 = vsub.f32 %v16251_v45, %v24322_v49  ;;  %v24446_v45 = vsub.f32 %v16246_v59, %v24414_v3  ;;  %v24478_v59 = vand.u32 4294901760, %v16242_v57 }
 0xf81   :  { %19916 = vmatpush3.msra.mxu1 %v24020_v24  ;;  %19874 = vmatprep.subr.mxu0 %v25375_v22  ;;  %v25376_v24 = vld [vmem:[#allocation3_spill] sm:$0xff]  ;;  %v24335_v62 = vsub.f32 %v16252_v6, %v24307_v55  ;;  %v25383_v6 = vld [vmem:[#allocation24_spill] sm:$0xff] }
 0xf82   :  { %19917 = vmatprep.subr.mxu1 %v24031_v61  ;;  %19875 = vmatpush3.msra.mxu0 %v25375_v22  ;;  %v24387_v28 = vand.u32 4294901760, %v24355_v48  ;;  %v24448_v22 = vand.u32 4294901760, %v16244_v58 }
 0xf83   :  { %19918 = vmatpush3.msra.mxu1 %v24031_v61  ;;  %19876 = vmatprep.subr.mxu0 %v25376_v24  ;;  %v24332_v61 = vand.u32 4294901760, %v24305_v27  ;;  %v24366_v36 = vand.u32 4294901760, %v24335_v62 }
 0xf84   :  { %19919 = vmatprep.subr.mxu1 %v24046_v15  ;;  %19877 = vmatpush3.msra.mxu0 %v25376_v24  ;;  %v14928_v38 = vsub.f32 %v24355_v48, %v24387_v28  ;;  %v14942_v24 = vsub.f32 %v24390_v16, %v24420_v40  ;;  %v24476_v26 = vsub.f32 %v16244_v58, %v24448_v22 }
 0xf85   :  { %19920 = vmatpush3.msra.mxu1 %v24046_v15  ;;  %19878 = vmatprep.subr.mxu0 %v25377_v63  ;;  %v16248_v15 = vld [vmem:[%s25137_s13 + $0xc0] sm:$0xff]  ;;  %v14921_v53 = vsub.f32 %v24335_v62, %v24366_v36 }
 0xf86   :  { %19921 = vmatprep.subr.mxu1 %v24062_v8  ;;  %19879 = vmatpush3.msra.mxu0 %v25377_v63  ;;  %v24371_v54 = vand.u32 4294901760, %v16248_v15  ;;  %v14929_v11 = vand.u32 4294901760, %v14928_v38  ;;  %v25384_v63 = vld [vmem:[#allocation25_spill] sm:$0xff] }
 0xf87   :  { %19922 = vmatpush3.msra.mxu1 %v24062_v8  ;;  %19880 = vmatprep.subr.mxu0 %v25378_v7  ;;  %v14907_v8 = vsub.f32 %v24305_v27, %v24332_v61  ;;  %v14922_v9 = vand.u32 4294901760, %v14921_v53 }
 0xf88   :  { %19923 = vmatprep.subr.mxu1 %v24079_v1  ;;  %19881 = vmatpush3.msra.mxu0 %v25378_v7  ;;  %v24407_v14 = vsub.f32 %v16248_v15, %v24371_v54  ;;  %v24461_v15 = vsub.f32 %v16245_v20, %v24430_v32  ;;  %v24463_v7 = vand.u32 4294901760, %v16243_v51 }
 0xf89   :  { %19924 = vmatpush3.msra.mxu1 %v24079_v1  ;;  %19882 = vmatprep.subr.mxu0 %v25379_v12  ;;  %v14901_v1 = vand.u32 4294901760, %v14900_v17  ;;  %v14908_v13 = vand.u32 4294901760, %v14907_v8 }
 0xf8a   :  { %19925 = vmatprep.subr.mxu1 %v24095_v23  ;;  %19883 = vmatpush3.msra.mxu0 %v25379_v12  ;;  %v24436_v42 = vand.u32 4294901760, %v24407_v14  ;;  %v14936_v12 = vand.u32 4294901760, %v14935_v50  ;;  %v24488_v53 = vand.u32 4294901760, %v24461_v15  ;;  %v24491_v20 = vsub.f32 %v16243_v51, %v24463_v7 }
 0xf8b   :  { %19926 = vmatpush3.msra.mxu1 %v24095_v23  ;;  %19884 = vmatprep.subr.mxu0 %v25380_v31  ;;  %v24397_v23 = vand.u32 4294901760, %v16247_v43 }
 0xf8c   :  { %19927 = vmatprep.subr.mxu1 %v24106_v21  ;;  %19885 = vmatpush3.msra.mxu0 %v25380_v31  ;;  %v14949_v8 = vsub.f32 %v24407_v14, %v24436_v42  ;;  %v24473_v31 = vand.u32 4294901760, %v24446_v45 }
 0xf8d   :  { %19928 = vmatpush3.msra.mxu1 %v24106_v21  ;;  %19886 = vmatprep.subr.mxu0 %v25381_v47  ;;  %v14878_v21 = vand.u32 4294901760, %v24380_v25  ;;  %v24428_v35 = vsub.f32 %v16247_v43, %v24397_v23  ;;  %v16241_v43 = vld [vmem:[%s25137_s13 + $0x88] sm:$0xff] }
 0xf8e   :  { %19930 = vmatmul.mubr.f32.vlgmr.msra.gmra.mxu1 %v24162_v29  ;;  %19967 = vmatprep.subr.mxu1 %v14901_v1  ;;  %v14950_v38 = vand.u32 4294901760, %v14949_v8  ;;  %v14963_v58 = vsub.f32 %v24446_v45, %v24473_v31 }
 0xf8f   :  { %19887 = vmatpush3.msra.mxu0 %v25381_v47  ;;  %19968 = vmatpush3.msra.mxu1 %v14901_v1  ;;  %v14879_v33 = vsub.f32 %v24380_v25, %v14878_v21  ;;  %v24458_v17 = vand.u32 4294901760, %v24428_v35  ;;  %v14943_v47 = vand.u32 4294901760, %v14942_v24 }
 0xf90   :  { %19999 = vmatprep.mubr.f32.mxu1 %v24344_v0  ;;  %19888 = vmatprep.subr.mxu0 %v25382_v37  ;;  %v14964_v24 = vand.u32 4294901760, %v14963_v58 }
 0xf91   :  { %19969 = vmatprep.subr.mxu1 %v14908_v13  ;;  %19889 = vmatpush3.msra.mxu0 %v25382_v37  ;;  %v14880_v1 = vand.u32 4294901760, %v14879_v33  ;;  %v24500_v37 = vand.u32 4294901760, %v24476_v26  ;;  %v24512_v33 = vand.u32 4294901760, %v24491_v20 }
 0xf92   :  { %19970 = vmatpush3.msra.mxu1 %v14908_v13  ;;  %19890 = vmatprep.subr.mxu0 %v25383_v6  ;;  %v16240_v13 = vld [vmem:[%s25137_s13 + $0x80] sm:$0xff] }
 0xf93   :  { %19971 = vmatprep.subr.mxu1 %v14915_v46  ;;  %19891 = vmatpush3.msra.mxu0 %v25383_v6  ;;  %v24505_v50 = vand.u32 4294901760, %v16240_v13  ;;  %v14970_v6 = vsub.f32 %v24461_v15, %v24488_v53 }
 0xf94   :  { %19972 = vmatpush3.msra.mxu1 %v14915_v46  ;;  %19892 = vmatprep.subr.mxu0 %v25384_v63  ;;  %v24493_v46 = vand.u32 4294901760, %v16241_v43 }
 0xf95   :  { %19973 = vmatprep.subr.mxu1 %v14922_v9  ;;  %19893 = vmatpush3.msra.mxu0 %v25384_v63  ;;  %v14971_v8 = vand.u32 4294901760, %v14970_v6 }
 0xf96   :  { %19974 = vmatpush3.msra.mxu1 %v14922_v9  ;;  %19895 = vmatmul.mubr.f32.vlgmr.msra.gmra.mxu0 %v24162_v29  ;;  %v14956_v29 = vsub.f32 %v24428_v35, %v24458_v17  ;;  %v24503_v9 = vsub.f32 %v16242_v57, %v24478_v59  ;;  %v14977_v57 = vsub.f32 %v24476_v26, %v24500_v37 }
 0xf97   :  { %19932 = vmatprep.subr.mxu0 %v24269_v56  ;;  %19975 = vmatprep.subr.mxu1 %v14929_v11 }
 0xf98   :  { %19933 = vmatpush3.msra.mxu0 %v24269_v56  ;;  %19964 = vmatprep.mubr.f32.mxu0 %v14880_v1  ;;  %v14957_v51 = vand.u32 4294901760, %v14956_v29  ;;  %v24522_v63 = vand.u32 4294901760, %v24503_v9 }
 0xf99   :  { %19976 = vmatpush3.msra.mxu1 %v14929_v11  ;;  %19934 = vmatprep.subr.mxu0 %v24283_v30  ;;  %v24515_v11 = vsub.f32 %v16241_v43, %v24493_v46  ;;  %v14984_v43 = vsub.f32 %v24491_v20, %v24512_v33 }
 0xf9a   :  { %19977 = vmatprep.subr.mxu1 %v14936_v12  ;;  %19935 = vmatpush3.msra.mxu0 %v24283_v30 }
 0xf9b   :  { %19978 = vmatpush3.msra.mxu1 %v14936_v12  ;;  %19936 = vmatprep.subr.mxu0 %v24295_v39  ;;  %v24525_v12 = vsub.f32 %v16240_v13, %v24505_v50  ;;  %v24532_v1 = vand.u32 4294901760, %v24515_v11  ;;  %v14991_v13 = vsub.f32 %v24503_v9, %v24522_v63 }
 0xf9c   :  { %19979 = vmatprep.subr.mxu1 %v14943_v47  ;;  %19937 = vmatpush3.msra.mxu0 %v24295_v39 }
 0xf9d   :  { %19980 = vmatpush3.msra.mxu1 %v14943_v47  ;;  %19938 = vmatprep.subr.mxu0 %v24307_v55  ;;  %v14978_v47 = vand.u32 4294901760, %v14977_v57  ;;  %v24539_v29 = vand.u32 4294901760, %v24525_v12  ;;  %v14998_v58 = vsub.f32 %v24515_v11, %v24532_v1 }
 0xf9e   :  { %19981 = vmatprep.subr.mxu1 %v14950_v38  ;;  %19939 = vmatpush3.msra.mxu0 %v24307_v55 }
 0xf9f   :  { %19982 = vmatpush3.msra.mxu1 %v14950_v38  ;;  %19940 = vmatprep.subr.mxu0 %v24322_v49  ;;  %v14985_v38 = vand.u32 4294901760, %v14984_v43  ;;  %v15005_v6 = vsub.f32 %v24525_v12, %v24539_v29  ;;  %v14999_v57 = vand.u32 4294901760, %v14998_v58 }
 0xfa0   :  { %19983 = vmatprep.subr.mxu1 %v14957_v51  ;;  %19941 = vmatpush3.msra.mxu0 %v24322_v49 }
 0xfa1   :  { %19984 = vmatpush3.msra.mxu1 %v14957_v51  ;;  %19942 = vmatprep.subr.mxu0 %v24337_v19  ;;  %v14992_v51 = vand.u32 4294901760, %v14991_v13  ;;  %v16260_v13 = vld [vmem:[%s25137_s13 + $0x120] sm:$0xff] }
 0xfa2   :  { %19985 = vmatprep.subr.mxu1 %v14964_v24  ;;  %19943 = vmatpush3.msra.mxu0 %v24337_v19 }
 0xfa3   :  { %19986 = vmatpush3.msra.mxu1 %v14964_v24  ;;  %19944 = vmatprep.subr.mxu0 %v24357_v2  ;;  %v24550_v24 = vand.u32 4294901760, %v24144_v34 }
 0xfa4   :  { %19987 = vmatprep.subr.mxu1 %v14971_v8  ;;  %19945 = vmatpush3.msra.mxu0 %v24357_v2 }
 0xfa5   :  { %19988 = vmatpush3.msra.mxu1 %v14971_v8  ;;  %19946 = vmatprep.subr.mxu0 %v24371_v54  ;;  %v15006_v8 = vand.u32 4294901760, %v15005_v6  ;;  %v24558_v43 = vsub.f32 %v24144_v34, %v24550_v24 }
 0xfa6   :  { %19989 = vmatprep.subr.mxu1 %v14978_v47  ;;  %19947 = vmatpush3.msra.mxu0 %v24371_v54 }
 0xfa7   :  { %19990 = vmatpush3.msra.mxu1 %v14978_v47  ;;  %19948 = vmatprep.subr.mxu0 %v24397_v23  ;;  %v14888_v47 = vand.u32 4294901760, %v24558_v43 }
 0xfa8   :  { %19991 = vmatprep.subr.mxu1 %v14985_v38  ;;  %19949 = vmatpush3.msra.mxu0 %v24397_v23 }
 0xfa9   :  { %19992 = vmatpush3.msra.mxu1 %v14985_v38  ;;  %19950 = vmatprep.subr.mxu0 %v24414_v3  ;;  %v14889_v34 = vsub.f32 %v24558_v43, %v14888_v47 }
 0xfaa   :  { %19993 = vmatprep.subr.mxu1 %v14992_v51  ;;  %19951 = vmatpush3.msra.mxu0 %v24414_v3 }
 0xfab   :  { %19994 = vmatpush3.msra.mxu1 %v14992_v51  ;;  %19952 = vmatprep.subr.mxu0 %v24430_v32 }
 0xfac   :  { %19995 = vmatprep.subr.mxu1 %v14999_v57  ;;  %19953 = vmatpush3.msra.mxu0 %v24430_v32 }
 0xfad   :  { %19996 = vmatpush3.msra.mxu1 %v14999_v57  ;;  %19954 = vmatprep.subr.mxu0 %v24448_v22  ;;  %v16259_v57 = vld [vmem:[%s25137_s13 + $0x118] sm:$0xff] }
 0xfae   :  { %19997 = vmatprep.subr.mxu1 %v15006_v8  ;;  %19955 = vmatpush3.msra.mxu0 %v24448_v22 }
 0xfaf   :  { %19998 = vmatpush3.msra.mxu1 %v15006_v8  ;;  %19956 = vmatprep.subr.mxu0 %v24463_v7 }
 0xfb0   :  { %20000 = vmatmul.mubr.f32.vlgmr.msra.gmra.mxu1 %v24550_v24  ;;  %20037 = vmatprep.subr.mxu1 %v24269_v56 }
 0xfb1   :  { %19957 = vmatpush3.msra.mxu0 %v24463_v7  ;;  %20038 = vmatpush3.msra.mxu1 %v24269_v56 }
 0xfb2   :  { %20069 = vmatprep.mubr.f32.mxu1 %v14878_v21  ;;  %19958 = vmatprep.subr.mxu0 %v24478_v59  ;;  %v14890_v21 = vand.u32 4294901760, %v14889_v34 }
 0xfb3   :  { %20039 = vmatprep.subr.mxu1 %v24283_v30  ;;  %19959 = vmatpush3.msra.mxu0 %v24478_v59 }
 0xfb4   :  { %20040 = vmatpush3.msra.mxu1 %v24283_v30  ;;  %19960 = vmatprep.subr.mxu0 %v24493_v46 }
 0xfb5   :  { %20041 = vmatprep.subr.mxu1 %v24295_v39  ;;  %19961 = vmatpush3.msra.mxu0 %v24493_v46 }
 0xfb6   :  { %20042 = vmatpush3.msra.mxu1 %v24295_v39  ;;  %19962 = vmatprep.subr.mxu0 %v24505_v50 }
 0xfb7   :  { %20043 = vmatprep.subr.mxu1 %v24307_v55  ;;  %19963 = vmatpush3.msra.mxu0 %v24505_v50 }
 0xfb8   :  { %20044 = vmatpush3.msra.mxu1 %v24307_v55  ;;  %19965 = vmatmul.mubr.f32.vlgmr.msra.gmra.mxu0 %v14890_v21  ;;  %v16258_v21 = vld [vmem:[%s25137_s13 + $0x110] sm:$0xff] }
 0xfb9   :  { %20002 = vmatprep.subr.mxu0 %v24288_v60  ;;  %20045 = vmatprep.subr.mxu1 %v24322_v49 }
 0xfba   :  { %20003 = vmatpush3.msra.mxu0 %v24288_v60  ;;  %20034 = vmatprep.mubr.f32.mxu0 %v24380_v25  ;;  %v16270_v60 = vld [vmem:[%s25137_s13 + $0x170] sm:$0xff] }
 0xfbb   :  { %20046 = vmatpush3.msra.mxu1 %v24322_v49  ;;  %20004 = vmatprep.subr.mxu0 %v24305_v27 }
 0xfbc   :  { %20047 = vmatprep.subr.mxu1 %v24337_v19  ;;  %20005 = vmatpush3.msra.mxu0 %v24305_v27  ;;  %v24685_v27 = vand.u32 4294901760, %v16270_v60 }
 0xfbd   :  { %20048 = vmatpush3.msra.mxu1 %v24337_v19  ;;  %20006 = vmatprep.subr.mxu0 %v24320_v44 }
 0xfbe   :  { %20049 = vmatprep.subr.mxu1 %v24357_v2  ;;  %20007 = vmatpush3.msra.mxu0 %v24320_v44 }
 0xfbf   :  { %20050 = vmatpush3.msra.mxu1 %v24357_v2  ;;  %20008 = vmatprep.subr.mxu0 %v24335_v62 }
 0xfc0   :  { %20051 = vmatprep.subr.mxu1 %v24371_v54  ;;  %20009 = vmatpush3.msra.mxu0 %v24335_v62 }
 0xfc1   :  { %20052 = vmatpush3.msra.mxu1 %v24371_v54  ;;  %20010 = vmatprep.subr.mxu0 %v24355_v48 }
 0xfc2   :  { %20053 = vmatprep.subr.mxu1 %v24397_v23  ;;  %20011 = vmatpush3.msra.mxu0 %v24355_v48  ;;  %v16266_v48 = vld [vmem:[%s25137_s13 + $0x150] sm:$0xff] }
 0xfc3   :  { %20054 = vmatpush3.msra.mxu1 %v24397_v23  ;;  %20012 = vmatprep.subr.mxu0 %v24369_v18 }
 0xfc4   :  { %20055 = vmatprep.subr.mxu1 %v24414_v3  ;;  %20013 = vmatpush3.msra.mxu0 %v24369_v18 }
 0xfc5   :  { %20056 = vmatpush3.msra.mxu1 %v24414_v3  ;;  %20014 = vmatprep.subr.mxu0 %v24390_v16 }
 0xfc6   :  { %20057 = vmatprep.subr.mxu1 %v24430_v32  ;;  %20015 = vmatpush3.msra.mxu0 %v24390_v16  ;;  %v16264_v16 = vld [vmem:[%s25137_s13 + $0x140] sm:$0xff] }
 0xfc7   :  { %20058 = vmatpush3.msra.mxu1 %v24430_v32  ;;  %20016 = vmatprep.subr.mxu0 %v24407_v14 }
 0xfc8   :  { %20059 = vmatprep.subr.mxu1 %v24448_v22  ;;  %20017 = vmatpush3.msra.mxu0 %v24407_v14 }
 0xfc9   :  { %20060 = vmatpush3.msra.mxu1 %v24448_v22  ;;  %20018 = vmatprep.subr.mxu0 %v24428_v35 }
 0xfca   :  { %20061 = vmatprep.subr.mxu1 %v24463_v7  ;;  %20019 = vmatpush3.msra.mxu0 %v24428_v35 }
 0xfcb   :  { %20062 = vmatpush3.msra.mxu1 %v24463_v7  ;;  %20020 = vmatprep.subr.mxu0 %v24446_v45 }
 0xfcc   :  { %20063 = vmatprep.subr.mxu1 %v24478_v59  ;;  %20021 = vmatpush3.msra.mxu0 %v24446_v45 }
 0xfcd   :  { %20064 = vmatpush3.msra.mxu1 %v24478_v59  ;;  %20022 = vmatprep.subr.mxu0 %v24461_v15 }
 0xfce   :  { %20065 = vmatprep.subr.mxu1 %v24493_v46  ;;  %20023 = vmatpush3.msra.mxu0 %v24461_v15 }
 0xfcf   :  { %20066 = vmatpush3.msra.mxu1 %v24493_v46  ;;  %20024 = vmatprep.subr.mxu0 %v24476_v26 }
 0xfd0   :  { %20067 = vmatprep.subr.mxu1 %v24505_v50  ;;  %20025 = vmatpush3.msra.mxu0 %v24476_v26 }
 0xfd1   :  { %20068 = vmatpush3.msra.mxu1 %v24505_v50  ;;  %20026 = vmatprep.subr.mxu0 %v24491_v20 }
 0xfd2   :  { %20070 = vmatmul.mubr.f32.vlgmr.msra.gmra.mxu1 %v14888_v47  ;;  %20107 = vmatprep.subr.mxu1 %v24269_v56 }
 0xfd3   :  { %20027 = vmatpush3.msra.mxu0 %v24491_v20  ;;  %20108 = vmatpush3.msra.mxu1 %v24269_v56  ;;  %v16271_v56 = vld [vmem:[%s25137_s13 + $0x178] sm:$0xff] }
 0xfd4   :  { %20139 = vmatprep.mubr.f32.mxu1 %v24344_v0  ;;  %20028 = vmatprep.subr.mxu0 %v24503_v9 }
 0xfd5   :  { %20109 = vmatprep.subr.mxu1 %v24283_v30  ;;  %20029 = vmatpush3.msra.mxu0 %v24503_v9 }
 0xfd6   :  { %20110 = vmatpush3.msra.mxu1 %v24283_v30  ;;  %20030 = vmatprep.subr.mxu0 %v24515_v11  ;;  %v24671_v30 = vand.u32 4294901760, %v16271_v56 }
 0xfd7   :  { %20111 = vmatprep.subr.mxu1 %v24295_v39  ;;  %20031 = vmatpush3.msra.mxu0 %v24515_v11 }
 0xfd8   :  { %20112 = vmatpush3.msra.mxu1 %v24295_v39  ;;  %20032 = vmatprep.subr.mxu0 %v24525_v12  ;;  %v16269_v39 = vld [vmem:[%s25137_s13 + $0x168] sm:$0xff] }
 0xfd9   :  { %20113 = vmatprep.subr.mxu1 %v24307_v55  ;;  %20033 = vmatpush3.msra.mxu0 %v24525_v12  ;;  %v24697_v44 = vand.u32 4294901760, %v16269_v39 }
 0xfda   :  { %20114 = vmatpush3.msra.mxu1 %v24307_v55  ;;  %20035 = vmatmul.mubr.f32.vlgmr.msra.gmra.mxu0 %v24558_v43  ;;  %v24690_v55 = vsub.f32 %v16271_v56, %v24671_v30  ;;  %v24850_v43 = vand.u32 4294901760, %v16260_v13 }
 0xfdb   :  { %20072 = vmatprep.subr.mxu0 %v24312_v41  ;;  %20115 = vmatprep.subr.mxu1 %v24322_v49 }
 0xfdc   :  { %20073 = vmatpush3.msra.mxu0 %v24312_v41  ;;  %20104 = vmatprep.mubr.f32.mxu0 %v24344_v0  ;;  %v16268_v41 = vld [vmem:[%s25137_s13 + $0x160] sm:$0xff]  ;;  %v24719_v0 = vsub.f32 %v16269_v39, %v24697_v44  ;;  %v24865_v39 = vand.u32 4294901760, %v16259_v57 }
 0xfdd   :  { %20116 = vmatpush3.msra.mxu1 %v24322_v49  ;;  %20074 = vmatprep.subr.mxu0 %v24332_v61  ;;  %v16267_v49 = vld [vmem:[%s25137_s13 + $0x158] sm:$0xff]  ;;  %v24709_v62 = vand.u32 4294901760, %v16268_v41 }
 0xfde   :  { %20117 = vmatprep.subr.mxu1 %v24337_v19  ;;  %20075 = vmatpush3.msra.mxu0 %v24332_v61  ;;  %v24707_v61 = vsub.f32 %v16270_v60, %v24685_v27 }
 0xfdf   :  { %20118 = vmatpush3.msra.mxu1 %v24337_v19  ;;  %20076 = vmatprep.subr.mxu0 %v24352_v5  ;;  %v24714_v19 = vand.u32 4294901760, %v24690_v55 }
 0xfe0   :  { %20119 = vmatprep.subr.mxu1 %v24357_v2  ;;  %20077 = vmatpush3.msra.mxu0 %v24352_v5  ;;  %v24721_v5 = vand.u32 4294901760, %v16267_v49  ;;  %v24737_v18 = vand.u32 4294901760, %v24707_v61 }
 0xfe1   :  { %20120 = vmatpush3.msra.mxu1 %v24357_v2  ;;  %20078 = vmatprep.subr.mxu0 %v24366_v36  ;;  %v16265_v2 = vld [vmem:[%s25137_s13 + $0x148] sm:$0xff]  ;;  %v15607_v25 = vsub.f32 %v24690_v55, %v24714_v19 }
 0xfe2   :  { %20121 = vmatprep.subr.mxu1 %v24371_v54  ;;  %20079 = vmatpush3.msra.mxu0 %v24366_v36  ;;  %v24734_v36 = vand.u32 4294901760, %v24158_v52  ;;  %v24759_v14 = vand.u32 4294901760, %v16265_v2 }
 0xfe3   :  { %20122 = vmatpush3.msra.mxu1 %v24371_v54  ;;  %20080 = vmatprep.subr.mxu0 %v24387_v28  ;;  %v24740_v54 = vsub.f32 %v16268_v41, %v24709_v62  ;;  %v15608_v45 = vand.u32 4294901760, %v15607_v25  ;;  %v24878_v25 = vsub.f32 %v16260_v13, %v24850_v43 }
 0xfe4   :  { %20123 = vmatprep.subr.mxu1 %v24397_v23  ;;  %20081 = vmatpush3.msra.mxu0 %v24387_v28  ;;  %v24746_v28 = vand.u32 4294901760, %v16266_v48  ;;  %v24772_v35 = vsub.f32 %v24158_v52, %v24734_v36  ;;  %v24792_v15 = vsub.f32 %v16265_v2, %v24759_v14 }
 0xfe5   :  { %20124 = vmatpush3.msra.mxu1 %v24397_v23  ;;  %20082 = vmatprep.subr.mxu0 %v24404_v10  ;;  %v24754_v23 = vand.u32 4294901760, %v24719_v0 }
 0xfe6   :  { %20125 = vmatprep.subr.mxu1 %v24414_v3  ;;  %20083 = vmatpush3.msra.mxu0 %v24404_v10  ;;  %v24757_v10 = vsub.f32 %v16267_v49, %v24721_v5  ;;  %v24822_v12 = vand.u32 4294901760, %v24792_v15  ;;  %v16257_v49 = vld [vmem:[%s25137_s13 + $0x108] sm:$0xff] }
 0xfe7   :  { %20126 = vmatpush3.msra.mxu1 %v24414_v3  ;;  %20084 = vmatprep.subr.mxu0 %v24420_v40  ;;  %v15614_v3 = vsub.f32 %v24707_v61, %v24737_v18  ;;  %v15621_v52 = vsub.f32 %v24719_v0, %v24754_v23 }
 0xfe8   :  { %20127 = vmatprep.subr.mxu1 %v24430_v32  ;;  %20085 = vmatpush3.msra.mxu0 %v24420_v40  ;;  %v24768_v40 = vand.u32 4294901760, %v24740_v54  ;;  %v15649_v34 = vsub.f32 %v24792_v15, %v24822_v12 }
 0xfe9   :  { %20128 = vmatpush3.msra.mxu1 %v24430_v32  ;;  %20086 = vmatprep.subr.mxu0 %v24436_v42  ;;  %v24774_v32 = vand.u32 4294901760, %v16264_v16  ;;  %v15615_v26 = vand.u32 4294901760, %v15614_v3  ;;  %v16256_v3 = vld [vmem:[%s25137_s13 + $0x100] sm:$0xff] }
 0xfea   :  { %20129 = vmatprep.subr.mxu1 %v24448_v22  ;;  %20087 = vmatpush3.msra.mxu0 %v24436_v42  ;;  %v16263_v42 = vld [vmem:[%s25137_s13 + $0x138] sm:$0xff] }
 0xfeb   :  { %20130 = vmatpush3.msra.mxu1 %v24448_v22  ;;  %20088 = vmatprep.subr.mxu0 %v24458_v17  ;;  %v24782_v22 = vsub.f32 %v16266_v48, %v24746_v28  ;;  %v24807_v20 = vsub.f32 %v16264_v16, %v24774_v32  ;;  %v24880_v16 = vand.u32 4294901760, %v16258_v21 }
 0xfec   :  { %20131 = vmatprep.subr.mxu1 %v24463_v7  ;;  %20089 = vmatpush3.msra.mxu0 %v24458_v17  ;;  %v24789_v17 = vand.u32 4294901760, %v24757_v10 }
 0xfed   :  { %20132 = vmatpush3.msra.mxu1 %v24463_v7  ;;  %20090 = vmatprep.subr.mxu0 %v24473_v31  ;;  %v16262_v7 = vld [vmem:[%s25137_s13 + $0x130] sm:$0xff]  ;;  %v24839_v6 = vand.u32 4294901760, %v24807_v20 }
 0xfee   :  { %20133 = vmatprep.subr.mxu1 %v24478_v59  ;;  %20091 = vmatpush3.msra.mxu0 %v24473_v31  ;;  %v24799_v31 = vand.u32 4294901760, %v16263_v42  ;;  %v24816_v9 = vand.u32 4294901760, %v16262_v7  ;;  %v15635_v11 = vsub.f32 %v24757_v10, %v24789_v17 }
 0xfef   :  { %20134 = vmatpush3.msra.mxu1 %v24478_v59  ;;  %20092 = vmatprep.subr.mxu0 %v24488_v53  ;;  %v15628_v59 = vsub.f32 %v24740_v54, %v24768_v40  ;;  %v15656_v41 = vsub.f32 %v24807_v20, %v24839_v6 }
 0xff0   :  { %20135 = vmatprep.subr.mxu1 %v24493_v46  ;;  %20093 = vmatpush3.msra.mxu0 %v24488_v53  ;;  %v15585_v53 = vand.u32 4294901760, %v24772_v35  ;;  %v24830_v38 = vsub.f32 %v16263_v42, %v24799_v31  ;;  %v15636_v47 = vand.u32 4294901760, %v15635_v11 }
 0xff1   :  { %20136 = vmatpush3.msra.mxu1 %v24493_v46  ;;  %20094 = vmatprep.subr.mxu0 %v24500_v37  ;;  %v16261_v46 = vld [vmem:[%s25137_s13 + $0x128] sm:$0xff]  ;;  %v15629_v58 = vand.u32 4294901760, %v15628_v59  ;;  %v24902_v59 = vand.u32 4294901760, %v24878_v25 }
 0xff2   :  { %20137 = vmatprep.subr.mxu1 %v24505_v50  ;;  %20095 = vmatpush3.msra.mxu0 %v24500_v37  ;;  %v24814_v37 = vand.u32 4294901760, %v24782_v22  ;;  %v15586_v51 = vsub.f32 %v24772_v35, %v15585_v53  ;;  %v24860_v56 = vand.u32 4294901760, %v24830_v38 }
 0xff3   :  { %20138 = vmatpush3.msra.mxu1 %v24505_v50  ;;  %20096 = vmatprep.subr.mxu0 %v24512_v33  ;;  %v15622_v50 = vand.u32 4294901760, %v15621_v52  ;;  %v24895_v52 = vand.u32 4294901760, %v16257_v49 }
 0xff4   :  { %20140 = vmatmul.mubr.f32.vlgmr.msra.gmra.mxu1 %v24550_v24  ;;  %20177 = vmatprep.subr.mxu1 %v15608_v45  ;;  %v15642_v8 = vsub.f32 %v24782_v22, %v24814_v37 }
 0xff5   :  { %20097 = vmatpush3.msra.mxu0 %v24512_v33  ;;  %20178 = vmatpush3.msra.mxu1 %v15608_v45  ;;  %v24832_v33 = vand.u32 4294901760, %v16261_v46  ;;  %v24893_v45 = vsub.f32 %v16259_v57, %v24865_v39 }
 0xff6   :  { %20209 = vmatprep.mubr.f32.mxu1 %v24734_v36  ;;  %20098 = vmatprep.subr.mxu0 %v24522_v63  ;;  %v15643_v48 = vand.u32 4294901760, %v15642_v8  ;;  %v15684_v8 = vsub.f32 %v24878_v25, %v24902_v59 }
 0xff7   :  { %20179 = vmatprep.subr.mxu1 %v15615_v26  ;;  %20099 = vmatpush3.msra.mxu0 %v24522_v63  ;;  %v24848_v63 = vsub.f32 %v16262_v7, %v24816_v9  ;;  %v24863_v60 = vsub.f32 %v16261_v46, %v24832_v33  ;;  %v15657_v7 = vand.u32 4294901760, %v15656_v41  ;;  %v24905_v46 = vsub.f32 %v16258_v21, %v24880_v16 }
 0xff8   :  { %20180 = vmatpush3.msra.mxu1 %v15615_v26  ;;  %20100 = vmatprep.subr.mxu0 %v24532_v1 }
 0xff9   :  { %20181 = vmatprep.subr.mxu1 %v15622_v50  ;;  %20101 = vmatpush3.msra.mxu0 %v24532_v1  ;;  %v15587_v1 = vand.u32 4294901760, %v15586_v51  ;;  %v24875_v2 = vand.u32 4294901760, %v24848_v63  ;;  %v24890_v42 = vand.u32 4294901760, %v24863_v60  ;;  %v24917_v51 = vsub.f32 %v16257_v49, %v24895_v52 }
 0xffa   :  { %20182 = vmatpush3.msra.mxu1 %v15622_v50  ;;  %20102 = vmatprep.subr.mxu0 %v24539_v29  ;;  %v24907_v50 = vand.u32 4294901760, %v16256_v3  ;;  %v15685_v49 = vand.u32 4294901760, %v15684_v8 }
 0xffb   :  { %20183 = vmatprep.subr.mxu1 %v15629_v58  ;;  %20103 = vmatpush3.msra.mxu0 %v24539_v29  ;;  %v15650_v29 = vand.u32 4294901760, %v15649_v34  ;;  %v15670_v26 = vsub.f32 %v24848_v63, %v24875_v2  ;;  %v15677_v13 = vsub.f32 %v24863_v60, %v24890_v42  ;;  %v24934_v41 = vand.u32 4294901760, %v24917_v51 }
 0xffc   :  { %20184 = vmatpush3.msra.mxu1 %v15629_v58  ;;  %20105 = vmatmul.mubr.f32.vlgmr.msra.gmra.mxu0 %v24550_v24  ;;  %v15663_v24 = vsub.f32 %v24830_v38, %v24860_v56  ;;  %v24914_v58 = vand.u32 4294901760, %v24893_v45  ;;  %v24927_v34 = vsub.f32 %v16256_v3, %v24907_v50 }
 0xffd   :  { %20142 = vmatprep.subr.mxu0 %v24671_v30  ;;  %20185 = vmatprep.subr.mxu1 %v15636_v47  ;;  %v15671_v57 = vand.u32 4294901760, %v15670_v26  ;;  %v15678_v21 = vand.u32 4294901760, %v15677_v13  ;;  %v15705_v26 = vsub.f32 %v24917_v51, %v24934_v41 }
 0xffe   :  { %20143 = vmatpush3.msra.mxu0 %v24671_v30  ;;  %20174 = vmatprep.mubr.f32.mxu0 %v15587_v1  ;;  %v15664_v11 = vand.u32 4294901760, %v15663_v24  ;;  %v15691_v1 = vsub.f32 %v24893_v45, %v24914_v58  ;;  %v15484_v24 = vsel %vm2478_vm5, %v24168_v4, 0.0 }
 0xfff   :  { %20186 = vmatpush3.msra.mxu1 %v15636_v47  ;;  %20144 = vmatprep.subr.mxu0 %v24685_v27  ;;  %v24924_v47 = vand.u32 4294901760, %v24905_v46  ;;  %v15706_v4 = vand.u32 4294901760, %v15705_v26 }
0x1000   :  { %20187 = vmatprep.subr.mxu1 %v15643_v48  ;;  %20145 = vmatpush3.msra.mxu0 %v24685_v27 }
0x1001   :  { %20188 = vmatpush3.msra.mxu1 %v15643_v48  ;;  %20146 = vmatprep.subr.mxu0 %v24697_v44  ;;  %v15698_v48 = vsub.f32 %v24905_v46, %v24924_v47 }
0x1002   :  { %20189 = vmatprep.subr.mxu1 %v15650_v29  ;;  %20147 = vmatpush3.msra.mxu0 %v24697_v44 }
0x1003   :  { %20190 = vmatpush3.msra.mxu1 %v15650_v29  ;;  %20148 = vmatprep.subr.mxu0 %v24709_v62  ;;  %v24941_v29 = vand.u32 4294901760, %v24927_v34 }
0x1004   :  { %20191 = vmatprep.subr.mxu1 %v15657_v7  ;;  %20149 = vmatpush3.msra.mxu0 %v24709_v62 }
0x1005   :  { %20192 = vmatpush3.msra.mxu1 %v15657_v7  ;;  %20150 = vmatprep.subr.mxu0 %v24721_v5  ;;  %v15692_v7 = vand.u32 4294901760, %v15691_v1  ;;  %v15712_v13 = vsub.f32 %v24927_v34, %v24941_v29 }
0x1006   :  { %20193 = vmatprep.subr.mxu1 %v15664_v11  ;;  %20151 = vmatpush3.msra.mxu0 %v24721_v5 }
0x1007   :  { %20194 = vmatpush3.msra.mxu1 %v15664_v11  ;;  %20152 = vmatprep.subr.mxu0 %v24746_v28  ;;  %v15699_v11 = vand.u32 4294901760, %v15698_v48  ;;  %v15713_v8 = vand.u32 4294901760, %v15712_v13 }
0x1008   :  { %20195 = vmatprep.subr.mxu1 %v15671_v57  ;;  %20153 = vmatpush3.msra.mxu0 %v24746_v28 }
0x1009   :  { %20196 = vmatpush3.msra.mxu1 %v15671_v57  ;;  %20154 = vmatprep.subr.mxu0 %v24759_v14  ;;  %v24954_v57 = vand.u32 4294901760, %v15484_v24 }
0x100a   :  { %20197 = vmatprep.subr.mxu1 %v15678_v21  ;;  %20155 = vmatpush3.msra.mxu0 %v24759_v14 }
0x100b   :  { %20198 = vmatpush3.msra.mxu1 %v15678_v21  ;;  %20156 = vmatprep.subr.mxu0 %v24774_v32  ;;  %v24961_v21 = vsub.f32 %v15484_v24, %v24954_v57 }
0x100c   :  { %20199 = vmatprep.subr.mxu1 %v15685_v49  ;;  %20157 = vmatpush3.msra.mxu0 %v24774_v32 }
0x100d   :  { %20200 = vmatpush3.msra.mxu1 %v15685_v49  ;;  %20158 = vmatprep.subr.mxu0 %v24799_v31  ;;  %v15595_v1 = vand.u32 4294901760, %v24961_v21 }
0x100e   :  { %20201 = vmatprep.subr.mxu1 %v15692_v7  ;;  %20159 = vmatpush3.msra.mxu0 %v24799_v31 }
0x100f   :  { %20202 = vmatpush3.msra.mxu1 %v15692_v7  ;;  %20160 = vmatprep.subr.mxu0 %v24816_v9  ;;  %v15596_v49 = vsub.f32 %v24961_v21, %v15595_v1 }
0x1010   :  { %20203 = vmatprep.subr.mxu1 %v15699_v11  ;;  %20161 = vmatpush3.msra.mxu0 %v24816_v9 }
0x1011   :  { %20204 = vmatpush3.msra.mxu1 %v15699_v11  ;;  %20162 = vmatprep.subr.mxu0 %v24832_v33 }
0x1012   :  { %20205 = vmatprep.subr.mxu1 %v15706_v4  ;;  %20163 = vmatpush3.msra.mxu0 %v24832_v33 }
0x1013   :  { %20206 = vmatpush3.msra.mxu1 %v15706_v4  ;;  %20164 = vmatprep.subr.mxu0 %v24850_v43 }
0x1014   :  { %20207 = vmatprep.subr.mxu1 %v15713_v8  ;;  %20165 = vmatpush3.msra.mxu0 %v24850_v43 }
0x1015   :  { %20208 = vmatpush3.msra.mxu1 %v15713_v8  ;;  %20166 = vmatprep.subr.mxu0 %v24865_v39 }
0x1016   :  { %20210 = vmatmul.mubr.f32.vlgmr.msra.gmra.mxu1 %v24954_v57  ;;  %20247 = vmatprep.subr.mxu1 %v24671_v30 }
0x1017   :  { %20167 = vmatpush3.msra.mxu0 %v24865_v39  ;;  %20248 = vmatpush3.msra.mxu1 %v24671_v30 }
0x1018   :  { %20279 = vmatprep.mubr.f32.mxu1 %v15585_v53  ;;  %20168 = vmatprep.subr.mxu0 %v24880_v16  ;;  %v15597_v53 = vand.u32 4294901760, %v15596_v49 }
0x1019   :  { %20249 = vmatprep.subr.mxu1 %v24685_v27  ;;  %20169 = vmatpush3.msra.mxu0 %v24880_v16 }
0x101a   :  { %20250 = vmatpush3.msra.mxu1 %v24685_v27  ;;  %20170 = vmatprep.subr.mxu0 %v24895_v52 }
0x101b   :  { %20251 = vmatprep.subr.mxu1 %v24697_v44  ;;  %20171 = vmatpush3.msra.mxu0 %v24895_v52 }
0x101c   :  { %20252 = vmatpush3.msra.mxu1 %v24697_v44  ;;  %20172 = vmatprep.subr.mxu0 %v24907_v50 }
0x101d   :  { %20253 = vmatprep.subr.mxu1 %v24709_v62  ;;  %20173 = vmatpush3.msra.mxu0 %v24907_v50 }
0x101e   :  { %20254 = vmatpush3.msra.mxu1 %v24709_v62  ;;  %20175 = vmatmul.mubr.f32.vlgmr.msra.gmra.mxu0 %v15597_v53 }
0x101f   :  { %20212 = vmatprep.subr.mxu0 %v24690_v55  ;;  %20255 = vmatprep.subr.mxu1 %v24721_v5 }
0x1020   :  { %20213 = vmatpush3.msra.mxu0 %v24690_v55  ;;  %20244 = vmatprep.mubr.f32.mxu0 %v24772_v35 }
0x1021   :  { %20256 = vmatpush3.msra.mxu1 %v24721_v5  ;;  %20214 = vmatprep.subr.mxu0 %v24707_v61 }
0x1022   :  { %20257 = vmatprep.subr.mxu1 %v24746_v28  ;;  %20215 = vmatpush3.msra.mxu0 %v24707_v61 }
0x1023   :  { %20258 = vmatpush3.msra.mxu1 %v24746_v28  ;;  %20216 = vmatprep.subr.mxu0 %v24719_v0 }
0x1024   :  { %20259 = vmatprep.subr.mxu1 %v24759_v14  ;;  %20217 = vmatpush3.msra.mxu0 %v24719_v0 }
0x1025   :  { %20260 = vmatpush3.msra.mxu1 %v24759_v14  ;;  %20218 = vmatprep.subr.mxu0 %v24740_v54 }
0x1026   :  { %20261 = vmatprep.subr.mxu1 %v24774_v32  ;;  %20219 = vmatpush3.msra.mxu0 %v24740_v54 }
0x1027   :  { %20262 = vmatpush3.msra.mxu1 %v24774_v32  ;;  %20220 = vmatprep.subr.mxu0 %v24757_v10 }
0x1028   :  { %20263 = vmatprep.subr.mxu1 %v24799_v31  ;;  %20221 = vmatpush3.msra.mxu0 %v24757_v10 }
0x1029   :  { %20264 = vmatpush3.msra.mxu1 %v24799_v31  ;;  %20222 = vmatprep.subr.mxu0 %v24782_v22 }
0x102a   :  { %20265 = vmatprep.subr.mxu1 %v24816_v9  ;;  %20223 = vmatpush3.msra.mxu0 %v24782_v22 }
0x102b   :  { %20266 = vmatpush3.msra.mxu1 %v24816_v9  ;;  %20224 = vmatprep.subr.mxu0 %v24792_v15 }
0x102c   :  { %20267 = vmatprep.subr.mxu1 %v24832_v33  ;;  %20225 = vmatpush3.msra.mxu0 %v24792_v15 }
0x102d   :  { %20268 = vmatpush3.msra.mxu1 %v24832_v33  ;;  %20226 = vmatprep.subr.mxu0 %v24807_v20 }
0x102e   :  { %20269 = vmatprep.subr.mxu1 %v24850_v43  ;;  %20227 = vmatpush3.msra.mxu0 %v24807_v20 }
0x102f   :  { %20270 = vmatpush3.msra.mxu1 %v24850_v43  ;;  %20228 = vmatprep.subr.mxu0 %v24830_v38 }
0x1030   :  { %20271 = vmatprep.subr.mxu1 %v24865_v39  ;;  %20229 = vmatpush3.msra.mxu0 %v24830_v38 }
0x1031   :  { %20272 = vmatpush3.msra.mxu1 %v24865_v39  ;;  %20230 = vmatprep.subr.mxu0 %v24848_v63 }
0x1032   :  { %20273 = vmatprep.subr.mxu1 %v24880_v16  ;;  %20231 = vmatpush3.msra.mxu0 %v24848_v63 }
0x1033   :  { %20274 = vmatpush3.msra.mxu1 %v24880_v16  ;;  %20232 = vmatprep.subr.mxu0 %v24863_v60 }
0x1034   :  { %20275 = vmatprep.subr.mxu1 %v24895_v52  ;;  %20233 = vmatpush3.msra.mxu0 %v24863_v60 }
0x1035   :  { %20276 = vmatpush3.msra.mxu1 %v24895_v52  ;;  %20234 = vmatprep.subr.mxu0 %v24878_v25 }
0x1036   :  { %20277 = vmatprep.subr.mxu1 %v24907_v50  ;;  %20235 = vmatpush3.msra.mxu0 %v24878_v25 }
0x1037   :  { %20278 = vmatpush3.msra.mxu1 %v24907_v50  ;;  %20236 = vmatprep.subr.mxu0 %v24893_v45 }
0x1038   :  { %20280 = vmatmul.mubr.f32.vlgmr.msra.gmra.mxu1 %v15595_v1  ;;  %20317 = vmatprep.subr.mxu1 %v24671_v30 }
0x1039   :  { %20237 = vmatpush3.msra.mxu0 %v24893_v45  ;;  %20318 = vmatpush3.msra.mxu1 %v24671_v30  ;;  %v19756_v30 = vpop.f32.mrf.mxu0 }
0x103a   :  { %20349 = vmatprep.mubr.f32.mxu1 %v24734_v36  ;;  %20238 = vmatprep.subr.mxu0 %v24905_v46 }
0x103b   :  { %20319 = vmatprep.subr.mxu1 %v24685_v27  ;;  %20239 = vmatpush3.msra.mxu0 %v24905_v46  ;;  %v14198_v55 = vpop.f32.mrf.mxu0 }
0x103c   :  { %20320 = vmatpush3.msra.mxu1 %v24685_v27  ;;  %20240 = vmatprep.subr.mxu0 %v24917_v51  ;;  %v19791_v27 = vpop.f32.mrf.mxu1 }
0x103d   :  { %20321 = vmatprep.subr.mxu1 %v24697_v44  ;;  %20241 = vmatpush3.msra.mxu0 %v24917_v51 }
0x103e   :  { %20322 = vmatpush3.msra.mxu1 %v24697_v44  ;;  %20242 = vmatprep.subr.mxu0 %v24927_v34  ;;  %v19826_v44 = vpop.f32.mrf.mxu0  ;;  %v14359_v61 = vpop.f32.mrf.mxu1 }
0x103f   :  { %20323 = vmatprep.subr.mxu1 %v24709_v62  ;;  %20243 = vmatpush3.msra.mxu0 %v24927_v34 }
0x1040   :  { %20324 = vmatpush3.msra.mxu1 %v24709_v62  ;;  %20245 = vmatmul.mubr.f32.vlgmr.msra.gmra.mxu0 %v24961_v21  ;;  %v19861_v62 = vpop.f32.mrf.mxu1 }
0x1041   :  { %20282 = vmatprep.subr.mxu0 %v24714_v19  ;;  %20325 = vmatprep.subr.mxu1 %v24721_v5 }
0x1042   :  { %20283 = vmatpush3.msra.mxu0 %v24714_v19  ;;  %20314 = vmatprep.mubr.f32.mxu0 %v24734_v36  ;;  %v14469_v19 = vpop.f32.mrf.mxu0 }
0x1043   :  { %20326 = vmatpush3.msra.mxu1 %v24721_v5  ;;  %20284 = vmatprep.subr.mxu0 %v24737_v18  ;;  %v14565_v5 = vpop.f32.mrf.mxu1 }
0x1044   :  { %20327 = vmatprep.subr.mxu1 %v24746_v28  ;;  %20285 = vmatpush3.msra.mxu0 %v24737_v18 }
0x1045   :  { %20328 = vmatpush3.msra.mxu1 %v24746_v28  ;;  %20286 = vmatprep.subr.mxu0 %v24754_v23 }
0x1046   :  { %20329 = vmatprep.subr.mxu1 %v24759_v14  ;;  %20287 = vmatpush3.msra.mxu0 %v24754_v23 }
0x1047   :  { %20330 = vmatpush3.msra.mxu1 %v24759_v14  ;;  %20288 = vmatprep.subr.mxu0 %v24768_v40 }
0x1048   :  { %20331 = vmatprep.subr.mxu1 %v24774_v32  ;;  %20289 = vmatpush3.msra.mxu0 %v24768_v40  ;;  %v14366_v40 = vadd.f32 %v19791_v27, %v19756_v30 }
0x1049   :  { %20332 = vmatpush3.msra.mxu1 %v24774_v32  ;;  %20290 = vmatprep.subr.mxu0 %v24789_v17  ;;  %v14360_v32 = vadd.f32 %v14359_v61, %v14198_v55 }
0x104a   :  { %20333 = vmatprep.subr.mxu1 %v24799_v31  ;;  %20291 = vmatpush3.msra.mxu0 %v24789_v17  ;;  %v14477_v22 = vadd.f32 %v19826_v44, %v14366_v40 }
0x104b   :  { %20334 = vmatpush3.msra.mxu1 %v24799_v31  ;;  %20292 = vmatprep.subr.mxu0 %v24814_v37  ;;  %v14470_v31 = vadd.f32 %v14469_v19, %v14360_v32 }
0x104c   :  { %20335 = vmatprep.subr.mxu1 %v24816_v9  ;;  %20293 = vmatpush3.msra.mxu0 %v24814_v37  ;;  %v14574_v37 = vadd.f32 %v19861_v62, %v14477_v22 }
0x104d   :  { %20336 = vmatpush3.msra.mxu1 %v24816_v9  ;;  %20294 = vmatprep.subr.mxu0 %v24822_v12  ;;  %v14566_v38 = vadd.f32 %v14565_v5, %v14470_v31 }
0x104e   :  { %20337 = vmatprep.subr.mxu1 %v24832_v33  ;;  %20295 = vmatpush3.msra.mxu0 %v24822_v12  ;;  %v19931_v36 = vpop.f32.mrf.mxu1 }
0x104f   :  { %20338 = vmatpush3.msra.mxu1 %v24832_v33  ;;  %20296 = vmatprep.subr.mxu0 %v24839_v6 }
0x1050   :  { %20339 = vmatprep.subr.mxu1 %v24850_v43  ;;  %20297 = vmatpush3.msra.mxu0 %v24839_v6  ;;  %v14785_v28 = vpop.f32.mrf.mxu1 }
0x1051   :  { %20340 = vmatpush3.msra.mxu1 %v24850_v43  ;;  %20298 = vmatprep.subr.mxu0 %v24860_v56 }
0x1052   :  { %20341 = vmatprep.subr.mxu1 %v24865_v39  ;;  %20299 = vmatpush3.msra.mxu0 %v24860_v56 }
0x1053   :  { %20342 = vmatpush3.msra.mxu1 %v24865_v39  ;;  %20300 = vmatprep.subr.mxu0 %v24875_v2 }
0x1054   :  { %20343 = vmatprep.subr.mxu1 %v24880_v16  ;;  %20301 = vmatpush3.msra.mxu0 %v24875_v2 }
0x1055   :  { %20344 = vmatpush3.msra.mxu1 %v24880_v16  ;;  %20302 = vmatprep.subr.mxu0 %v24890_v42 }
0x1056   :  { %20345 = vmatprep.subr.mxu1 %v24895_v52  ;;  %20303 = vmatpush3.msra.mxu0 %v24890_v42  ;;  %v19896_v0 = vpop.f32.mrf.mxu0 }
0x1057   :  { %20346 = vmatpush3.msra.mxu1 %v24895_v52  ;;  %20304 = vmatprep.subr.mxu0 %v24902_v59  ;;  %v14699_v12 = vadd.f32 %v19896_v0, %v14574_v37 }
0x1058   :  { %20347 = vmatprep.subr.mxu1 %v24907_v50  ;;  %20305 = vmatpush3.msra.mxu0 %v24902_v59  ;;  %v14692_v18 = vpop.f32.mrf.mxu0 }
0x1059   :  { %20348 = vmatpush3.msra.mxu1 %v24907_v50  ;;  %20306 = vmatprep.subr.mxu0 %v24914_v58  ;;  %v14693_v63 = vadd.f32 %v14692_v18, %v14566_v38  ;;  %v14792_v56 = vadd.f32 %v19931_v36, %v14699_v12 }
0x105a   :  { %20350 = vmatmul.mubr.f32.vlgmr.msra.gmra.mxu1 %v24954_v57  ;;  %20307 = vmatpush3.msra.mxu0 %v24914_v58 }
0x105b   :  { %20308 = vmatprep.subr.mxu0 %v24924_v47  ;;  %v14786_v2 = vadd.f32 %v14785_v28, %v14693_v63 }
0x105c   :  { %20309 = vmatpush3.msra.mxu0 %v24924_v47 }
0x105d   :  { %20310 = vmatprep.subr.mxu0 %v24934_v41 }
0x105e   :  { %20311 = vmatpush3.msra.mxu0 %v24934_v41 }
0x105f   :  { %20312 = vmatprep.subr.mxu0 %v24941_v29 }
0x1060   :  { %20313 = vmatpush3.msra.mxu0 %v24941_v29 }
0x1061   :  { %20315 = vmatmul.mubr.f32.vlgmr.msra.gmra.mxu0 %v24954_v57 }
0x1070   :  { %v20001_v23 = vpop.f32.mrf.mxu1 }
0x1072   :  { %v15043_v35 = vpop.f32.mrf.mxu1 }
0x1078   :  { %v19966_v54 = vpop.f32.mrf.mxu0 }
0x1079   :  { %v14893_v39 = vadd.f32 %v19966_v54, %v14792_v56 }
0x107a   :  { %v14882_v10 = vpop.f32.mrf.mxu0 }
0x107b   :  { %v14883_v42 = vadd.f32 %v14882_v10, %v14786_v2  ;;  %v15050_v52 = vadd.f32 %v20001_v23, %v14893_v39 }
0x107d   :  { %v15044_v50 = vadd.f32 %v15043_v35, %v14883_v42 }
0x1092   :  { %v20071_v17 = vpop.f32.mrf.mxu1 }
0x1094   :  { %v15249_v9 = vpop.f32.mrf.mxu1 }
0x109a   :  { %v20036_v14 = vpop.f32.mrf.mxu0 }
0x109b   :  { %v15161_v46 = vadd.f32 %v20036_v14, %v15050_v52 }
0x109c   :  { %v15153_v15 = vpop.f32.mrf.mxu0 }
0x109d   :  { %v15154_v34 = vadd.f32 %v15153_v15, %v15044_v50  ;;  %v15258_v29 = vadd.f32 %v20071_v17, %v15161_v46 }
0x109f   :  { %v15250_v26 = vadd.f32 %v15249_v9, %v15154_v34 }
0x10b4   :  { %v20141_v33 = vpop.f32.mrf.mxu1 }
0x10b6   :  { %v15469_v60 = vpop.f32.mrf.mxu1 }
0x10bc   :  { %v20106_v20 = vpop.f32.mrf.mxu0 }
0x10bd   :  { %v15383_v7 = vadd.f32 %v20106_v20, %v15258_v29 }
0x10be   :  { %v15376_v6 = vpop.f32.mrf.mxu0 }
0x10bf   :  { %v15377_v4 = vadd.f32 %v15376_v6, %v15250_v26  ;;  %v15476_v49 = vadd.f32 %v20141_v33, %v15383_v7 }
0x10c1   :  { %v15470_v55 = vadd.f32 %v15469_v60, %v15377_v4 }
0x10d6   :  { %v20211_v25 = vpop.f32.mrf.mxu1 }
0x10d8   :  { %v15750_v59 = vpop.f32.mrf.mxu1 }
0x10de   :  { %v20176_v43 = vpop.f32.mrf.mxu0 }
0x10df   :  { %v15757_v58 = vadd.f32 %v20211_v25, %v20176_v43 }
0x10e0   :  { %v15589_v16 = vpop.f32.mrf.mxu0 }
0x10e1   :  { %v15751_v41 = vadd.f32 %v15750_v59, %v15589_v16 }
0x10f8   :  { %v20281_v51 = vpop.f32.mrf.mxu1 }
0x10fa   :  { %v15956_v24 = vpop.f32.mrf.mxu1 }
0x1100   :  { %v20246_v45 = vpop.f32.mrf.mxu0 }
0x1101   :  { %v15868_v48 = vadd.f32 %v20246_v45, %v15757_v58 }
0x1102   :  { %v15860_v47 = vpop.f32.mrf.mxu0 }
0x1103   :  { %v15861_v3 = vadd.f32 %v15860_v47, %v15751_v41  ;;  %v15965_v11 = vadd.f32 %v20281_v51, %v15868_v48 }
0x1105   :  { %v15957_v21 = vadd.f32 %v15956_v24, %v15861_v3 }
0x111a   :  { %v20351_v13 = vpop.f32.mrf.mxu1 }
0x111c   :  { %v16176_v27 = vpop.f32.mrf.mxu1 }
0x1121   :  { %v20316_v57 = vpop.f32.mrf.mxu0 }
0x1122   :  { %v16090_v8 = vadd.f32 %v20316_v57, %v15965_v11 }
0x1123   :  { %v16083_v1 = vpop.f32.mrf.mxu0 }
0x1124   :  { %v16183_v53 = vadd.f32 %v20351_v13, %v16090_v8  ;;  %v16084_v30 = vadd.f32 %v16083_v1, %v15957_v21 }
0x1126   :  { %v16187_v44 = vadd.f32 %v16183_v53, %v15476_v49  ;;  %v16177_v61 = vadd.f32 %v16176_v27, %v16084_v30 }
0x1128   :  { %16189 = vst [vmem:[%s25138_s14 + $0x8] sm:$0xff] %v16187_v44  ;;  %v16186_v62 = vadd.f32 %v16177_v61, %v15470_v55 }
0x112a   :  { %16188 = vst [vmem:[%s25138_s14] sm:$0xff] %v16186_v62 }

</bundles_post_ra>
